<compile_context>
chip_gen: v7x
topology: tpu7x:2x2x1
jax: 0.10.0
libtpu: 0.0.40
codegen_flags: <defaults>
</compile_context>

<pallas_src>
import functools

import jax
import jax.numpy as jnp
import numpy as np
from jax import lax
from jax.experimental import pallas as pl
from jax.experimental.pallas import tpu as pltpu

LEAK = 0.01       # nn.LeakyReLU default negative_slope
EPS = 1e-5        # nn.BatchNorm2d default eps


def _leaky(v):
    return jnp.where(v >= 0, v, LEAK * v)


def _bn_affine(gamma, beta, mean, var):
    scale = gamma / jnp.sqrt(var + EPS)
    shift = beta - mean * scale
    return scale, shift


def _shift_rows_zero(p, off):
    """y[i] = p[i + off] if 0 <= i + off < HW else 0, for a static |off| < HW.

    Static slice + concat-with-zeros on the small [HW, hidden] product; the
    within-image-row column wrap is zeroed by the caller's validity mask.
    # TODO(synk): switch to pltpu.roll (XLU sublane rotate) once validated for
    #             [HW, hidden] tiles whose lane extent is not 128-aligned.
    """
    hw, c = p.shape
    if off == 0:
        return p
    pad = jnp.zeros((abs(off), c), p.dtype)
    if off > 0:
        return jnp.concatenate([p[off:, :], pad], axis=0)
    return jnp.concatenate([pad, p[:hw + off, :]], axis=0)


# ----------------------------------------------------------------------------
# Pallas kernel: fused 4-branch (1x1 + three dilated 3x3) convs + folded map_bn
#                + leaky + fused red_conv + pooled-branch add + folded red_bn
#                + leaky.  One grid step == one batch element.
# ----------------------------------------------------------------------------
def aspp_kernel(x_ref, wc_ref, wshift_ref, mask_ref, bias_ref, wred_ref, pool_ref,
                o_ref, *, shift_info, hidden):
    """
    x_ref      [HW, Cin]              bf16  input tokens
    wc_ref     [Cin, 4*hidden]        bf16  center taps of all 4 branches (map_bn scale folded)
    wshift_ref [n_shift, Cin, hidden] bf16  non-center tap weights (map_bn scale folded)
    mask_ref   [HW, n_shift]          f32   per-tap validity masks (1 = source pixel in bounds)
    bias_ref   [1, 4*hidden]          f32   folded map_bn shift
    wred_ref   [4*hidden, out_p]      bf16  red_conv weights with red_bn scale folded
    pool_ref   [1, out_p]             f32   pooled branch (+ red_bn shift folded)
    o_ref      [HW, out_p]            bf16  output
    """
    x = x_ref[...]                                            # [HW, Cin] bf16

    # Stage 1a: all four branch center taps in a single MXU matmul.
    h_all = jnp.dot(x, wc_ref[...], preferred_element_type=jnp.float32)
    h_parts = [h_all[:, b * hidden:(b + 1) * hidden] for b in range(4)]

    # Stage 1b: shifted taps.  Matmul on the UNSHIFTED input, then shift + mask
    # the (much smaller) [HW, hidden] product.
    if shift_info:
        masks = mask_ref[...]                                 # [HW, n_shift] f32
        for t, (b, off) in enumerate(shift_info):
            p = jnp.dot(x, wshift_ref[t], preferred_element_type=jnp.float32)
            p = _shift_rows_zero(p, off)
            h_parts[b] = h_parts[b] + p * masks[:, t:t + 1]

    # map_bn shift (scale already folded into the weights) + leaky.
    a_all = _leaky(jnp.concatenate(h_parts, axis=1) + bias_ref[...])

    # Stage 2: one fused reduce matmul over K = 4*hidden.
    red = jnp.dot(a_all.astype(wred_ref.dtype), wred_ref[...],
                  preferred_element_type=jnp.float32)

    # red_bn scale/shift already folded into wred / pool -> just add + leaky.
    o_ref[...] = _leaky(red + pool_ref[...]).astype(o_ref.dtype)


# ----------------------------------------------------------------------------
# JAX glue: tap pruning, BN folds, mask precompute, pooling branch, pallas_call.
# ----------------------------------------------------------------------------
def _padded_vmem_bytes(shape, dtype):
    s = list(shape)
    if len(s) >= 1:
        s[-1] = -(-s[-1] // 128) * 128
    if len(s) >= 2:
        s[-2] = -(-s[-2] // 8) * 8
    size = 1
    for d in s:
        size *= d
    return size * jnp.dtype(dtype).itemsize


def aspp_forward(x_nchw, params, *, compute_dtype=jnp.bfloat16):
    n, cin, h, w = x_nchw.shape
    hw = h * w
    hidden = params["w_map0"].shape[0]
    out_c = params["w_red"].shape[0]
    out_p = -(-out_c // 128) * 128                 # lane-dense padded output channels

    x_nhwc = jnp.transpose(x_nchw, (0, 2, 3, 1))   # NHWC, f32
    x_tok = x_nhwc.reshape(n, hw, cin).astype(compute_dtype)

    map_scale, map_shift = _bn_affine(params["map_bn_gamma"], params["map_bn_beta"],
                                      params["map_bn_mean"], params["map_bn_var"])
    red_scale, red_shift = _bn_affine(params["red_bn_gamma"], params["red_bn_beta"],
                                      params["red_bn_mean"], params["red_bn_var"])

    # --- fold map_bn scale into the branch conv weights; split center / shifted
    #     taps; prune taps that can never hit an in-bounds pixel at this H x W.
    branch_names = ("w_map0", "w_map1", "w_map2", "w_map3")
    dils = (1,) + tuple(params["dilations"])
    y_idx, x_idx = np.divmod(np.arange(hw), w)
    center_ws, shift_ws, shift_info, mask_cols = [], [], [], []
    for b in range(4):
        wk = params[branch_names[b]]               # [hidden, cin, kh, kw]
        sc = map_scale[b * hidden:(b + 1) * hidden]
        c = wk.shape[2] // 2                       # center tap (0 for 1x1, 1 for 3x3)
        center_ws.append(wk[:, :, c, c].T * sc[None, :])
        if wk.shape[2] == 1:
            continue
        d = dils[b]
        for ky in range(3):
            for kx in range(3):
                if ky == 1 and kx == 1:
                    continue
                dy, dx = (ky - 1) * d, (kx - 1) * d
                if abs(dy) >= h or abs(dx) >= w:   # pure zero-padding tap: prune
                    continue
                shift_ws.append(wk[:, :, ky, kx].T * sc[None, :])
                shift_info.append((b, dy * w + dx))
                valid = ((y_idx + dy >= 0) & (y_idx + dy < h)
                         & (x_idx + dx >= 0) & (x_idx + dx < w))
                mask_cols.append(valid.astype(np.float32))
    wc = jnp.concatenate(center_ws, axis=1).astype(compute_dtype)       # [Cin, 4*hidden]
    if shift_ws:
        wshift = jnp.stack(shift_ws).astype(compute_dtype)              # [n_shift, Cin, hidden]
        masks = jnp.asarray(np.stack(mask_cols, axis=1))                # [HW, n_shift] f32
    else:                                           # all dilated taps pruned: dummies (never read)
        wshift = jnp.zeros((1, cin, hidden), compute_dtype)
        masks = jnp.zeros((hw, 1), jnp.float32)
    shift_info = tuple(shift_info)
    bias = map_shift.reshape(1, 4 * hidden).astype(jnp.float32)

    # red_conv with red_bn scale folded in, padded to a lane-dense out dim.
    wred = params["w_red"][:, :, 0, 0].T * red_scale[None, :]           # [4*hidden, out_c]
    wred = jnp.pad(wred, ((0, 0), (0, out_p - out_c))).astype(compute_dtype)

    # Global-pooling branch (tiny [N, Cin] matmuls) kept in f32 JAX glue;
    # red_bn scale/shift folded so the kernel epilogue is just add + leaky.
    gp = x_nhwc.mean(axis=(1, 2))                                       # [N, Cin]
    gp = gp @ params["w_gpool"][:, :, 0, 0].T                           # [N, hidden]
    gsc, gsh = _bn_affine(params["gp_bn_gamma"], params["gp_bn_beta"],
                          params["gp_bn_mean"], params["gp_bn_var"])
    gp = _leaky(gp * gsc + gsh)
    pool = gp @ params["w_pool_red"][:, :, 0, 0].T                      # [N, out_c]
    pool = pool * red_scale[None, :] + red_shift[None, :]
    pool = jnp.pad(pool, ((0, 0), (0, out_p - out_c)))
    pool = pool.reshape(n, 1, out_p).astype(jnp.float32)

    # --- VMEM budget: ceiling from the actual chip, with headroom for the
    #     compiler's internal scratch / pipelining buffers.
    try:
        vmem_cap = int(pltpu.get_tpu_info().vmem_capacity_bytes)
    except Exception:
        vmem_cap = 64 << 20                         # conservative (v7x per-TC VMEM)
    ceiling = max(vmem_cap - (16 << 20), 32 << 20)
    per_step = (_padded_vmem_bytes((hw, cin), compute_dtype)
                + _padded_vmem_bytes(wc.shape, compute_dtype)
                + _padded_vmem_bytes(wshift.shape, compute_dtype)
                + _padded_vmem_bytes(masks.shape, jnp.float32)
                + _padded_vmem_bytes(bias.shape, jnp.float32)
                + _padded_vmem_bytes(wred.shape, compute_dtype)
                + _padded_vmem_bytes((1, out_p), jnp.float32)
                + _padded_vmem_bytes((hw, out_p), compute_dtype))
    scratch = hw * (4 * hidden * 4 * 2              # h_all + reassembled h
                    + hidden * 4 * 2                # per-tap product + shifted copy
                    + 4 * hidden * 2                # a_all (bf16)
                    + out_p * 4)                    # red accumulator
    vmem_limit = int(min(max(2 * per_step + scratch + (8 << 20), 32 << 20), ceiling))

    kernel = functools.partial(aspp_kernel, shift_info=shift_info, hidden=hidden)

    def run(weight_mode):
        def wspec(shape):
            idx = lambda b: (0,) * len(shape)
            if weight_mode is None:
                return pl.BlockSpec(shape, idx)
            return pl.BlockSpec(shape, idx, pipeline_mode=weight_mode)

        return pl.pallas_call(
            kernel,
            out_shape=jax.ShapeDtypeStruct((n, hw, out_p), compute_dtype),
            grid_spec=pltpu.PrefetchScalarGridSpec(
                num_scalar_prefetch=0,
                grid=(n,),
                in_specs=[
                    pl.BlockSpec((None, hw, cin), lambda b: (b, 0, 0)),
                    wspec(wc.shape),
                    wspec(wshift.shape),
                    wspec(masks.shape),
                    wspec(bias.shape),
                    wspec(wred.shape),
                    pl.BlockSpec((None, 1, out_p), lambda b: (b, 0, 0)),
                ],
                out_specs=pl.BlockSpec((None, hw, out_p), lambda b: (b, 0, 0)),
            ),
            compiler_params=pltpu.CompilerParams(
                dimension_semantics=("parallel",),
                vmem_limit_bytes=vmem_limit),
        )(x_tok, wc, wshift, masks, bias, wred, pool)

    try:
        # Constant-index weight blocks never change: single-buffer them to halve
        # their VMEM footprint (matters at real ASPP sizes on v7x's 64 MiB).
        out = run(pl.Buffered(buffer_count=1))
    except Exception:
        out = run(None)   # this jax build rejects single-buffer pipeline_mode

    out = out[:, :, :out_c].astype(jnp.float32)
    return jnp.transpose(out.reshape(n, h, w, out_c), (0, 3, 1, 2))     # back to NCHW


# ----------------------------------------------------------------------------
# Pure-JAX reference (NCHW, lax convs) for correctness checking.
# ----------------------------------------------------------------------------
def aspp_reference(x, params):
    def conv(xx, wk, d=1, p=0):
        return lax.conv_general_dilated(
            xx, wk, window_strides=(1, 1), padding=[(p, p), (p, p)],
            rhs_dilation=(d, d), dimension_numbers=("NCHW", "OIHW", "NCHW"),
            precision=lax.Precision.HIGHEST)

    def bn(xx, g, b, m, v):
        s = g / jnp.sqrt(v + EPS)
        sh = b - m * s
        return xx * s[None, :, None, None] + sh[None, :, None, None]

    outs = [conv(x, params["w_map0"])]
    for wk, d in zip((params["w_map1"], params["w_map2"], params["w_map3"]),
                     params["dilations"]):
        outs.append(conv(x, wk, d=d, p=d))
    out = jnp.concatenate(outs, axis=1)
    out = _leaky(bn(out, params["map_bn_gamma"], params["map_bn_beta"],
                    params["map_bn_mean"], params["map_bn_var"]))
    out = conv(out, params["w_red"])

    pool = x.mean(axis=(2, 3), keepdims=True)      # _global_pooling (pooling_size=None)
    pool = conv(pool, params["w_gpool"])
    pool = _leaky(bn(pool, params["gp_bn_gamma"], params["gp_bn_beta"],
                     params["gp_bn_mean"], params["gp_bn_var"]))
    pool = conv(pool, params["w_pool_red"])
    out = out + pool                               # repeat(1,1,H,W) == broadcast
    out = _leaky(bn(out, params["red_bn_gamma"], params["red_bn_beta"],
                    params["red_bn_mean"], params["red_bn_var"]))
    return out


# ----------------------------------------------------------------------------
# Deterministic parameter init (shapes match ASPP.__init__).
# ----------------------------------------------------------------------------
def init_params(key, cin, hidden, out_c, dilations=(12, 24, 36)):
    ks = jax.random.split(key, 10)

    def wrand(k, shape, scale=0.1):
        return (scale * jax.random.normal(k, shape)).astype(jnp.float32)

    def bn_params(k, c):
        k1, k2, k3, k4 = jax.random.split(k, 4)
        return ((1.0 + 0.1 * jax.random.normal(k1, (c,))).astype(jnp.float32),
                (0.1 * jax.random.normal(k2, (c,))).astype(jnp.float32),
                (0.1 * jax.random.normal(k3, (c,))).astype(jnp.float32),
                (1.0 + 0.1 * jax.random.uniform(k4, (c,))).astype(jnp.float32))

    p = dict(dilations=tuple(dilations))
    p["w_map0"] = wrand(ks[0], (hidden, cin, 1, 1))
    p["w_map1"] = wrand(ks[1], (hidden, cin, 3, 3))
    p["w_map2"] = wrand(ks[2], (hidden, cin, 3, 3))
    p["w_map3"] = wrand(ks[3], (hidden, cin, 3, 3))
    p["w_gpool"] = wrand(ks[4], (hidden, cin, 1, 1))
    p["w_red"] = wrand(ks[5], (out_c, 4 * hidden, 1, 1))
    p["w_pool_red"] = wrand(ks[6], (out_c, hidden, 1, 1))
    (p["map_bn_gamma"], p["map_bn_beta"],
     p["map_bn_mean"], p["map_bn_var"]) = bn_params(ks[7], 4 * hidden)
    (p["gp_bn_gamma"], p["gp_bn_beta"],
     p["gp_bn_mean"], p["gp_bn_var"]) = bn_params(ks[8], hidden)
    (p["red_bn_gamma"], p["red_bn_beta"],
     p["red_bn_mean"], p["red_bn_var"]) = bn_params(ks[9], out_c)
    return p


if __name__ == "__main__":
    key = jax.random.PRNGKey(0)
    kx, kp = jax.random.split(key)

    N, CIN, H, W = 2, 4, 16, 16
    HIDDEN, OUT_C = 32, 8

    x = jax.random.normal(kx, (N, CIN, H, W), dtype=jnp.float32)
    params = init_params(kp, CIN, HIDDEN, OUT_C)

    y = aspp_forward(x, params)
    y = jax.block_until_ready(y)

    y_ref = aspp_reference(x, params)
    # bf16 operands + bf16 kernel store (f32 accumulation) vs f32 HIGHEST reference.
    np.testing.assert_allclose(np.asarray(y), np.asarray(y_ref), rtol=2e-2, atol=2e-2)
    assert y.shape == (N, OUT_C, H, W)

    print("KERNEL_OK")
</pallas_src>

<mosaic_0001>
module attributes {stable_mosaic.version = 11 : i64} {
  func.func @aspp_kernel(%arg0: i32, %arg1: memref<1x256x4xbf16, #tpu.memory_space<vmem>>, %arg2: memref<4x128xbf16, #tpu.memory_space<vmem>>, %arg3: memref<8x4x32xbf16, #tpu.memory_space<vmem>>, %arg4: memref<256x8xf32, #tpu.memory_space<vmem>>, %arg5: memref<1x128xf32, #tpu.memory_space<vmem>>, %arg6: memref<128x128xbf16, #tpu.memory_space<vmem>>, %arg7: memref<1x1x128xf32, #tpu.memory_space<vmem>>, %arg8: memref<1x256x128xbf16, #tpu.memory_space<vmem>>) attributes {dimension_semantics = [#tpu.dimension_semantics<parallel>], iteration_bounds = array<i64: 2>, scalar_prefetch = 0 : i64, scratch_operands = 0 : i64, tpu.core_type = #tpu.core_type<tc>, window_params = [{transform_indices = @transform_0, window_bounds = array<i64: 1, 256, 4>}, {pipeline_mode = #tpu.pipeline_mode<synchronous>, transform_indices = @transform_1, window_bounds = array<i64: 4, 128>}, {pipeline_mode = #tpu.pipeline_mode<synchronous>, transform_indices = @transform_2, window_bounds = array<i64: 8, 4, 32>}, {pipeline_mode = #tpu.pipeline_mode<synchronous>, transform_indices = @transform_3, window_bounds = array<i64: 256, 8>}, {pipeline_mode = #tpu.pipeline_mode<synchronous>, transform_indices = @transform_4, window_bounds = array<i64: 1, 128>}, {pipeline_mode = #tpu.pipeline_mode<synchronous>, transform_indices = @transform_5, window_bounds = array<i64: 128, 128>}, {transform_indices = @transform_6, window_bounds = array<i64: 1, 1, 128>}, {transform_indices = @transform_7, window_bounds = array<i64: 1, 256, 128>}]} {
    %c0 = arith.constant 0 : index
    %c0_0 = arith.constant 0 : index
    %c0_1 = arith.constant 0 : index
    %0 = vector.load %arg1[%c0, %c0_0, %c0_1] : memref<1x256x4xbf16, #tpu.memory_space<vmem>>, vector<1x256x4xbf16>
    %1 = vector.shape_cast %0 : vector<1x256x4xbf16> to vector<256x4xbf16>
    %c0_2 = arith.constant 0 : index
    %c0_3 = arith.constant 0 : index
    %2 = vector.load %arg2[%c0_2, %c0_3] : memref<4x128xbf16, #tpu.memory_space<vmem>>, vector<4x128xbf16>
    %cst = arith.constant dense<0.000000e+00> : vector<256x128xf32>
    %3 = tpu.matmul %1, %2, %cst {dimension_numbers = #tpu.dot_dimension_numbers<[1], [0], [0], [1], [0, 0, 1, 1], [], []>} : vector<256x4xbf16>, vector<4x128xbf16>, vector<256x128xf32> -> vector<256x128xf32>
    %4 = vector.extract_strided_slice %3 {offsets = [0, 0], sizes = [256, 32], strides = [1, 1]} : vector<256x128xf32> to vector<256x32xf32>
    %5 = vector.extract_strided_slice %3 {offsets = [0, 32], sizes = [256, 32], strides = [1, 1]} : vector<256x128xf32> to vector<256x32xf32>
    %6 = vector.extract_strided_slice %3 {offsets = [0, 64], sizes = [256, 32], strides = [1, 1]} : vector<256x128xf32> to vector<256x32xf32>
    %7 = vector.extract_strided_slice %3 {offsets = [0, 96], sizes = [256, 32], strides = [1, 1]} : vector<256x128xf32> to vector<256x32xf32>
    %c0_4 = arith.constant 0 : index
    %c0_5 = arith.constant 0 : index
    %8 = vector.load %arg4[%c0_4, %c0_5] : memref<256x8xf32, #tpu.memory_space<vmem>>, vector<256x8xf32>
    %c0_6 = arith.constant 0 : index
    %c0_7 = arith.constant 0 : index
    %c0_8 = arith.constant 0 : index
    %9 = vector.load %arg3[%c0_6, %c0_7, %c0_8] : memref<8x4x32xbf16, #tpu.memory_space<vmem>>, vector<1x4x32xbf16>
    %10 = vector.shape_cast %9 : vector<1x4x32xbf16> to vector<4x32xbf16>
    %cst_9 = arith.constant dense<0.000000e+00> : vector<256x32xf32>
    %11 = tpu.matmul %1, %10, %cst_9 {dimension_numbers = #tpu.dot_dimension_numbers<[1], [0], [0], [1], [0, 0, 1, 1], [], []>} : vector<256x4xbf16>, vector<4x32xbf16>, vector<256x32xf32> -> vector<256x32xf32>
    %cst_10 = arith.constant 0.000000e+00 : f32
    %12 = vector.broadcast %cst_10 : f32 to vector<204x32xf32>
    %13 = vector.extract_strided_slice %11 {offsets = [0, 0], sizes = [52, 32], strides = [1, 1]} : vector<256x32xf32> to vector<52x32xf32>
    %14 = tpu.concatenate %12, %13 in 0 : vector<204x32xf32>, vector<52x32xf32> -> vector<256x32xf32>
    %15 = vector.extract_strided_slice %8 {offsets = [0, 0], sizes = [256, 1], strides = [1, 1]} : vector<256x8xf32> to vector<256x1xf32>
    %16 = vector.broadcast %15 : vector<256x1xf32> to vector<256x32xf32>
    %17 = arith.mulf %14, %16 : vector<256x32xf32>
    %18 = arith.addf %5, %17 : vector<256x32xf32>
    %c1 = arith.constant 1 : index
    %c0_11 = arith.constant 0 : index
    %c0_12 = arith.constant 0 : index
    %19 = vector.load %arg3[%c1, %c0_11, %c0_12] : memref<8x4x32xbf16, #tpu.memory_space<vmem>>, vector<1x4x32xbf16>
    %20 = vector.shape_cast %19 : vector<1x4x32xbf16> to vector<4x32xbf16>
    %cst_13 = arith.constant dense<0.000000e+00> : vector<256x32xf32>
    %21 = tpu.matmul %1, %20, %cst_13 {dimension_numbers = #tpu.dot_dimension_numbers<[1], [0], [0], [1], [0, 0, 1, 1], [], []>} : vector<256x4xbf16>, vector<4x32xbf16>, vector<256x32xf32> -> vector<256x32xf32>
    %cst_14 = arith.constant 0.000000e+00 : f32
    %22 = vector.broadcast %cst_14 : f32 to vector<192x32xf32>
    %23 = vector.extract_strided_slice %21 {offsets = [0, 0], sizes = [64, 32], strides = [1, 1]} : vector<256x32xf32> to vector<64x32xf32>
    %24 = tpu.concatenate %22, %23 in 0 : vector<192x32xf32>, vector<64x32xf32> -> vector<256x32xf32>
    %25 = vector.extract_strided_slice %8 {offsets = [0, 1], sizes = [256, 1], strides = [1, 1]} : vector<256x8xf32> to vector<256x1xf32>
    %26 = vector.broadcast %25 : vector<256x1xf32> to vector<256x32xf32>
    %27 = arith.mulf %24, %26 : vector<256x32xf32>
    %28 = arith.addf %18, %27 : vector<256x32xf32>
    %c2 = arith.constant 2 : index
    %c0_15 = arith.constant 0 : index
    %c0_16 = arith.constant 0 : index
    %29 = vector.load %arg3[%c2, %c0_15, %c0_16] : memref<8x4x32xbf16, #tpu.memory_space<vmem>>, vector<1x4x32xbf16>
    %30 = vector.shape_cast %29 : vector<1x4x32xbf16> to vector<4x32xbf16>
    %cst_17 = arith.constant dense<0.000000e+00> : vector<256x32xf32>
    %31 = tpu.matmul %1, %30, %cst_17 {dimension_numbers = #tpu.dot_dimension_numbers<[1], [0], [0], [1], [0, 0, 1, 1], [], []>} : vector<256x4xbf16>, vector<4x32xbf16>, vector<256x32xf32> -> vector<256x32xf32>
    %cst_18 = arith.constant 0.000000e+00 : f32
    %32 = vector.broadcast %cst_18 : f32 to vector<180x32xf32>
    %33 = vector.extract_strided_slice %31 {offsets = [0, 0], sizes = [76, 32], strides = [1, 1]} : vector<256x32xf32> to vector<76x32xf32>
    %34 = tpu.concatenate %32, %33 in 0 : vector<180x32xf32>, vector<76x32xf32> -> vector<256x32xf32>
    %35 = vector.extract_strided_slice %8 {offsets = [0, 2], sizes = [256, 1], strides = [1, 1]} : vector<256x8xf32> to vector<256x1xf32>
    %36 = vector.broadcast %35 : vector<256x1xf32> to vector<256x32xf32>
    %37 = arith.mulf %34, %36 : vector<256x32xf32>
    %38 = arith.addf %28, %37 : vector<256x32xf32>
    %c3 = arith.constant 3 : index
    %c0_19 = arith.constant 0 : index
    %c0_20 = arith.constant 0 : index
    %39 = vector.load %arg3[%c3, %c0_19, %c0_20] : memref<8x4x32xbf16, #tpu.memory_space<vmem>>, vector<1x4x32xbf16>
    %40 = vector.shape_cast %39 : vector<1x4x32xbf16> to vector<4x32xbf16>
    %cst_21 = arith.constant dense<0.000000e+00> : vector<256x32xf32>
    %41 = tpu.matmul %1, %40, %cst_21 {dimension_numbers = #tpu.dot_dimension_numbers<[1], [0], [0], [1], [0, 0, 1, 1], [], []>} : vector<256x4xbf16>, vector<4x32xbf16>, vector<256x32xf32> -> vector<256x32xf32>
    %cst_22 = arith.constant 0.000000e+00 : f32
    %42 = vector.broadcast %cst_22 : f32 to vector<12x32xf32>
    %43 = vector.extract_strided_slice %41 {offsets = [0, 0], sizes = [244, 32], strides = [1, 1]} : vector<256x32xf32> to vector<244x32xf32>
    %44 = tpu.concatenate %42, %43 in 0 : vector<12x32xf32>, vector<244x32xf32> -> vector<256x32xf32>
    %45 = vector.extract_strided_slice %8 {offsets = [0, 3], sizes = [256, 1], strides = [1, 1]} : vector<256x8xf32> to vector<256x1xf32>
    %46 = vector.broadcast %45 : vector<256x1xf32> to vector<256x32xf32>
    %47 = arith.mulf %44, %46 : vector<256x32xf32>
    %48 = arith.addf %38, %47 : vector<256x32xf32>
    %c4 = arith.constant 4 : index
    %c0_23 = arith.constant 0 : index
    %c0_24 = arith.constant 0 : index
    %49 = vector.load %arg3[%c4, %c0_23, %c0_24] : memref<8x4x32xbf16, #tpu.memory_space<vmem>>, vector<1x4x32xbf16>
    %50 = vector.shape_cast %49 : vector<1x4x32xbf16> to vector<4x32xbf16>
    %cst_25 = arith.constant dense<0.000000e+00> : vector<256x32xf32>
    %51 = tpu.matmul %1, %50, %cst_25 {dimension_numbers = #tpu.dot_dimension_numbers<[1], [0], [0], [1], [0, 0, 1, 1], [], []>} : vector<256x4xbf16>, vector<4x32xbf16>, vector<256x32xf32> -> vector<256x32xf32>
    %cst_26 = arith.constant 0.000000e+00 : f32
    %52 = vector.broadcast %cst_26 : f32 to vector<12x32xf32>
    %53 = vector.extract_strided_slice %51 {offsets = [12, 0], sizes = [244, 32], strides = [1, 1]} : vector<256x32xf32> to vector<244x32xf32>
    %54 = tpu.concatenate %53, %52 in 0 : vector<244x32xf32>, vector<12x32xf32> -> vector<256x32xf32>
    %55 = vector.extract_strided_slice %8 {offsets = [0, 4], sizes = [256, 1], strides = [1, 1]} : vector<256x8xf32> to vector<256x1xf32>
    %56 = vector.broadcast %55 : vector<256x1xf32> to vector<256x32xf32>
    %57 = arith.mulf %54, %56 : vector<256x32xf32>
    %58 = arith.addf %48, %57 : vector<256x32xf32>
    %c5 = arith.constant 5 : index
    %c0_27 = arith.constant 0 : index
    %c0_28 = arith.constant 0 : index
    %59 = vector.load %arg3[%c5, %c0_27, %c0_28] : memref<8x4x32xbf16, #tpu.memory_space<vmem>>, vector<1x4x32xbf16>
    %60 = vector.shape_cast %59 : vector<1x4x32xbf16> to vector<4x32xbf16>
    %cst_29 = arith.constant dense<0.000000e+00> : vector<256x32xf32>
    %61 = tpu.matmul %1, %60, %cst_29 {dimension_numbers = #tpu.dot_dimension_numbers<[1], [0], [0], [1], [0, 0, 1, 1], [], []>} : vector<256x4xbf16>, vector<4x32xbf16>, vector<256x32xf32> -> vector<256x32xf32>
    %cst_30 = arith.constant 0.000000e+00 : f32
    %62 = vector.broadcast %cst_30 : f32 to vector<180x32xf32>
    %63 = vector.extract_strided_slice %61 {offsets = [180, 0], sizes = [76, 32], strides = [1, 1]} : vector<256x32xf32> to vector<76x32xf32>
    %64 = tpu.concatenate %63, %62 in 0 : vector<76x32xf32>, vector<180x32xf32> -> vector<256x32xf32>
    %65 = vector.extract_strided_slice %8 {offsets = [0, 5], sizes = [256, 1], strides = [1, 1]} : vector<256x8xf32> to vector<256x1xf32>
    %66 = vector.broadcast %65 : vector<256x1xf32> to vector<256x32xf32>
    %67 = arith.mulf %64, %66 : vector<256x32xf32>
    %68 = arith.addf %58, %67 : vector<256x32xf32>
    %c6 = arith.constant 6 : index
    %c0_31 = arith.constant 0 : index
    %c0_32 = arith.constant 0 : index
    %69 = vector.load %arg3[%c6, %c0_31, %c0_32] : memref<8x4x32xbf16, #tpu.memory_space<vmem>>, vector<1x4x32xbf16>
    %70 = vector.shape_cast %69 : vector<1x4x32xbf16> to vector<4x32xbf16>
    %cst_33 = arith.constant dense<0.000000e+00> : vector<256x32xf32>
    %71 = tpu.matmul %1, %70, %cst_33 {dimension_numbers = #tpu.dot_dimension_numbers<[1], [0], [0], [1], [0, 0, 1, 1], [], []>} : vector<256x4xbf16>, vector<4x32xbf16>, vector<256x32xf32> -> vector<256x32xf32>
    %cst_34 = arith.constant 0.000000e+00 : f32
    %72 = vector.broadcast %cst_34 : f32 to vector<192x32xf32>
    %73 = vector.extract_strided_slice %71 {offsets = [192, 0], sizes = [64, 32], strides = [1, 1]} : vector<256x32xf32> to vector<64x32xf32>
    %74 = tpu.concatenate %73, %72 in 0 : vector<64x32xf32>, vector<192x32xf32> -> vector<256x32xf32>
    %75 = vector.extract_strided_slice %8 {offsets = [0, 6], sizes = [256, 1], strides = [1, 1]} : vector<256x8xf32> to vector<256x1xf32>
    %76 = vector.broadcast %75 : vector<256x1xf32> to vector<256x32xf32>
    %77 = arith.mulf %74, %76 : vector<256x32xf32>
    %78 = arith.addf %68, %77 : vector<256x32xf32>
    %c7 = arith.constant 7 : index
    %c0_35 = arith.constant 0 : index
    %c0_36 = arith.constant 0 : index
    %79 = vector.load %arg3[%c7, %c0_35, %c0_36] : memref<8x4x32xbf16, #tpu.memory_space<vmem>>, vector<1x4x32xbf16>
    %80 = vector.shape_cast %79 : vector<1x4x32xbf16> to vector<4x32xbf16>
    %cst_37 = arith.constant dense<0.000000e+00> : vector<256x32xf32>
    %81 = tpu.matmul %1, %80, %cst_37 {dimension_numbers = #tpu.dot_dimension_numbers<[1], [0], [0], [1], [0, 0, 1, 1], [], []>} : vector<256x4xbf16>, vector<4x32xbf16>, vector<256x32xf32> -> vector<256x32xf32>
    %cst_38 = arith.constant 0.000000e+00 : f32
    %82 = vector.broadcast %cst_38 : f32 to vector<204x32xf32>
    %83 = vector.extract_strided_slice %81 {offsets = [204, 0], sizes = [52, 32], strides = [1, 1]} : vector<256x32xf32> to vector<52x32xf32>
    %84 = tpu.concatenate %83, %82 in 0 : vector<52x32xf32>, vector<204x32xf32> -> vector<256x32xf32>
    %85 = vector.extract_strided_slice %8 {offsets = [0, 7], sizes = [256, 1], strides = [1, 1]} : vector<256x8xf32> to vector<256x1xf32>
    %86 = vector.broadcast %85 : vector<256x1xf32> to vector<256x32xf32>
    %87 = arith.mulf %84, %86 : vector<256x32xf32>
    %88 = arith.addf %78, %87 : vector<256x32xf32>
    %89 = tpu.concatenate %4, %88, %6, %7 in 1 : vector<256x32xf32>, vector<256x32xf32>, vector<256x32xf32>, vector<256x32xf32> -> vector<256x128xf32>
    %c0_39 = arith.constant 0 : index
    %c0_40 = arith.constant 0 : index
    %90 = vector.load %arg5[%c0_39, %c0_40] : memref<1x128xf32, #tpu.memory_space<vmem>>, vector<1x128xf32>
    %91 = vector.broadcast %90 : vector<1x128xf32> to vector<256x128xf32>
    %92 = arith.addf %89, %91 : vector<256x128xf32>
    %cst_41 = arith.constant 0.000000e+00 : f32
    %93 = vector.broadcast %cst_41 : f32 to vector<256x128xf32>
    %94 = arith.cmpf oge, %92, %93 : vector<256x128xf32>
    %cst_42 = arith.constant 0.00999999977 : f32
    %95 = vector.broadcast %cst_42 : f32 to vector<256x128xf32>
    %96 = arith.mulf %95, %92 : vector<256x128xf32>
    %97 = arith.select %94, %92, %96 : vector<256x128xi1>, vector<256x128xf32>
    %98 = arith.truncf %97 : vector<256x128xf32> to vector<256x128xbf16>
    %c0_43 = arith.constant 0 : index
    %c0_44 = arith.constant 0 : index
    %99 = vector.load %arg6[%c0_43, %c0_44] : memref<128x128xbf16, #tpu.memory_space<vmem>>, vector<128x128xbf16>
    %cst_45 = arith.constant dense<0.000000e+00> : vector<256x128xf32>
    %100 = tpu.matmul %98, %99, %cst_45 {dimension_numbers = #tpu.dot_dimension_numbers<[1], [0], [0], [1], [0, 0, 1, 1], [], []>} : vector<256x128xbf16>, vector<128x128xbf16>, vector<256x128xf32> -> vector<256x128xf32>
    %c0_46 = arith.constant 0 : index
    %c0_47 = arith.constant 0 : index
    %c0_48 = arith.constant 0 : index
    %101 = vector.load %arg7[%c0_46, %c0_47, %c0_48] : memref<1x1x128xf32, #tpu.memory_space<vmem>>, vector<1x1x128xf32>
    %102 = vector.shape_cast %101 : vector<1x1x128xf32> to vector<1x128xf32>
    %103 = vector.broadcast %102 : vector<1x128xf32> to vector<256x128xf32>
    %104 = arith.addf %100, %103 : vector<256x128xf32>
    %cst_49 = arith.constant 0.000000e+00 : f32
    %105 = vector.broadcast %cst_49 : f32 to vector<256x128xf32>
    %106 = arith.cmpf oge, %104, %105 : vector<256x128xf32>
    %cst_50 = arith.constant 0.00999999977 : f32
    %107 = vector.broadcast %cst_50 : f32 to vector<256x128xf32>
    %108 = arith.mulf %107, %104 : vector<256x128xf32>
    %109 = arith.select %106, %104, %108 : vector<256x128xi1>, vector<256x128xf32>
    %110 = arith.truncf %109 : vector<256x128xf32> to vector<256x128xbf16>
    %c0_51 = arith.constant 0 : index
    %c0_52 = arith.constant 0 : index
    %c0_53 = arith.constant 0 : index
    %111 = vector.load %arg8[%c0_51, %c0_52, %c0_53] : memref<1x256x128xbf16, #tpu.memory_space<vmem>>, vector<1x256x128xbf16>
    %112 = vector.shape_cast %111 : vector<1x256x128xbf16> to vector<256x128xbf16>
    %113 = vector.shape_cast %110 : vector<256x128xbf16> to vector<1x256x128xbf16>
    tpu.vector_store %arg8[%c0_51, %c0_52, %c0_53], %113 {strides = array<i32>} : memref<1x256x128xbf16, #tpu.memory_space<vmem>>, vector<1x256x128xbf16>,
    return
  }
  func.func @transform_0(%arg0: i32) -> (i32, i32, i32) {
    %c0_i32 = arith.constant 0 : i32
    %c0_i32_0 = arith.constant 0 : i32
    %c0_i32_1 = arith.constant 0 : i32
    return %arg0, %c0_i32, %c0_i32_0 : i32, i32, i32
  }
  func.func @transform_1(%arg0: i32) -> (i32, i32) {
    %c0_i32 = arith.constant 0 : i32
    %c0_i32_0 = arith.constant 0 : i32
    %c0_i32_1 = arith.constant 0 : i32
    return %c0_i32, %c0_i32_0 : i32, i32
  }
  func.func @transform_2(%arg0: i32) -> (i32, i32, i32) {
    %c0_i32 = arith.constant 0 : i32
    %c0_i32_0 = arith.constant 0 : i32
    %c0_i32_1 = arith.constant 0 : i32
    %c0_i32_2 = arith.constant 0 : i32
    return %c0_i32, %c0_i32_0, %c0_i32_1 : i32, i32, i32
  }
  func.func @transform_3(%arg0: i32) -> (i32, i32) {
    %c0_i32 = arith.constant 0 : i32
    %c0_i32_0 = arith.constant 0 : i32
    %c0_i32_1 = arith.constant 0 : i32
    return %c0_i32, %c0_i32_0 : i32, i32
  }
  func.func @transform_4(%arg0: i32) -> (i32, i32) {
    %c0_i32 = arith.constant 0 : i32
    %c0_i32_0 = arith.constant 0 : i32
    %c0_i32_1 = arith.constant 0 : i32
    return %c0_i32, %c0_i32_0 : i32, i32
  }
  func.func @transform_5(%arg0: i32) -> (i32, i32) {
    %c0_i32 = arith.constant 0 : i32
    %c0_i32_0 = arith.constant 0 : i32
    %c0_i32_1 = arith.constant 0 : i32
    return %c0_i32, %c0_i32_0 : i32, i32
  }
  func.func @transform_6(%arg0: i32) -> (i32, i32, i32) {
    %c0_i32 = arith.constant 0 : i32
    %c0_i32_0 = arith.constant 0 : i32
    %c0_i32_1 = arith.constant 0 : i32
    return %arg0, %c0_i32, %c0_i32_0 : i32, i32, i32
  }
  func.func @transform_7(%arg0: i32) -> (i32, i32, i32) {
    %c0_i32 = arith.constant 0 : i32
    %c0_i32_0 = arith.constant 0 : i32
    %c0_i32_1 = arith.constant 0 : i32
    return %arg0, %c0_i32, %c0_i32_0 : i32, i32, i32
  }
}

module attributes {stable_mosaic.version = 11 : i64} {
  func.func @aspp_kernel(%arg0: i32, %arg1: memref<1x256x4xbf16, #tpu.memory_space<vmem>>, %arg2: memref<4x128xbf16, #tpu.memory_space<vmem>>, %arg3: memref<8x4x32xbf16, #tpu.memory_space<vmem>>, %arg4: memref<256x8xf32, #tpu.memory_space<vmem>>, %arg5: memref<1x128xf32, #tpu.memory_space<vmem>>, %arg6: memref<128x128xbf16, #tpu.memory_space<vmem>>, %arg7: memref<1x1x128xf32, #tpu.memory_space<vmem>>, %arg8: memref<1x256x128xbf16, #tpu.memory_space<vmem>>) attributes {dimension_semantics = [#tpu.dimension_semantics<parallel>], iteration_bounds = array<i64: 2>, scalar_prefetch = 0 : i64, scratch_operands = 0 : i64, tpu.core_type = #tpu.core_type<tc>, window_params = [{transform_indices = @transform_0, window_bounds = array<i64: 1, 256, 4>}, {pipeline_mode = #tpu.pipeline_mode<synchronous>, transform_indices = @transform_1, window_bounds = array<i64: 4, 128>}, {pipeline_mode = #tpu.pipeline_mode<synchronous>, transform_indices = @transform_2, window_bounds = array<i64: 8, 4, 32>}, {pipeline_mode = #tpu.pipeline_mode<synchronous>, transform_indices = @transform_3, window_bounds = array<i64: 256, 8>}, {pipeline_mode = #tpu.pipeline_mode<synchronous>, transform_indices = @transform_4, window_bounds = array<i64: 1, 128>}, {pipeline_mode = #tpu.pipeline_mode<synchronous>, transform_indices = @transform_5, window_bounds = array<i64: 128, 128>}, {transform_indices = @transform_6, window_bounds = array<i64: 1, 1, 128>}, {transform_indices = @transform_7, window_bounds = array<i64: 1, 256, 128>}]} {
    %c0 = arith.constant 0 : index
    %c0_0 = arith.constant 0 : index
    %c0_1 = arith.constant 0 : index
    %0 = vector.load %arg1[%c0, %c0_0, %c0_1] : memref<1x256x4xbf16, #tpu.memory_space<vmem>>, vector<1x256x4xbf16>
    %1 = vector.shape_cast %0 : vector<1x256x4xbf16> to vector<256x4xbf16>
    %c0_2 = arith.constant 0 : index
    %c0_3 = arith.constant 0 : index
    %2 = vector.load %arg2[%c0_2, %c0_3] : memref<4x128xbf16, #tpu.memory_space<vmem>>, vector<4x128xbf16>
    %cst = arith.constant dense<0.000000e+00> : vector<256x128xf32>
    %3 = tpu.matmul %1, %2, %cst {dimension_numbers = #tpu.dot_dimension_numbers<[1], [0], [0], [1], [0, 0, 1, 1], [], []>} : vector<256x4xbf16>, vector<4x128xbf16>, vector<256x128xf32> -> vector<256x128xf32>
    %4 = vector.extract_strided_slice %3 {offsets = [0, 0], sizes = [256, 32], strides = [1, 1]} : vector<256x128xf32> to vector<256x32xf32>
    %5 = vector.extract_strided_slice %3 {offsets = [0, 32], sizes = [256, 32], strides = [1, 1]} : vector<256x128xf32> to vector<256x32xf32>
    %6 = vector.extract_strided_slice %3 {offsets = [0, 64], sizes = [256, 32], strides = [1, 1]} : vector<256x128xf32> to vector<256x32xf32>
    %7 = vector.extract_strided_slice %3 {offsets = [0, 96], sizes = [256, 32], strides = [1, 1]} : vector<256x128xf32> to vector<256x32xf32>
    %c0_4 = arith.constant 0 : index
    %c0_5 = arith.constant 0 : index
    %8 = vector.load %arg4[%c0_4, %c0_5] : memref<256x8xf32, #tpu.memory_space<vmem>>, vector<256x8xf32>
    %c0_6 = arith.constant 0 : index
    %c0_7 = arith.constant 0 : index
    %c0_8 = arith.constant 0 : index
    %9 = vector.load %arg3[%c0_6, %c0_7, %c0_8] : memref<8x4x32xbf16, #tpu.memory_space<vmem>>, vector<1x4x32xbf16>
    %10 = vector.shape_cast %9 : vector<1x4x32xbf16> to vector<4x32xbf16>
    %cst_9 = arith.constant dense<0.000000e+00> : vector<256x32xf32>
    %11 = tpu.matmul %1, %10, %cst_9 {dimension_numbers = #tpu.dot_dimension_numbers<[1], [0], [0], [1], [0, 0, 1, 1], [], []>} : vector<256x4xbf16>, vector<4x32xbf16>, vector<256x32xf32> -> vector<256x32xf32>
    %cst_10 = arith.constant 0.000000e+00 : f32
    %12 = vector.broadcast %cst_10 : f32 to vector<204x32xf32>
    %13 = vector.extract_strided_slice %11 {offsets = [0, 0], sizes = [52, 32], strides = [1, 1]} : vector<256x32xf32> to vector<52x32xf32>
    %14 = tpu.concatenate %12, %13 in 0 : vector<204x32xf32>, vector<52x32xf32> -> vector<256x32xf32>
    %15 = vector.extract_strided_slice %8 {offsets = [0, 0], sizes = [256, 1], strides = [1, 1]} : vector<256x8xf32> to vector<256x1xf32>
    %16 = vector.broadcast %15 : vector<256x1xf32> to vector<256x32xf32>
    %17 = arith.mulf %14, %16 : vector<256x32xf32>
    %18 = arith.addf %5, %17 : vector<256x32xf32>
    %c1 = arith.constant 1 : index
    %c0_11 = arith.constant 0 : index
    %c0_12 = arith.constant 0 : index
    %19 = vector.load %arg3[%c1, %c0_11, %c0_12] : memref<8x4x32xbf16, #tpu.memory_space<vmem>>, vector<1x4x32xbf16>
    %20 = vector.shape_cast %19 : vector<1x4x32xbf16> to vector<4x32xbf16>
    %cst_13 = arith.constant dense<0.000000e+00> : vector<256x32xf32>
    %21 = tpu.matmul %1, %20, %cst_13 {dimension_numbers = #tpu.dot_dimension_numbers<[1], [0], [0], [1], [0, 0, 1, 1], [], []>} : vector<256x4xbf16>, vector<4x32xbf16>, vector<256x32xf32> -> vector<256x32xf32>
    %cst_14 = arith.constant 0.000000e+00 : f32
    %22 = vector.broadcast %cst_14 : f32 to vector<192x32xf32>
    %23 = vector.extract_strided_slice %21 {offsets = [0, 0], sizes = [64, 32], strides = [1, 1]} : vector<256x32xf32> to vector<64x32xf32>
    %24 = tpu.concatenate %22, %23 in 0 : vector<192x32xf32>, vector<64x32xf32> -> vector<256x32xf32>
    %25 = vector.extract_strided_slice %8 {offsets = [0, 1], sizes = [256, 1], strides = [1, 1]} : vector<256x8xf32> to vector<256x1xf32>
    %26 = vector.broadcast %25 : vector<256x1xf32> to vector<256x32xf32>
    %27 = arith.mulf %24, %26 : vector<256x32xf32>
    %28 = arith.addf %18, %27 : vector<256x32xf32>
    %c2 = arith.constant 2 : index
    %c0_15 = arith.constant 0 : index
    %c0_16 = arith.constant 0 : index
    %29 = vector.load %arg3[%c2, %c0_15, %c0_16] : memref<8x4x32xbf16, #tpu.memory_space<vmem>>, vector<1x4x32xbf16>
    %30 = vector.shape_cast %29 : vector<1x4x32xbf16> to vector<4x32xbf16>
    %cst_17 = arith.constant dense<0.000000e+00> : vector<256x32xf32>
    %31 = tpu.matmul %1, %30, %cst_17 {dimension_numbers = #tpu.dot_dimension_numbers<[1], [0], [0], [1], [0, 0, 1, 1], [], []>} : vector<256x4xbf16>, vector<4x32xbf16>, vector<256x32xf32> -> vector<256x32xf32>
    %cst_18 = arith.constant 0.000000e+00 : f32
    %32 = vector.broadcast %cst_18 : f32 to vector<180x32xf32>
    %33 = vector.extract_strided_slice %31 {offsets = [0, 0], sizes = [76, 32], strides = [1, 1]} : vector<256x32xf32> to vector<76x32xf32>
    %34 = tpu.concatenate %32, %33 in 0 : vector<180x32xf32>, vector<76x32xf32> -> vector<256x32xf32>
    %35 = vector.extract_strided_slice %8 {offsets = [0, 2], sizes = [256, 1], strides = [1, 1]} : vector<256x8xf32> to vector<256x1xf32>
    %36 = vector.broadcast %35 : vector<256x1xf32> to vector<256x32xf32>
    %37 = arith.mulf %34, %36 : vector<256x32xf32>
    %38 = arith.addf %28, %37 : vector<256x32xf32>
    %c3 = arith.constant 3 : index
    %c0_19 = arith.constant 0 : index
    %c0_20 = arith.constant 0 : index
    %39 = vector.load %arg3[%c3, %c0_19, %c0_20] : memref<8x4x32xbf16, #tpu.memory_space<vmem>>, vector<1x4x32xbf16>
    %40 = vector.shape_cast %39 : vector<1x4x32xbf16> to vector<4x32xbf16>
    %cst_21 = arith.constant dense<0.000000e+00> : vector<256x32xf32>
    %41 = tpu.matmul %1, %40, %cst_21 {dimension_numbers = #tpu.dot_dimension_numbers<[1], [0], [0], [1], [0, 0, 1, 1], [], []>} : vector<256x4xbf16>, vector<4x32xbf16>, vector<256x32xf32> -> vector<256x32xf32>
    %cst_22 = arith.constant 0.000000e+00 : f32
    %42 = vector.broadcast %cst_22 : f32 to vector<12x32xf32>
    %43 = vector.extract_strided_slice %41 {offsets = [0, 0], sizes = [244, 32], strides = [1, 1]} : vector<256x32xf32> to vector<244x32xf32>
    %44 = tpu.concatenate %42, %43 in 0 : vector<12x32xf32>, vector<244x32xf32> -> vector<256x32xf32>
    %45 = vector.extract_strided_slice %8 {offsets = [0, 3], sizes = [256, 1], strides = [1, 1]} : vector<256x8xf32> to vector<256x1xf32>
    %46 = vector.broadcast %45 : vector<256x1xf32> to vector<256x32xf32>
    %47 = arith.mulf %44, %46 : vector<256x32xf32>
    %48 = arith.addf %38, %47 : vector<256x32xf32>
    %c4 = arith.constant 4 : index
    %c0_23 = arith.constant 0 : index
    %c0_24 = arith.constant 0 : index
    %49 = vector.load %arg3[%c4, %c0_23, %c0_24] : memref<8x4x32xbf16, #tpu.memory_space<vmem>>, vector<1x4x32xbf16>
    %50 = vector.shape_cast %49 : vector<1x4x32xbf16> to vector<4x32xbf16>
    %cst_25 = arith.constant dense<0.000000e+00> : vector<256x32xf32>
    %51 = tpu.matmul %1, %50, %cst_25 {dimension_numbers = #tpu.dot_dimension_numbers<[1], [0], [0], [1], [0, 0, 1, 1], [], []>} : vector<256x4xbf16>, vector<4x32xbf16>, vector<256x32xf32> -> vector<256x32xf32>
    %cst_26 = arith.constant 0.000000e+00 : f32
    %52 = vector.broadcast %cst_26 : f32 to vector<12x32xf32>
    %53 = vector.extract_strided_slice %51 {offsets = [12, 0], sizes = [244, 32], strides = [1, 1]} : vector<256x32xf32> to vector<244x32xf32>
    %54 = tpu.concatenate %53, %52 in 0 : vector<244x32xf32>, vector<12x32xf32> -> vector<256x32xf32>
    %55 = vector.extract_strided_slice %8 {offsets = [0, 4], sizes = [256, 1], strides = [1, 1]} : vector<256x8xf32> to vector<256x1xf32>
    %56 = vector.broadcast %55 : vector<256x1xf32> to vector<256x32xf32>
    %57 = arith.mulf %54, %56 : vector<256x32xf32>
    %58 = arith.addf %48, %57 : vector<256x32xf32>
    %c5 = arith.constant 5 : index
    %c0_27 = arith.constant 0 : index
    %c0_28 = arith.constant 0 : index
    %59 = vector.load %arg3[%c5, %c0_27, %c0_28] : memref<8x4x32xbf16, #tpu.memory_space<vmem>>, vector<1x4x32xbf16>
    %60 = vector.shape_cast %59 : vector<1x4x32xbf16> to vector<4x32xbf16>
    %cst_29 = arith.constant dense<0.000000e+00> : vector<256x32xf32>
    %61 = tpu.matmul %1, %60, %cst_29 {dimension_numbers = #tpu.dot_dimension_numbers<[1], [0], [0], [1], [0, 0, 1, 1], [], []>} : vector<256x4xbf16>, vector<4x32xbf16>, vector<256x32xf32> -> vector<256x32xf32>
    %cst_30 = arith.constant 0.000000e+00 : f32
    %62 = vector.broadcast %cst_30 : f32 to vector<180x32xf32>
    %63 = vector.extract_strided_slice %61 {offsets = [180, 0], sizes = [76, 32], strides = [1, 1]} : vector<256x32xf32> to vector<76x32xf32>
    %64 = tpu.concatenate %63, %62 in 0 : vector<76x32xf32>, vector<180x32xf32> -> vector<256x32xf32>
    %65 = vector.extract_strided_slice %8 {offsets = [0, 5], sizes = [256, 1], strides = [1, 1]} : vector<256x8xf32> to vector<256x1xf32>
    %66 = vector.broadcast %65 : vector<256x1xf32> to vector<256x32xf32>
    %67 = arith.mulf %64, %66 : vector<256x32xf32>
    %68 = arith.addf %58, %67 : vector<256x32xf32>
    %c6 = arith.constant 6 : index
    %c0_31 = arith.constant 0 : index
    %c0_32 = arith.constant 0 : index
    %69 = vector.load %arg3[%c6, %c0_31, %c0_32] : memref<8x4x32xbf16, #tpu.memory_space<vmem>>, vector<1x4x32xbf16>
    %70 = vector.shape_cast %69 : vector<1x4x32xbf16> to vector<4x32xbf16>
    %cst_33 = arith.constant dense<0.000000e+00> : vector<256x32xf32>
    %71 = tpu.matmul %1, %70, %cst_33 {dimension_numbers = #tpu.dot_dimension_numbers<[1], [0], [0], [1], [0, 0, 1, 1], [], []>} : vector<256x4xbf16>, vector<4x32xbf16>, vector<256x32xf32> -> vector<256x32xf32>
    %cst_34 = arith.constant 0.000000e+00 : f32
    %72 = vector.broadcast %cst_34 : f32 to vector<192x32xf32>
    %73 = vector.extract_strided_slice %71 {offsets = [192, 0], sizes = [64, 32], strides = [1, 1]} : vector<256x32xf32> to vector<64x32xf32>
    %74 = tpu.concatenate %73, %72 in 0 : vector<64x32xf32>, vector<192x32xf32> -> vector<256x32xf32>
    %75 = vector.extract_strided_slice %8 {offsets = [0, 6], sizes = [256, 1], strides = [1, 1]} : vector<256x8xf32> to vector<256x1xf32>
    %76 = vector.broadcast %75 : vector<256x1xf32> to vector<256x32xf32>
    %77 = arith.mulf %74, %76 : vector<256x32xf32>
    %78 = arith.addf %68, %77 : vector<256x32xf32>
    %c7 = arith.constant 7 : index
    %c0_35 = arith.constant 0 : index
    %c0_36 = arith.constant 0 : index
    %79 = vector.load %arg3[%c7, %c0_35, %c0_36] : memref<8x4x32xbf16, #tpu.memory_space<vmem>>, vector<1x4x32xbf16>
    %80 = vector.shape_cast %79 : vector<1x4x32xbf16> to vector<4x32xbf16>
    %cst_37 = arith.constant dense<0.000000e+00> : vector<256x32xf32>
    %81 = tpu.matmul %1, %80, %cst_37 {dimension_numbers = #tpu.dot_dimension_numbers<[1], [0], [0], [1], [0, 0, 1, 1], [], []>} : vector<256x4xbf16>, vector<4x32xbf16>, vector<256x32xf32> -> vector<256x32xf32>
    %cst_38 = arith.constant 0.000000e+00 : f32
    %82 = vector.broadcast %cst_38 : f32 to vector<204x32xf32>
    %83 = vector.extract_strided_slice %81 {offsets = [204, 0], sizes = [52, 32], strides = [1, 1]} : vector<256x32xf32> to vector<52x32xf32>
    %84 = tpu.concatenate %83, %82 in 0 : vector<52x32xf32>, vector<204x32xf32> -> vector<256x32xf32>
    %85 = vector.extract_strided_slice %8 {offsets = [0, 7], sizes = [256, 1], strides = [1, 1]} : vector<256x8xf32> to vector<256x1xf32>
    %86 = vector.broadcast %85 : vector<256x1xf32> to vector<256x32xf32>
    %87 = arith.mulf %84, %86 : vector<256x32xf32>
    %88 = arith.addf %78, %87 : vector<256x32xf32>
    %89 = tpu.concatenate %4, %88, %6, %7 in 1 : vector<256x32xf32>, vector<256x32xf32>, vector<256x32xf32>, vector<256x32xf32> -> vector<256x128xf32>
    %c0_39 = arith.constant 0 : index
    %c0_40 = arith.constant 0 : index
    %90 = vector.load %arg5[%c0_39, %c0_40] : memref<1x128xf32, #tpu.memory_space<vmem>>, vector<1x128xf32>
    %91 = vector.broadcast %90 : vector<1x128xf32> to vector<256x128xf32>
    %92 = arith.addf %89, %91 : vector<256x128xf32>
    %cst_41 = arith.constant 0.000000e+00 : f32
    %93 = vector.broadcast %cst_41 : f32 to vector<256x128xf32>
    %94 = arith.cmpf oge, %92, %93 : vector<256x128xf32>
    %cst_42 = arith.constant 0.00999999977 : f32
    %95 = vector.broadcast %cst_42 : f32 to vector<256x128xf32>
    %96 = arith.mulf %95, %92 : vector<256x128xf32>
    %97 = arith.select %94, %92, %96 : vector<256x128xi1>, vector<256x128xf32>
    %98 = arith.truncf %97 : vector<256x128xf32> to vector<256x128xbf16>
    %c0_43 = arith.constant 0 : index
    %c0_44 = arith.constant 0 : index
    %99 = vector.load %arg6[%c0_43, %c0_44] : memref<128x128xbf16, #tpu.memory_space<vmem>>, vector<128x128xbf16>
    %cst_45 = arith.constant dense<0.000000e+00> : vector<256x128xf32>
    %100 = tpu.matmul %98, %99, %cst_45 {dimension_numbers = #tpu.dot_dimension_numbers<[1], [0], [0], [1], [0, 0, 1, 1], [], []>} : vector<256x128xbf16>, vector<128x128xbf16>, vector<256x128xf32> -> vector<256x128xf32>
    %c0_46 = arith.constant 0 : index
    %c0_47 = arith.constant 0 : index
    %c0_48 = arith.constant 0 : index
    %101 = vector.load %arg7[%c0_46, %c0_47, %c0_48] : memref<1x1x128xf32, #tpu.memory_space<vmem>>, vector<1x1x128xf32>
    %102 = vector.shape_cast %101 : vector<1x1x128xf32> to vector<1x128xf32>
    %103 = vector.broadcast %102 : vector<1x128xf32> to vector<256x128xf32>
    %104 = arith.addf %100, %103 : vector<256x128xf32>
    %cst_49 = arith.constant 0.000000e+00 : f32
    %105 = vector.broadcast %cst_49 : f32 to vector<256x128xf32>
    %106 = arith.cmpf oge, %104, %105 : vector<256x128xf32>
    %cst_50 = arith.constant 0.00999999977 : f32
    %107 = vector.broadcast %cst_50 : f32 to vector<256x128xf32>
    %108 = arith.mulf %107, %104 : vector<256x128xf32>
    %109 = arith.select %106, %104, %108 : vector<256x128xi1>, vector<256x128xf32>
    %110 = arith.truncf %109 : vector<256x128xf32> to vector<256x128xbf16>
    %c0_51 = arith.constant 0 : index
    %c0_52 = arith.constant 0 : index
    %c0_53 = arith.constant 0 : index
    %111 = vector.load %arg8[%c0_51, %c0_52, %c0_53] : memref<1x256x128xbf16, #tpu.memory_space<vmem>>, vector<1x256x128xbf16>
    %112 = vector.shape_cast %111 : vector<1x256x128xbf16> to vector<256x128xbf16>
    %113 = vector.shape_cast %110 : vector<256x128xbf16> to vector<1x256x128xbf16>
    tpu.vector_store %arg8[%c0_51, %c0_52, %c0_53], %113 {strides = array<i32>} : memref<1x256x128xbf16, #tpu.memory_space<vmem>>, vector<1x256x128xbf16>,
    return
  }
  func.func @transform_0(%arg0: i32) -> (i32, i32, i32) {
    %c0_i32 = arith.constant 0 : i32
    %c0_i32_0 = arith.constant 0 : i32
    %c0_i32_1 = arith.constant 0 : i32
    return %arg0, %c0_i32, %c0_i32_0 : i32, i32, i32
  }
  func.func @transform_1(%arg0: i32) -> (i32, i32) {
    %c0_i32 = arith.constant 0 : i32
    %c0_i32_0 = arith.constant 0 : i32
    %c0_i32_1 = arith.constant 0 : i32
    return %c0_i32, %c0_i32_0 : i32, i32
  }
  func.func @transform_2(%arg0: i32) -> (i32, i32, i32) {
    %c0_i32 = arith.constant 0 : i32
    %c0_i32_0 = arith.constant 0 : i32
    %c0_i32_1 = arith.constant 0 : i32
    %c0_i32_2 = arith.constant 0 : i32
    return %c0_i32, %c0_i32_0, %c0_i32_1 : i32, i32, i32
  }
  func.func @transform_3(%arg0: i32) -> (i32, i32) {
    %c0_i32 = arith.constant 0 : i32
    %c0_i32_0 = arith.constant 0 : i32
    %c0_i32_1 = arith.constant 0 : i32
    return %c0_i32, %c0_i32_0 : i32, i32
  }
  func.func @transform_4(%arg0: i32) -> (i32, i32) {
    %c0_i32 = arith.constant 0 : i32
    %c0_i32_0 = arith.constant 0 : i32
    %c0_i32_1 = arith.constant 0 : i32
    return %c0_i32, %c0_i32_0 : i32, i32
  }
  func.func @transform_5(%arg0: i32) -> (i32, i32) {
    %c0_i32 = arith.constant 0 : i32
    %c0_i32_0 = arith.constant 0 : i32
    %c0_i32_1 = arith.constant 0 : i32
    return %c0_i32, %c0_i32_0 : i32, i32
  }
  func.func @transform_6(%arg0: i32) -> (i32, i32, i32) {
    %c0_i32 = arith.constant 0 : i32
    %c0_i32_0 = arith.constant 0 : i32
    %c0_i32_1 = arith.constant 0 : i32
    return %arg0, %c0_i32, %c0_i32_0 : i32, i32, i32
  }
  func.func @transform_7(%arg0: i32) -> (i32, i32, i32) {
    %c0_i32 = arith.constant 0 : i32
    %c0_i32_0 = arith.constant 0 : i32
    %c0_i32_1 = arith.constant 0 : i32
    return %arg0, %c0_i32, %c0_i32_0 : i32, i32, i32
  }
}

</mosaic_0001>

<bundles_post_ra>
// kernel: tpu_custom_call.1
= control target key start
LH: loop header
LB: loop body
LE: loop exit
PB: predicated region body
PF: predicated region fallthrough
CT: control target
= control target key end

     0   :  { %12 = vsyncpa [#allocation3], 0  ;;  %s10071_s0 = inlined_call_operand.vmem [shape: bf16[2,256,4], index: 0, kind: input, shape index: {}]   ;;  %s10072_s1 = inlined_call_operand.vmem [shape: bf16[4,128], index: 1, kind: input, shape index: {}]   ;;  %s10073_s2 = inlined_call_operand.vmem [shape: bf16[8,4,32], index: 2, kind: input, shape index: {}]   ;;  %s10074_s3 = inlined_call_operand.vmem [shape: f32[256,8], index: 3, kind: input, shape index: {}]   ;;  %s10075_s4 = inlined_call_operand.vmem [shape: f32[1,128], index: 4, kind: input, shape index: {}]   ;;  %s10076_s5 = inlined_call_operand.vmem [shape: bf16[128,128], index: 5, kind: input, shape index: {}]   ;;  %s10077_s6 = inlined_call_operand.vmem [shape: f32[2,1,128], index: 6, kind: input, shape index: {}]   ;;  %s10078_s7 = inlined_call_operand.hbm [shape: bf16[2,256,128], index: 7, kind: output, shape index: {}]  }
   0x1   :  { %14 = vsyncpa [#allocation3 + $0x1], 0  ;;  %s6855_s24 = smov 0   ;;  %s6857_s25 = smov 0  }
   0x2   :  { %s6859_s26 = smov 0   ;;  %s6861_s27 = smov 0  }
   0x3 LB: > { %s6876_s28 = sadd.s32 4294967295, %s6801_s27   ;;  %s5634_s29 = sadd.s32 4294967294, %s6801_s27   ;;  %s6801_s27 = sphi %s6861_s27, %s10528_s27   ;;  %s6797_s26 = sphi %s6859_s26, %s10527_s26   ;;  %s6793_s25 = sphi %s6857_s25, %s10526_s25   ;;  %s6789_s24 = sphi %s6855_s24, %s10525_s24  }
   0x4   : > { %s6880_s30 = sadd.s32 1, %s6801_s27   ;;  %s184_s8 = sadd.s32 1, %s6797_s26 }
   0x5   : > { %s181_s9 = ssub.s32 %s6801_s27, %s6880_s30  ;;  %p194_p0 = scmp.ne.s32.totalorder %s6797_s26, %s6793_s25 }
   0x6   : > { %p182_p1 = scmp.eq.s32.totalorder %s181_s9, 0  ;;  %p195_p2 = scmp.eq.s32.totalorder %s6876_s28, 1 }
   0x7   : > { %p200_p3 = scmp.ne.s32.totalorder %s6793_s25, %s6789_s24  ;;  %p201_p4 = scmp.eq.s32.totalorder %s5634_s29, 1 }
   0x8   : > { %s6891_s10 = scalar_select %p182_p1, %s6797_s26, %s184_s8  }
   0x9   : > { %p6893_p5 = por %p195_p2, %p194_p0  ;;  %p6897_p6 = por %p201_p4, %p200_p3 }
   0xa   : > { %p5637_p7 = scmp.ge.s32.totalorder %s6801_s27, 1  ;;  %p248_p8 = scmp.lt.s32.totalorder %s6801_s27, 3 }
   0xc   : > { %p249_p9 = pnand %p5637_p7, %p248_p8 }
   0xe   : > { %252 = sbr.rel (%p249_p9) target bundleno = 1855 (0x73f), region = 48 }
  0x15   : > { %v6906_v0 = vld [vmem:[%s10074_s3 + $0x10] sm:$0xff]  ;;  %v6911_v1 = vld [vmem:[%s10074_s3] sm:$0xff]  ;;  %vm454_vm0 = vcmask 1041408   ;;  %p283_p10 = scmp.lt.s32.totalorder %s6876_s28, 1  ;;  %v6803_v2 = vmov 0   ;;  %v6926_v5 = vld [vmem:[%s10074_s3 + $0x18] sm:$0xff] }
  0x16   : > { %6575 = vset.pattern.permute.xlu1 %v6803_v2  ;;  %6574 = vset.pattern.permute.xlu0 %v6803_v2  ;;  %v651_v3 = vld [vmem:[%s10073_s2] sm:$0x3]  ;;  %v6931_v6 = vld [vmem:[%s10074_s3 + $0x8] sm:$0xff]  ;;  %vm405_vm1 = vcmask 31744   ;;  %v6977_v14 = vld [vmem:[%s10074_s3 + $0x38] sm:$0xff]  ;;  %v6804_v55 = vmov 1  }
  0x17   : > { %832 = vperm.xlu1 %6575, %v6906_v0   ;;  %822 = vperm.xlu0 %6574, %v6911_v1   ;;  %v653_v4 = vsel %vm454_vm0, %v651_v3, 0  ;;  %s6921_s19 = scalar_select %p283_p10, %s6876_s28, 1  ;;  %v6943_v7 = vld [vmem:[%s10074_s3 + $0x28] sm:$0xff]  ;;  %v6948_v8 = vld [vmem:[%s10074_s3 + $0x20] sm:$0xff]  ;;  %v6982_v15 = vld [vmem:[%s10074_s3 + $0x30] sm:$0xff]  ;;  %vm798_vm2 = vcmask 1043456  }
  0x18   : > { %6516 = vmatprep.subr.msk.bf16.mxu1 %vm454_vm0, %v651_v3  ;;  %v324_v9 = vld [vmem:[%s10072_s1] sm:$0x3]  ;;  %v6998_v17 = vld [vmem:[%s10074_s3 + $0x48] sm:$0xff]  ;;  %v7015_v20 = vld [vmem:[%s10074_s3 + $0x58] sm:$0xff]  ;;  %s6805_s14 = smov 32   ;;  %vm4811_vm3 = vcmask 261120  }
  0x19   : > { %6196 = vmatpush3.bf16.msra.mxu1 %v653_v4  ;;  %s5855_s29 = sshll.u32 %s6921_s19, 7  ;;  %v456_v11 = vsel %vm454_vm0, %v324_v9, 0  ;;  %6515 = vmatprep.subr.msk.bf16.mxu0 %vm454_vm0, %v324_v9  ;;  %v7003_v18 = vld [vmem:[%s10074_s3 + $0x40] sm:$0xff]  ;;  %v7020_v21 = vld [vmem:[%s10074_s3 + $0x50] sm:$0xff]  ;;  %v7031_v22 = vld [vmem:[%s10074_s3 + $0x68] sm:$0xff]  ;;  %vm4844_vm4 = vcmask 523264  }
  0x1a   : > { %s6938_s13 = scalar_lea.vmem %s10071_s0, %s5855_s29  ;;  %6162 = vmatpush3.bf16.msra.mxu0 %v456_v11  ;;  %v7038_v23 = vld [vmem:[%s10074_s3 + $0x60] sm:$0xff]  ;;  %v7053_v26 = vld [vmem:[%s10074_s3 + $0x78] sm:$0xff]  ;;  %v7058_v27 = vld [vmem:[%s10074_s3 + $0x70] sm:$0xff]  ;;  %vm4877_vm5 = vcmask 785408   ;;  %s290_s29 = scalar_lea.vmem %s10077_s6, %s6921_s19 }
  0x1b   : > { %837 = vperm.xlu1 %6575, %v6926_v5   ;;  %827 = vperm.xlu0 %6574, %v6931_v6   ;;  %v6956_v10 = vld [vmem:[%s6938_s13] sm:$0xff]   ;;  %v6960_v12 = vld [vmem:[%s6938_s13 + $0x8] sm:$0xff]   ;;  %v6966_v13 = vld [vmem:[%s6938_s13 + $0x10] sm:$0xff]   ;;  %s280_s8 = sand.u32 1, %s6793_s25   ;;  %s5888_s15 = sshll.u32 %s6876_s28, 11 }
  0x1c   : > { %6197 = vmatprep.mubr.msk.bf16.mxu1 %vm405_vm1, %v6956_v10  ;;  %6163 = vmatprep.mubr.msk.bf16.mxu0 %vm405_vm1, %v6956_v10  ;;  %v6991_v16 = vld [vmem:[%s6938_s13 + $0x18] sm:$0xff]   ;;  %v7006_v19 = vld [vmem:[%s6938_s13 + $0x20] sm:$0xff]   ;;  %v7041_v24 = vld [vmem:[%s6938_s13 + $0x28] sm:$0xff]   ;;  %s5638_s9 = sshll.u32 %s280_s8, 7  ;;  %s10030_s28 = scalar_lea.sflag [#allocation3], %s280_s8 }
  0x1d   : > { %6198 = vmatmul.mubr.msk.bf16.vlgmr.msra.gmra.mrb[0].mxu1 %vm405_vm1, %v6960_v12  ;;  %6164 = vmatmul.mubr.msk.bf16.vlgmr.msra.gmra.mrb[0].mxu0 %vm405_vm1, %v6960_v12  ;;  %v7044_v25 = vld [vmem:[%s6938_s13 + $0x30] sm:$0xff]   ;;  %v5689_v28 = vld [vmem:[%s10073_s2 + $0x2] sm:$0x3]  ;;  %v7074_v30 = vld [vmem:[%s10074_s3 + $0x88] sm:$0xff]  ;;  %s9973_s19 = scalar_lea.vmem [#allocation2], %s5638_s9 }
  0x1e   : > { %6201 = vmatprep.mubr.msk.bf16.mxu1 %vm405_vm1, %v6966_v13  ;;  %6167 = vmatprep.mubr.msk.bf16.mxu0 %vm405_vm1, %v6966_v13  ;;  %v1175_v29 = vsel %vm454_vm0, %v5689_v28, 0  ;;  %v7079_v31 = vld [vmem:[%s10074_s3 + $0x80] sm:$0xff]  ;;  %v7082_v32 = vld [vmem:[%s6938_s13 + $0x38] sm:$0xff]   ;;  %v7101_v35 = vld [vmem:[%s10074_s3 + $0x90] sm:$0xff]  ;;  %s5563_s16 = sshll.u32 %s9973_s19, 4  ;;  %s10024_s16 = int_to_ptr.vmem [resolvable:$true] %s5563_s16 }
  0x1f   : > { %847 = vperm.xlu1 %6575, %v6943_v7   ;;  %842 = vperm.xlu0 %6574, %v6948_v8   ;;  %v7087_v33 = vld [vmem:[%s6938_s13 + $0x40] sm:$0xff]   ;;  %v7096_v34 = vld [vmem:[%s10074_s3 + $0x98] sm:$0xff]  ;;  %v7114_v36 = vld [vmem:[%s10074_s3 + $0xa8] sm:$0xff]  ;;  %s6739_s20 = scalar_lea.vmem %s10024_s16, 2048 }
  0x20   : > { %6517 = vmatprep.subr.msk.bf16.mxu0 %vm454_vm0, %v5689_v28  ;;  %v7119_v37 = vld [vmem:[%s10074_s3 + $0xa0] sm:$0xff]  ;;  %v7122_v38 = vld [vmem:[%s6938_s13 + $0x48] sm:$0xff]   ;;  %v7125_v39 = vld [vmem:[%s6938_s13 + $0x50] sm:$0xff]   ;;  %p6740_p11 = scmp.ne.s32.totalorder %s10024_s16, %s6739_s20 }
  0x21   : > { %6230 = vmatpush3.bf16.msra.mxu0 %v1175_v29  ;;  %v7134_v40 = vld [vmem:[%s10074_s3 + $0xb8] sm:$0xff]  ;;  %v7139_v41 = vld [vmem:[%s10074_s3 + $0xb0] sm:$0xff]  ;;  %v7152_v42 = vld [vmem:[%s10074_s3 + $0xc8] sm:$0xff] }
  0x22   : > { %v7157_v43 = vld [vmem:[%s10074_s3 + $0xc0] sm:$0xff]  ;;  %v7160_v44 = vld [vmem:[%s6938_s13 + $0x58] sm:$0xff]   ;;  %v7177_v47 = vld [vmem:[%s10074_s3 + $0xd0] sm:$0xff]  ;;  %p6741_p12 = pnand %p6740_p11, %p6893_p5 }
  0x23   : > { %857 = vperm.xlu1 %6575, %v6977_v14   ;;  %852 = vperm.xlu0 %6574, %v6982_v15   ;;  %v7163_v45 = vld [vmem:[%s6938_s13 + $0x60] sm:$0xff]   ;;  %v7172_v46 = vld [vmem:[%s10074_s3 + $0xd8] sm:$0xff]  ;;  %v7190_v48 = vld [vmem:[%s10074_s3 + $0xe8] sm:$0xff] }
  0x24   : > { %v7195_v49 = vld [vmem:[%s10074_s3 + $0xe0] sm:$0xff]  ;;  %v7198_v50 = vld [vmem:[%s6938_s13 + $0x68] sm:$0xff]   ;;  %v7201_v51 = vld [vmem:[%s6938_s13 + $0x70] sm:$0xff]   ;;  %p6742_p13 = pneg %p6741_p12 }
  0x25   : > { %6202 = vmatmul.mubr.msk.bf16.gmra.mrb[4].mxu1 %vm405_vm1, %v6991_v16  ;;  %6168 = vmatmul.mubr.msk.bf16.gmra.mrb[4].mxu0 %vm405_vm1, %v6991_v16  ;;  %v7210_v52 = vld [vmem:[%s10074_s3 + $0xf8] sm:$0xff]  ;;  %v7215_v53 = vld [vmem:[%s10074_s3 + $0xf0] sm:$0xff]  ;;  %v5706_v3 = vld [vmem:[%s10073_s2 + $0x4] sm:$0x3] }
  0x26   : > { %6205 = vmatprep.mubr.msk.bf16.mxu1 %vm405_vm1, %v7006_v19  ;;  %6171 = vmatprep.mubr.msk.bf16.mxu0 %vm405_vm1, %v7006_v19  ;;  %v7226_v54 = vld [vmem:[%s6938_s13 + $0x78] sm:$0xff]   ;;  %v1637_v4 = vsel %vm454_vm0, %v5706_v3, 0 }
  0x27   : > { %867 = vperm.xlu1 %6575, %v6998_v17   ;;  %862 = vperm.xlu0 %6574, %v7003_v18  }
  0x28   : > { %6518 = vmatprep.subr.msk.bf16.mxu1 %vm454_vm0, %v5706_v3 }
  0x29   : > { %6264 = vmatpush3.bf16.msra.mxu1 %v1637_v4 }
  0x2b   : > { %877 = vperm.xlu1 %6575, %v7015_v20   ;;  %872 = vperm.xlu0 %6574, %v7020_v21  }
  0x2d   : > { %6206 = vmatmul.mubr.msk.bf16.gmra.mrb[8].mxu1 %vm405_vm1, %v7041_v24  ;;  %6172 = vmatmul.mubr.msk.bf16.gmra.mrb[8].mxu0 %vm405_vm1, %v7041_v24 }
  0x2e   : > { %6209 = vmatprep.mubr.msk.bf16.mxu1 %vm405_vm1, %v7044_v25  ;;  %6175 = vmatprep.mubr.msk.bf16.mxu0 %vm405_vm1, %v7044_v25 }
  0x2f   : > { %887 = vperm.xlu1 %6575, %v7031_v22   ;;  %882 = vperm.xlu0 %6574, %v7038_v23  }
  0x33   : > { %897 = vperm.xlu1 %6575, %v7053_v26   ;;  %892 = vperm.xlu0 %6574, %v7058_v27  }
  0x35   : > { %6210 = vmatmul.mubr.msk.bf16.gmra.mrb[12].mxu1 %vm405_vm1, %v7082_v32  ;;  %6176 = vmatmul.mubr.msk.bf16.gmra.mrb[12].mxu0 %vm405_vm1, %v7082_v32 }
  0x36   : > { %6213 = vmatprep.mubr.msk.bf16.mxu1 %vm405_vm1, %v7087_v33  ;;  %6179 = vmatprep.mubr.msk.bf16.mxu0 %vm405_vm1, %v7087_v33 }
  0x37   : > { %907 = vperm.xlu1 %6575, %v7074_v30   ;;  %902 = vperm.xlu0 %6574, %v7079_v31  }
  0x3b   : > { %917 = vperm.xlu1 %6575, %v7096_v34   ;;  %912 = vperm.xlu0 %6574, %v7101_v35  }
  0x3d   : > { %6214 = vmatmul.mubr.msk.bf16.gmra.mrb[16].mxu1 %vm405_vm1, %v7122_v38  ;;  %6180 = vmatmul.mubr.msk.bf16.gmra.mrb[16].mxu0 %vm405_vm1, %v7122_v38 }
  0x3e   : > { %6217 = vmatprep.mubr.msk.bf16.mxu1 %vm405_vm1, %v7125_v39  ;;  %6183 = vmatprep.mubr.msk.bf16.mxu0 %vm405_vm1, %v7125_v39 }
  0x3f   : > { %927 = vperm.xlu1 %6575, %v7114_v36   ;;  %922 = vperm.xlu0 %6574, %v7119_v37  }
  0x43   : > { %937 = vperm.xlu1 %6575, %v7134_v40   ;;  %932 = vperm.xlu0 %6574, %v7139_v41  }
  0x45   : > { %6218 = vmatmul.mubr.msk.bf16.gmra.mrb[20].mxu1 %vm405_vm1, %v7160_v44  ;;  %6184 = vmatmul.mubr.msk.bf16.gmra.mrb[20].mxu0 %vm405_vm1, %v7160_v44 }
  0x46   : > { %6221 = vmatprep.mubr.msk.bf16.mxu1 %vm405_vm1, %v7163_v45  ;;  %6187 = vmatprep.mubr.msk.bf16.mxu0 %vm405_vm1, %v7163_v45 }
  0x47   : > { %947 = vperm.xlu1 %6575, %v7152_v42   ;;  %942 = vperm.xlu0 %6574, %v7157_v43  }
  0x4b   : > { %957 = vperm.xlu1 %6575, %v7172_v46   ;;  %952 = vperm.xlu0 %6574, %v7177_v47  }
  0x4d   : > { %6222 = vmatmul.mubr.msk.bf16.gmra.mrb[24].mxu1 %vm405_vm1, %v7198_v50  ;;  %6188 = vmatmul.mubr.msk.bf16.gmra.mrb[24].mxu0 %vm405_vm1, %v7198_v50 }
  0x4e   : > { %6225 = vmatprep.mubr.msk.bf16.mxu1 %vm405_vm1, %v7201_v51  ;;  %6191 = vmatprep.mubr.msk.bf16.mxu0 %vm405_vm1, %v7201_v51 }
  0x4f   : > { %967 = vperm.xlu1 %6575, %v7190_v48   ;;  %962 = vperm.xlu0 %6574, %v7195_v49  }
  0x53   : > { %977 = vperm.xlu1 %6575, %v7210_v52   ;;  %972 = vperm.xlu0 %6574, %v7215_v53  }
  0x55   : > { %6226 = vmatmul.mubr.msk.bf16.gmra.mrb[28].mxu1 %vm405_vm1, %v7226_v54  ;;  %6192 = vmatmul.mubr.msk.bf16.gmra.mrb[28].mxu0 %vm405_vm1, %v7226_v54 }
  0x56   : > { %6265 = vmatprep.mubr.msk.bf16.mxu1 %vm405_vm1, %v6956_v10  ;;  %6231 = vmatprep.mubr.msk.bf16.mxu0 %vm405_vm1, %v6956_v10 }
  0x57   : > { %6577 = vset.pattern.permute.xlu1 %v6804_v55  ;;  %6576 = vset.pattern.permute.xlu0 %v6804_v55 }
  0x58   : > { %1319 = vperm.xlu1 %6577, %v6931_v6   ;;  %1315 = vperm.xlu0 %6576, %v6911_v1  }
  0x5c   : > { %1323 = vperm.xlu1 %6577, %v6906_v0   ;;  %1327 = vperm.xlu0 %6576, %v6926_v5  }
  0x5d   : > { %6232 = vmatmul.mubr.msk.bf16.vlgmr.msra.gmra.mrb[32].mxu0 %vm405_vm1, %v6960_v12  ;;  %6266 = vmatmul.mubr.msk.bf16.vlgmr.msra.gmra.mrb[32].mxu1 %vm405_vm1, %v6960_v12 }
  0x5e   : > { %6235 = vmatprep.mubr.msk.bf16.mxu0 %vm405_vm1, %v6966_v13  ;;  %6269 = vmatprep.mubr.msk.bf16.mxu1 %vm405_vm1, %v6966_v13 }
  0x60   : > { %1331 = vperm.xlu1 %6577, %v6948_v8   ;;  %1335 = vperm.xlu0 %6576, %v6943_v7  }
  0x64   : > { %1339 = vperm.xlu1 %6577, %v6982_v15   ;;  %1343 = vperm.xlu0 %6576, %v6977_v14  }
  0x65   : > { %6236 = vmatmul.mubr.msk.bf16.gmra.mrb[36].mxu0 %vm405_vm1, %v6991_v16  ;;  %6270 = vmatmul.mubr.msk.bf16.gmra.mrb[36].mxu1 %vm405_vm1, %v6991_v16 }
  0x66   : > { %6239 = vmatprep.mubr.msk.bf16.mxu0 %vm405_vm1, %v7006_v19  ;;  %6273 = vmatprep.mubr.msk.bf16.mxu1 %vm405_vm1, %v7006_v19 }
  0x68   : > { %1347 = vperm.xlu1 %6577, %v7003_v18  }
  0x6d   : > { %6240 = vmatmul.mubr.msk.bf16.gmra.mrb[40].mxu0 %vm405_vm1, %v7041_v24  ;;  %6274 = vmatmul.mubr.msk.bf16.gmra.mrb[40].mxu1 %vm405_vm1, %v7041_v24 }
  0x6e   : > { %6243 = vmatprep.mubr.msk.bf16.mxu0 %vm405_vm1, %v7044_v25  ;;  %6277 = vmatprep.mubr.msk.bf16.mxu1 %vm405_vm1, %v7044_v25 }
  0x75   : > { %6244 = vmatmul.mubr.msk.bf16.gmra.mrb[44].mxu0 %vm405_vm1, %v7082_v32  ;;  %6278 = vmatmul.mubr.msk.bf16.gmra.mrb[44].mxu1 %vm405_vm1, %v7082_v32 }
  0x76   : > { %6247 = vmatprep.mubr.msk.bf16.mxu0 %vm405_vm1, %v7087_v33  ;;  %6281 = vmatprep.mubr.msk.bf16.mxu1 %vm405_vm1, %v7087_v33 }
  0x7d   : > { %6248 = vmatmul.mubr.msk.bf16.gmra.mrb[48].mxu0 %vm405_vm1, %v7122_v38  ;;  %6282 = vmatmul.mubr.msk.bf16.gmra.mrb[48].mxu1 %vm405_vm1, %v7122_v38 }
  0x7e   : > { %6251 = vmatprep.mubr.msk.bf16.mxu0 %vm405_vm1, %v7125_v39  ;;  %6285 = vmatprep.mubr.msk.bf16.mxu1 %vm405_vm1, %v7125_v39 }
  0x85   : > { %6252 = vmatmul.mubr.msk.bf16.gmra.mrb[52].mxu0 %vm405_vm1, %v7160_v44  ;;  %6286 = vmatmul.mubr.msk.bf16.gmra.mrb[52].mxu1 %vm405_vm1, %v7160_v44 }
  0x86   : > { %6255 = vmatprep.mubr.msk.bf16.mxu0 %vm405_vm1, %v7163_v45  ;;  %6289 = vmatprep.mubr.msk.bf16.mxu1 %vm405_vm1, %v7163_v45 }
  0x8d   : > { %6256 = vmatmul.mubr.msk.bf16.gmra.mrb[56].mxu0 %vm405_vm1, %v7198_v50  ;;  %6290 = vmatmul.mubr.msk.bf16.gmra.mrb[56].mxu1 %vm405_vm1, %v7198_v50 }
  0x8e   : > { %6259 = vmatprep.mubr.msk.bf16.mxu0 %vm405_vm1, %v7201_v51  ;;  %6293 = vmatprep.mubr.msk.bf16.mxu1 %vm405_vm1, %v7201_v51 }
  0x95   : > { %6260 = vmatmul.mubr.msk.bf16.gmra.mrb[60].mxu0 %vm405_vm1, %v7226_v54  ;;  %6294 = vmatmul.mubr.msk.bf16.gmra.mrb[60].mxu1 %vm405_vm1, %v7226_v54 }
  0x96   : > { %v833_v56 = vpop.permute.xlu1 %832  ;;  %v823_v57 = vpop.permute.xlu0 %822  ;;  %6299 = vmatprep.mubr.msk.bf16.mxu0 %vm405_vm1, %v6956_v10  ;;  %6333 = vmatprep.mubr.msk.bf16.mxu1 %vm405_vm1, %v6956_v10 }
  0x97   : > { %v980_v58 = vmul.f32 0.0, %v823_v57  ;;  %v982_v59 = vmul.f32 0.0, %v833_v56 }
  0x99   : > { %1044 = vrot.lane.b32.xlu0 %v980_v58, %s6805_s14 }
  0x9a   : > { %v838_v60 = vpop.permute.xlu1 %837  ;;  %v828_v61 = vpop.permute.xlu0 %827 }
  0x9b   : > { %v981_v62 = vmul.f32 0.0, %v828_v61  ;;  %v983_v1 = vmul.f32 0.0, %v838_v60 }
  0x9d   : > { %1048 = vrot.lane.b32.xlu0 %v982_v59, %s6805_s14  ;;  %1046 = vrot.lane.b32.xlu1 %v981_v62, %s6805_s14 }
  0x9e   : > { %v848_v63 = vpop.permute.xlu1 %847  ;;  %v843_v0 = vpop.permute.xlu0 %842 }
  0x9f   : > { %v984_v2 = vmul.f32 0.0, %v843_v0  ;;  %v985_v7 = vmul.f32 0.0, %v848_v63 }
  0xa1   : > { %1050 = vrot.lane.b32.xlu1 %v983_v1, %s6805_s14  ;;  %1052 = vrot.lane.b32.xlu0 %v984_v2, %s6805_s14 }
  0xa2   : > { %v858_v5 = vpop.permute.xlu1 %857  ;;  %v853_v6 = vpop.permute.xlu0 %852 }
  0xa3   : > { %v986_v8 = vmul.f32 0.0, %v853_v6  ;;  %v987_v14 = vmul.f32 0.0, %v858_v5 }
  0xa5   : > { %1054 = vrot.lane.b32.xlu1 %v985_v7, %s6805_s14  ;;  %1056 = vrot.lane.b32.xlu0 %v986_v8, %s6805_s14 }
  0xa6   : > { %v868_v9 = vpop.permute.xlu1 %867  ;;  %v863_v11 = vpop.permute.xlu0 %862 }
  0xa7   : > { %v988_v15 = vmul.f32 0.0, %v863_v11  ;;  %v989_v29 = vmul.f32 0.0, %v868_v9 }
  0xa9   : > { %1058 = vrot.lane.b32.xlu1 %v987_v14, %s6805_s14  ;;  %1060 = vrot.lane.b32.xlu0 %v988_v15, %s6805_s14 }
  0xaa   : > { %v878_v18 = vpop.permute.xlu1 %877  ;;  %v873_v28 = vpop.permute.xlu0 %872 }
  0xab   : > { %v990_v55 = vmul.f32 0.0, %v873_v28  ;;  %v991_v58 = vmul.f32 0.0, %v878_v18 }
  0xad   : > { %1062 = vrot.lane.b32.xlu1 %v989_v29, %s6805_s14  ;;  %1064 = vrot.lane.b32.xlu0 %v990_v55, %s6805_s14 }
  0xae   : > { %v888_v56 = vpop.permute.xlu1 %887  ;;  %v883_v57 = vpop.permute.xlu0 %882 }
  0xaf   : > { %v992_v59 = vmul.f32 0.0, %v883_v57  ;;  %v993_v62 = vmul.f32 0.0, %v888_v56 }
  0xb1   : > { %1066 = vrot.lane.b32.xlu1 %v991_v58, %s6805_s14  ;;  %1068 = vrot.lane.b32.xlu0 %v992_v59, %s6805_s14 }
  0xb2   : > { %v898_v60 = vpop.permute.xlu1 %897  ;;  %v893_v61 = vpop.permute.xlu0 %892 }
  0xb3   : > { %v994_v63 = vmul.f32 0.0, %v893_v61  ;;  %v995_v2 = vmul.f32 0.0, %v898_v60 }
  0xb5   : > { %1070 = vrot.lane.b32.xlu1 %v993_v62, %s6805_s14  ;;  %1072 = vrot.lane.b32.xlu0 %v994_v63, %s6805_s14 }
  0xb6   : > { %v908_v0 = vpop.permute.xlu1 %907  ;;  %v903_v1 = vpop.permute.xlu0 %902 }
  0xb7   : > { %v996_v3 = vmul.f32 0.0, %v903_v1  ;;  %v997_v6 = vmul.f32 0.0, %v908_v0 }
  0xb9   : > { %1074 = vrot.lane.b32.xlu1 %v995_v2, %s6805_s14  ;;  %1076 = vrot.lane.b32.xlu0 %v996_v3, %s6805_s14 }
  0xba   : > { %v918_v4 = vpop.permute.xlu1 %917  ;;  %v913_v5 = vpop.permute.xlu0 %912 }
  0xbb   : > { %v998_v7 = vmul.f32 0.0, %v913_v5  ;;  %v999_v11 = vmul.f32 0.0, %v918_v4 }
  0xbd   : > { %1078 = vrot.lane.b32.xlu1 %v997_v6, %s6805_s14  ;;  %1080 = vrot.lane.b32.xlu0 %v998_v7, %s6805_s14 }
  0xbe   : > { %v928_v8 = vpop.permute.xlu1 %927  ;;  %v923_v9 = vpop.permute.xlu0 %922 }
  0xbf   : > { %v1000_v14 = vmul.f32 0.0, %v923_v9  ;;  %v1001_v18 = vmul.f32 0.0, %v928_v8 }
  0xc1   : > { %1082 = vrot.lane.b32.xlu1 %v999_v11, %s6805_s14  ;;  %1084 = vrot.lane.b32.xlu0 %v1000_v14, %s6805_s14 }
  0xc2   : > { %v933_v15 = vpop.permute.xlu0 %932  ;;  %v938_v29 = vpop.permute.xlu1 %937 }
  0xc3   : > { %v1002_v28 = vmul.f32 0.0, %v933_v15  ;;  %v1003_v56 = vmul.f32 0.0, %v938_v29 }
  0xc5   : > { %1086 = vrot.lane.b32.xlu1 %v1001_v18, %s6805_s14  ;;  %1088 = vrot.lane.b32.xlu0 %v1002_v28, %s6805_s14 }
  0xc6   : > { %v943_v55 = vpop.permute.xlu0 %942  ;;  %v7333_v58 = vpop.permute.xlu1 %947 }
  0xc7   : > { %v1004_v57 = vmul.f32 0.0, %v943_v55 }
  0xc9   : > { %1090 = vrot.lane.b32.xlu1 %v1003_v56, %s6805_s14  ;;  %1092 = vrot.lane.b32.xlu0 %v1004_v57, %s6805_s14  ;;  %v6806_v57 = vmov 2  }
  0xca   : > { %v7339_v59 = vpop.permute.xlu1 %957 }
  0xcd   : > { %1355 = vperm.xlu1 %6577, %v7020_v21   ;;  %1351 = vperm.xlu0 %6576, %v6998_v17   ;;  %v7349_v21 = vpop.permute.xlu0 %952 }
  0xce   : > { %v7347_v17 = vpop.permute.xlu1 %967 }
  0xd1   : > { %1363 = vperm.xlu1 %6577, %v7038_v23   ;;  %1359 = vperm.xlu0 %6576, %v7015_v20  }
  0xd2   : > { %v7359_v20 = vpop.permute.xlu1 %977 }
  0xd5   : > { %1371 = vperm.xlu1 %6577, %v7058_v27   ;;  %1367 = vperm.xlu0 %6576, %v7031_v22   ;;  %v7361_v22 = vpop.permute.xlu0 %962 }
  0xd7   : > { %v1320_v23 = vpop.permute.xlu1 %1319 }
  0xd8   : > { %v1443_v18 = vmul.f32 0.0, %v1320_v23 }
  0xd9   : > { %1379 = vperm.xlu1 %6577, %v7079_v31   ;;  %1375 = vperm.xlu0 %6576, %v7053_v26   ;;  %v7365_v60 = vpop.permute.xlu0 %972 }
  0xdb   : > { %v1324_v10 = vpop.permute.xlu1 %1323 }
  0xdc   : > { %v1444_v28 = vmul.f32 0.0, %v1324_v10 }
  0xdd   : > { %1387 = vperm.xlu1 %6577, %v7101_v35   ;;  %1383 = vperm.xlu0 %6576, %v7074_v30   ;;  %v1316_v61 = vpop.permute.xlu0 %1315 }
  0xde   : > { %v1442_v7 = vmul.f32 0.0, %v1316_v61 }
  0xdf   : > { %v1332_v2 = vpop.permute.xlu1 %1331 }
  0xe1   : > { %1395 = vperm.xlu1 %6577, %v7119_v37   ;;  %1391 = vperm.xlu0 %6576, %v7096_v34   ;;  %v1328_v63 = vpop.permute.xlu0 %1327 }
  0xe2   : > { %v1445_v10 = vmul.f32 0.0, %v1328_v63 }
  0xe3   : > { %v1340_v56 = vpop.permute.xlu1 %1339 }
  0xe5   : > { %1403 = vperm.xlu1 %6577, %v7139_v41   ;;  %1399 = vperm.xlu0 %6576, %v7114_v36   ;;  %v1336_v29 = vpop.permute.xlu0 %1335 }
  0xe9   : > { %1411 = vperm.xlu1 %6577, %v7157_v43   ;;  %1407 = vperm.xlu0 %6576, %v7134_v40  }
  0xed   : > { %1419 = vperm.xlu1 %6577, %v7177_v47   ;;  %1415 = vperm.xlu0 %6576, %v7152_v42  }
  0xf0   : > { %v6199_v62 = vpop.f32.mrb[0].mxu1  ;;  %v7375_v4 = vpop.f32.mrb[0].mxu0 }
  0xf1   : > { %1427 = vperm.xlu1 %6577, %v7195_v49   ;;  %1423 = vperm.xlu0 %6576, %v7172_v46   ;;  %v802_v0 = vrot.slane %v6199_v62, 4  ;;  %v7373_v1 = vpop.f32.mrb[1].mxu1  ;;  %10127 = vst [vmem:[#allocation5_spill] sm:$0xff] %v7375_v4  ;;  %v7377_v6 = vpop.f32.mrb[1].mxu0 }
  0xf2   : > { %v6200_v3 = vpop.f32.mrb[2].mxu1  ;;  %10128 = vst [vmem:[#allocation6_spill] sm:$0xff] %v7377_v6  ;;  %v10079_v42 = vrot.slane %v7373_v1, 4  ;;  %v7382_v8 = vpop.f32.mrb[2].mxu0 }
  0xf3   : > { %v804_v40 = vrot.slane %v6200_v3, 4  ;;  %v692_v5 = vpop.f32.mrb[3].mxu1  ;;  %10129 = vst [vmem:[#allocation7_spill] sm:$0xff] %v7382_v8  ;;  %v7387_v11 = vpop.f32.mrb[3].mxu0 }
  0xf4   : > { %v800_v46 = vrot.slane %v692_v5, 4  ;;  %10130 = vst [vmem:[#allocation8_spill] sm:$0xff] %v7387_v11 }
  0xf5   : > { %1435 = vperm.xlu1 %6577, %v7215_v53   ;;  %1431 = vperm.xlu0 %6576, %v7190_v48   ;;  %v7385_v9 = vsel %vm798_vm2, %v802_v0, %v804_v40 }
  0xf6   : > { %v7392_v14 = vsel %vm798_vm2, %v10079_v42, %v800_v46  ;;  %v7395_v15 = vsel %vm798_vm2, %v800_v46, %v802_v0  ;;  %v1446_v46 = vmul.f32 0.0, %v1332_v2  ;;  %v1348_v2 = vpop.permute.xlu1 %1347 }
  0xf8   : > { %v6203_v48 = vpop.f32.mrb[4].mxu1  ;;  %v7399_v5 = vpop.f32.mrb[4].mxu0 }
  0xf9   : > { %1439 = vperm.xlu0 %6576, %v7210_v52   ;;  %1506 = vrot.lane.b32.xlu1 %v1442_v7, %s6805_s14  ;;  %v705_v55 = vpop.f32.mrb[5].mxu1  ;;  %v810_v61 = vrot.slane %v6203_v48, 4  ;;  %10131 = vst [vmem:[#allocation9_spill] sm:$0xff] %v7399_v5  ;;  %v7401_v0 = vpop.f32.mrb[5].mxu0 }
  0xfa   : > { %6578 = vset.pattern.permute.xlu1 %v6806_v57  ;;  %v806_v62 = vrot.slane %v705_v55, 4  ;;  %v6204_v3 = vpop.f32.mrb[6].mxu1  ;;  %10132 = vst [vmem:[#allocation10_spill] sm:$0xff] %v7401_v0  ;;  %v7408_v7 = vpop.f32.mrb[6].mxu0 }
  0xfb   : > { %v708_v42 = vpop.f32.mrb[7].mxu1  ;;  %10133 = vst [vmem:[#allocation11_spill] sm:$0xff] %v7408_v7  ;;  %v7410_v48 = vpop.f32.mrb[7].mxu0 }
  0xfc   : > { %v7404_v23 = vsel %vm798_vm2, %v804_v40, %v806_v62  ;;  %v808_v52 = vrot.slane %v708_v42, 4  ;;  %10134 = vst [vmem:[#allocation12_spill] sm:$0xff] %v7410_v48  ;;  %v1447_v40 = vmul.f32 0.0, %v1336_v29  ;;  %v1448_v42 = vmul.f32 0.0, %v1340_v56 }
  0xfd   : > { %1510 = vrot.lane.b32.xlu1 %v1444_v28, %s6805_s14  ;;  %1508 = vrot.lane.b32.xlu0 %v1443_v18, %s6805_s14  ;;  %v1344_v28 = vpop.permute.xlu0 %1343 }
  0xfe   : > { %6579 = vset.pattern.permute.xlu0 %v6806_v57  ;;  %v7413_v55 = vsel %vm798_vm2, %v806_v62, %v808_v52  ;;  %v7416_v3 = vsel %vm798_vm2, %v808_v52, %v810_v61  ;;  %v1449_v61 = vmul.f32 0.0, %v1344_v28  ;;  %v1450_v52 = vmul.f32 0.0, %v1348_v2 }
 0x100   : > { %v6207_v63 = vpop.f32.mrb[8].mxu1  ;;  %v7420_v7 = vpop.f32.mrb[8].mxu0 }
 0x101   : > { %1514 = vrot.lane.b32.xlu1 %v1446_v46, %s6805_s14  ;;  %1512 = vrot.lane.b32.xlu0 %v1445_v10, %s6805_s14  ;;  %v720_v18 = vpop.f32.mrb[9].mxu1  ;;  %10135 = vst [vmem:[#allocation13_spill] sm:$0xff] %v7420_v7  ;;  %v7422_v57 = vpop.f32.mrb[9].mxu0 }
 0x102   : > { %v6208_v48 = vpop.f32.mrb[10].mxu1  ;;  %10136 = vst [vmem:[#allocation14_spill] sm:$0xff] %v7422_v57  ;;  %v7426_v29 = vpop.f32.mrb[10].mxu0 }
 0x103   : > { %v722_v62 = vpop.f32.mrb[11].mxu1  ;;  %10137 = vst [vmem:[#allocation15_spill] sm:$0xff] %v7426_v29  ;;  %v7428_v56 = vpop.f32.mrb[11].mxu0 }
 0x104   : > { %10138 = vst [vmem:[#allocation16_spill] sm:$0xff] %v7428_v56 }
 0x105   : > { %1518 = vrot.lane.b32.xlu1 %v1448_v42, %s6805_s14  ;;  %1516 = vrot.lane.b32.xlu0 %v1447_v40, %s6805_s14 }
 0x108   : > { %v6211_v10 = vpop.f32.mrb[12].mxu1  ;;  %v7434_v63 = vpop.f32.mrb[12].mxu0 }
 0x109   : > { %1522 = vrot.lane.b32.xlu1 %v1450_v52, %s6805_s14  ;;  %1520 = vrot.lane.b32.xlu0 %v1449_v61, %s6805_s14  ;;  %v732_v46 = vpop.f32.mrb[13].mxu1  ;;  %10140 = vst [vmem:[#allocation18_spill] sm:$0xff] %v7434_v63  ;;  %v7436_v18 = vpop.f32.mrb[13].mxu0 }
 0x10a   : > { %10141 = vst [vmem:[#allocation19_spill] sm:$0xff] %v7436_v18  ;;  %v6212_v42 = vpop.f32.mrb[14].mxu1  ;;  %v7438_v28 = vpop.f32.mrb[14].mxu0 }
 0x10b   : > { %v7432_v48 = vpop.permute.xlu0 %1044  ;;  %10142 = vst [vmem:[#allocation20_spill] sm:$0xff] %v7438_v28  ;;  %v734_v40 = vpop.f32.mrb[15].mxu1 }
 0x10c   : > { %10139 = vst [vmem:[#allocation17_spill] sm:$0xff] %v7432_v48  ;;  %v7440_v2 = vpop.f32.mrb[15].mxu0  ;;  %v8134_v48 = vld [vmem:[%s10074_s3 + $0xa0] sm:$0xff] }
 0x10d   : > { %10143 = vst [vmem:[#allocation21_spill] sm:$0xff] %v7440_v2 }
 0x10f   : > { %v7442_v62 = vpop.permute.xlu1 %1046  ;;  %v7444_v29 = vpop.permute.xlu0 %1048 }
 0x110   : > { %10144 = vst [vmem:[#allocation22_spill] sm:$0xff] %v7442_v62  ;;  %10145 = vst [vmem:[#allocation23_spill] sm:$0xff] %v7444_v29  ;;  %v6215_v52 = vpop.f32.mrb[16].mxu1  ;;  %v7450_v56 = vpop.f32.mrb[16].mxu0 }
 0x111   : > { %v744_v61 = vpop.f32.mrb[17].mxu1  ;;  %10148 = vst [vmem:[#allocation26_spill] sm:$0xff] %v7450_v56  ;;  %v7452_v18 = vpop.f32.mrb[17].mxu0 }
 0x112   : > { %v6216_v63 = vpop.f32.mrb[18].mxu1  ;;  %10149 = vst [vmem:[#allocation27_spill] sm:$0xff] %v7452_v18  ;;  %v7454_v28 = vpop.f32.mrb[18].mxu0 }
 0x113   : > { %v7446_v10 = vpop.permute.xlu1 %1050  ;;  %v7448_v46 = vpop.permute.xlu0 %1052  ;;  %10150 = vst [vmem:[#allocation28_spill] sm:$0xff] %v7454_v28 }
 0x114   : > { %10146 = vst [vmem:[#allocation24_spill] sm:$0xff] %v7446_v10  ;;  %10147 = vst [vmem:[#allocation25_spill] sm:$0xff] %v7448_v46  ;;  %v746_v42 = vpop.f32.mrb[19].mxu1  ;;  %v7460_v57 = vpop.f32.mrb[19].mxu0 }
 0x115   : > { %10153 = vst [vmem:[#allocation31_spill] sm:$0xff] %v7460_v57 }
 0x117   : > { %v7456_v40 = vpop.permute.xlu1 %1054  ;;  %v7458_v2 = vpop.permute.xlu0 %1056 }
 0x118   : > { %10151 = vst [vmem:[#allocation29_spill] sm:$0xff] %v7456_v40  ;;  %10152 = vst [vmem:[#allocation30_spill] sm:$0xff] %v7458_v2  ;;  %v6219_v52 = vpop.f32.mrb[20].mxu1  ;;  %v7466_v46 = vpop.f32.mrb[20].mxu0 }
 0x119   : > { %v756_v61 = vpop.f32.mrb[21].mxu1  ;;  %10156 = vst [vmem:[#allocation34_spill] sm:$0xff] %v7466_v46  ;;  %v7468_v56 = vpop.f32.mrb[21].mxu0 }
 0x11a   : > { %v6220_v63 = vpop.f32.mrb[22].mxu1  ;;  %10157 = vst [vmem:[#allocation35_spill] sm:$0xff] %v7468_v56  ;;  %v7470_v18 = vpop.f32.mrb[22].mxu0 }
 0x11b   : > { %v7462_v7 = vpop.permute.xlu1 %1058  ;;  %v7464_v5 = vpop.permute.xlu0 %1060  ;;  %10158 = vst [vmem:[#allocation36_spill] sm:$0xff] %v7470_v18 }
 0x11c   : > { %10154 = vst [vmem:[#allocation32_spill] sm:$0xff] %v7462_v7  ;;  %10155 = vst [vmem:[#allocation33_spill] sm:$0xff] %v7464_v5  ;;  %v758_v42 = vpop.f32.mrb[23].mxu1  ;;  %v7476_v2 = vpop.f32.mrb[23].mxu0 }
 0x11d   : > { %10161 = vst [vmem:[#allocation39_spill] sm:$0xff] %v7476_v2 }
 0x11f   : > { %v7472_v28 = vpop.permute.xlu1 %1062  ;;  %v7474_v40 = vpop.permute.xlu0 %1064 }
 0x120   : > { %10159 = vst [vmem:[#allocation37_spill] sm:$0xff] %v7472_v28  ;;  %10160 = vst [vmem:[#allocation38_spill] sm:$0xff] %v7474_v40  ;;  %v6223_v52 = vpop.f32.mrb[24].mxu1  ;;  %v7482_v5 = vpop.f32.mrb[24].mxu0 }
 0x121   : > { %v768_v61 = vpop.f32.mrb[25].mxu1  ;;  %10164 = vst [vmem:[#allocation42_spill] sm:$0xff] %v7482_v5  ;;  %v7484_v46 = vpop.f32.mrb[25].mxu0 }
 0x122   : > { %v6224_v63 = vpop.f32.mrb[26].mxu1  ;;  %10165 = vst [vmem:[#allocation43_spill] sm:$0xff] %v7484_v46  ;;  %v7486_v56 = vpop.f32.mrb[26].mxu0 }
 0x123   : > { %v7478_v57 = vpop.permute.xlu1 %1066  ;;  %v7480_v7 = vpop.permute.xlu0 %1068  ;;  %10166 = vst [vmem:[#allocation44_spill] sm:$0xff] %v7486_v56 }
 0x124   : > { %10162 = vst [vmem:[#allocation40_spill] sm:$0xff] %v7478_v57  ;;  %10163 = vst [vmem:[#allocation41_spill] sm:$0xff] %v7480_v7  ;;  %v770_v42 = vpop.f32.mrb[27].mxu1  ;;  %v7488_v18 = vpop.f32.mrb[27].mxu0 }
 0x125   : > { %10167 = vst [vmem:[#allocation45_spill] sm:$0xff] %v7488_v18 }
 0x127   : > { %v7490_v28 = vpop.permute.xlu1 %1070  ;;  %v7492_v2 = vpop.permute.xlu0 %1072 }
 0x128   : > { %10168 = vst [vmem:[#allocation46_spill] sm:$0xff] %v7490_v28  ;;  %v6227_v40 = vpop.f32.mrb[28].mxu1  ;;  %10169 = vst [vmem:[#allocation47_spill] sm:$0xff] %v7492_v2  ;;  %v7494_v61 = vpop.f32.mrb[28].mxu0 }
 0x129   : > { %v780_v52 = vpop.f32.mrb[29].mxu1  ;;  %10170 = vst [vmem:[#allocation48_spill] sm:$0xff] %v7494_v61  ;;  %v7496_v7 = vpop.f32.mrb[29].mxu0 }
 0x12a   : > { %v6228_v57 = vpop.f32.mrb[30].mxu1  ;;  %10171 = vst [vmem:[#allocation49_spill] sm:$0xff] %v7496_v7  ;;  %v7498_v63 = vpop.f32.mrb[30].mxu0 }
 0x12b   : > { %v782_v5 = vpop.f32.mrb[31].mxu1  ;;  %10172 = vst [vmem:[#allocation50_spill] sm:$0xff] %v7498_v63  ;;  %v7500_v46 = vpop.permute.xlu1 %1074 }
 0x12c   : > { %10173 = vst [vmem:[#allocation51_spill] sm:$0xff] %v7500_v46  ;;  %v7502_v42 = vpop.permute.xlu0 %1076  ;;  %v7504_v56 = vpop.f32.mrb[31].mxu0  ;;  %v5723_v5 = vld [vmem:[%s10073_s2 + $0x6] sm:$0x3] }
 0x12d   : > { %10174 = vst [vmem:[#allocation52_spill] sm:$0xff] %v7502_v42  ;;  %10175 = vst [vmem:[#allocation53_spill] sm:$0xff] %v7504_v56  ;;  %6519 = vmatprep.subr.msk.bf16.mxu0 %vm454_vm0, %v5723_v5  ;;  %v2141_v7 = vsel %vm454_vm0, %v5723_v5, 0 }
 0x12e   : > { %6298 = vmatpush3.bf16.msra.mxu0 %v2141_v7 }
 0x12f   : > { %v7508_v40 = vpop.permute.xlu1 %1078 }
 0x130   : > { %v7506_v18 = vpop.f32.mrb[32].mxu0  ;;  %10176 = vst [vmem:[#allocation54_spill] sm:$0xff] %v7508_v40  ;;  %v7512_v52 = vpop.permute.xlu0 %1080 }
 0x131   : > { %v7510_v2 = vpop.f32.mrb[33].mxu0  ;;  %10177 = vst [vmem:[#allocation55_spill] sm:$0xff] %v7512_v52  ;;  %6300 = vmatmul.mubr.msk.bf16.vlgmr.msra.gmra.mrb[64].mxu0 %vm405_vm1, %v6960_v12 }
 0x132   : > { %v7514_v57 = vpop.f32.mrb[34].mxu0  ;;  %6303 = vmatprep.mubr.msk.bf16.mxu0 %vm405_vm1, %v6966_v13 }
 0x133   : > { %v7519_v61 = vpop.f32.mrb[35].mxu0  ;;  %v7523_v63 = vpop.permute.xlu1 %1082 }
 0x134   : > { %10178 = vst [vmem:[#allocation56_spill] sm:$0xff] %v7523_v63  ;;  %v7525_v56 = vpop.permute.xlu0 %1084 }
 0x135   : > { %10179 = vst [vmem:[#allocation57_spill] sm:$0xff] %v7525_v56 }
 0x137   : > { %v7539_v5 = vpop.permute.xlu1 %1086 }
 0x138   : > { %v7527_v42 = vpop.f32.mrb[36].mxu0  ;;  %10180 = vst [vmem:[#allocation58_spill] sm:$0xff] %v7539_v5  ;;  %v7541_v7 = vpop.permute.xlu0 %1088 }
 0x139   : > { %v7531_v52 = vpop.f32.mrb[37].mxu0  ;;  %10181 = vst [vmem:[#allocation59_spill] sm:$0xff] %v7541_v7  ;;  %6304 = vmatmul.mubr.msk.bf16.gmra.mrb[68].mxu0 %vm405_vm1, %v6991_v16 }
 0x13a   : > { %v7535_v40 = vpop.f32.mrb[38].mxu0  ;;  %6307 = vmatprep.mubr.msk.bf16.mxu0 %vm405_vm1, %v7006_v19 }
 0x13b   : > { %v7537_v28 = vpop.f32.mrb[39].mxu0  ;;  %v7547_v0 = vpop.permute.xlu1 %1090 }
 0x13c   : > { %10182 = vst [vmem:[#allocation60_spill] sm:$0xff] %v7547_v0  ;;  %v7549_v13 = vpop.permute.xlu0 %1092 }
 0x13d   : > { %10183 = vst [vmem:[#allocation61_spill] sm:$0xff] %v7549_v13 }
 0x140   : > { %v6241_v56 = vpop.f32.mrb[40].mxu0 }
 0x141   : > { %v1243_v12 = vpop.f32.mrb[41].mxu0  ;;  %6308 = vmatmul.mubr.msk.bf16.gmra.mrb[72].mxu0 %vm405_vm1, %v7041_v24 }
 0x142   : > { %v6242_v63 = vpop.f32.mrb[42].mxu0  ;;  %6311 = vmatprep.mubr.msk.bf16.mxu0 %vm405_vm1, %v7044_v25 }
 0x143   : > { %v1245_v46 = vpop.f32.mrb[43].mxu0 }
 0x148   : > { %v6245_v16 = vpop.f32.mrb[44].mxu0 }
 0x149   : > { %v1255_v56 = vpop.f32.mrb[45].mxu0  ;;  %6312 = vmatmul.mubr.msk.bf16.gmra.mrb[76].mxu0 %vm405_vm1, %v7082_v32 }
 0x14a   : > { %v6246_v19 = vpop.f32.mrb[46].mxu0  ;;  %6315 = vmatprep.mubr.msk.bf16.mxu0 %vm405_vm1, %v7087_v33 }
 0x14b   : > { %v1257_v0 = vpop.f32.mrb[47].mxu0 }
 0x14c   : > { %v1356_v8 = vpop.permute.xlu1 %1355  ;;  %v1352_v10 = vpop.permute.xlu0 %1351 }
 0x14d   : > { %v1452_v7 = vmul.f32 0.0, %v1356_v8  ;;  %v1451_v5 = vmul.f32 0.0, %v1352_v10 }
 0x14f   : > { %1526 = vrot.lane.b32.xlu1 %v1452_v7, %s6805_s14  ;;  %1524 = vrot.lane.b32.xlu0 %v1451_v5, %s6805_s14 }
 0x150   : > { %v1364_v46 = vpop.permute.xlu1 %1363  ;;  %v1360_v63 = vpop.permute.xlu0 %1359 }
 0x151   : > { %v1454_v12 = vmul.f32 0.0, %v1364_v46  ;;  %v1453_v13 = vmul.f32 0.0, %v1360_v63  ;;  %v6249_v5 = vpop.f32.mrb[48].mxu0  ;;  %6316 = vmatmul.mubr.msk.bf16.gmra.mrb[80].mxu0 %vm405_vm1, %v7122_v38 }
 0x152   : > { %v1267_v7 = vpop.f32.mrb[49].mxu0  ;;  %6319 = vmatprep.mubr.msk.bf16.mxu0 %vm405_vm1, %v7125_v39 }
 0x153   : > { %1530 = vrot.lane.b32.xlu1 %v1454_v12, %s6805_s14  ;;  %1528 = vrot.lane.b32.xlu0 %v1453_v13, %s6805_s14  ;;  %v6250_v0 = vpop.f32.mrb[50].mxu0 }
 0x154   : > { %v1372_v24 = vpop.permute.xlu1 %1371  ;;  %v1368_v8 = vpop.permute.xlu0 %1367 }
 0x155   : > { %v1456_v25 = vmul.f32 0.0, %v1372_v24  ;;  %v1455_v10 = vmul.f32 0.0, %v1368_v8  ;;  %v1269_v46 = vpop.f32.mrb[51].mxu0 }
 0x157   : > { %1534 = vrot.lane.b32.xlu1 %v1456_v25, %s6805_s14  ;;  %1532 = vrot.lane.b32.xlu0 %v1455_v10, %s6805_s14 }
 0x158   : > { %v1380_v16 = vpop.permute.xlu1 %1379  ;;  %v1376_v56 = vpop.permute.xlu0 %1375 }
 0x159   : > { %v1458_v13 = vmul.f32 0.0, %v1380_v16  ;;  %v1457_v19 = vmul.f32 0.0, %v1376_v56  ;;  %v6253_v24 = vpop.f32.mrb[52].mxu0  ;;  %v10184_v56 = vrot.slane %v7373_v1, 4  ;;  %6320 = vmatmul.mubr.msk.bf16.gmra.mrb[84].mxu0 %vm405_vm1, %v7160_v44 }
 0x15a   : > { %v1279_v8 = vpop.f32.mrb[53].mxu0  ;;  %6323 = vmatprep.mubr.msk.bf16.mxu0 %vm405_vm1, %v7163_v45  ;;  %v1007_v45 = vmul.f32 %v7339_v59, %v7395_v15 }
 0x15b   : > { %1538 = vrot.lane.b32.xlu1 %v1458_v13, %s6805_s14  ;;  %1536 = vrot.lane.b32.xlu0 %v1457_v19, %s6805_s14  ;;  %v6254_v25 = vpop.f32.mrb[54].mxu0  ;;  %v819_v38 = vsel %vm798_vm2, 0.0, %v10184_v56  ;;  %v1008_v13 = vmul.f32 %v7361_v22, %v7385_v9  ;;  %v7610_v8 = vld [vmem:[%s6938_s13] sm:$0xff]  }
 0x15c   : > { %v1388_v32 = vpop.permute.xlu1 %1387  ;;  %v1384_v63 = vpop.permute.xlu0 %1383  ;;  %v1005_v39 = vmul.f32 %v7333_v58, %v819_v38  ;;  %v7661_v25 = vld [vmem:[%s10074_s3 + $0x40] sm:$0xff] }
 0x15d   : > { %v1460_v33 = vmul.f32 0.0, %v1388_v32  ;;  %v1459_v12 = vmul.f32 0.0, %v1384_v63  ;;  %v1281_v16 = vpop.f32.mrb[55].mxu0  ;;  %v1006_v63 = vmul.f32 %v7349_v21, %v7392_v14 }
 0x15e   : > { %v7685_v16 = vld [vmem:[%s10074_s3 + $0x60] sm:$0xff] }
 0x15f   : > { %1542 = vrot.lane.b32.xlu1 %v1460_v33, %s6805_s14  ;;  %1540 = vrot.lane.b32.xlu0 %v1459_v12, %s6805_s14  ;;  %v1009_v12 = vmul.f32 %v7347_v17, %v7404_v23  ;;  %v7619_v17 = vld [vmem:[%s10074_s3] sm:$0xff]  ;;  %v7643_v23 = vld [vmem:[%s10074_s3 + $0x18] sm:$0xff] }
 0x160   : > { %v1396_v10 = vpop.permute.xlu1 %1395  ;;  %v1392_v5 = vpop.permute.xlu0 %1391 }
 0x161   : > { %v1462_v7 = vmul.f32 0.0, %v1396_v10  ;;  %v1461_v0 = vmul.f32 0.0, %v1392_v5  ;;  %v6257_v19 = vpop.f32.mrb[56].mxu0  ;;  %6324 = vmatmul.mubr.msk.bf16.gmra.mrb[88].mxu0 %vm405_vm1, %v7198_v50  ;;  %v1010_v50 = vmul.f32 %v7365_v60, %v7413_v55  ;;  %v7637_v60 = vld [vmem:[%s10074_s3 + $0x20] sm:$0xff]  ;;  %v7649_v55 = vld [vmem:[%s10074_s3 + $0x30] sm:$0xff]  ;;  %v7667_v10 = vld [vmem:[%s10074_s3 + $0x38] sm:$0xff] }
 0x162   : > { %v1291_v1 = vpop.f32.mrb[57].mxu0  ;;  %6327 = vmatprep.mubr.msk.bf16.mxu0 %vm405_vm1, %v7201_v51  ;;  %v1011_v51 = vmul.f32 %v7359_v20, %v7416_v3  ;;  %v7631_v20 = vld [vmem:[%s10074_s3 + $0x10] sm:$0xff]  ;;  %v7655_v3 = vld [vmem:[%s10074_s3 + $0x28] sm:$0xff] }
 0x163   : > { %1546 = vrot.lane.b32.xlu1 %v1462_v7, %s6805_s14  ;;  %1544 = vrot.lane.b32.xlu0 %v1461_v0, %s6805_s14  ;;  %v6258_v32 = vpop.f32.mrb[58].mxu0  ;;  %v7673_v5 = vld [vmem:[%s10074_s3 + $0x50] sm:$0xff]  ;;  %v7679_v0 = vld [vmem:[%s10074_s3 + $0x48] sm:$0xff] }
 0x164   : > { %v1404_v46 = vpop.permute.xlu1 %1403  ;;  %v1293_v33 = vpop.f32.mrb[59].mxu0  ;;  %v7698_v19 = vld [vmem:[%s10074_s3 + $0x68] sm:$0xff] }
 0x165   : > { %v1464_v44 = vmul.f32 0.0, %v1404_v46  ;;  %v1400_v58 = vpop.permute.xlu0 %1399 }
 0x166   : > { %v1463_v22 = vmul.f32 0.0, %v1400_v58 }
 0x167   : > { %1094 = vrot.lane.b32.xlu1 %v1005_v39, %s6805_s14  ;;  %1100 = vrot.lane.b32.xlu0 %v1008_v13, %s6805_s14  ;;  %v7691_v39 = vld [vmem:[%s10074_s3 + $0x58] sm:$0xff] }
 0x168   : > { %v6261_v9 = vpop.f32.mrb[60].mxu0  ;;  %v1412_v7 = vpop.permute.xlu1 %1411 }
 0x169   : > { %v1303_v21 = vpop.f32.mrb[61].mxu0  ;;  %v1408_v59 = vpop.permute.xlu0 %1407  ;;  %6328 = vmatmul.mubr.msk.bf16.gmra.mrb[92].mxu0 %vm405_vm1, %v7226_v54  ;;  %v7625_v54 = vld [vmem:[%s10074_s3 + $0x8] sm:$0xff] }
 0x16a   : > { %v6262_v14 = vpop.f32.mrb[62].mxu0  ;;  %v1465_v15 = vmul.f32 0.0, %v1408_v59  ;;  %6367 = vmatprep.mubr.msk.bf16.mxu0 %vm405_vm1, %v7610_v8 }
 0x16b   : > { %1550 = vrot.lane.b32.xlu1 %v1464_v44, %s6805_s14  ;;  %1096 = vrot.lane.b32.xlu0 %v1006_v63, %s6805_s14  ;;  %v1305_v24 = vpop.f32.mrb[63].mxu0 }
 0x16c   : > { %v1420_v38 = vpop.permute.xlu1 %1419 }
 0x16d   : > { %v1416_v56 = vpop.permute.xlu0 %1415 }
 0x16f   : > { %1098 = vrot.lane.b32.xlu1 %v1007_v45, %s6805_s14  ;;  %1548 = vrot.lane.b32.xlu0 %v1463_v22, %s6805_s14 }
 0x170   : > { %v1428_v46 = vpop.permute.xlu1 %1427 }
 0x171   : > { %v1424_v13 = vpop.permute.xlu0 %1423  ;;  %v1470_v58 = vmul.f32 %v1428_v46, %v7531_v52 }
 0x172   : > { %v1469_v32 = vmul.f32 %v7514_v57, %v1424_v13 }
 0x173   : > { %1102 = vrot.lane.b32.xlu1 %v1009_v12, %s6805_s14  ;;  %1104 = vrot.lane.b32.xlu0 %v1010_v50, %s6805_s14 }
 0x174   : > { %v1436_v63 = vpop.permute.xlu1 %1435 }
 0x175   : > { %v1432_v1 = vpop.permute.xlu0 %1431 }
 0x176   : > { %v1471_v57 = vmul.f32 %v1432_v1, %v7537_v28 }
 0x177   : > { %1106 = vrot.lane.b32.xlu1 %v1011_v51, %s6805_s14  ;;  %1552 = vrot.lane.b32.xlu0 %v1465_v15, %s6805_s14 }
 0x179   : > { %v1440_v44 = vpop.permute.xlu0 %1439 }
 0x17b   : > { %1819 = vperm.xlu1 %6578, %v7619_v17   ;;  %1823 = vperm.xlu0 %6579, %v7625_v54  }
 0x17d   : > { %v7720_v33 = vpop.permute.xlu0 %1508 }
 0x17e   : > { %10187 = vst [vmem:[#allocation64_spill] sm:$0xff] %v7720_v33  ;;  %v8103_v33 = vld [vmem:[%s10074_s3 + $0xa8] sm:$0xff] }
 0x17f   : > { %1827 = vperm.xlu1 %6578, %v7631_v20   ;;  %1835 = vperm.xlu0 %6579, %v7637_v60   ;;  %10228 = vst [vmem:[#allocation104_spill] sm:$0xff] %v8103_v33 }
 0x181   : > { %v7732_v45 = vpop.permute.xlu0 %1512 }
 0x182   : > { %10189 = vst [vmem:[#allocation66_spill] sm:$0xff] %v7732_v45  ;;  %v8097_v45 = vld [vmem:[%s10074_s3 + $0x80] sm:$0xff] }
 0x183   : > { %1831 = vperm.xlu1 %6578, %v7643_v23   ;;  %1843 = vperm.xlu0 %6579, %v7649_v55  }
 0x185   : > { %v7742_v52 = vpop.permute.xlu0 %1516 }
 0x186   : > { %10191 = vst [vmem:[#allocation68_spill] sm:$0xff] %v7742_v52 }
 0x187   : > { %1839 = vperm.xlu1 %6578, %v7655_v3   ;;  %1851 = vperm.xlu0 %6579, %v7661_v25  }
 0x18b   : > { %1847 = vperm.xlu1 %6578, %v7667_v10   ;;  %1859 = vperm.xlu0 %6579, %v7673_v5  }
 0x18f   : > { %1855 = vperm.xlu1 %6578, %v7679_v0   ;;  %1867 = vperm.xlu0 %6579, %v7685_v16  }
 0x193   : > { %1863 = vperm.xlu1 %6578, %v7691_v39   ;;  %1875 = vperm.xlu0 %6579, %v7058_v27   ;;  %v1467_v27 = vmul.f32 %v1416_v56, %v7519_v61 }
 0x197   : > { %1871 = vperm.xlu1 %6578, %v7698_v19   ;;  %1883 = vperm.xlu0 %6579, %v7079_v31   ;;  %v7710_v31 = vpop.permute.xlu1 %1506 }
 0x198   : > { %10185 = vst [vmem:[#allocation62_spill] sm:$0xff] %v7710_v31  ;;  %v8120_v31 = vld [vmem:[%s10074_s3 + $0x90] sm:$0xff] }
 0x19b   : > { %1879 = vperm.xlu1 %6578, %v7053_v26   ;;  %1891 = vperm.xlu0 %6579, %v7101_v35   ;;  %v1468_v26 = vmul.f32 %v7506_v18, %v1420_v38  ;;  %v1473_v35 = vmul.f32 %v7535_v40, %v1440_v44  ;;  %v7718_v61 = vpop.permute.xlu1 %1510  ;;  %v1472_v18 = vmul.f32 %v7527_v42, %v1436_v63  ;;  %v7766_v44 = vpop.permute.xlu0 %1520 }
 0x19c   : > { %10186 = vst [vmem:[#allocation63_spill] sm:$0xff] %v7718_v61  ;;  %10193 = vst [vmem:[#allocation70_spill] sm:$0xff] %v7766_v44 }
 0x19f   : > { %1887 = vperm.xlu1 %6578, %v7074_v30   ;;  %1560 = vrot.lane.b32.xlu0 %v1469_v32, %s6805_s14  ;;  %v1466_v30 = vmul.f32 %v1412_v7, %v7510_v2  ;;  %v7729_v2 = vpop.permute.xlu1 %1514 }
 0x1a0   : > { %10188 = vst [vmem:[#allocation65_spill] sm:$0xff] %v7729_v2 }
 0x1a3   : > { %1895 = vperm.xlu1 %6578, %v7096_v34   ;;  %1556 = vrot.lane.b32.xlu0 %v1467_v27, %s6805_s14  ;;  %v6267_v34 = vpop.f32.mrb[32].mxu1  ;;  %v7737_v24 = vpop.permute.xlu1 %1518 }
 0x1a4   : > { %v7727_v40 = vpop.f32.mrb[33].mxu1  ;;  %v1791_v9 = vrot.slane %v6267_v34, 4  ;;  %10190 = vst [vmem:[#allocation67_spill] sm:$0xff] %v7737_v24 }
 0x1a5   : > { %v6268_v28 = vpop.f32.mrb[34].mxu1  ;;  %v10223_v44 = vrot.slane %v7727_v40, 4 }
 0x1a6   : > { %v1676_v22 = vpop.f32.mrb[35].mxu1  ;;  %v1793_v42 = vrot.slane %v6268_v28, 4  ;;  %v7794_v28 = vld [vmem:[%s10074_s3 + $0xd8] sm:$0xff] }
 0x1a7   : > { %1558 = vrot.lane.b32.xlu1 %v1468_v26, %s6805_s14  ;;  %1568 = vrot.lane.b32.xlu0 %v1473_v35, %s6805_s14  ;;  %v1789_v21 = vrot.slane %v1676_v22, 4  ;;  %v6271_v14 = vpop.f32.mrb[36].mxu1  ;;  %v7764_v27 = vpop.permute.xlu1 %1522  ;;  %v7774_v35 = vld [vmem:[%s10074_s3 + $0xc8] sm:$0xff] }
 0x1a8   : > { %v1689_v12 = vpop.f32.mrb[37].mxu1  ;;  %v7755_v7 = vsel %vm798_vm2, %v1791_v9, %v1793_v42  ;;  %v1799_v38 = vrot.slane %v6271_v14, 4  ;;  %10192 = vst [vmem:[#allocation69_spill] sm:$0xff] %v7764_v27  ;;  %v7805_v14 = vld [vmem:[%s10074_s3 + $0xe8] sm:$0xff] }
 0x1a9   : > { %v1795_v50 = vrot.slane %v1689_v12, 4  ;;  %v7740_v59 = vsel %vm798_vm2, %v1789_v21, %v1791_v9  ;;  %v6272_v51 = vpop.f32.mrb[38].mxu1 }
 0x1aa   : > { %v1692_v56 = vpop.f32.mrb[39].mxu1 }
 0x1ab   : > { %1554 = vrot.lane.b32.xlu1 %v1466_v30, %s6805_s14  ;;  %1564 = vrot.lane.b32.xlu0 %v1471_v57, %s6805_s14  ;;  %v7752_v15 = vsel %vm798_vm2, %v1793_v42, %v1795_v50  ;;  %v1797_v13 = vrot.slane %v1692_v56, 4  ;;  %v6275_v46 = vpop.f32.mrb[40].mxu1 }
 0x1ac   : > { %v1705_v1 = vpop.f32.mrb[41].mxu1  ;;  %v7818_v46 = vld [vmem:[%s10074_s3 + $0xf8] sm:$0xff] }
 0x1ad   : > { %v1803_v32 = vrot.slane %v1705_v1, 4  ;;  %v6276_v63 = vpop.f32.mrb[42].mxu1  ;;  %v7769_v26 = vsel %vm798_vm2, %v1797_v13, %v1799_v38 }
 0x1af   : > { %1566 = vrot.lane.b32.xlu1 %v1472_v18, %s6805_s14  ;;  %1899 = vperm.xlu0 %6579, %v7119_v37   ;;  %v10109_v37 = vrot.slane %v7727_v40, 4 }
 0x1b3   : > { %1562 = vrot.lane.b32.xlu1 %v1470_v58, %s6805_s14  ;;  %1907 = vperm.xlu0 %6579, %v7139_v41   ;;  %v7749_v41 = vsel %vm798_vm2, %v10109_v37, %v1789_v21 }
 0x1b7   : > { %1903 = vperm.xlu1 %6578, %v7114_v36   ;;  %1915 = vperm.xlu0 %6579, %v7157_v43   ;;  %v7760_v36 = vld [vmem:[%s10074_s3 + $0xb8] sm:$0xff]  ;;  %v1801_v43 = vrot.slane %v6272_v51, 4 }
 0x1b9   : > { %v7782_v30 = vsel %vm798_vm2, %v1801_v43, %v1803_v32  ;;  %v7785_v57 = vsel %vm798_vm2, %v1799_v38, %v1801_v43 }
 0x1bb   : > { %1911 = vperm.xlu1 %6578, %v7760_v36   ;;  %1923 = vperm.xlu0 %6579, %v7177_v47   ;;  %v7779_v47 = vsel %vm798_vm2, %v1795_v50, %v1797_v13 }
 0x1bf   : > { %1919 = vperm.xlu1 %6578, %v7774_v35   ;;  %1931 = vperm.xlu0 %6579, %v7195_v49   ;;  %v1708_v49 = vpop.f32.mrb[43].mxu1 }
 0x1c0   : > { %v1805_v58 = vrot.slane %v1708_v49, 4  ;;  %v6279_v22 = vpop.f32.mrb[44].mxu1 }
 0x1c1   : > { %v7787_v34 = vpop.permute.xlu1 %1526  ;;  %v7789_v18 = vpop.permute.xlu0 %1524 }
 0x1c2   : > { %10194 = vst [vmem:[#allocation71_spill] sm:$0xff] %v7787_v34  ;;  %10195 = vst [vmem:[#allocation72_spill] sm:$0xff] %v7789_v18  ;;  %v1719_v42 = vpop.f32.mrb[45].mxu1  ;;  %v7809_v12 = vsel %vm798_vm2, %v1803_v32, %v1805_v58  ;;  %v7907_v18 = vld [vmem:[%s6938_s13 + $0x40] sm:$0xff]   ;;  %v7923_v34 = vld [vmem:[%s6938_s13 + $0x50] sm:$0xff]  }
 0x1c3   : > { %1927 = vperm.xlu1 %6578, %v7794_v28   ;;  %1939 = vperm.xlu0 %6579, %v7215_v53   ;;  %v6280_v50 = vpop.f32.mrb[46].mxu1  ;;  %v6807_v53 = vmov 3  }
 0x1c4   : > { %v1721_v51 = vpop.f32.mrb[47].mxu1 }
 0x1c5   : > { %v7798_v9 = vpop.permute.xlu1 %1530  ;;  %v7800_v21 = vpop.permute.xlu0 %1528 }
 0x1c6   : > { %10196 = vst [vmem:[#allocation73_spill] sm:$0xff] %v7798_v9  ;;  %10197 = vst [vmem:[#allocation74_spill] sm:$0xff] %v7800_v21  ;;  %v6283_v13 = vpop.f32.mrb[48].mxu1 }
 0x1c7   : > { %1935 = vperm.xlu1 %6578, %v7805_v14   ;;  %6580 = vset.pattern.permute.xlu0 %v6807_v53  ;;  %v1731_v43 = vpop.f32.mrb[49].mxu1 }
 0x1c8   : > { %v6284_v1 = vpop.f32.mrb[50].mxu1 }
 0x1c9   : > { %v7811_v56 = vpop.permute.xlu1 %1534  ;;  %v7813_v38 = vpop.permute.xlu0 %1532 }
 0x1ca   : > { %10198 = vst [vmem:[#allocation75_spill] sm:$0xff] %v7811_v56  ;;  %10199 = vst [vmem:[#allocation76_spill] sm:$0xff] %v7813_v38  ;;  %v1733_v49 = vpop.f32.mrb[51].mxu1 }
 0x1cb   : > { %1943 = vperm.xlu1 %6578, %v7818_v46   ;;  %v6287_v58 = vpop.f32.mrb[52].mxu1 }
 0x1cc   : > { %v1743_v22 = vpop.f32.mrb[53].mxu1 }
 0x1cd   : > { %v7821_v32 = vpop.permute.xlu1 %1538  ;;  %v7823_v63 = vpop.permute.xlu0 %1536 }
 0x1ce   : > { %10200 = vst [vmem:[#allocation77_spill] sm:$0xff] %v7821_v32  ;;  %10201 = vst [vmem:[#allocation78_spill] sm:$0xff] %v7823_v63  ;;  %v6288_v51 = vpop.f32.mrb[54].mxu1 }
 0x1cf   : > { %6581 = vset.pattern.permute.xlu1 %v6807_v53  ;;  %v1745_v13 = vpop.f32.mrb[55].mxu1 }
 0x1d0   : > { %v6291_v37 = vpop.f32.mrb[56].mxu1 }
 0x1d1   : > { %v7825_v42 = vpop.permute.xlu1 %1542  ;;  %v7827_v50 = vpop.permute.xlu0 %1540 }
 0x1d2   : > { %10202 = vst [vmem:[#allocation79_spill] sm:$0xff] %v7825_v42  ;;  %10203 = vst [vmem:[#allocation80_spill] sm:$0xff] %v7827_v50  ;;  %v1755_v56 = vpop.f32.mrb[57].mxu1  ;;  %v7893_v50 = vld [vmem:[%s6938_s13 + $0x30] sm:$0xff]  }
 0x1d3   : > { %v6292_v43 = vpop.f32.mrb[58].mxu1 }
 0x1d4   : > { %v1757_v32 = vpop.f32.mrb[59].mxu1  ;;  %v5740_v43 = vld [vmem:[%s10073_s2 + $0x8] sm:$0x3] }
 0x1d5   : > { %v7829_v9 = vpop.permute.xlu1 %1546  ;;  %v7831_v1 = vpop.permute.xlu0 %1544  ;;  %6520 = vmatprep.subr.msk.bf16.mxu1 %vm454_vm0, %v5740_v43 }
 0x1d6   : > { %10204 = vst [vmem:[#allocation81_spill] sm:$0xff] %v7829_v9  ;;  %10205 = vst [vmem:[#allocation82_spill] sm:$0xff] %v7831_v1  ;;  %v6295_v38 = vpop.f32.mrb[60].mxu1  ;;  %v7874_v9 = vld [vmem:[%s6938_s13 + $0x18] sm:$0xff]  }
 0x1d7   : > { %v1767_v63 = vpop.f32.mrb[61].mxu1 }
 0x1d8   : > { %v6296_v49 = vpop.f32.mrb[62].mxu1 }
 0x1d9   : > { %v7833_v53 = vpop.permute.xlu1 %1094  ;;  %v7835_v58 = vpop.permute.xlu0 %1100  ;;  %v2750_v49 = vsel %vm454_vm0, %v5740_v43, 0  ;;  %v7866_v43 = vld [vmem:[%s6938_s13 + $0x10] sm:$0xff]  }
 0x1da   : > { %10206 = vst [vmem:[#allocation83_spill] sm:$0xff] %v7833_v53  ;;  %10207 = vst [vmem:[#allocation84_spill] sm:$0xff] %v7835_v58  ;;  %v1769_v22 = vpop.f32.mrb[63].mxu1  ;;  %6332 = vmatpush3.bf16.msra.mxu1 %v2750_v49 }
 0x1dd   : > { %v7837_v42 = vpop.permute.xlu1 %1550  ;;  %v7839_v51 = vpop.permute.xlu0 %1096 }
 0x1de   : > { %10208 = vst [vmem:[#allocation85_spill] sm:$0xff] %v7837_v42  ;;  %10209 = vst [vmem:[#allocation86_spill] sm:$0xff] %v7839_v51 }
 0x1e1   : > { %v7841_v37 = vpop.permute.xlu1 %1098  ;;  %v7843_v56 = vpop.permute.xlu0 %1548 }
 0x1e2   : > { %10210 = vst [vmem:[#allocation87_spill] sm:$0xff] %v7841_v37  ;;  %10211 = vst [vmem:[#allocation88_spill] sm:$0xff] %v7843_v56  ;;  %v7861_v37 = vld [vmem:[%s6938_s13 + $0x8] sm:$0xff]  }
 0x1e3   : > { %6334 = vmatmul.mubr.msk.bf16.vlgmr.msra.gmra.mrb[64].mxu1 %vm405_vm1, %v7861_v37  ;;  %v7888_v56 = vld [vmem:[%s6938_s13 + $0x28] sm:$0xff]  }
 0x1e4   : > { %6337 = vmatprep.mubr.msk.bf16.mxu1 %vm405_vm1, %v7866_v43 }
 0x1e5   : > { %v7845_v13 = vpop.permute.xlu1 %1102  ;;  %v7847_v32 = vpop.permute.xlu0 %1104 }
 0x1e6   : > { %10212 = vst [vmem:[#allocation89_spill] sm:$0xff] %v7845_v13  ;;  %10213 = vst [vmem:[#allocation90_spill] sm:$0xff] %v7847_v32 }
 0x1e9   : > { %v7849_v38 = vpop.permute.xlu1 %1106  ;;  %v7851_v63 = vpop.permute.xlu0 %1552 }
 0x1ea   : > { %10214 = vst [vmem:[#allocation91_spill] sm:$0xff] %v7849_v38  ;;  %10215 = vst [vmem:[#allocation92_spill] sm:$0xff] %v7851_v63 }
 0x1eb   : > { %6338 = vmatmul.mubr.msk.bf16.gmra.mrb[68].mxu1 %vm405_vm1, %v7874_v9 }
 0x1fa   : > { %v1820_v22 = vpop.permute.xlu1 %1819  ;;  %v1824_v58 = vpop.permute.xlu0 %1823 }
 0x1fb   : > { %v1946_v13 = vmul.f32 0.0, %v1820_v22  ;;  %v1947_v51 = vmul.f32 0.0, %v1824_v58 }
 0x1fd   : > { %2012 = vrot.lane.b32.xlu1 %v1947_v51, %s6805_s14  ;;  %2010 = vrot.lane.b32.xlu0 %v1946_v13, %s6805_s14 }
 0x1fe   : > { %v1828_v32 = vpop.permute.xlu1 %1827  ;;  %v1836_v38 = vpop.permute.xlu0 %1835 }
 0x1ff   : > { %v1948_v53 = vmul.f32 0.0, %v1828_v32  ;;  %v1950_v58 = vmul.f32 0.0, %v1836_v38  ;;  %v7879_v38 = vld [vmem:[%s6938_s13 + $0x20] sm:$0xff]  }
 0x200   : > { %6341 = vmatprep.mubr.msk.bf16.mxu1 %vm405_vm1, %v7879_v38 }
 0x201   : > { %2014 = vrot.lane.b32.xlu0 %v1948_v53, %s6805_s14  ;;  %6342 = vmatmul.mubr.msk.bf16.gmra.mrb[72].mxu1 %vm405_vm1, %v7888_v56 }
 0x202   : > { %v1832_v51 = vpop.permute.xlu1 %1831  ;;  %v1844_v13 = vpop.permute.xlu0 %1843  ;;  %6345 = vmatprep.mubr.msk.bf16.mxu1 %vm405_vm1, %v7893_v50 }
 0x203   : > { %v1949_v49 = vmul.f32 0.0, %v1832_v51  ;;  %v1952_v32 = vmul.f32 0.0, %v1844_v13 }
 0x205   : > { %2016 = vrot.lane.b32.xlu1 %v1949_v49, %s6805_s14  ;;  %2018 = vrot.lane.b32.xlu0 %v1950_v58, %s6805_s14 }
 0x206   : > { %v1840_v22 = vpop.permute.xlu1 %1839  ;;  %v1852_v42 = vpop.permute.xlu0 %1851 }
 0x207   : > { %v1951_v63 = vmul.f32 0.0, %v1840_v22  ;;  %v1954_v51 = vmul.f32 0.0, %v1852_v42 }
 0x209   : > { %2020 = vrot.lane.b32.xlu1 %v1951_v63, %s6805_s14  ;;  %2022 = vrot.lane.b32.xlu0 %v1952_v32, %s6805_s14 }
 0x20a   : > { %v1848_v53 = vpop.permute.xlu1 %1847  ;;  %v1860_v58 = vpop.permute.xlu0 %1859 }
 0x20b   : > { %v1953_v49 = vmul.f32 0.0, %v1848_v53  ;;  %v1956_v1 = vmul.f32 0.0, %v1860_v58 }
 0x20d   : > { %2024 = vrot.lane.b32.xlu1 %v1953_v49, %s6805_s14  ;;  %2026 = vrot.lane.b32.xlu0 %v1954_v51, %s6805_s14 }
 0x20e   : > { %v1856_v13 = vpop.permute.xlu1 %1855  ;;  %v1868_v22 = vpop.permute.xlu0 %1867 }
 0x20f   : > { %v1955_v63 = vmul.f32 0.0, %v1856_v13  ;;  %v1958_v53 = vmul.f32 0.0, %v1868_v22  ;;  %v7902_v13 = vld [vmem:[%s6938_s13 + $0x38] sm:$0xff]  }
 0x210   : > { %6346 = vmatmul.mubr.msk.bf16.gmra.mrb[76].mxu1 %vm405_vm1, %v7902_v13 }
 0x211   : > { %2028 = vrot.lane.b32.xlu1 %v1955_v63, %s6805_s14  ;;  %2030 = vrot.lane.b32.xlu0 %v1956_v1, %s6805_s14 }
 0x212   : > { %v1864_v42 = vpop.permute.xlu1 %1863  ;;  %v1876_v32 = vpop.permute.xlu0 %1875  ;;  %6349 = vmatprep.mubr.msk.bf16.mxu1 %vm405_vm1, %v7907_v18 }
 0x213   : > { %v1957_v51 = vmul.f32 0.0, %v1864_v42  ;;  %v1960_v21 = vmul.f32 0.0, %v1876_v32 }
 0x215   : > { %2032 = vrot.lane.b32.xlu1 %v1957_v51, %s6805_s14  ;;  %2034 = vrot.lane.b32.xlu0 %v1958_v53, %s6805_s14 }
 0x216   : > { %v1872_v58 = vpop.permute.xlu1 %1871  ;;  %v1884_v49 = vpop.permute.xlu0 %1883 }
 0x217   : > { %v1959_v63 = vmul.f32 0.0, %v1872_v58  ;;  %v1962_v42 = vmul.f32 0.0, %v1884_v49  ;;  %v7918_v58 = vld [vmem:[%s6938_s13 + $0x48] sm:$0xff]  }
 0x218   : > { %6350 = vmatmul.mubr.msk.bf16.gmra.mrb[80].mxu1 %vm405_vm1, %v7918_v58 }
 0x219   : > { %2036 = vrot.lane.b32.xlu1 %v1959_v63, %s6805_s14  ;;  %2038 = vrot.lane.b32.xlu0 %v1960_v21, %s6805_s14 }
 0x21a   : > { %v1880_v1 = vpop.permute.xlu1 %1879  ;;  %v1892_v22 = vpop.permute.xlu0 %1891  ;;  %6353 = vmatprep.mubr.msk.bf16.mxu1 %vm405_vm1, %v7923_v34 }
 0x21b   : > { %v1961_v53 = vmul.f32 0.0, %v1880_v1  ;;  %v1964_v63 = vmul.f32 0.0, %v1892_v22 }
 0x21d   : > { %2040 = vrot.lane.b32.xlu1 %v1961_v53, %s6805_s14  ;;  %2042 = vrot.lane.b32.xlu0 %v1962_v42, %s6805_s14 }
 0x21e   : > { %v1888_v32 = vpop.permute.xlu1 %1887  ;;  %v7915_v51 = vpop.permute.xlu0 %1560 }
 0x21f   : > { %10216 = vst [vmem:[#allocation93_spill] sm:$0xff] %v7915_v51  ;;  %v1963_v21 = vmul.f32 0.0, %v1888_v32  ;;  %v7937_v32 = vld [vmem:[%s6938_s13 + $0x58] sm:$0xff]  }
 0x220   : > { %6354 = vmatmul.mubr.msk.bf16.gmra.mrb[84].mxu1 %vm405_vm1, %v7937_v32 }
 0x221   : > { %2044 = vrot.lane.b32.xlu1 %v1963_v21, %s6805_s14  ;;  %2046 = vrot.lane.b32.xlu0 %v1964_v63, %s6805_s14  ;;  %v7942_v21 = vld [vmem:[%s6938_s13 + $0x60] sm:$0xff]  }
 0x222   : > { %v1896_v49 = vpop.permute.xlu1 %1895  ;;  %v7929_v1 = vpop.permute.xlu0 %1556  ;;  %6357 = vmatprep.mubr.msk.bf16.mxu1 %vm405_vm1, %v7942_v21 }
 0x223   : > { %10217 = vst [vmem:[#allocation94_spill] sm:$0xff] %v7929_v1  ;;  %v1965_v42 = vmul.f32 0.0, %v1896_v49  ;;  %v7958_v1 = vld [vmem:[%s6938_s13 + $0x70] sm:$0xff]  }
 0x225   : > { %2048 = vrot.lane.b32.xlu1 %v1965_v42, %s6805_s14 }
 0x226   : > { %v7932_v53 = vpop.permute.xlu1 %1558  ;;  %v7934_v22 = vpop.permute.xlu0 %1568 }
 0x227   : > { %10218 = vst [vmem:[#allocation95_spill] sm:$0xff] %v7932_v53  ;;  %10219 = vst [vmem:[#allocation96_spill] sm:$0xff] %v7934_v22  ;;  %v7953_v53 = vld [vmem:[%s6938_s13 + $0x68] sm:$0xff]  }
 0x228   : > { %6358 = vmatmul.mubr.msk.bf16.gmra.mrb[88].mxu1 %vm405_vm1, %v7953_v53 }
 0x229   : > { %6361 = vmatprep.mubr.msk.bf16.mxu1 %vm405_vm1, %v7958_v1 }
 0x22a   : > { %v7946_v63 = vpop.permute.xlu1 %1554  ;;  %v7948_v51 = vpop.permute.xlu0 %1564 }
 0x22b   : > { %10220 = vst [vmem:[#allocation97_spill] sm:$0xff] %v7946_v63  ;;  %10221 = vst [vmem:[#allocation98_spill] sm:$0xff] %v7948_v51  ;;  %v1817_v63 = vsel %vm798_vm2, 0.0, %v10223_v44 }
 0x22e   : > { %v7950_v49 = vpop.permute.xlu1 %1566  ;;  %v1900_v42 = vpop.permute.xlu0 %1899 }
 0x22f   : > { %10222 = vst [vmem:[#allocation99_spill] sm:$0xff] %v7950_v49  ;;  %v1966_v22 = vmul.f32 0.0, %v1900_v42  ;;  %v7970_v42 = vld [vmem:[%s6938_s13 + $0x78] sm:$0xff]  }
 0x230   : > { %6362 = vmatmul.mubr.msk.bf16.gmra.mrb[92].mxu1 %vm405_vm1, %v7970_v42 }
 0x231   : > { %2050 = vrot.lane.b32.xlu0 %v1966_v22, %s6805_s14  ;;  %6401 = vmatprep.mubr.msk.bf16.mxu1 %vm405_vm1, %v7610_v8 }
 0x232   : > { %v7966_v51 = vpop.permute.xlu1 %1562  ;;  %v1908_v49 = vpop.permute.xlu0 %1907 }
 0x233   : > { %10224 = vst [vmem:[#allocation100_spill] sm:$0xff] %v7966_v51  ;;  %v1968_v27 = vmul.f32 %v1908_v49, %v1817_v63 }
 0x235   : > { %2054 = vrot.lane.b32.xlu0 %v1968_v27, %s6805_s14 }
 0x236   : > { %v1904_v52 = vpop.permute.xlu1 %1903  ;;  %v1916_v24 = vpop.permute.xlu0 %1915 }
 0x237   : > { %v1967_v2 = vmul.f32 0.0, %v1904_v52  ;;  %v1970_v40 = vmul.f32 %v1916_v24, %v7740_v59 }
 0x239   : > { %2052 = vrot.lane.b32.xlu1 %v1967_v2, %s6805_s14  ;;  %2058 = vrot.lane.b32.xlu0 %v1970_v40, %s6805_s14 }
 0x23a   : > { %v1912_v44 = vpop.permute.xlu1 %1911  ;;  %v1924_v22 = vpop.permute.xlu0 %1923 }
 0x23b   : > { %v1969_v27 = vmul.f32 %v1912_v44, %v7749_v41  ;;  %v1972_v63 = vmul.f32 %v1924_v22, %v7752_v15 }
 0x23d   : > { %2056 = vrot.lane.b32.xlu1 %v1969_v27, %s6805_s14  ;;  %2062 = vrot.lane.b32.xlu0 %v1972_v63, %s6805_s14 }
 0x23e   : > { %v1920_v52 = vpop.permute.xlu1 %1919  ;;  %v1932_v49 = vpop.permute.xlu0 %1931 }
 0x23f   : > { %v1971_v24 = vmul.f32 %v1920_v52, %v7755_v7  ;;  %v1974_v59 = vmul.f32 %v1932_v49, %v7769_v26  ;;  %v6301_v7 = vpop.f32.mrb[64].mxu0 }
 0x240   : > { %v7994_v26 = vpop.f32.mrb[65].mxu0  ;;  %v2337_v63 = vrot.slane %v6301_v7, 4 }
 0x241   : > { %2060 = vrot.lane.b32.xlu1 %v1971_v24, %s6805_s14  ;;  %2066 = vrot.lane.b32.xlu0 %v1974_v59, %s6805_s14  ;;  %v6302_v52 = vpop.f32.mrb[66].mxu0 }
 0x242   : > { %v1928_v2 = vpop.permute.xlu1 %1927  ;;  %v1940_v40 = vpop.permute.xlu0 %1939  ;;  %v2339_v49 = vrot.slane %v6302_v52, 4 }
 0x243   : > { %v1973_v41 = vmul.f32 %v1928_v2, %v7779_v47  ;;  %v1976_v15 = vmul.f32 %v1940_v40, %v7782_v30  ;;  %v2180_v30 = vpop.f32.mrb[67].mxu0 }
 0x244   : > { %v2335_v24 = vrot.slane %v2180_v30, 4  ;;  %v6305_v59 = vpop.f32.mrb[68].mxu0 }
 0x245   : > { %2064 = vrot.lane.b32.xlu1 %v1973_v41, %s6805_s14  ;;  %2070 = vrot.lane.b32.xlu0 %v1976_v15, %s6805_s14  ;;  %v2193_v2 = vpop.f32.mrb[69].mxu0  ;;  %v2345_v41 = vrot.slane %v6305_v59, 4 }
 0x246   : > { %v1936_v44 = vpop.permute.xlu1 %1935  ;;  %v2341_v40 = vrot.slane %v2193_v2, 4 }
 0x247   : > { %v1975_v22 = vmul.f32 %v1936_v44, %v7785_v57  ;;  %v10110_v57 = vrot.slane %v7994_v26, 4 }
 0x248   : > { %v8004_v15 = vsel %vm798_vm2, %v2339_v49, %v2341_v40 }
 0x249   : > { %2068 = vrot.lane.b32.xlu1 %v1975_v22, %s6805_s14  ;;  %2428 = vperm.xlu0 %6580, %v7619_v17   ;;  %v8001_v17 = vsel %vm798_vm2, %v2335_v24, %v2337_v63  ;;  %v8014_v22 = vsel %vm798_vm2, %v2337_v63, %v2339_v49 }
 0x24a   : > { %v1944_v27 = vpop.permute.xlu1 %1943 }
 0x24b   : > { %v1977_v47 = vmul.f32 %v1944_v27, %v7809_v12  ;;  %v6306_v12 = vpop.f32.mrb[70].mxu0 }
 0x24c   : > { %v2196_v44 = vpop.f32.mrb[71].mxu0  ;;  %v2347_v27 = vrot.slane %v6306_v12, 4 }
 0x24d   : > { %2072 = vrot.lane.b32.xlu1 %v1977_v47, %s6805_s14  ;;  %2440 = vperm.xlu0 %6580, %v7643_v23   ;;  %v8011_v23 = vsel %vm798_vm2, %v10110_v57, %v2335_v24  ;;  %v2343_v7 = vrot.slane %v2196_v44, 4  ;;  %v6309_v47 = vpop.f32.mrb[72].mxu0  ;;  %v8080_v57 = vld [vmem:[%s10074_s3 + $0x70] sm:$0xff] }
 0x24e   : > { %v2353_v30 = vrot.slane %v6309_v47, 4  ;;  %v8030_v2 = vsel %vm798_vm2, %v2345_v41, %v2347_v27 }
 0x24f   : > { %v8017_v52 = vsel %vm798_vm2, %v2343_v7, %v2345_v41  ;;  %v8027_v49 = vsel %vm798_vm2, %v2341_v40, %v2343_v7 }
 0x251   : > { %2432 = vperm.xlu1 %6581, %v7625_v54   ;;  %2448 = vperm.xlu0 %6580, %v7655_v3   ;;  %v2209_v54 = vpop.f32.mrb[73].mxu0 }
 0x252   : > { %v2349_v3 = vrot.slane %v2209_v54, 4  ;;  %v6310_v24 = vpop.f32.mrb[74].mxu0 }
 0x253   : > { %v2212_v63 = vpop.f32.mrb[75].mxu0 }
 0x254   : > { %v8022_v59 = vsel %vm798_vm2, %v2347_v27, %v2349_v3  ;;  %v6313_v44 = vpop.f32.mrb[76].mxu0 }
 0x255   : > { %2436 = vperm.xlu1 %6581, %v7631_v20   ;;  %2456 = vperm.xlu0 %6580, %v7667_v10   ;;  %v2351_v20 = vrot.slane %v2212_v63, 4  ;;  %v2355_v10 = vrot.slane %v6310_v24, 4 }
 0x257   : > { %v8033_v12 = vsel %vm798_vm2, %v2351_v20, %v2353_v30  ;;  %v8043_v7 = vsel %vm798_vm2, %v2349_v3, %v2351_v20  ;;  %v8046_v27 = vsel %vm798_vm2, %v2353_v30, %v2355_v10 }
 0x259   : > { %2444 = vperm.xlu1 %6581, %v7637_v60   ;;  %2464 = vperm.xlu0 %6580, %v7679_v0   ;;  %v2225_v60 = vpop.f32.mrb[77].mxu0  ;;  %v2361_v0 = vrot.slane %v6313_v44, 4 }
 0x25a   : > { %v2357_v47 = vrot.slane %v2225_v60, 4  ;;  %v6314_v40 = vpop.f32.mrb[78].mxu0 }
 0x25b   : > { %v2228_v41 = vpop.f32.mrb[79].mxu0 }
 0x25c   : > { %v8038_v54 = vsel %vm798_vm2, %v2355_v10, %v2357_v47  ;;  %v6317_v63 = vpop.f32.mrb[80].mxu0 }
 0x25d   : > { %2452 = vperm.xlu1 %6581, %v7649_v55   ;;  %2472 = vperm.xlu0 %6580, %v7691_v39   ;;  %v2359_v55 = vrot.slane %v2228_v41, 4  ;;  %v2363_v39 = vrot.slane %v6314_v40, 4  ;;  %v2369_v20 = vrot.slane %v6317_v63, 4 }
 0x25f   : > { %v8049_v24 = vsel %vm798_vm2, %v2359_v55, %v2361_v0  ;;  %v8069_v60 = vsel %vm798_vm2, %v2357_v47, %v2359_v55  ;;  %v8072_v40 = vsel %vm798_vm2, %v2361_v0, %v2363_v39  ;;  %v8086_v47 = vld [vmem:[%s10074_s3 + $0x98] sm:$0xff] }
 0x260   : > { %10226 = vst [vmem:[#allocation102_spill] sm:$0xff] %v8086_v47 }
 0x261   : > { %2460 = vperm.xlu1 %6581, %v7661_v25   ;;  %2480 = vperm.xlu0 %6580, %v7698_v19   ;;  %v8055_v25 = vld [vmem:[%s10074_s3 + $0x78] sm:$0xff]  ;;  %v2241_v19 = vpop.f32.mrb[81].mxu0 }
 0x262   : > { %v2365_v3 = vrot.slane %v2241_v19, 4  ;;  %v6318_v10 = vpop.f32.mrb[82].mxu0 }
 0x263   : > { %v2244_v44 = vpop.f32.mrb[83].mxu0  ;;  %v2371_v63 = vrot.slane %v6318_v10, 4 }
 0x264   : > { %v8059_v30 = vsel %vm798_vm2, %v2363_v39, %v2365_v3  ;;  %v2367_v41 = vrot.slane %v2244_v44, 4 }
 0x265   : > { %2468 = vperm.xlu1 %6581, %v7673_v5   ;;  %2488 = vperm.xlu0 %6580, %v8055_v25   ;;  %v8065_v5 = vld [vmem:[%s10074_s3 + $0x88] sm:$0xff]  ;;  %v8110_v62 = vsel %vm798_vm2, %v2369_v20, %v2371_v63 }
 0x266   : > { %10225 = vst [vmem:[#allocation101_spill] sm:$0xff] %v8065_v5  ;;  %v8075_v19 = vsel %vm798_vm2, %v2367_v41, %v2369_v20 }
 0x269   : > { %2476 = vperm.xlu1 %6581, %v7685_v16   ;;  %2496 = vperm.xlu0 %6580, %v8065_v5   ;;  %v6321_v16 = vpop.f32.mrb[84].mxu0  ;;  %v8152_v5 = vld [vmem:[%s10074_s3 + $0xb0] sm:$0xff] }
 0x26a   : > { %v2257_v0 = vpop.f32.mrb[85].mxu0  ;;  %v2377_v10 = vrot.slane %v6321_v16, 4  ;;  %v8107_v16 = vsel %vm798_vm2, %v2365_v3, %v2367_v41  ;;  %10233 = vst [vmem:[#allocation109_spill] sm:$0xff] %v8152_v5 }
 0x26b   : > { %v2373_v55 = vrot.slane %v2257_v0, 4  ;;  %v6322_v51 = vpop.f32.mrb[86].mxu0 }
 0x26c   : > { %v2260_v0 = vpop.f32.mrb[87].mxu0 }
 0x26d   : > { %2484 = vperm.xlu1 %6581, %v8080_v57   ;;  %2504 = vperm.xlu0 %6580, %v8086_v47   ;;  %v8092_v44 = vsel %vm798_vm2, %v2371_v63, %v2373_v55  ;;  %v2375_v11 = vrot.slane %v2260_v0, 4  ;;  %v6325_v29 = vpop.f32.mrb[88].mxu0 }
 0x26e   : > { %v2273_v3 = vpop.f32.mrb[89].mxu0 }
 0x26f   : > { %v8089_v39 = vpop.permute.xlu0 %2010  ;;  %v8115_v4 = vsel %vm798_vm2, %v2375_v11, %v2377_v10  ;;  %v8124_v20 = vpop.permute.xlu1 %2012  ;;  %v2381_v41 = vrot.slane %v2273_v3, 4 }
 0x270   : > { %10227 = vst [vmem:[#allocation103_spill] sm:$0xff] %v8089_v39  ;;  %v2379_v39 = vrot.slane %v6322_v51, 4  ;;  %10230 = vst [vmem:[#allocation106_spill] sm:$0xff] %v8124_v20  ;;  %v2385_v51 = vrot.slane %v6325_v29, 4  ;;  %v8139_v20 = vsel %vm798_vm2, %v2373_v55, %v2375_v11 }
 0x271   : > { %2492 = vperm.xlu1 %6581, %v8097_v45   ;;  %2512 = vperm.xlu0 %6580, %v8103_v33  }
 0x272   : > { %v8129_v0 = vsel %vm798_vm2, %v2379_v39, %v2381_v41  ;;  %v8142_v3 = vsel %vm798_vm2, %v2377_v10, %v2379_v39 }
 0x273   : > { %v8112_v61 = vpop.permute.xlu0 %2014 }
 0x274   : > { %10229 = vst [vmem:[#allocation105_spill] sm:$0xff] %v8112_v61  ;;  %v6326_v61 = vpop.f32.mrb[90].mxu0 }
 0x275   : > { %2500 = vperm.xlu1 %6581, %v8120_v31   ;;  %2520 = vperm.xlu0 %6580, %v7760_v36   ;;  %v2276_v36 = vpop.f32.mrb[91].mxu0  ;;  %v2387_v6 = vrot.slane %v6326_v61, 4 }
 0x276   : > { %v6329_v47 = vpop.f32.mrb[92].mxu0 }
 0x277   : > { %v8126_v63 = vpop.permute.xlu0 %2018  ;;  %v8144_v29 = vpop.permute.xlu1 %2016  ;;  %v2393_v61 = vrot.slane %v6329_v47, 4 }
 0x278   : > { %10231 = vst [vmem:[#allocation107_spill] sm:$0xff] %v8126_v63  ;;  %10232 = vst [vmem:[#allocation108_spill] sm:$0xff] %v8144_v29  ;;  %v2383_v63 = vrot.slane %v2276_v36, 4  ;;  %v2289_v11 = vpop.f32.mrb[93].mxu0  ;;  %v8166_v29 = vld [vmem:[%s10074_s3 + $0xc0] sm:$0xff] }
 0x279   : > { %2508 = vperm.xlu1 %6581, %v8134_v48   ;;  %2528 = vperm.xlu0 %6580, %v7774_v35   ;;  %v2389_v55 = vrot.slane %v2289_v11, 4  ;;  %v6330_v39 = vpop.f32.mrb[94].mxu0  ;;  %v8174_v11 = vsel %vm798_vm2, %v2385_v51, %v2387_v6 }
 0x27a   : > { %v8147_v33 = vsel %vm798_vm2, %v2383_v63, %v2385_v51 }
 0x27b   : > { %v8156_v35 = vpop.permute.xlu0 %2022  ;;  %v8158_v10 = vpop.permute.xlu1 %2020  ;;  %v8161_v36 = vsel %vm798_vm2, %v2387_v6, %v2389_v55  ;;  %v8193_v6 = vld [vmem:[%s10074_s3 + $0xe0] sm:$0xff] }
 0x27c   : > { %10234 = vst [vmem:[#allocation110_spill] sm:$0xff] %v8156_v35  ;;  %10235 = vst [vmem:[#allocation111_spill] sm:$0xff] %v8158_v10  ;;  %v8171_v35 = vsel %vm798_vm2, %v2381_v41, %v2383_v63 }
 0x27d   : > { %2516 = vperm.xlu1 %6581, %v8152_v5   ;;  %2536 = vperm.xlu0 %6580, %v7794_v28   ;;  %v2292_v28 = vpop.f32.mrb[95].mxu0  ;;  %v8184_v5 = vld [vmem:[%s10074_s3 + $0xd0] sm:$0xff] }
 0x27e   : > { %v2391_v47 = vrot.slane %v2292_v28, 4 }
 0x27f   : > { %v8176_v39 = vpop.permute.xlu0 %2026 }
 0x280   : > { %10236 = vst [vmem:[#allocation112_spill] sm:$0xff] %v8176_v39  ;;  %v8179_v10 = vsel %vm798_vm2, %v2391_v47, %v2393_v61  ;;  %v8197_v41 = vsel %vm798_vm2, %v2389_v55, %v2391_v47  ;;  %v5757_v61 = vld [vmem:[%s10073_s2 + $0xa] sm:$0x3]  ;;  %v6808_v55 = vmov 4  }
 0x281   : > { %2524 = vperm.xlu1 %6581, %v8166_v29   ;;  %2544 = vperm.xlu0 %6580, %v7805_v14   ;;  %v8188_v14 = vpop.permute.xlu1 %2024  ;;  %v3359_v47 = vsel %vm454_vm0, %v5757_v61, 0 }
 0x282   : > { %10237 = vst [vmem:[#allocation113_spill] sm:$0xff] %v8188_v14  ;;  %6521 = vmatprep.subr.msk.bf16.mxu0 %vm454_vm0, %v5757_v61 }
 0x283   : > { %v8199_v63 = vpop.permute.xlu0 %2030  ;;  %6366 = vmatpush3.bf16.msra.mxu0 %v3359_v47 }
 0x284   : > { %10238 = vst [vmem:[#allocation114_spill] sm:$0xff] %v8199_v63 }
 0x285   : > { %2532 = vperm.xlu1 %6581, %v8184_v5   ;;  %2552 = vperm.xlu0 %6580, %v7818_v46   ;;  %v8201_v51 = vpop.permute.xlu1 %2028  ;;  %v8206_v46 = vld [vmem:[%s10074_s3 + $0xf0] sm:$0xff] }
 0x286   : > { %10239 = vst [vmem:[#allocation115_spill] sm:$0xff] %v8201_v51  ;;  %6368 = vmatmul.mubr.msk.bf16.vlgmr.msra.gmra.mrb[96].mxu0 %vm405_vm1, %v7861_v37 }
 0x287   : > { %v8212_v28 = vpop.permute.xlu0 %2034  ;;  %6371 = vmatprep.mubr.msk.bf16.mxu0 %vm405_vm1, %v7866_v43 }
 0x288   : > { %10240 = vst [vmem:[#allocation116_spill] sm:$0xff] %v8212_v28 }
 0x289   : > { %2540 = vperm.xlu1 %6581, %v8193_v6   ;;  %6583 = vset.pattern.permute.xlu0 %v6808_v55  ;;  %v8216_v51 = vpop.permute.xlu1 %2032 }
 0x28a   : > { %10241 = vst [vmem:[#allocation117_spill] sm:$0xff] %v8216_v51 }
 0x28b   : > { %v8222_v63 = vpop.permute.xlu0 %2038 }
 0x28c   : > { %10242 = vst [vmem:[#allocation118_spill] sm:$0xff] %v8222_v63 }
 0x28d   : > { %2548 = vperm.xlu1 %6581, %v8206_v46   ;;  %v8224_v39 = vpop.permute.xlu1 %2036 }
 0x28e   : > { %10243 = vst [vmem:[#allocation119_spill] sm:$0xff] %v8224_v39  ;;  %6372 = vmatmul.mubr.msk.bf16.gmra.mrb[100].mxu0 %vm405_vm1, %v7874_v9 }
 0x28f   : > { %v8226_v28 = vpop.permute.xlu0 %2042  ;;  %6375 = vmatprep.mubr.msk.bf16.mxu0 %vm405_vm1, %v7879_v38 }
 0x290   : > { %10244 = vst [vmem:[#allocation120_spill] sm:$0xff] %v8226_v28 }
 0x291   : > { %6582 = vset.pattern.permute.xlu1 %v6808_v55  ;;  %v8232_v61 = vpop.permute.xlu1 %2040 }
 0x292   : > { %10245 = vst [vmem:[#allocation121_spill] sm:$0xff] %v8232_v61 }
 0x293   : > { %v8234_v55 = vpop.permute.xlu0 %2046 }
 0x294   : > { %10246 = vst [vmem:[#allocation122_spill] sm:$0xff] %v8234_v55 }
 0x295   : > { %v8236_v37 = vpop.permute.xlu1 %2044 }
 0x296   : > { %10247 = vst [vmem:[#allocation123_spill] sm:$0xff] %v8236_v37  ;;  %6376 = vmatmul.mubr.msk.bf16.gmra.mrb[104].mxu0 %vm405_vm1, %v7888_v56  ;;  %v6809_v37 = vmov 5  }
 0x297   : > { %6379 = vmatprep.mubr.msk.bf16.mxu0 %vm405_vm1, %v7893_v50 }
 0x299   : > { %v8244_v47 = vpop.permute.xlu1 %2048 }
 0x29a   : > { %10249 = vst [vmem:[#allocation125_spill] sm:$0xff] %v8244_v47 }
 0x29e   : > { %6380 = vmatmul.mubr.msk.bf16.gmra.mrb[108].mxu0 %vm405_vm1, %v7902_v13 }
 0x29f   : > { %6383 = vmatprep.mubr.msk.bf16.mxu0 %vm405_vm1, %v7907_v18 }
 0x2a3   : > { %v8242_v43 = vpop.permute.xlu0 %2050 }
 0x2a4   : > { %10248 = vst [vmem:[#allocation124_spill] sm:$0xff] %v8242_v43 }
 0x2a6   : > { %6384 = vmatmul.mubr.msk.bf16.gmra.mrb[112].mxu0 %vm405_vm1, %v7918_v58 }
 0x2a7   : > { %v8246_v9 = vpop.permute.xlu0 %2054  ;;  %6387 = vmatprep.mubr.msk.bf16.mxu0 %vm405_vm1, %v7923_v34 }
 0x2a8   : > { %10250 = vst [vmem:[#allocation126_spill] sm:$0xff] %v8246_v9 }
 0x2ab   : > { %v8252_v38 = vpop.permute.xlu1 %2052  ;;  %v8254_v55 = vpop.permute.xlu0 %2058 }
 0x2ac   : > { %10251 = vst [vmem:[#allocation127_spill] sm:$0xff] %v8252_v38  ;;  %10252 = vst [vmem:[#allocation128_spill] sm:$0xff] %v8254_v55 }
 0x2ae   : > { %6388 = vmatmul.mubr.msk.bf16.gmra.mrb[116].mxu0 %vm405_vm1, %v7937_v32 }
 0x2af   : > { %v8256_v56 = vpop.permute.xlu1 %2056  ;;  %v8262_v50 = vpop.permute.xlu0 %2062  ;;  %6391 = vmatprep.mubr.msk.bf16.mxu0 %vm405_vm1, %v7942_v21 }
 0x2b0   : > { %10253 = vst [vmem:[#allocation129_spill] sm:$0xff] %v8256_v56  ;;  %10254 = vst [vmem:[#allocation130_spill] sm:$0xff] %v8262_v50 }
 0x2b3   : > { %v8264_v9 = vpop.permute.xlu1 %2060  ;;  %v8270_v18 = vpop.permute.xlu0 %2066 }
 0x2b4   : > { %10255 = vst [vmem:[#allocation131_spill] sm:$0xff] %v8264_v9  ;;  %10256 = vst [vmem:[#allocation132_spill] sm:$0xff] %v8270_v18 }
 0x2b6   : > { %6392 = vmatmul.mubr.msk.bf16.gmra.mrb[120].mxu0 %vm405_vm1, %v7953_v53  ;;  %v10261_v53 = vrot.slane %v7994_v26, 4 }
 0x2b7   : > { %v8272_v13 = vpop.permute.xlu1 %2064  ;;  %v8274_v55 = vpop.permute.xlu0 %2070  ;;  %6395 = vmatprep.mubr.msk.bf16.mxu0 %vm405_vm1, %v7958_v1 }
 0x2b8   : > { %10257 = vst [vmem:[#allocation133_spill] sm:$0xff] %v8272_v13  ;;  %10258 = vst [vmem:[#allocation134_spill] sm:$0xff] %v8274_v55  ;;  %v2426_v55 = vsel %vm798_vm2, 0.0, %v10261_v53 }
 0x2bb   : > { %v8280_v34 = vpop.permute.xlu1 %2068 }
 0x2bc   : > { %10259 = vst [vmem:[#allocation135_spill] sm:$0xff] %v8280_v34 }
 0x2be   : > { %6396 = vmatmul.mubr.msk.bf16.gmra.mrb[124].mxu0 %vm405_vm1, %v7970_v42 }
 0x2bf   : > { %v8283_v32 = vpop.permute.xlu1 %2072  ;;  %6435 = vmatprep.mubr.msk.bf16.mxu0 %vm405_vm1, %v7610_v8 }
 0x2c0   : > { %10260 = vst [vmem:[#allocation136_spill] sm:$0xff] %v8283_v32 }
 0x2c8   : > { %v2429_v58 = vpop.permute.xlu0 %2428 }
 0x2c9   : > { %v2555_v50 = vmul.f32 0.0, %v2429_v58 }
 0x2cb   : > { %2619 = vrot.lane.b32.xlu1 %v2555_v50, %s6805_s14 }
 0x2cc   : > { %v2441_v21 = vpop.permute.xlu0 %2440 }
 0x2cd   : > { %v2558_v32 = vmul.f32 %v2441_v21, %v8001_v17 }
 0x2d0   : > { %v2433_v1 = vpop.permute.xlu1 %2432  ;;  %v2449_v18 = vpop.permute.xlu0 %2448 }
 0x2d1   : > { %v2556_v34 = vmul.f32 %v2433_v1, %v2426_v55  ;;  %v2560_v26 = vmul.f32 %v2449_v18, %v8004_v15 }
 0x2d3   : > { %2621 = vrot.lane.b32.xlu0 %v2556_v34, %s6805_s14 }
 0x2d4   : > { %v2437_v58 = vpop.permute.xlu1 %2436  ;;  %v2457_v50 = vpop.permute.xlu0 %2456 }
 0x2d5   : > { %v2557_v13 = vmul.f32 %v2437_v58, %v8011_v23  ;;  %v2562_v17 = vmul.f32 %v2457_v50, %v8017_v52 }
 0x2d7   : > { %2625 = vrot.lane.b32.xlu0 %v2558_v32, %s6805_s14  ;;  %2623 = vrot.lane.b32.xlu1 %v2557_v13, %s6805_s14 }
 0x2d8   : > { %v2445_v8 = vpop.permute.xlu1 %2444  ;;  %v2465_v42 = vpop.permute.xlu0 %2464 }
 0x2d9   : > { %v2559_v53 = vmul.f32 %v2445_v8, %v8014_v22  ;;  %v2564_v15 = vmul.f32 %v2465_v42, %v8022_v59 }
 0x2db   : > { %2627 = vrot.lane.b32.xlu1 %v2559_v53, %s6805_s14  ;;  %2629 = vrot.lane.b32.xlu0 %v2560_v26, %s6805_s14 }
 0x2dc   : > { %v2453_v55 = vpop.permute.xlu1 %2452  ;;  %v2473_v34 = vpop.permute.xlu0 %2472 }
 0x2dd   : > { %v2561_v23 = vmul.f32 %v2453_v55, %v8027_v49  ;;  %v2566_v52 = vmul.f32 %v2473_v34, %v8033_v12 }
 0x2df   : > { %2633 = vrot.lane.b32.xlu0 %v2562_v17, %s6805_s14  ;;  %2631 = vrot.lane.b32.xlu1 %v2561_v23, %s6805_s14 }
 0x2e0   : > { %v2461_v13 = vpop.permute.xlu1 %2460  ;;  %v2481_v32 = vpop.permute.xlu0 %2480 }
 0x2e1   : > { %v2563_v22 = vmul.f32 %v2461_v13, %v8030_v2  ;;  %v2568_v59 = vmul.f32 %v2481_v32, %v8038_v54 }
 0x2e3   : > { %2635 = vrot.lane.b32.xlu1 %v2563_v22, %s6805_s14  ;;  %2637 = vrot.lane.b32.xlu0 %v2564_v15, %s6805_s14 }
 0x2e4   : > { %v2469_v18 = vpop.permute.xlu1 %2468  ;;  %v2489_v21 = vpop.permute.xlu0 %2488 }
 0x2e5   : > { %v2565_v49 = vmul.f32 %v2469_v18, %v8043_v7  ;;  %v2570_v12 = vmul.f32 %v2489_v21, %v8049_v24 }
 0x2e7   : > { %2641 = vrot.lane.b32.xlu0 %v2566_v52, %s6805_s14  ;;  %2639 = vrot.lane.b32.xlu1 %v2565_v49, %s6805_s14 }
 0x2e8   : > { %v2477_v1 = vpop.permute.xlu1 %2476  ;;  %v2497_v58 = vpop.permute.xlu0 %2496 }
 0x2e9   : > { %v2567_v2 = vmul.f32 %v2477_v1, %v8046_v27  ;;  %v2572_v54 = vmul.f32 %v2497_v58, %v8059_v30 }
 0x2eb   : > { %2643 = vrot.lane.b32.xlu1 %v2567_v2, %s6805_s14  ;;  %2645 = vrot.lane.b32.xlu0 %v2568_v59, %s6805_s14 }
 0x2ec   : > { %v2485_v50 = vpop.permute.xlu1 %2484  ;;  %v2505_v8 = vpop.permute.xlu0 %2504 }
 0x2ed   : > { %v2569_v7 = vmul.f32 %v2485_v50, %v8069_v60  ;;  %v2574_v24 = vmul.f32 %v2505_v8, %v8075_v19 }
 0x2ef   : > { %2649 = vrot.lane.b32.xlu0 %v2570_v12, %s6805_s14  ;;  %2647 = vrot.lane.b32.xlu1 %v2569_v7, %s6805_s14 }
 0x2f0   : > { %v2493_v42 = vpop.permute.xlu1 %2492  ;;  %v2513_v26 = vpop.permute.xlu0 %2512 }
 0x2f1   : > { %v2571_v27 = vmul.f32 %v2493_v42, %v8072_v40  ;;  %v2576_v30 = vmul.f32 %v2513_v26, %v8092_v44 }
 0x2f3   : > { %2651 = vrot.lane.b32.xlu1 %v2571_v27, %s6805_s14  ;;  %2653 = vrot.lane.b32.xlu0 %v2572_v54, %s6805_s14 }
 0x2f4   : > { %v2501_v53 = vpop.permute.xlu1 %2500  ;;  %v2521_v55 = vpop.permute.xlu0 %2520 }
 0x2f5   : > { %v2573_v60 = vmul.f32 %v2501_v53, %v8107_v16  ;;  %v2578_v13 = vmul.f32 %v2521_v55, %v8115_v4 }
 0x2f7   : > { %2657 = vrot.lane.b32.xlu0 %v2574_v24, %s6805_s14  ;;  %2655 = vrot.lane.b32.xlu1 %v2573_v60, %s6805_s14  ;;  %v8365_v24 = vld [vmem:[%s10074_s3 + $0x8] sm:$0xff] }
 0x2f8   : > { %v2509_v34 = vpop.permute.xlu1 %2508  ;;  %v2529_v17 = vpop.permute.xlu0 %2528 }
 0x2f9   : > { %v2575_v40 = vmul.f32 %v2509_v34, %v8110_v62  ;;  %v2580_v15 = vmul.f32 %v2529_v17, %v8129_v0  ;;  %v6335_v62 = vpop.f32.mrb[64].mxu1 }
 0x2fa   : > { %v2786_v22 = vpop.f32.mrb[65].mxu1  ;;  %v2944_v21 = vrot.slane %v6335_v62, 4 }
 0x2fb   : > { %2659 = vrot.lane.b32.xlu1 %v2575_v40, %s6805_s14  ;;  %2661 = vrot.lane.b32.xlu0 %v2576_v30, %s6805_s14  ;;  %v6336_v49 = vpop.f32.mrb[66].mxu1  ;;  %v8380_v40 = vld [vmem:[%s10074_s3 + $0x20] sm:$0xff]  ;;  %v8401_v22 = vld [vmem:[%s10074_s3 + $0x30] sm:$0xff] }
 0x2fc   : > { %v2517_v23 = vpop.permute.xlu1 %2516  ;;  %v2537_v16 = vpop.permute.xlu0 %2536  ;;  %v2946_v1 = vrot.slane %v6336_v49, 4 }
 0x2fd   : > { %v2577_v19 = vmul.f32 %v2517_v23, %v8139_v20  ;;  %v2582_v20 = vmul.f32 %v2537_v16, %v8147_v33  ;;  %v2788_v58 = vpop.f32.mrb[67].mxu1  ;;  %v8386_v23 = vld [vmem:[%s10074_s3 + $0x10] sm:$0xff] }
 0x2fe   : > { %v6339_v0 = vpop.f32.mrb[68].mxu1  ;;  %v8346_v2 = vsel %vm798_vm2, %v2944_v21, %v2946_v1  ;;  %v2943_v7 = vrot.slane %v2788_v58, 4  ;;  %v8422_v58 = vld [vmem:[%s10074_s3 + $0x28] sm:$0xff] }
 0x2ff   : > { %2665 = vrot.lane.b32.xlu0 %v2578_v13, %s6805_s14  ;;  %2663 = vrot.lane.b32.xlu1 %v2577_v19, %s6805_s14  ;;  %v2801_v59 = vpop.f32.mrb[69].mxu1  ;;  %v2952_v53 = vrot.slane %v6339_v0, 4 }
 0x300   : > { %v2525_v32 = vpop.permute.xlu1 %2524  ;;  %v2545_v18 = vpop.permute.xlu0 %2544  ;;  %v2948_v42 = vrot.slane %v2801_v59, 4 }
 0x301   : > { %v2579_v44 = vmul.f32 %v2525_v32, %v8142_v3  ;;  %v2584_v50 = vmul.f32 %v2545_v18, %v8161_v36  ;;  %v6340_v33 = vpop.f32.mrb[70].mxu1  ;;  %v8357_v36 = vsel %vm798_vm2, %v2943_v7, %v2944_v21  ;;  %v8407_v18 = vld [vmem:[%s10074_s3 + $0x18] sm:$0xff] }
 0x302   : > { %v8443_v7 = vld [vmem:[%s10074_s3 + $0x38] sm:$0xff] }
 0x303   : > { %2667 = vrot.lane.b32.xlu1 %v2579_v44, %s6805_s14  ;;  %2669 = vrot.lane.b32.xlu0 %v2580_v15, %s6805_s14 }
 0x304   : > { %v2533_v4 = vpop.permute.xlu1 %2532  ;;  %v2553_v12 = vpop.permute.xlu0 %2552 }
 0x305   : > { %v2581_v52 = vmul.f32 %v2533_v4, %v8171_v35  ;;  %v2804_v35 = vpop.f32.mrb[71].mxu1  ;;  %v2586_v54 = vmul.f32 %v2553_v12, %v8179_v10  ;;  %v8371_v10 = vld [vmem:[%s10074_s3] sm:$0xff] }
 0x306   : > { %v2950_v55 = vrot.slane %v2804_v35, 4  ;;  %v6343_v60 = vpop.f32.mrb[72].mxu1  ;;  %v8437_v35 = vld [vmem:[%s10074_s3 + $0x50] sm:$0xff] }
 0x307   : > { %2673 = vrot.lane.b32.xlu0 %v2582_v20, %s6805_s14  ;;  %2671 = vrot.lane.b32.xlu1 %v2581_v52, %s6805_s14  ;;  %v2817_v34 = vpop.f32.mrb[73].mxu1  ;;  %v2960_v15 = vrot.slane %v6343_v60, 4 }
 0x308   : > { %v2541_v3 = vpop.permute.xlu1 %2540  ;;  %v2956_v17 = vrot.slane %v2817_v34, 4  ;;  %v8375_v30 = vsel %vm798_vm2, %v2950_v55, %v2952_v53  ;;  %v6344_v13 = vpop.f32.mrb[74].mxu1  ;;  %v8393_v16 = vsel %vm798_vm2, %v2948_v42, %v2950_v55  ;;  %v8452_v55 = vld [vmem:[%s10074_s3 + $0x60] sm:$0xff] }
 0x309   : > { %v2583_v8 = vmul.f32 %v2541_v3, %v8174_v11  ;;  %v8360_v11 = vsel %vm798_vm2, %v2946_v1, %v2948_v42  ;;  %v2820_v44 = vpop.f32.mrb[75].mxu1  ;;  %v2962_v4 = vrot.slane %v6344_v13, 4  ;;  %v8416_v1 = vld [vmem:[%s10074_s3 + $0x40] sm:$0xff] }
 0x30a   : > { %v2958_v62 = vrot.slane %v2820_v44, 4  ;;  %v6347_v21 = vpop.f32.mrb[76].mxu1 }
 0x30b   : > { %2675 = vrot.lane.b32.xlu1 %v2583_v8, %s6805_s14  ;;  %2677 = vrot.lane.b32.xlu0 %v2584_v50, %s6805_s14  ;;  %v2833_v20 = vpop.f32.mrb[77].mxu1  ;;  %v8432_v50 = vsel %vm798_vm2, %v2960_v15, %v2962_v4  ;;  %v2968_v8 = vrot.slane %v6347_v21, 4 }
 0x30c   : > { %v2549_v26 = vpop.permute.xlu1 %2548  ;;  %v2964_v52 = vrot.slane %v2833_v20, 4  ;;  %v8411_v49 = vsel %vm798_vm2, %v2958_v62, %v2960_v15  ;;  %v6348_v0 = vpop.f32.mrb[78].mxu1  ;;  %v8429_v59 = vsel %vm798_vm2, %v2956_v17, %v2958_v62 }
 0x30d   : > { %v2585_v27 = vmul.f32 %v2549_v26, %v8197_v41  ;;  %v2954_v41 = vrot.slane %v6340_v33, 4  ;;  %v2836_v33 = vpop.f32.mrb[79].mxu1  ;;  %v2970_v42 = vrot.slane %v6348_v0, 4 }
 0x30e   : > { %v8426_v3 = vsel %vm798_vm2, %v2962_v4, %v2964_v52  ;;  %v2966_v12 = vrot.slane %v2836_v33, 4  ;;  %v6351_v26 = vpop.f32.mrb[80].mxu1  ;;  %v8474_v4 = vld [vmem:[%s10074_s3 + $0x58] sm:$0xff] }
 0x30f   : > { %2681 = vrot.lane.b32.xlu0 %v2586_v54, %s6805_s14  ;;  %2679 = vrot.lane.b32.xlu1 %v2585_v27, %s6805_s14  ;;  %v8390_v19 = vsel %vm798_vm2, %v2954_v41, %v2956_v17  ;;  %v8396_v32 = vsel %vm798_vm2, %v2952_v53, %v2954_v41  ;;  %v2849_v54 = vpop.f32.mrb[81].mxu1  ;;  %v8458_v41 = vld [vmem:[%s10074_s3 + $0x48] sm:$0xff]  ;;  %v8468_v13 = vsel %vm798_vm2, %v2968_v8, %v2970_v42  ;;  %v2976_v15 = vrot.slane %v6351_v26, 4 }
 0x310   : > { %v2972_v27 = vrot.slane %v2849_v54, 4  ;;  %v8447_v53 = vsel %vm798_vm2, %v2966_v12, %v2968_v8  ;;  %v6352_v60 = vpop.f32.mrb[82].mxu1  ;;  %v8465_v17 = vsel %vm798_vm2, %v2964_v52, %v2966_v12 }
 0x311   : > { %v2852_v44 = vpop.f32.mrb[83].mxu1  ;;  %v2978_v21 = vrot.slane %v6352_v60, 4 }
 0x312   : > { %v8462_v34 = vsel %vm798_vm2, %v2970_v42, %v2972_v27  ;;  %v2974_v62 = vrot.slane %v2852_v44, 4  ;;  %v6355_v20 = vpop.f32.mrb[84].mxu1 }
 0x313   : > { %3041 = vperm.xlu0 %6583, %v8365_v24   ;;  %3037 = vperm.xlu1 %6582, %v8371_v10   ;;  %v2865_v0 = vpop.f32.mrb[85].mxu1  ;;  %v8494_v26 = vsel %vm798_vm2, %v2976_v15, %v2978_v21  ;;  %v2984_v54 = vrot.slane %v6355_v20, 4 }
 0x314   : > { %v2980_v52 = vrot.slane %v2865_v0, 4  ;;  %v8478_v33 = vsel %vm798_vm2, %v2974_v62, %v2976_v15  ;;  %v6356_v8 = vpop.f32.mrb[86].mxu1  ;;  %v8491_v42 = vsel %vm798_vm2, %v2972_v27, %v2974_v62  ;;  %v10262_v27 = vld [vmem:[#allocation101_spill] sm:$0xff] }
 0x315   : > { %v2868_v60 = vpop.f32.mrb[87].mxu1  ;;  %v2986_v44 = vrot.slane %v6356_v8, 4  ;;  %v10263_v8 = vld [vmem:[#allocation109_spill] sm:$0xff] }
 0x316   : > { %v8488_v12 = vsel %vm798_vm2, %v2978_v21, %v2980_v52  ;;  %v6359_v0 = vpop.f32.mrb[88].mxu1 }
 0x317   : > { %3053 = vperm.xlu0 %6583, %v8380_v40   ;;  %3045 = vperm.xlu1 %6582, %v8386_v23   ;;  %v2881_v9 = vpop.f32.mrb[89].mxu1 }
 0x318   : > { %v2988_v43 = vrot.slane %v2881_v9, 4  ;;  %v6360_v15 = vpop.f32.mrb[90].mxu1 }
 0x319   : > { %v2884_v20 = vpop.f32.mrb[91].mxu1 }
 0x31a   : > { %v8504_v62 = vsel %vm798_vm2, %v2986_v44, %v2988_v43  ;;  %v2990_v9 = vrot.slane %v2884_v20, 4  ;;  %v6363_v38 = vpop.f32.mrb[92].mxu1 }
 0x31b   : > { %3061 = vperm.xlu0 %6583, %v8401_v22   ;;  %3049 = vperm.xlu1 %6582, %v8407_v18  }
 0x31f   : > { %3069 = vperm.xlu0 %6583, %v8416_v1   ;;  %3057 = vperm.xlu1 %6582, %v8422_v58  }
 0x323   : > { %3077 = vperm.xlu0 %6583, %v8437_v35   ;;  %3065 = vperm.xlu1 %6582, %v8443_v7  }
 0x327   : > { %3085 = vperm.xlu0 %6583, %v8452_v55   ;;  %3073 = vperm.xlu1 %6582, %v8458_v41  }
 0x32b   : > { %3093 = vperm.xlu0 %6583, %v8080_v57   ;;  %3081 = vperm.xlu1 %6582, %v8474_v4   ;;  %v8484_v57 = vld [vmem:[%s10074_s3 + $0x68] sm:$0xff] }
 0x32f   : > { %3101 = vperm.xlu0 %6583, %v8097_v45   ;;  %3089 = vperm.xlu1 %6582, %v8484_v57   ;;  %v2982_v45 = vrot.slane %v2868_v60, 4  ;;  %v10264_v60 = vld [vmem:[#allocation102_spill] sm:$0xff] }
 0x331   : > { %v8499_v56 = vsel %vm798_vm2, %v2982_v45, %v2984_v54  ;;  %v8507_v21 = vsel %vm798_vm2, %v2980_v52, %v2982_v45  ;;  %v10265_v52 = vld [vmem:[#allocation104_spill] sm:$0xff]  ;;  %v8523_v45 = vsel %vm798_vm2, %v2988_v43, %v2990_v9 }
 0x333   : > { %3109 = vperm.xlu0 %6583, %v8120_v31   ;;  %3097 = vperm.xlu1 %6582, %v8055_v25   ;;  %v8510_v31 = vsel %vm798_vm2, %v2984_v54, %v2986_v44  ;;  %v2992_v25 = vrot.slane %v6359_v0, 4 }
 0x335   : > { %v8515_v47 = vsel %vm798_vm2, %v2990_v9, %v2992_v25 }
 0x337   : > { %3117 = vperm.xlu0 %6583, %v8134_v48   ;;  %3105 = vperm.xlu1 %6582, %v10262_v27   ;;  %v2994_v48 = vrot.slane %v6360_v15, 4  ;;  %v2897_v27 = vpop.f32.mrb[93].mxu1  ;;  %v3000_v15 = vrot.slane %v6363_v38, 4 }
 0x338   : > { %v2996_v28 = vrot.slane %v2897_v27, 4  ;;  %v8528_v0 = vpop.f32.mrb[94].mxu1 }
 0x339   : > { %v8526_v44 = vsel %vm798_vm2, %v2992_v25, %v2994_v48  ;;  %v10118_v20 = vrot.slane %v8528_v0, 4 }
 0x33a   : > { %v8520_v54 = vsel %vm798_vm2, %v2994_v48, %v2996_v28 }
 0x33b   : > { %3125 = vperm.xlu0 %6583, %v10263_v8   ;;  %3113 = vperm.xlu1 %6582, %v10264_v60   ;;  %v2900_v8 = vpop.f32.mrb[95].mxu1  ;;  %v8558_v48 = vsel %vm798_vm2, %v3000_v15, %v10118_v20  ;;  %v8588_v20 = vld [vmem:[%s10074_s3 + $0xf8] sm:$0xff] }
 0x33c   : > { %v2998_v43 = vrot.slane %v2900_v8, 4 }
 0x33d   : > { %v8538_v9 = vpop.permute.xlu1 %2619 }
 0x33e   : > { %v8543_v60 = vsel %vm798_vm2, %v2998_v43, %v3000_v15  ;;  %v8553_v38 = vsel %vm798_vm2, %v2996_v28, %v2998_v43  ;;  %v8578_v15 = vld [vmem:[%s10074_s3 + $0xe8] sm:$0xff] }
 0x33f   : > { %3133 = vperm.xlu0 %6583, %v8166_v29   ;;  %3121 = vperm.xlu1 %6582, %v10265_v52   ;;  %v8534_v29 = vld [vmem:[%s10074_s3 + $0xb8] sm:$0xff] }
 0x343   : > { %3141 = vperm.xlu0 %6583, %v8184_v5   ;;  %3129 = vperm.xlu1 %6582, %v8534_v29   ;;  %v8549_v5 = vld [vmem:[%s10074_s3 + $0xc8] sm:$0xff] }
 0x345   : > { %v8540_v25 = vpop.permute.xlu0 %2621 }
 0x347   : > { %3149 = vperm.xlu0 %6583, %v8193_v6   ;;  %3137 = vperm.xlu1 %6582, %v8549_v5   ;;  %v8568_v6 = vld [vmem:[%s10074_s3 + $0xd8] sm:$0xff] }
 0x349   : > { %v8560_v27 = vpop.permute.xlu0 %2625  ;;  %v8562_v52 = vpop.permute.xlu1 %2623 }
 0x34a   : > { %10266 = vst [vmem:[#allocation101_spill] sm:$0xff] %v8560_v27 }
 0x34b   : > { %3157 = vperm.xlu0 %6583, %v8206_v46   ;;  %3145 = vperm.xlu1 %6582, %v8568_v6  }
 0x34d   : > { %v8571_v28 = vpop.permute.xlu1 %2627  ;;  %v8573_v8 = vpop.permute.xlu0 %2629 }
 0x34e   : > { %10267 = vst [vmem:[#allocation109_spill] sm:$0xff] %v8571_v28  ;;  %10268 = vst [vmem:[#allocation102_spill] sm:$0xff] %v8573_v8 }
 0x34f   : > { %3153 = vperm.xlu1 %6582, %v8578_v15   ;;  %6584 = vset.pattern.permute.xlu0 %v6809_v37 }
 0x351   : > { %v8581_v43 = vpop.permute.xlu0 %2633  ;;  %v8583_v46 = vpop.permute.xlu1 %2631 }
 0x352   : > { %10269 = vst [vmem:[#allocation104_spill] sm:$0xff] %v8581_v43  ;;  %10270 = vst [vmem:[#allocation137_spill] sm:$0xff] %v8583_v46 }
 0x353   : > { %3161 = vperm.xlu1 %6582, %v8588_v20  }
 0x355   : > { %v8591_v63 = vpop.permute.xlu1 %2635  ;;  %v8593_v61 = vpop.permute.xlu0 %2637 }
 0x356   : > { %10271 = vst [vmem:[#allocation138_spill] sm:$0xff] %v8591_v63  ;;  %10272 = vst [vmem:[#allocation139_spill] sm:$0xff] %v8593_v61 }
 0x357   : > { %6585 = vset.pattern.permute.xlu1 %v6809_v37 }
 0x359   : > { %v8595_v39 = vpop.permute.xlu0 %2641  ;;  %v8597_v51 = vpop.permute.xlu1 %2639 }
 0x35a   : > { %10273 = vst [vmem:[#allocation140_spill] sm:$0xff] %v8595_v39  ;;  %10274 = vst [vmem:[#allocation141_spill] sm:$0xff] %v8597_v51  ;;  %v6369_v63 = vpop.f32.mrb[96].mxu0  ;;  %v6703_v51 = vld [vmem:[%s6938_s13 + $0x48] sm:$0xff]  }
 0x35b   : > { %v3395_v61 = vpop.f32.mrb[97].mxu0 }
 0x35c   : > { %v6370_v61 = vpop.f32.mrb[98].mxu0 }
 0x35d   : > { %v8599_v43 = vpop.permute.xlu1 %2643  ;;  %v8601_v8 = vpop.permute.xlu0 %2645 }
 0x35e   : > { %10275 = vst [vmem:[#allocation142_spill] sm:$0xff] %v8599_v43  ;;  %10276 = vst [vmem:[#allocation143_spill] sm:$0xff] %v8601_v8  ;;  %v5774_v43 = vld [vmem:[%s10073_s2 + $0xc] sm:$0x3] }
 0x35f   : > { %6522 = vmatprep.subr.msk.bf16.mxu1 %vm454_vm0, %v5774_v43 }
 0x361   : > { %v8603_v14 = vpop.permute.xlu0 %2649  ;;  %v8605_v46 = vpop.permute.xlu1 %2647 }
 0x362   : > { %10277 = vst [vmem:[#allocation144_spill] sm:$0xff] %v8603_v14  ;;  %10278 = vst [vmem:[#allocation145_spill] sm:$0xff] %v8605_v46  ;;  %v5791_v14 = vld [vmem:[%s10073_s2 + $0xe] sm:$0x3]  ;;  %v6696_v46 = vld [vmem:[%s6938_s13 + $0x10] sm:$0xff]  }
 0x363   : > { %6523 = vmatprep.subr.msk.bf16.mxu0 %vm454_vm0, %v5791_v14  ;;  %v4325_v63 = vsel %vm454_vm0, %v5791_v14, 0 }
 0x364   : > { %6434 = vmatpush3.bf16.msra.mxu0 %v4325_v63 }
 0x365   : > { %v8607_v28 = vpop.permute.xlu1 %2651  ;;  %v8609_v27 = vpop.permute.xlu0 %2653 }
 0x366   : > { %10279 = vst [vmem:[#allocation146_spill] sm:$0xff] %v8607_v28  ;;  %10280 = vst [vmem:[#allocation147_spill] sm:$0xff] %v8609_v27  ;;  %v3863_v28 = vsel %vm454_vm0, %v5774_v43, 0  ;;  %v6695_v27 = vld [vmem:[%s6938_s13 + $0x8] sm:$0xff]  }
 0x367   : > { %6400 = vmatpush3.bf16.msra.mxu1 %v3863_v28  ;;  %6436 = vmatmul.mubr.msk.bf16.vlgmr.msra.gmra.mrb[128].mxu0 %vm405_vm1, %v6695_v27 }
 0x368   : > { %6439 = vmatprep.mubr.msk.bf16.mxu0 %vm405_vm1, %v6696_v46 }
 0x369   : > { %v8611_v37 = vpop.permute.xlu1 %2655  ;;  %v8619_v8 = vpop.permute.xlu0 %2657 }
 0x36a   : > { %10281 = vst [vmem:[#allocation148_spill] sm:$0xff] %v8611_v37  ;;  %10282 = vst [vmem:[#allocation149_spill] sm:$0xff] %v8619_v8  ;;  %v3397_v37 = vpop.f32.mrb[99].mxu0  ;;  %6402 = vmatmul.mubr.msk.bf16.vlgmr.msra.gmra.mrb[96].mxu1 %vm405_vm1, %v6695_v27  ;;  %v6697_v27 = vld [vmem:[%s6938_s13 + $0x18] sm:$0xff]  }
 0x36b   : > { %6405 = vmatprep.mubr.msk.bf16.mxu1 %vm405_vm1, %v6696_v46  ;;  %v6373_v43 = vpop.f32.mrb[100].mxu0 }
 0x36c   : > { %v3407_v28 = vpop.f32.mrb[101].mxu0 }
 0x36d   : > { %v8628_v8 = vpop.permute.xlu1 %2659  ;;  %v8633_v14 = vpop.permute.xlu0 %2661 }
 0x36e   : > { %10283 = vst [vmem:[#allocation150_spill] sm:$0xff] %v8628_v8  ;;  %10284 = vst [vmem:[#allocation151_spill] sm:$0xff] %v8633_v14  ;;  %v6374_v63 = vpop.f32.mrb[102].mxu0  ;;  %v6698_v8 = vld [vmem:[%s6938_s13 + $0x20] sm:$0xff]  }
 0x36f   : > { %v3409_v37 = vpop.f32.mrb[103].mxu0  ;;  %6440 = vmatmul.mubr.msk.bf16.gmra.mrb[132].mxu0 %vm405_vm1, %v6697_v27  ;;  %v6702_v14 = vld [vmem:[%s6938_s13 + $0x40] sm:$0xff]  }
 0x370   : > { %6443 = vmatprep.mubr.msk.bf16.mxu0 %vm405_vm1, %v6698_v8  ;;  %v6377_v46 = vpop.f32.mrb[104].mxu0 }
 0x371   : > { %v8635_v61 = vpop.permute.xlu1 %2663  ;;  %v8637_v39 = vpop.permute.xlu0 %2665 }
 0x372   : > { %10285 = vst [vmem:[#allocation152_spill] sm:$0xff] %v8635_v61  ;;  %10286 = vst [vmem:[#allocation153_spill] sm:$0xff] %v8637_v39  ;;  %6406 = vmatmul.mubr.msk.bf16.gmra.mrb[100].mxu1 %vm405_vm1, %v6697_v27  ;;  %v3419_v43 = vpop.f32.mrb[105].mxu0  ;;  %v6699_v39 = vld [vmem:[%s6938_s13 + $0x28] sm:$0xff]   ;;  %v6700_v27 = vld [vmem:[%s6938_s13 + $0x30] sm:$0xff]  }
 0x373   : > { %6409 = vmatprep.mubr.msk.bf16.mxu1 %vm405_vm1, %v6698_v8  ;;  %v6378_v28 = vpop.f32.mrb[106].mxu0 }
 0x374   : > { %v3421_v37 = vpop.f32.mrb[107].mxu0 }
 0x375   : > { %v8645_v63 = vpop.permute.xlu1 %2667  ;;  %v8647_v61 = vpop.permute.xlu0 %2669 }
 0x376   : > { %10287 = vst [vmem:[#allocation154_spill] sm:$0xff] %v8645_v63  ;;  %10288 = vst [vmem:[#allocation155_spill] sm:$0xff] %v8647_v61  ;;  %v6381_v8 = vpop.f32.mrb[108].mxu0  ;;  %v6701_v61 = vld [vmem:[%s6938_s13 + $0x38] sm:$0xff]  }
 0x377   : > { %6444 = vmatmul.mubr.msk.bf16.gmra.mrb[136].mxu0 %vm405_vm1, %v6699_v39  ;;  %v3431_v46 = vpop.f32.mrb[109].mxu0 }
 0x378   : > { %6447 = vmatprep.mubr.msk.bf16.mxu0 %vm405_vm1, %v6700_v27  ;;  %v6382_v37 = vpop.f32.mrb[110].mxu0 }
 0x379   : > { %v8655_v43 = vpop.permute.xlu1 %2671  ;;  %v8657_v28 = vpop.permute.xlu0 %2673 }
 0x37a   : > { %6410 = vmatmul.mubr.msk.bf16.gmra.mrb[104].mxu1 %vm405_vm1, %v6699_v39  ;;  %10289 = vst [vmem:[#allocation156_spill] sm:$0xff] %v8655_v43  ;;  %10290 = vst [vmem:[#allocation157_spill] sm:$0xff] %v8657_v28  ;;  %v3433_v63 = vpop.f32.mrb[111].mxu0 }
 0x37b   : > { %6413 = vmatprep.mubr.msk.bf16.mxu1 %vm405_vm1, %v6700_v27  ;;  %v6385_v27 = vpop.f32.mrb[112].mxu0 }
 0x37c   : > { %v3443_v46 = vpop.f32.mrb[113].mxu0 }
 0x37d   : > { %v8662_v39 = vpop.permute.xlu1 %2675  ;;  %v8667_v8 = vpop.permute.xlu0 %2677 }
 0x37e   : > { %10291 = vst [vmem:[#allocation158_spill] sm:$0xff] %v8662_v39  ;;  %10292 = vst [vmem:[#allocation159_spill] sm:$0xff] %v8667_v8  ;;  %v6386_v37 = vpop.f32.mrb[114].mxu0  ;;  %v6705_v39 = vld [vmem:[%s6938_s13 + $0x58] sm:$0xff]  }
 0x37f   : > { %6448 = vmatmul.mubr.msk.bf16.gmra.mrb[140].mxu0 %vm405_vm1, %v6701_v61  ;;  %v3445_v43 = vpop.f32.mrb[115].mxu0 }
 0x380   : > { %6451 = vmatprep.mubr.msk.bf16.mxu0 %vm405_vm1, %v6702_v14 }
 0x381   : > { %v8669_v63 = vpop.permute.xlu0 %2681  ;;  %v8671_v28 = vpop.permute.xlu1 %2679 }
 0x382   : > { %6414 = vmatmul.mubr.msk.bf16.gmra.mrb[108].mxu1 %vm405_vm1, %v6701_v61  ;;  %10293 = vst [vmem:[#allocation160_spill] sm:$0xff] %v8669_v63  ;;  %10294 = vst [vmem:[#allocation161_spill] sm:$0xff] %v8671_v28  ;;  %v6704_v61 = vld [vmem:[%s6938_s13 + $0x50] sm:$0xff]  }
 0x383   : > { %6417 = vmatprep.mubr.msk.bf16.mxu1 %vm405_vm1, %v6702_v14 }
 0x387   : > { %6452 = vmatmul.mubr.msk.bf16.gmra.mrb[144].mxu0 %vm405_vm1, %v6703_v51 }
 0x388   : > { %6455 = vmatprep.mubr.msk.bf16.mxu0 %vm405_vm1, %v6704_v61 }
 0x38a   : > { %6418 = vmatmul.mubr.msk.bf16.gmra.mrb[112].mxu1 %vm405_vm1, %v6703_v51 }
 0x38b   : > { %6421 = vmatprep.mubr.msk.bf16.mxu1 %vm405_vm1, %v6704_v61  ;;  %v6706_v61 = vld [vmem:[%s6938_s13 + $0x60] sm:$0xff]  }
 0x38f   : > { %6456 = vmatmul.mubr.msk.bf16.gmra.mrb[148].mxu0 %vm405_vm1, %v6705_v39 }
 0x390   : > { %6459 = vmatprep.mubr.msk.bf16.mxu0 %vm405_vm1, %v6706_v61 }
 0x392   : > { %v3042_v14 = vpop.permute.xlu0 %3041  ;;  %v3038_v27 = vpop.permute.xlu1 %3037  ;;  %6422 = vmatmul.mubr.msk.bf16.gmra.mrb[116].mxu1 %vm405_vm1, %v6705_v39 }
 0x393   : > { %v3165_v43 = vmul.f32 %v3042_v14, %v8346_v2  ;;  %v3164_v46 = vmul.f32 %v3038_v27, %v8357_v36  ;;  %6425 = vmatprep.mubr.msk.bf16.mxu1 %vm405_vm1, %v6706_v61 }
 0x395   : > { %3230 = vrot.lane.b32.xlu1 %v3165_v43, %s6805_s14  ;;  %3228 = vrot.lane.b32.xlu0 %v3164_v46, %s6805_s14 }
 0x396   : > { %v3054_v37 = vpop.permute.xlu0 %3053  ;;  %v3046_v28 = vpop.permute.xlu1 %3045 }
 0x397   : > { %v3166_v51 = vmul.f32 %v3046_v28, %v8360_v11  ;;  %v3168_v14 = vmul.f32 %v3054_v37, %v8375_v30  ;;  %v6707_v28 = vld [vmem:[%s6938_s13 + $0x68] sm:$0xff]  }
 0x398   : > { %6460 = vmatmul.mubr.msk.bf16.gmra.mrb[152].mxu0 %vm405_vm1, %v6707_v28 }
 0x399   : > { %3232 = vrot.lane.b32.xlu0 %v3166_v51, %s6805_s14  ;;  %v6708_v51 = vld [vmem:[%s6938_s13 + $0x70] sm:$0xff]  }
 0x39a   : > { %v3062_v2 = vpop.permute.xlu0 %3061  ;;  %v3050_v36 = vpop.permute.xlu1 %3049  ;;  %6426 = vmatmul.mubr.msk.bf16.gmra.mrb[120].mxu1 %vm405_vm1, %v6707_v28  ;;  %6463 = vmatprep.mubr.msk.bf16.mxu0 %vm405_vm1, %v6708_v51 }
 0x39b   : > { %v3167_v27 = vmul.f32 %v3050_v36, %v8393_v16  ;;  %v3170_v43 = vmul.f32 %v3062_v2, %v8390_v19  ;;  %6429 = vmatprep.mubr.msk.bf16.mxu1 %vm405_vm1, %v6708_v51  ;;  %v6709_v2 = vld [vmem:[%s6938_s13 + $0x78] sm:$0xff]   ;;  %s10022_s13 = scalar_lea.hbm %s10078_s7, %s5888_s15 }
 0x39d   : > { %3236 = vrot.lane.b32.xlu0 %v3168_v14, %s6805_s14  ;;  %3234 = vrot.lane.b32.xlu1 %v3167_v27, %s6805_s14 }
 0x39e   : > { %v3070_v39 = vpop.permute.xlu0 %3069  ;;  %v3058_v11 = vpop.permute.xlu1 %3057 }
 0x39f   : > { %v3169_v46 = vmul.f32 %v3058_v11, %v8396_v32  ;;  %v3172_v37 = vmul.f32 %v3070_v39, %v8411_v49 }
 0x3a0   : > { %6464 = vmatmul.mubr.msk.bf16.gmra.mrb[156].mxu0 %vm405_vm1, %v6709_v2 }
 0x3a1   : > { %3240 = vrot.lane.b32.xlu0 %v3170_v43, %s6805_s14  ;;  %3238 = vrot.lane.b32.xlu1 %v3169_v46, %s6805_s14 }
 0x3a2   : > { %v3078_v30 = vpop.permute.xlu0 %3077  ;;  %v3066_v16 = vpop.permute.xlu1 %3065  ;;  %6430 = vmatmul.mubr.msk.bf16.gmra.mrb[124].mxu1 %vm405_vm1, %v6709_v2 }
 0x3a3   : > { %v3171_v61 = vmul.f32 %v3066_v16, %v8429_v59  ;;  %v3174_v36 = vmul.f32 %v3078_v30, %v8426_v3 }
 0x3a5   : > { %3244 = vrot.lane.b32.xlu0 %v3172_v37, %s6805_s14  ;;  %3242 = vrot.lane.b32.xlu1 %v3171_v61, %s6805_s14 }
 0x3a6   : > { %v3086_v19 = vpop.permute.xlu0 %3085  ;;  %v3074_v32 = vpop.permute.xlu1 %3073 }
 0x3a7   : > { %v3173_v14 = vmul.f32 %v3074_v32, %v8432_v50  ;;  %v3176_v27 = vmul.f32 %v3086_v19, %v8447_v53 }
 0x3a9   : > { %3248 = vrot.lane.b32.xlu0 %v3174_v36, %s6805_s14  ;;  %3246 = vrot.lane.b32.xlu1 %v3173_v14, %s6805_s14 }
 0x3aa   : > { %v3094_v49 = vpop.permute.xlu0 %3093  ;;  %v3082_v59 = vpop.permute.xlu1 %3081 }
 0x3ab   : > { %v3175_v39 = vmul.f32 %v3082_v59, %v8465_v17  ;;  %v3178_v3 = vmul.f32 %v3094_v49, %v8462_v34  ;;  %v6389_v49 = vpop.f32.mrb[116].mxu0 }
 0x3ac   : > { %v3455_v59 = vpop.f32.mrb[117].mxu0 }
 0x3ad   : > { %3252 = vrot.lane.b32.xlu0 %v3176_v27, %s6805_s14  ;;  %3250 = vrot.lane.b32.xlu1 %v3175_v39, %s6805_s14 }
 0x3ae   : > { %v3102_v11 = vpop.permute.xlu0 %3101  ;;  %v3090_v28 = vpop.permute.xlu1 %3089 }
 0x3af   : > { %v3177_v50 = vmul.f32 %v3090_v28, %v8468_v13  ;;  %v3180_v53 = vmul.f32 %v3102_v11, %v8478_v33  ;;  %v6390_v11 = vpop.f32.mrb[118].mxu0 }
 0x3b1   : > { %3256 = vrot.lane.b32.xlu0 %v3178_v3, %s6805_s14  ;;  %3254 = vrot.lane.b32.xlu1 %v3177_v50, %s6805_s14  ;;  %v3511_v3 = vrot.slane %v6390_v11, 4  ;;  %v3457_v50 = vpop.f32.mrb[119].mxu0  ;;  %v8851_v11 = vld [vmem:[%s10074_s3 + $0xa0] sm:$0xff] }
 0x3b2   : > { %v3110_v43 = vpop.permute.xlu0 %3109  ;;  %v3098_v46 = vpop.permute.xlu1 %3097  ;;  %v8867_v50 = vld [vmem:[%s10074_s3 + $0xc0] sm:$0xff] }
 0x3b3   : > { %v3179_v17 = vmul.f32 %v3098_v46, %v8491_v42  ;;  %v3182_v34 = vmul.f32 %v3110_v43, %v8488_v12 }
 0x3b5   : > { %3260 = vrot.lane.b32.xlu0 %v3180_v53, %s6805_s14  ;;  %3258 = vrot.lane.b32.xlu1 %v3179_v17, %s6805_s14 }
 0x3b6   : > { %v3118_v51 = vpop.permute.xlu0 %3117  ;;  %v3106_v30 = vpop.permute.xlu1 %3105 }
 0x3b7   : > { %v3181_v13 = vmul.f32 %v3106_v30, %v8494_v26  ;;  %v3184_v33 = vmul.f32 %v3118_v51, %v8499_v56 }
 0x3b9   : > { %3264 = vrot.lane.b32.xlu0 %v3182_v34, %s6805_s14  ;;  %3262 = vrot.lane.b32.xlu1 %v3181_v13, %s6805_s14 }
 0x3ba   : > { %v3126_v16 = vpop.permute.xlu0 %3125  ;;  %v3114_v37 = vpop.permute.xlu1 %3113 }
 0x3bb   : > { %v3183_v42 = vmul.f32 %v3114_v37, %v8507_v21  ;;  %v3186_v12 = vmul.f32 %v3126_v16, %v8504_v62 }
 0x3bd   : > { %3268 = vrot.lane.b32.xlu0 %v3184_v33, %s6805_s14  ;;  %3266 = vrot.lane.b32.xlu1 %v3183_v42, %s6805_s14 }
 0x3be   : > { %v3134_v61 = vpop.permute.xlu0 %3133  ;;  %v3122_v19 = vpop.permute.xlu1 %3121 }
 0x3bf   : > { %v3185_v26 = vmul.f32 %v3122_v19, %v8510_v31  ;;  %v3188_v56 = vmul.f32 %v3134_v61, %v8515_v47  ;;  %v3510_v47 = vrot.slane %v6389_v49, 4 }
 0x3c1   : > { %3272 = vrot.lane.b32.xlu0 %v3186_v12, %s6805_s14  ;;  %3270 = vrot.lane.b32.xlu1 %v3185_v26, %s6805_s14  ;;  %v8756_v17 = vsel %vm798_vm2, %v3510_v47, %v3511_v3  ;;  %v8832_v47 = vld [vmem:[%s10074_s3 + $0x80] sm:$0xff] }
 0x3c2   : > { %v3142_v32 = vpop.permute.xlu0 %3141  ;;  %v3130_v2 = vpop.permute.xlu1 %3129 }
 0x3c3   : > { %v3187_v21 = vmul.f32 %v3130_v2, %v8523_v45  ;;  %v3190_v62 = vmul.f32 %v3142_v32, %v8520_v54  ;;  %v6393_v54 = vpop.f32.mrb[120].mxu0 }
 0x3c4   : > { %v3469_v53 = vpop.f32.mrb[121].mxu0  ;;  %v3517_v37 = vrot.slane %v6393_v54, 4 }
 0x3c5   : > { %3276 = vrot.lane.b32.xlu0 %v3188_v56, %s6805_s14  ;;  %3274 = vrot.lane.b32.xlu1 %v3187_v21, %s6805_s14  ;;  %v3513_v51 = vrot.slane %v3469_v53, 4  ;;  %v6394_v30 = vpop.f32.mrb[122].mxu0 }
 0x3c6   : > { %v3150_v36 = vpop.permute.xlu0 %3149  ;;  %v3138_v14 = vpop.permute.xlu1 %3137  ;;  %v3519_v42 = vrot.slane %v6394_v30, 4  ;;  %v8899_v30 = vld [vmem:[%s10074_s3 + $0xf0] sm:$0xff] }
 0x3c7   : > { %v3189_v31 = vmul.f32 %v3138_v14, %v8526_v44  ;;  %v3192_v45 = vmul.f32 %v3150_v36, %v8543_v60  ;;  %v10295_v44 = vrot.slane %v8528_v0, 4  ;;  %v3472_v34 = vpop.f32.mrb[123].mxu0  ;;  %v8762_v13 = vsel %vm798_vm2, %v3511_v3, %v3513_v51 }
 0x3c8   : > { %v3515_v33 = vrot.slane %v3472_v34, 4  ;;  %v8778_v2 = vsel %vm798_vm2, %v3517_v37, %v3519_v42  ;;  %v10120_v34 = vmov 6  }
 0x3c9   : > { %3280 = vrot.lane.b32.xlu0 %v3190_v62, %s6805_s14  ;;  %3278 = vrot.lane.b32.xlu1 %v3189_v31, %s6805_s14  ;;  %v3035_v43 = vsel %vm798_vm2, %v10295_v44, 0.0 }
 0x3ca   : > { %v3146_v27 = vpop.permute.xlu1 %3145  ;;  %v3158_v28 = vpop.permute.xlu0 %3157  ;;  %v8767_v12 = vsel %vm798_vm2, %v3515_v33, %v3517_v37  ;;  %v8775_v32 = vsel %vm798_vm2, %v3513_v51, %v3515_v33 }
 0x3cb   : > { %v3191_v39 = vmul.f32 %v3146_v27, %v8553_v38  ;;  %v3194_v60 = vmul.f32 %v3158_v28, %v3035_v43  ;;  %v8807_v27 = vld [vmem:[%s10074_s3 + $0x78] sm:$0xff]  ;;  %v8858_v28 = vld [vmem:[%s10074_s3 + $0xb0] sm:$0xff] }
 0x3cc   : > { %v8878_v43 = vld [vmem:[%s10074_s3 + $0xd0] sm:$0xff] }
 0x3cd   : > { %3284 = vrot.lane.b32.xlu0 %v3192_v45, %s6805_s14  ;;  %3282 = vrot.lane.b32.xlu1 %v3191_v39, %s6805_s14  ;;  %v8838_v45 = vld [vmem:[%s10074_s3 + $0xa8] sm:$0xff]  ;;  %v8844_v39 = vld [vmem:[%s10074_s3 + $0x90] sm:$0xff] }
 0x3ce   : > { %v3154_v46 = vpop.permute.xlu1 %3153 }
 0x3cf   : > { %v3193_v38 = vmul.f32 %v3154_v46, %v8558_v48  ;;  %v6397_v48 = vpop.f32.mrb[124].mxu0 }
 0x3d0   : > { %v3485_v61 = vpop.f32.mrb[125].mxu0  ;;  %v3525_v21 = vrot.slane %v6397_v48, 4 }
 0x3d1   : > { %3288 = vrot.lane.b32.xlu0 %v3194_v60, %s6805_s14  ;;  %3286 = vrot.lane.b32.xlu1 %v3193_v38, %s6805_s14  ;;  %v3521_v19 = vrot.slane %v3485_v61, 4  ;;  %v8780_v56 = vpop.f32.mrb[126].mxu0  ;;  %v8889_v60 = vld [vmem:[%s10074_s3 + $0xe0] sm:$0xff] }
 0x3d2   : > { %v3162_v0 = vpop.permute.xlu1 %3161  ;;  %v10119_v36 = vrot.slane %v8780_v56, 4  ;;  %v3488_v14 = vpop.f32.mrb[127].mxu0 }
 0x3d3   : > { %v3195_v16 = vmul.f32 0.0, %v3162_v0  ;;  %v8772_v26 = vsel %vm798_vm2, %v3519_v42, %v3521_v19  ;;  %v3523_v62 = vrot.slane %v3488_v14, 4 }
 0x3d4   : > { %v8796_v59 = vsel %vm798_vm2, %v3525_v21, %v10119_v36 }
 0x3d5   : > { %3541 = vperm.xlu0 %6584, %v8371_v10   ;;  %3290 = vrot.lane.b32.xlu1 %v3195_v16, %s6805_s14  ;;  %v8786_v31 = vsel %vm798_vm2, %v3523_v62, %v3525_v21  ;;  %v8791_v49 = vsel %vm798_vm2, %v3521_v19, %v3523_v62 }
 0x3d9   : > { %3553 = vperm.xlu0 %6584, %v8407_v18   ;;  %3545 = vperm.xlu1 %6585, %v8365_v24  }
 0x3dd   : > { %3561 = vperm.xlu0 %6584, %v8422_v58   ;;  %3549 = vperm.xlu1 %6585, %v8386_v23  }
 0x3e1   : > { %3569 = vperm.xlu0 %6584, %v8443_v7   ;;  %3557 = vperm.xlu1 %6585, %v8380_v40  }
 0x3e5   : > { %3577 = vperm.xlu0 %6584, %v8458_v41   ;;  %3565 = vperm.xlu1 %6585, %v8401_v22   ;;  %v8814_v22 = vld [vmem:[%s10074_s3 + $0x88] sm:$0xff] }
 0x3e9   : > { %3585 = vperm.xlu0 %6584, %v8474_v4   ;;  %3573 = vperm.xlu1 %6585, %v8416_v1  }
 0x3ed   : > { %3593 = vperm.xlu0 %6584, %v8484_v57   ;;  %3581 = vperm.xlu1 %6585, %v8437_v35   ;;  %v8820_v35 = vld [vmem:[%s10074_s3 + $0x70] sm:$0xff]  ;;  %v8826_v57 = vld [vmem:[%s10074_s3 + $0x98] sm:$0xff] }
 0x3f1   : > { %3601 = vperm.xlu0 %6584, %v8807_v27   ;;  %3589 = vperm.xlu1 %6585, %v8452_v55  }
 0x3f5   : > { %3609 = vperm.xlu0 %6584, %v8814_v22   ;;  %3597 = vperm.xlu1 %6585, %v8820_v35  }
 0x3f9   : > { %3617 = vperm.xlu0 %6584, %v8826_v57   ;;  %3605 = vperm.xlu1 %6585, %v8832_v47  }
 0x3fd   : > { %3625 = vperm.xlu0 %6584, %v8838_v45   ;;  %3613 = vperm.xlu1 %6585, %v8844_v39  }
 0x401   : > { %3633 = vperm.xlu0 %6584, %v8534_v29   ;;  %3621 = vperm.xlu1 %6585, %v8851_v11  }
 0x405   : > { %3641 = vperm.xlu0 %6584, %v8549_v5   ;;  %3629 = vperm.xlu1 %6585, %v8858_v28  }
 0x407   : > { %v8861_v3 = vpop.permute.xlu0 %3228  ;;  %v8870_v54 = vpop.permute.xlu1 %3230 }
 0x409   : > { %3649 = vperm.xlu0 %6584, %v8568_v6   ;;  %3637 = vperm.xlu1 %6585, %v8867_v50  }
 0x40b   : > { %v8872_v44 = vpop.permute.xlu0 %3232 }
 0x40d   : > { %3657 = vperm.xlu0 %6584, %v8578_v15   ;;  %3645 = vperm.xlu1 %6585, %v8878_v43  }
 0x40f   : > { %v8881_v46 = vpop.permute.xlu0 %3236  ;;  %v8883_v53 = vpop.permute.xlu1 %3234 }
 0x410   : > { %10296 = vst [vmem:[#allocation162_spill] sm:$0xff] %v8883_v53 }
 0x411   : > { %3665 = vperm.xlu0 %6584, %v8588_v20   ;;  %3653 = vperm.xlu1 %6585, %v8889_v60  }
 0x413   : > { %v8892_v38 = vpop.permute.xlu0 %3240  ;;  %v8894_v51 = vpop.permute.xlu1 %3238 }
 0x414   : > { %10297 = vst [vmem:[#allocation163_spill] sm:$0xff] %v8892_v38  ;;  %10298 = vst [vmem:[#allocation164_spill] sm:$0xff] %v8894_v51 }
 0x415   : > { %3661 = vperm.xlu1 %6585, %v8899_v30   ;;  %6586 = vset.pattern.permute.xlu0 %v10120_v34 }
 0x417   : > { %v8903_v0 = vpop.permute.xlu0 %3244  ;;  %v8905_v16 = vpop.permute.xlu1 %3242 }
 0x418   : > { %10299 = vst [vmem:[#allocation165_spill] sm:$0xff] %v8903_v0  ;;  %10300 = vst [vmem:[#allocation166_spill] sm:$0xff] %v8905_v16 }
 0x419   : > { %6587 = vset.pattern.permute.xlu1 %v10120_v34 }
 0x41b   : > { %v8908_v37 = vpop.permute.xlu0 %3248  ;;  %v8910_v33 = vpop.permute.xlu1 %3246 }
 0x41c   : > { %10301 = vst [vmem:[#allocation167_spill] sm:$0xff] %v8908_v37  ;;  %10302 = vst [vmem:[#allocation168_spill] sm:$0xff] %v8910_v33 }
 0x41f   : > { %v8912_v42 = vpop.permute.xlu0 %3252  ;;  %v8914_v48 = vpop.permute.xlu1 %3250 }
 0x420   : > { %10303 = vst [vmem:[#allocation169_spill] sm:$0xff] %v8912_v42  ;;  %10304 = vst [vmem:[#allocation170_spill] sm:$0xff] %v8914_v48 }
 0x423   : > { %v8916_v61 = vpop.permute.xlu0 %3256  ;;  %v8918_v19 = vpop.permute.xlu1 %3254 }
 0x424   : > { %10305 = vst [vmem:[#allocation171_spill] sm:$0xff] %v8916_v61  ;;  %10306 = vst [vmem:[#allocation172_spill] sm:$0xff] %v8918_v19 }
 0x427   : > { %v8920_v21 = vpop.permute.xlu0 %3260  ;;  %v8922_v14 = vpop.permute.xlu1 %3258 }
 0x428   : > { %10307 = vst [vmem:[#allocation173_spill] sm:$0xff] %v8920_v21  ;;  %10308 = vst [vmem:[#allocation174_spill] sm:$0xff] %v8922_v14 }
 0x42b   : > { %v8924_v62 = vpop.permute.xlu0 %3264  ;;  %v8926_v36 = vpop.permute.xlu1 %3262 }
 0x42c   : > { %10309 = vst [vmem:[#allocation175_spill] sm:$0xff] %v8924_v62  ;;  %10310 = vst [vmem:[#allocation176_spill] sm:$0xff] %v8926_v36 }
 0x42f   : > { %v8928_v34 = vpop.permute.xlu0 %3268  ;;  %v8930_v63 = vpop.permute.xlu1 %3266 }
 0x430   : > { %10311 = vst [vmem:[#allocation177_spill] sm:$0xff] %v8928_v34  ;;  %10312 = vst [vmem:[#allocation178_spill] sm:$0xff] %v8930_v63 }
 0x433   : > { %v8932_v8 = vpop.permute.xlu1 %3270  ;;  %v8934_v42 = vpop.permute.xlu0 %3272 }
 0x434   : > { %10313 = vst [vmem:[#allocation179_spill] sm:$0xff] %v8932_v8  ;;  %10314 = vst [vmem:[#allocation180_spill] sm:$0xff] %v8934_v42 }
 0x437   : > { %v8936_v48 = vpop.permute.xlu1 %3274  ;;  %v8938_v61 = vpop.permute.xlu0 %3276 }
 0x438   : > { %10315 = vst [vmem:[#allocation181_spill] sm:$0xff] %v8936_v48  ;;  %10316 = vst [vmem:[#allocation182_spill] sm:$0xff] %v8938_v61 }
 0x43a   : > { %v6437_v36 = vpop.f32.mrb[128].mxu0 }
 0x43b   : > { %v8940_v19 = vpop.permute.xlu1 %3278  ;;  %v8942_v21 = vpop.permute.xlu0 %3280 }
 0x43c   : > { %10317 = vst [vmem:[#allocation183_spill] sm:$0xff] %v8940_v19  ;;  %10318 = vst [vmem:[#allocation184_spill] sm:$0xff] %v8942_v21  ;;  %v4361_v34 = vpop.f32.mrb[129].mxu0 }
 0x43d   : > { %v6403_v62 = vpop.f32.mrb[96].mxu1  ;;  %v6438_v63 = vpop.f32.mrb[130].mxu0 }
 0x43e   : > { %v3899_v33 = vpop.f32.mrb[97].mxu1  ;;  %v4363_v8 = vpop.f32.mrb[131].mxu0 }
 0x43f   : > { %v8944_v14 = vpop.permute.xlu1 %3282  ;;  %v6404_v37 = vpop.f32.mrb[98].mxu1 }
 0x440   : > { %10319 = vst [vmem:[#allocation185_spill] sm:$0xff] %v8944_v14  ;;  %v3901_v16 = vpop.f32.mrb[99].mxu1  ;;  %v8946_v0 = vpop.permute.xlu0 %3284 }
 0x441   : > { %10320 = vst [vmem:[#allocation186_spill] sm:$0xff] %v8946_v0 }
 0x442   : > { %v6441_v61 = vpop.f32.mrb[132].mxu0 }
 0x443   : > { %v8948_v42 = vpop.permute.xlu1 %3286  ;;  %v4373_v19 = vpop.f32.mrb[133].mxu0 }
 0x444   : > { %10321 = vst [vmem:[#allocation187_spill] sm:$0xff] %v8948_v42  ;;  %v6442_v21 = vpop.f32.mrb[134].mxu0  ;;  %v8950_v62 = vpop.permute.xlu0 %3288 }
 0x445   : > { %v6407_v48 = vpop.f32.mrb[100].mxu1  ;;  %v4375_v14 = vpop.f32.mrb[135].mxu0  ;;  %10322 = vst [vmem:[#allocation188_spill] sm:$0xff] %v8950_v62  ;;  %v10330_v62 = vmov 7  }
 0x446   : > { %v3911_v51 = vpop.f32.mrb[101].mxu1 }
 0x447   : > { %v6408_v38 = vpop.f32.mrb[102].mxu1  ;;  %v8952_v36 = vpop.permute.xlu1 %3290 }
 0x448   : > { %v3913_v53 = vpop.f32.mrb[103].mxu1  ;;  %10323 = vst [vmem:[#allocation189_spill] sm:$0xff] %v8952_v36 }
 0x44a   : > { %v6445_v63 = vpop.f32.mrb[136].mxu0 }
 0x44b   : > { %v4385_v8 = vpop.f32.mrb[137].mxu0 }
 0x44c   : > { %v6446_v33 = vpop.f32.mrb[138].mxu0 }
 0x44d   : > { %v6411_v34 = vpop.f32.mrb[104].mxu1  ;;  %v4387_v51 = vpop.f32.mrb[139].mxu0 }
 0x44e   : > { %v3923_v16 = vpop.f32.mrb[105].mxu1 }
 0x44f   : > { %v6412_v37 = vpop.f32.mrb[106].mxu1 }
 0x450   : > { %v3925_v42 = vpop.f32.mrb[107].mxu1 }
 0x452   : > { %v6449_v21 = vpop.f32.mrb[140].mxu0 }
 0x453   : > { %v4397_v34 = vpop.f32.mrb[141].mxu0 }
 0x454   : > { %v3542_v0 = vpop.permute.xlu0 %3541  ;;  %v6450_v16 = vpop.f32.mrb[142].mxu0 }
 0x455   : > { %v3668_v48 = vmul.f32 %v3542_v0, %v8756_v17  ;;  %v6415_v19 = vpop.f32.mrb[108].mxu1  ;;  %v4399_v33 = vpop.f32.mrb[143].mxu0 }
 0x456   : > { %v3935_v14 = vpop.f32.mrb[109].mxu1 }
 0x457   : > { %3732 = vrot.lane.b32.xlu1 %v3668_v48, %s6805_s14  ;;  %v6416_v63 = vpop.f32.mrb[110].mxu1 }
 0x458   : > { %v3554_v38 = vpop.permute.xlu0 %3553  ;;  %v3546_v53 = vpop.permute.xlu1 %3545 }
 0x459   : > { %v3669_v61 = vmul.f32 %v3546_v53, %v8762_v13  ;;  %v3671_v42 = vmul.f32 %v3554_v38, %v8767_v12  ;;  %v3937_v0 = vpop.f32.mrb[111].mxu1 }
 0x45a   : > { %v6453_v19 = vpop.f32.mrb[144].mxu0 }
 0x45b   : > { %3734 = vrot.lane.b32.xlu0 %v3669_v61, %s6805_s14  ;;  %v4409_v14 = vpop.f32.mrb[145].mxu0 }
 0x45c   : > { %v3562_v8 = vpop.permute.xlu0 %3561  ;;  %v3550_v37 = vpop.permute.xlu1 %3549 }
 0x45d   : > { %v3670_v17 = vmul.f32 %v3550_v37, %v8775_v32  ;;  %v3673_v51 = vmul.f32 %v3562_v8, %v8772_v26  ;;  %v6419_v61 = vpop.f32.mrb[112].mxu1  ;;  %v6454_v32 = vpop.f32.mrb[146].mxu0 }
 0x45e   : > { %v3947_v21 = vpop.f32.mrb[113].mxu1  ;;  %v4411_v26 = vpop.f32.mrb[147].mxu0 }
 0x45f   : > { %3738 = vrot.lane.b32.xlu0 %v3671_v42, %s6805_s14  ;;  %3736 = vrot.lane.b32.xlu1 %v3670_v17, %s6805_s14  ;;  %v6420_v12 = vpop.f32.mrb[114].mxu1 }
 0x460   : > { %v3570_v13 = vpop.permute.xlu0 %3569  ;;  %v3558_v48 = vpop.permute.xlu1 %3557 }
 0x461   : > { %v3672_v53 = vmul.f32 %v3558_v48, %v8778_v2  ;;  %v3675_v63 = vmul.f32 %v3570_v13, %v8786_v31  ;;  %v3949_v37 = vpop.f32.mrb[115].mxu1  ;;  %v10324_v2 = vrot.slane %v8780_v56, 4 }
 0x463   : > { %3742 = vrot.lane.b32.xlu0 %v3673_v51, %s6805_s14  ;;  %3740 = vrot.lane.b32.xlu1 %v3672_v53, %s6805_s14  ;;  %v3539_v8 = vsel %vm798_vm2, %v10324_v2, 0.0  ;;  %v6457_v51 = vpop.f32.mrb[148].mxu0 }
 0x464   : > { %v3578_v38 = vpop.permute.xlu0 %3577  ;;  %v3566_v34 = vpop.permute.xlu1 %3565 }
 0x465   : > { %v3674_v16 = vmul.f32 %v3566_v34, %v8791_v49  ;;  %v3677_v0 = vmul.f32 %v3578_v38, %v3539_v8  ;;  %v6423_v48 = vpop.f32.mrb[116].mxu1  ;;  %v4421_v13 = vpop.f32.mrb[149].mxu0 }
 0x466   : > { %v3959_v31 = vpop.f32.mrb[117].mxu1  ;;  %v6458_v53 = vpop.f32.mrb[150].mxu0 }
 0x467   : > { %3746 = vrot.lane.b32.xlu0 %v3675_v63, %s6805_s14  ;;  %3744 = vrot.lane.b32.xlu1 %v3674_v16, %s6805_s14  ;;  %v6424_v49 = vpop.f32.mrb[118].mxu1  ;;  %v4423_v14 = vpop.f32.mrb[151].mxu0 }
 0x468   : > { %v3586_v42 = vpop.permute.xlu0 %3585  ;;  %v3574_v17 = vpop.permute.xlu1 %3573 }
 0x469   : > { %v3676_v33 = vmul.f32 %v3574_v17, %v8796_v59  ;;  %v3679_v19 = vmul.f32 0.0, %v3586_v42  ;;  %v3961_v21 = vpop.f32.mrb[119].mxu1 }
 0x46b   : > { %3750 = vrot.lane.b32.xlu0 %v3677_v0, %s6805_s14  ;;  %3748 = vrot.lane.b32.xlu1 %v3676_v33, %s6805_s14  ;;  %v8994_v42 = vpop.f32.mrb[152].mxu0 }
 0x46c   : > { %v3582_v61 = vpop.permute.xlu1 %3581  ;;  %v3594_v12 = vpop.permute.xlu0 %3593  ;;  %v4471_v48 = vrot.slane %v8994_v42, 4  ;;  %v6725_v42 = vld [vmem:[%s10074_s3 + $0x50] sm:$0xff] }
 0x46d   : > { %v3678_v56 = vmul.f32 0.0, %v3582_v61  ;;  %v3681_v32 = vmul.f32 0.0, %v3594_v12  ;;  %v8978_v34 = vpop.f32.mrb[120].mxu1  ;;  %v4433_v0 = vpop.f32.mrb[153].mxu0 }
 0x46e   : > { %v8982_v63 = vpop.f32.mrb[121].mxu1  ;;  %v9000_v33 = vpop.f32.mrb[154].mxu0  ;;  %v6726_v0 = vld [vmem:[%s10074_s3 + $0x40] sm:$0xff] }
 0x46f   : > { %3754 = vrot.lane.b32.xlu0 %v3679_v19, %s6805_s14  ;;  %3752 = vrot.lane.b32.xlu1 %v3678_v56, %s6805_s14  ;;  %v8986_v26 = vpop.f32.mrb[122].mxu1  ;;  %v4435_v51 = vpop.f32.mrb[155].mxu0 }
 0x470   : > { %v3590_v59 = vpop.permute.xlu1 %3589  ;;  %v8988_v2 = vpop.f32.mrb[123].mxu1  ;;  %v4470_v13 = vrot.slane %v4435_v51, 4 }
 0x471   : > { %v3680_v38 = vmul.f32 0.0, %v3590_v59 }
 0x472   : > { %v9012_v53 = vsel %vm798_vm2, %v4470_v13, %v4471_v48 }
 0x473   : > { %3758 = vrot.lane.b32.xlu0 %v3681_v32, %s6805_s14  ;;  %3756 = vrot.lane.b32.xlu1 %v3680_v38, %s6805_s14  ;;  %v9007_v49 = vpop.f32.mrb[156].mxu0 }
 0x474   : > { %v3598_v16 = vpop.permute.xlu1 %3597  ;;  %v4448_v61 = vpop.f32.mrb[157].mxu0 }
 0x475   : > { %v3682_v37 = vmul.f32 0.0, %v3598_v16  ;;  %v8992_v8 = vpop.f32.mrb[124].mxu1  ;;  %v4475_v19 = vrot.slane %v4448_v61, 4  ;;  %v9015_v56 = vpop.f32.mrb[158].mxu0  ;;  %v6728_v61 = vld [vmem:[%s10074_s3 + $0x58] sm:$0xff] }
 0x476   : > { %v8996_v17 = vpop.f32.mrb[125].mxu1  ;;  %v4451_v14 = vpop.f32.mrb[159].mxu0 }
 0x477   : > { %4003 = vperm.xlu0 %6586, %v8371_v10   ;;  %3760 = vrot.lane.b32.xlu1 %v3682_v37, %s6805_s14  ;;  %v9003_v31 = vpop.f32.mrb[126].mxu1  ;;  %v4477_v12 = vrot.slane %v4451_v14, 4 }
 0x478   : > { %v9027_v59 = vpop.f32.mrb[127].mxu1  ;;  %v9050_v38 = vpop.permute.xlu1 %3605 }
 0x47b   : > { %4015 = vperm.xlu0 %6586, %v8407_v18   ;;  %4007 = vperm.xlu1 %6587, %v8365_v24   ;;  %v10123_v24 = vmov 7  }
 0x47c   : > { %v9056_v37 = vpop.permute.xlu1 %3613 }
 0x47f   : > { %4019 = vperm.xlu0 %6586, %v8380_v40   ;;  %4011 = vperm.xlu1 %6587, %v8386_v23   ;;  %v4473_v40 = vrot.slane %v9000_v33, 4 }
 0x481   : > { %v9019_v21 = vsel %vm798_vm2, %v4473_v40, %v4475_v19  ;;  %v9080_v33 = vsel %vm798_vm2, %v4471_v48, %v4473_v40  ;;  %v6729_v40 = vld [vmem:[%s10074_s3 + $0x28] sm:$0xff] }
 0x483   : > { %4031 = vperm.xlu0 %6586, %v8443_v7   ;;  %6588 = vset.pattern.permute.xlu1 %v10123_v24 }
 0x484   : > { %4492 = vperm.xlu1 %6588, %v8371_v10   ;;  %v9024_v10 = vsel %vm798_vm2, %v4475_v19, %v4477_v12  ;;  %v6730_v19 = vld [vmem:[%s10074_s3 + $0x68] sm:$0xff] }
 0x487   : > { %4035 = vperm.xlu0 %6586, %v8416_v1   ;;  %v10325_v1 = vmov 6  }
 0x488   : > { %4500 = vperm.xlu1 %6588, %v8386_v23   ;;  %v6723_v23 = vld [vmem:[%s10074_s3 + $0x30] sm:$0xff] }
 0x48b   : > { %4047 = vperm.xlu0 %6586, %v8474_v4   ;;  %v9041_v4 = vpop.permute.xlu0 %3601 }
 0x48c   : > { %4504 = vperm.xlu1 %6588, %v8407_v18   ;;  %v4479_v18 = vrot.slane %v9007_v49, 4  ;;  %v6727_v49 = vld [vmem:[%s10074_s3 + $0x8] sm:$0xff] }
 0x48f   : > { %4051 = vperm.xlu0 %6586, %v8452_v55   ;;  %v9039_v55 = vsel %vm798_vm2, %v4477_v12, %v4479_v18  ;;  %v9048_v32 = vpop.permute.xlu0 %3609 }
 0x490   : > { %6589 = vset.pattern.permute.xlu1 %v10325_v1 }
 0x491   : > { %4023 = vperm.xlu1 %6589, %v8422_v58   ;;  %v6724_v58 = vld [vmem:[%s10074_s3 + $0x20] sm:$0xff] }
 0x493   : > { %4063 = vperm.xlu0 %6586, %v8807_v27   ;;  %v9054_v16 = vpop.permute.xlu0 %3617 }
 0x495   : > { %4027 = vperm.xlu1 %6589, %v6723_v23  }
 0x497   : > { %4067 = vperm.xlu0 %6586, %v8832_v47  }
 0x499   : > { %6590 = vset.pattern.permute.xlu1 %v10123_v24 }
 0x49a   : > { %4508 = vperm.xlu1 %6590, %v6724_v58  }
 0x49b   : > { %4079 = vperm.xlu0 %6586, %v8826_v57  }
 0x49e   : > { %4516 = vperm.xlu1 %6590, %v6723_v23   ;;  %v6731_v23 = vld [vmem:[%s10074_s3 + $0x48] sm:$0xff] }
 0x49f   : > { %4083 = vperm.xlu0 %6586, %v8851_v11  }
 0x4a2   : > { %4520 = vperm.xlu1 %6590, %v8443_v7   ;;  %v9065_v7 = vpop.permute.xlu0 %3625 }
 0x4a3   : > { %4095 = vperm.xlu0 %6586, %v8534_v29   ;;  %v9067_v29 = vpop.permute.xlu1 %3621 }
 0x4a6   : > { %6591 = vset.pattern.permute.xlu1 %v10325_v1 }
 0x4a7   : > { %4099 = vperm.xlu0 %6586, %v8867_v50   ;;  %4039 = vperm.xlu1 %6591, %v8458_v41   ;;  %v9074_v41 = vpop.permute.xlu0 %3633 }
 0x4ab   : > { %4111 = vperm.xlu0 %6586, %v8568_v6   ;;  %4043 = vperm.xlu1 %6591, %v6725_v42   ;;  %v9076_v6 = vpop.permute.xlu1 %3629  ;;  %v9083_v51 = vpop.permute.xlu0 %3641 }
 0x4af   : > { %4115 = vperm.xlu0 %6586, %v8889_v60   ;;  %6592 = vset.pattern.permute.xlu1 %v10123_v24  ;;  %v9085_v13 = vpop.permute.xlu1 %3637  ;;  %v9106_v14 = vpop.permute.xlu0 %3649 }
 0x4b0   : > { %4524 = vperm.xlu1 %6592, %v6726_v0  }
 0x4b3   : > { %4127 = vperm.xlu0 %6586, %v8588_v20   ;;  %v10122_v20 = vrot.slane %v9015_v56, 4  ;;  %v9108_v12 = vpop.permute.xlu1 %3645 }
 0x4b4   : > { %4532 = vperm.xlu1 %6592, %v6725_v42   ;;  %v6732_v42 = vld [vmem:[%s10074_s3 + $0x60] sm:$0xff] }
 0x4b5   : > { %v9097_v48 = vsel %vm798_vm2, %v4479_v18, %v10122_v20  ;;  %v9114_v18 = vpop.permute.xlu0 %3657 }
 0x4b7   : > { %6602 = vset.pattern.permute.xlu0 %v10123_v24  ;;  %v9116_v58 = vpop.permute.xlu1 %3653 }
 0x4b8   : > { %4496 = vperm.xlu0 %6602, %v6727_v49   ;;  %4536 = vperm.xlu1 %6592, %v6728_v61  }
 0x4b9   : > { %v9123_v0 = vpop.permute.xlu0 %3665 }
 0x4bb   : > { %v9125_v49 = vpop.permute.xlu1 %3661 }
 0x4bc   : > { %4512 = vperm.xlu0 %6602, %v6729_v40   ;;  %6593 = vset.pattern.permute.xlu1 %v10325_v1 }
 0x4bd   : > { %4055 = vperm.xlu1 %6593, %v6730_v19  }
 0x4c0   : > { %4528 = vperm.xlu0 %6602, %v6731_v23  }
 0x4c1   : > { %4059 = vperm.xlu1 %6593, %v8820_v35  }
 0x4c4   : > { %4544 = vperm.xlu0 %6602, %v6730_v19  }
 0x4c5   : > { %6594 = vset.pattern.permute.xlu1 %v10123_v24 }
 0x4c6   : > { %4540 = vperm.xlu1 %6594, %v6732_v42  }
 0x4c8   : > { %4560 = vperm.xlu0 %6602, %v8814_v22  }
 0x4c9   : > { %v9129_v61 = vpop.permute.xlu1 %3732 }
 0x4ca   : > { %4548 = vperm.xlu1 %6594, %v8820_v35  }
 0x4cc   : > { %4576 = vperm.xlu0 %6602, %v8838_v45  }
 0x4cd   : > { %v9131_v40 = vpop.permute.xlu0 %3734 }
 0x4ce   : > { %4552 = vperm.xlu1 %6594, %v8807_v27  }
 0x4d0   : > { %4592 = vperm.xlu0 %6602, %v8549_v5  }
 0x4d1   : > { %v9135_v19 = vpop.permute.xlu1 %3736  ;;  %v9139_v23 = vpop.permute.xlu0 %3738 }
 0x4d2   : > { %6595 = vset.pattern.permute.xlu1 %v10325_v1 }
 0x4d3   : > { %4071 = vperm.xlu1 %6595, %v8814_v22  }
 0x4d4   : > { %4608 = vperm.xlu0 %6602, %v8578_v15  }
 0x4d5   : > { %v9143_v35 = vpop.permute.xlu1 %3740  ;;  %v9145_v42 = vpop.permute.xlu0 %3742 }
 0x4d7   : > { %4075 = vperm.xlu1 %6595, %v8844_v39  }
 0x4d9   : > { %v9149_v5 = vpop.permute.xlu1 %3744  ;;  %v9151_v27 = vpop.permute.xlu0 %3746 }
 0x4db   : > { %6596 = vset.pattern.permute.xlu1 %v10123_v24 }
 0x4dc   : > { %4556 = vperm.xlu1 %6596, %v8832_v47  }
 0x4dd   : > { %v9154_v22 = vpop.permute.xlu1 %3748  ;;  %v9157_v15 = vpop.permute.xlu0 %3750 }
 0x4de   : > { %10326 = vst [vmem:[#allocation190_spill] sm:$0xff] %v9157_v15 }
 0x4e0   : > { %4564 = vperm.xlu1 %6596, %v8844_v39  }
 0x4e1   : > { %v9161_v20 = vpop.permute.xlu1 %3752  ;;  %v9163_v24 = vpop.permute.xlu0 %3754 }
 0x4e2   : > { %10327 = vst [vmem:[#allocation191_spill] sm:$0xff] %v9161_v20  ;;  %10328 = vst [vmem:[#allocation192_spill] sm:$0xff] %v9163_v24 }
 0x4e4   : > { %4568 = vperm.xlu1 %6596, %v8826_v57  }
 0x4e5   : > { %v9166_v47 = vpop.permute.xlu1 %3756  ;;  %v9169_v39 = vpop.permute.xlu0 %3758 }
 0x4e6   : > { %10329 = vst [vmem:[#allocation193_spill] sm:$0xff] %v9166_v47  ;;  %10331 = vst [vmem:[#allocation194_spill] sm:$0xff] %v9169_v39  ;;  %v6733_v47 = vld [vmem:[%s10074_s3 + $0xb8] sm:$0xff] }
 0x4e8   : > { %6597 = vset.pattern.permute.xlu1 %v10325_v1 }
 0x4e9   : > { %4087 = vperm.xlu1 %6597, %v8838_v45   ;;  %v9172_v57 = vpop.permute.xlu1 %3760 }
 0x4ea   : > { %10332 = vst [vmem:[#allocation195_spill] sm:$0xff] %v9172_v57 }
 0x4ed   : > { %4091 = vperm.xlu1 %6597, %v8858_v28  }
 0x4f1   : > { %6598 = vset.pattern.permute.xlu1 %v10330_v62 }
 0x4f2   : > { %4572 = vperm.xlu1 %6598, %v8851_v11  }
 0x4f6   : > { %v4004_v36 = vpop.permute.xlu0 %4003  ;;  %4580 = vperm.xlu1 %6598, %v8858_v28   ;;  %v6734_v28 = vld [vmem:[%s10074_s3 + $0xc8] sm:$0xff] }
 0x4f7   : > { %v4130_v45 = vmul.f32 %v4004_v36, %v8982_v63 }
 0x4f9   : > { %4194 = vrot.lane.b32.xlu0 %v4130_v45, %s6805_s14 }
 0x4fa   : > { %v9177_v24 = vpop.permute.xlu0 %4015  ;;  %4584 = vperm.xlu1 %6598, %v6733_v47   ;;  %v9182_v15 = vpop.permute.xlu1 %4007 }
 0x4fe   : > { %v4020_v39 = vpop.permute.xlu0 %4019  ;;  %6599 = vset.pattern.permute.xlu1 %v10325_v1  ;;  %v4012_v11 = vpop.permute.xlu1 %4011 }
 0x4ff   : > { %v4132_v57 = vmul.f32 %v8978_v34, %v4012_v11  ;;  %4103 = vperm.xlu1 %6599, %v6734_v28   ;;  %v4134_v20 = vmul.f32 %v4020_v39, %v8996_v17 }
 0x501   : > { %4198 = vrot.lane.b32.xlu0 %v4132_v57, %s6805_s14 }
 0x502   : > { %v9190_v36 = vpop.permute.xlu0 %4031 }
 0x503   : > { %4107 = vperm.xlu1 %6599, %v8878_v43   ;;  %v4493_v63 = vpop.permute.xlu1 %4492 }
 0x504   : > { %v4619_v47 = vmul.f32 %v4493_v63, %v9012_v53 }
 0x506   : > { %v4036_v45 = vpop.permute.xlu0 %4035  ;;  %4683 = vrot.lane.b32.xlu0 %v4619_v47, %s6805_s14 }
 0x507   : > { %6600 = vset.pattern.permute.xlu1 %v10330_v62  ;;  %v4501_v34 = vpop.permute.xlu1 %4500 }
 0x508   : > { %v4621_v11 = vmul.f32 %v4501_v34, %v9019_v21  ;;  %4588 = vperm.xlu1 %6600, %v8867_v50   ;;  %v6735_v21 = vld [vmem:[%s10074_s3 + $0xd8] sm:$0xff] }
 0x50a   : > { %v9198_v28 = vpop.permute.xlu0 %4047  ;;  %4687 = vrot.lane.b32.xlu0 %v4621_v11, %s6805_s14 }
 0x50b   : > { %v9201_v57 = vpop.permute.xlu1 %4504 }
 0x50c   : > { %4596 = vperm.xlu1 %6600, %v8878_v43   ;;  %v6736_v43 = vld [vmem:[%s10074_s3 + $0xe8] sm:$0xff] }
 0x50e   : > { %v9205_v53 = vpop.permute.xlu0 %4051  ;;  %4202 = vrot.lane.b32.xlu0 %v4134_v20, %s6805_s14 }
 0x510   : > { %4600 = vperm.xlu1 %6600, %v6735_v21   ;;  %v9211_v50 = vpop.permute.xlu1 %4023 }
 0x512   : > { %v9213_v63 = vpop.permute.xlu0 %4063 }
 0x514   : > { %6601 = vset.pattern.permute.xlu1 %v10325_v1  ;;  %v4028_v47 = vpop.permute.xlu1 %4027  ;;  %v10333_v1 = vrot.slane %v9015_v56, 4  ;;  %v4138_v56 = vmul.f32 0.0, %v4036_v45 }
 0x515   : > { %v4136_v17 = vmul.f32 %v8992_v8, %v4028_v47  ;;  %4119 = vperm.xlu1 %6601, %v6736_v43  }
 0x516   : > { %v9220_v20 = vpop.permute.xlu0 %4067  ;;  %v4490_v8 = vsel %vm798_vm2, %v10333_v1, 0.0  ;;  %v6622_v1 = vld [vmem:[%s10076_s5 + $0x10] sm:$0xff]  }
 0x517   : > { %4206 = vrot.lane.b32.xlu0 %v4136_v17, %s6805_s14 }
 0x519   : > { %4123 = vperm.xlu1 %6601, %v8899_v30   ;;  %v4509_v39 = vpop.permute.xlu1 %4508 }
 0x51a   : > { %v4623_v34 = vmul.f32 %v4509_v39, %v9039_v55  ;;  %v9225_v11 = vpop.permute.xlu0 %4079  ;;  %v6620_v55 = vld [vmem:[%s10076_s5] sm:$0xff]  }
 0x51b   : > { %6467 = vmatprep.subr.bf16.mxu1 %v6620_v55 }
 0x51c   : > { %4691 = vrot.lane.b32.xlu0 %v4623_v34, %s6805_s14  ;;  %6468 = vmatpush3.bf16.msra.mxu1 %v6620_v55  ;;  %v6737_v34 = vld [vmem:[%s10074_s3 + $0xf8] sm:$0xff]  ;;  %v4133_v55 = vmul.f32 %v8986_v26, %v9177_v24 }
 0x51d   : > { %6603 = vset.pattern.permute.xlu1 %v10330_v62  ;;  %v4517_v21 = vpop.permute.xlu1 %4516 }
 0x51e   : > { %v4625_v47 = vmul.f32 %v4517_v21, %v4490_v8  ;;  %v9232_v43 = vpop.permute.xlu0 %4083  ;;  %4604 = vperm.xlu1 %6603, %v8889_v60   ;;  %v6621_v60 = vld [vmem:[%s10076_s5 + $0x8] sm:$0xff]  }
 0x51f   : > { %6469 = vmatprep.subr.bf16.mxu1 %v6621_v60 }
 0x520   : > { %4695 = vrot.lane.b32.xlu0 %v4625_v47, %s6805_s14  ;;  %6470 = vmatpush3.bf16.msra.mxu1 %v6621_v60 }
 0x521   : > { %v9239_v17 = vpop.permute.xlu1 %4520  ;;  %6471 = vmatprep.subr.bf16.mxu1 %v6622_v1 }
 0x522   : > { %v9241_v39 = vpop.permute.xlu0 %4095  ;;  %4612 = vperm.xlu1 %6603, %v8899_v30   ;;  %v4131_v30 = vmul.f32 %v9182_v15, %v8988_v2 }
 0x524   : > { %4210 = vrot.lane.b32.xlu0 %v4138_v56, %s6805_s14  ;;  %6472 = vmatpush3.bf16.msra.mxu1 %v6622_v1  ;;  %v6623_v56 = vld [vmem:[%s10076_s5 + $0x18] sm:$0xff]   ;;  %v6625_v1 = vld [vmem:[%s10076_s5 + $0x28] sm:$0xff]  }
 0x525   : > { %6473 = vmatprep.subr.bf16.mxu1 %v6623_v56 }
 0x526   : > { %v9248_v62 = vpop.permute.xlu0 %4099  ;;  %4616 = vperm.xlu1 %6603, %v6737_v34   ;;  %v9253_v45 = vpop.permute.xlu1 %4039  ;;  %v6624_v34 = vld [vmem:[%s10076_s5 + $0x20] sm:$0xff]  }
 0x528   : > { %6474 = vmatpush3.bf16.msra.mxu1 %v6623_v56 }
 0x529   : > { %6475 = vmatprep.subr.bf16.mxu1 %v6624_v34 }
 0x52a   : > { %v9260_v8 = vpop.permute.xlu0 %4111  ;;  %4196 = vrot.lane.b32.xlu1 %v4131_v30, %s6805_s14  ;;  %v4044_v21 = vpop.permute.xlu1 %4043 }
 0x52b   : > { %v4140_v47 = vmul.f32 0.0, %v4044_v21 }
 0x52c   : > { %6476 = vmatpush3.bf16.msra.mxu1 %v6624_v34  ;;  %v4622_v34 = vmul.f32 %v9201_v57, %v9024_v10  ;;  %v4145_v10 = vmul.f32 0.0, %v9213_v63  ;;  %v4626_v63 = vmul.f32 0.0, %v9239_v17 }
 0x52d   : > { %4214 = vrot.lane.b32.xlu0 %v4140_v47, %s6805_s14  ;;  %6477 = vmatprep.subr.bf16.mxu1 %v6625_v1 }
 0x52e   : > { %v9269_v2 = vpop.permute.xlu0 %4115  ;;  %4200 = vrot.lane.b32.xlu1 %v4133_v55, %s6805_s14  ;;  %v3683_v55 = vmul.f32 0.0, %v9041_v4  ;;  %v6627_v4 = vld [vmem:[%s10076_s5 + $0x38] sm:$0xff]  }
 0x52f   : > { %v4525_v15 = vpop.permute.xlu1 %4524 }
 0x530   : > { %v4627_v60 = vmul.f32 0.0, %v4525_v15  ;;  %6478 = vmatpush3.bf16.msra.mxu1 %v6625_v1  ;;  %v6626_v15 = vld [vmem:[%s10076_s5 + $0x30] sm:$0xff]   ;;  %v4135_v1 = vmul.f32 %v9211_v50, %v9027_v59 }
 0x531   : > { %6479 = vmatprep.subr.bf16.mxu1 %v6626_v15 }
 0x532   : > { %v9275_v30 = vpop.permute.xlu0 %4127  ;;  %4699 = vrot.lane.b32.xlu0 %v4627_v60, %s6805_s14 }
 0x533   : > { %v4533_v26 = vpop.permute.xlu1 %4532 }
 0x534   : > { %v4629_v24 = vmul.f32 0.0, %v4533_v26  ;;  %6480 = vmatpush3.bf16.msra.mxu1 %v6626_v15 }
 0x535   : > { %6481 = vmatprep.subr.bf16.mxu1 %v6627_v4 }
 0x536   : > { %4703 = vrot.lane.b32.xlu0 %v4629_v24, %s6805_s14 }
 0x537   : > { %v4497_v21 = vpop.permute.xlu0 %4496  ;;  %v4537_v47 = vpop.permute.xlu1 %4536 }
 0x538   : > { %v4620_v56 = vmul.f32 %v4497_v21, %v9080_v33  ;;  %6482 = vmatpush3.bf16.msra.mxu1 %v6627_v4  ;;  %v4139_v4 = vmul.f32 0.0, %v9253_v45 }
 0x53a   : > { %4685 = vrot.lane.b32.xlu1 %v4620_v56, %s6805_s14  ;;  %3762 = vrot.lane.b32.xlu0 %v3683_v55, %s6805_s14  ;;  %v4137_v55 = vmul.f32 %v9003_v31, %v9190_v36  ;;  %v3685_v31 = vmul.f32 0.0, %v9048_v32 }
 0x53b   : > { %v4513_v60 = vpop.permute.xlu0 %4512 }
 0x53c   : > { %v4056_v26 = vpop.permute.xlu1 %4055  ;;  %v4624_v59 = vmul.f32 %v4513_v60, %v9097_v48  ;;  %v4141_v48 = vmul.f32 0.0, %v9198_v28  ;;  %v3687_v60 = vmul.f32 0.0, %v9054_v16  ;;  %v4149_v28 = vmul.f32 0.0, %v9225_v11 }
 0x53d   : > { %v4143_v33 = vmul.f32 0.0, %v4056_v26 }
 0x53e   : > { %4689 = vrot.lane.b32.xlu1 %v4622_v34, %s6805_s14 }
 0x53f   : > { %v4529_v24 = vpop.permute.xlu0 %4528  ;;  %4220 = vrot.lane.b32.xlu0 %v4143_v33, %s6805_s14 }
 0x540   : > { %v4060_v21 = vpop.permute.xlu1 %4059  ;;  %v4628_v33 = vmul.f32 0.0, %v4529_v24 }
 0x542   : > { %4204 = vrot.lane.b32.xlu1 %v4135_v1, %s6805_s14 }
 0x543   : > { %v4545_v57 = vpop.permute.xlu0 %4544  ;;  %4224 = vrot.lane.b32.xlu0 %v4145_v10, %s6805_s14  ;;  %v4630_v10 = vmul.f32 0.0, %v4537_v47 }
 0x544   : > { %v4632_v56 = vmul.f32 0.0, %v4545_v57 }
 0x545   : > { %v4541_v15 = vpop.permute.xlu1 %4540 }
 0x546   : > { %4208 = vrot.lane.b32.xlu1 %v4137_v55, %s6805_s14  ;;  %v4142_v55 = vmul.f32 0.0, %v9205_v53  ;;  %v4631_v11 = vmul.f32 0.0, %v4541_v15  ;;  %v3684_v15 = vmul.f32 0.0, %v9050_v38 }
 0x547   : > { %4709 = vrot.lane.b32.xlu0 %v4632_v56, %s6805_s14  ;;  %v4561_v45 = vpop.permute.xlu0 %4560 }
 0x548   : > { %v4636_v24 = vmul.f32 0.0, %v4561_v45  ;;  %v4146_v45 = vmul.f32 0.0, %v9220_v20  ;;  %v3693_v20 = vmul.f32 0.0, %v9083_v51 }
 0x549   : > { %v4549_v50 = vpop.permute.xlu1 %4548 }
 0x54a   : > { %4693 = vrot.lane.b32.xlu1 %v4624_v59, %s6805_s14  ;;  %v4144_v59 = vmul.f32 0.0, %v4060_v21 }
 0x54b   : > { %v4577_v57 = vpop.permute.xlu0 %4576 }
 0x54d   : > { %v4553_v34 = vpop.permute.xlu1 %4552 }
 0x54e   : > { %v4634_v26 = vmul.f32 0.0, %v4553_v34  ;;  %4697 = vrot.lane.b32.xlu1 %v4626_v63, %s6805_s14 }
 0x54f   : > { %v4593_v47 = vpop.permute.xlu0 %4592 }
 0x550   : > { %4713 = vrot.lane.b32.xlu0 %v4634_v26, %s6805_s14  ;;  %v3689_v26 = vmul.f32 0.0, %v9065_v7 }
 0x552   : > { %4212 = vrot.lane.b32.xlu1 %v4139_v4, %s6805_s14  ;;  %v4072_v36 = vpop.permute.xlu1 %4071  ;;  %v4633_v4 = vmul.f32 0.0, %v4549_v50  ;;  %v3686_v50 = vmul.f32 0.0, %v9056_v37 }
 0x553   : > { %v4147_v1 = vmul.f32 0.0, %v4072_v36  ;;  %v9330_v53 = vpop.permute.xlu0 %4608 }
 0x554   : > { %3766 = vrot.lane.b32.xlu0 %v3685_v31, %s6805_s14  ;;  %v3691_v31 = vmul.f32 0.0, %v9074_v41  ;;  %v4153_v41 = vmul.f32 0.0, %v9241_v39 }
 0x556   : > { %4216 = vrot.lane.b32.xlu1 %v4141_v48, %s6805_s14  ;;  %v4076_v17 = vpop.permute.xlu1 %4075 }
 0x558   : > { %3770 = vrot.lane.b32.xlu0 %v3687_v60, %s6805_s14 }
 0x55a   : > { %4701 = vrot.lane.b32.xlu1 %v4628_v33, %s6805_s14 }
 0x55b   : > { %v4557_v32 = vpop.permute.xlu1 %4556 }
 0x55c   : > { %4228 = vrot.lane.b32.xlu0 %v4147_v1, %s6805_s14 }
 0x55e   : > { %4705 = vrot.lane.b32.xlu1 %v4630_v10, %s6805_s14  ;;  %v4640_v10 = vmul.f32 0.0, %v4577_v57 }
 0x55f   : > { %v4565_v16 = vpop.permute.xlu1 %4564 }
 0x560   : > { %4232 = vrot.lane.b32.xlu0 %v4149_v28, %s6805_s14  ;;  %v4148_v28 = vmul.f32 0.0, %v4076_v17  ;;  %v4637_v57 = vmul.f32 0.0, %v4565_v16 }
 0x562   : > { %4218 = vrot.lane.b32.xlu1 %v4142_v55, %s6805_s14 }
 0x563   : > { %v4569_v56 = vpop.permute.xlu1 %4568 }
 0x564   : > { %4717 = vrot.lane.b32.xlu0 %v4636_v24, %s6805_s14  ;;  %v4638_v63 = vmul.f32 0.0, %v4569_v56  ;;  %v4635_v24 = vmul.f32 0.0, %v4557_v32  ;;  %v3688_v32 = vmul.f32 0.0, %v9067_v29 }
 0x566   : > { %4222 = vrot.lane.b32.xlu1 %v4144_v59, %s6805_s14  ;;  %v3695_v59 = vmul.f32 0.0, %v9106_v14  ;;  %v4157_v14 = vmul.f32 0.0, %v9260_v8  ;;  %v10334_v8 = vld [vmem:[#allocation6_spill] sm:$0xff] }
 0x568   : > { %4721 = vrot.lane.b32.xlu0 %v4638_v63, %s6805_s14  ;;  %v4088_v34 = vpop.permute.xlu1 %4087 }
 0x569   : > { %v4151_v7 = vmul.f32 0.0, %v4088_v34  ;;  %v3690_v34 = vmul.f32 0.0, %v9076_v6 }
 0x56a   : > { %4707 = vrot.lane.b32.xlu1 %v4631_v11, %s6805_s14 }
 0x56b   : > { %v9335_v36 = vpop.permute.xlu0 %4194 }
 0x56c   : > { %3774 = vrot.lane.b32.xlu0 %v3689_v26, %s6805_s14  ;;  %v4092_v21 = vpop.permute.xlu1 %4091 }
 0x56e   : > { %4711 = vrot.lane.b32.xlu1 %v4633_v4, %s6805_s14  ;;  %v4150_v4 = vmul.f32 0.0, %v9232_v43 }
 0x570   : > { %3778 = vrot.lane.b32.xlu0 %v3691_v31, %s6805_s14  ;;  %v4644_v31 = vmul.f32 0.0, %v4593_v47  ;;  %v10336_v47 = vld [vmem:[#allocation62_spill] sm:$0xff] }
 0x571   : > { %v4573_v48 = vpop.permute.xlu1 %4572 }
 0x572   : > { %3764 = vrot.lane.b32.xlu1 %v3684_v15, %s6805_s14  ;;  %v4152_v15 = vmul.f32 0.0, %v4092_v21  ;;  %v3697_v21 = vmul.f32 0.0, %v9114_v18  ;;  %v3699_v18 = vmul.f32 0.0, %v9123_v0 }
 0x573   : > { %v9340_v60 = vpop.permute.xlu0 %4198 }
 0x574   : > { %4236 = vrot.lane.b32.xlu0 %v4151_v7, %s6805_s14 }
 0x575   : > { %v4581_v33 = vpop.permute.xlu1 %4580 }
 0x576   : > { %3768 = vrot.lane.b32.xlu1 %v3686_v50, %s6805_s14 }
 0x578   : > { %4240 = vrot.lane.b32.xlu0 %v4153_v41, %s6805_s14  ;;  %v9348_v38 = vpop.permute.xlu0 %4683  ;;  %v10335_v41 = vld [vmem:[#allocation17_spill] sm:$0xff] }
 0x579   : > { %v4585_v1 = vpop.permute.xlu1 %4584 }
 0x57a   : > { %4226 = vrot.lane.b32.xlu1 %v4146_v45, %s6805_s14  ;;  %v4642_v37 = vmul.f32 0.0, %v4585_v1  ;;  %v1140_v45 = vadd.f32 %v10335_v41, %v10334_v8  ;;  %v4639_v1 = vmul.f32 0.0, %v4573_v48  ;;  %v10340_v48 = vld [vmem:[#allocation63_spill] sm:$0xff] }
 0x57c   : > { %4725 = vrot.lane.b32.xlu0 %v4640_v10, %s6805_s14  ;;  %v9353_v39 = vpop.permute.xlu0 %4687  ;;  %v1602_v10 = vadd.f32 %v10336_v47, %v1140_v45  ;;  %v10342_v45 = vld [vmem:[#allocation8_spill] sm:$0xff] }
 0x57e   : > { %4230 = vrot.lane.b32.xlu1 %v4148_v28, %s6805_s14  ;;  %v4104_v55 = vpop.permute.xlu1 %4103  ;;  %v10337_v28 = vld [vmem:[#allocation23_spill] sm:$0xff] }
 0x57f   : > { %v4155_v11 = vmul.f32 0.0, %v4104_v55 }
 0x580   : > { %4729 = vrot.lane.b32.xlu0 %v4642_v37, %s6805_s14  ;;  %v9361_v17 = vpop.permute.xlu0 %4202  ;;  %v10338_v37 = vld [vmem:[#allocation5_spill] sm:$0xff] }
 0x581   : > { %v1142_v55 = vadd.f32 %v10338_v37, %v10337_v28 }
 0x582   : > { %4715 = vrot.lane.b32.xlu1 %v4635_v24, %s6805_s14  ;;  %v9358_v56 = vpop.permute.xlu1 %4107 }
 0x584   : > { %3782 = vrot.lane.b32.xlu0 %v3693_v20, %s6805_s14  ;;  %v10339_v20 = vld [vmem:[#allocation103_spill] sm:$0xff] }
 0x586   : > { %4719 = vrot.lane.b32.xlu1 %v4637_v57, %s6805_s14  ;;  %v2106_v57 = vadd.f32 %v10339_v20, %v1602_v10 }
 0x587   : > { %v9365_v63 = vpop.permute.xlu1 %4588 }
 0x588   : > { %3786 = vrot.lane.b32.xlu0 %v3695_v59, %s6805_s14  ;;  %v4641_v59 = vmul.f32 0.0, %v4581_v33  ;;  %v3692_v33 = vmul.f32 0.0, %v9085_v13 }
 0x589   : > { %v9369_v51 = vpop.permute.xlu0 %4206 }
 0x58a   : > { %3772 = vrot.lane.b32.xlu1 %v3688_v32, %s6805_s14  ;;  %v1604_v32 = vadd.f32 %v10340_v48, %v1142_v55  ;;  %v10346_v55 = vld [vmem:[#allocation64_spill] sm:$0xff]  ;;  %v10349_v48 = vld [vmem:[#allocation66_spill] sm:$0xff] }
 0x58b   : > { %v9372_v16 = vpop.permute.xlu1 %4596 }
 0x58c   : > { %4244 = vrot.lane.b32.xlu0 %v4155_v11, %s6805_s14 }
 0x58e   : > { %3776 = vrot.lane.b32.xlu1 %v3690_v34, %s6805_s14  ;;  %v9378_v26 = vpop.permute.xlu0 %4691  ;;  %v2715_v34 = vadd.f32 %v8538_v9, %v2106_v57 }
 0x58f   : > { %v4601_v29 = vpop.permute.xlu1 %4600 }
 0x590   : > { %4248 = vrot.lane.b32.xlu0 %v4157_v14, %s6805_s14  ;;  %v4646_v50 = vmul.f32 0.0, %v4601_v29  ;;  %v10341_v14 = vld [vmem:[#allocation105_spill] sm:$0xff] }
 0x591   : > { %v2108_v29 = vadd.f32 %v10341_v14, %v1604_v32 }
 0x592   : > { %4234 = vrot.lane.b32.xlu1 %v4150_v4, %s6805_s14  ;;  %v9384_v7 = vpop.permute.xlu0 %4695 }
 0x594   : > { %4733 = vrot.lane.b32.xlu0 %v4644_v31, %s6805_s14  ;;  %v4120_v6 = vpop.permute.xlu1 %4119  ;;  %v3324_v31 = vadd.f32 %v8861_v3, %v2715_v34  ;;  %v3694_v3 = vmul.f32 0.0, %v9108_v12  ;;  %v10347_v12 = vld [vmem:[#allocation10_spill] sm:$0xff] }
 0x595   : > { %v4159_v41 = vmul.f32 0.0, %v4120_v6 }
 0x596   : > { %4238 = vrot.lane.b32.xlu1 %v4152_v15, %s6805_s14  ;;  %v9397_v24 = vpop.permute.xlu0 %4210  ;;  %v2717_v15 = vadd.f32 %v8562_v52, %v2108_v29  ;;  %v3828_v9 = vadd.f32 %v9129_v61, %v3324_v31  ;;  %v10344_v52 = vld [vmem:[#allocation24_spill] sm:$0xff] }
 0x598   : > { %4737 = vrot.lane.b32.xlu0 %v4646_v50, %s6805_s14  ;;  %v9390_v43 = vpop.permute.xlu1 %4123  ;;  %v3326_v0 = vadd.f32 %v8872_v44, %v2717_v15  ;;  %v4290_v13 = vadd.f32 %v9335_v36, %v3828_v9  ;;  %v4161_v44 = vmul.f32 0.0, %v9275_v30  ;;  %v10348_v36 = vld [vmem:[#allocation25_spill] sm:$0xff]  ;;  %v10351_v30 = vld [vmem:[#allocation30_spill] sm:$0xff]  ;;  %v10354_v9 = vld [vmem:[#allocation108_spill] sm:$0xff] }
 0x59a   : > { %4723 = vrot.lane.b32.xlu1 %v4639_v1, %s6805_s14  ;;  %v10343_v1 = vld [vmem:[#allocation22_spill] sm:$0xff]  ;;  %v3830_v61 = vadd.f32 %v9135_v19, %v3326_v0  ;;  %v4779_v57 = vadd.f32 %v9348_v38, %v4290_v13  ;;  %v4154_v19 = vmul.f32 0.0, %v9248_v62  ;;  %v10352_v38 = vld [vmem:[#allocation9_spill] sm:$0xff]  ;;  %v10356_v13 = vld [vmem:[#allocation11_spill] sm:$0xff] }
 0x59b   : > { %v1141_v47 = vadd.f32 %v10343_v1, %v10342_v45  ;;  %v1146_v31 = vadd.f32 %v10352_v38, %v10351_v30  ;;  %v10363_v30 = vld [vmem:[#allocation38_spill] sm:$0xff] }
 0x59c   : > { %3790 = vrot.lane.b32.xlu0 %v3697_v21, %s6805_s14  ;;  %v10345_v21 = vld [vmem:[#allocation7_spill] sm:$0xff]  ;;  %v4292_v34 = vadd.f32 %v9340_v60, %v3830_v61  ;;  %v4812_v62 = vsel %vm4811_vm3, %v10334_v8, %v4779_v57  ;;  %v10358_v61 = vld [vmem:[#allocation29_spill] sm:$0xff] }
 0x59d   : > { %v9402_v11 = vpop.permute.xlu1 %4604  ;;  %v1143_v28 = vadd.f32 %v10345_v21, %v10344_v52  ;;  %v1603_v20 = vadd.f32 %v10346_v55, %v1141_v47  ;;  %v4648_v47 = vmul.f32 0.0, %v9330_v53  ;;  %v10362_v57 = vld [vmem:[#allocation109_spill] sm:$0xff] }
 0x59e   : > { %4727 = vrot.lane.b32.xlu1 %v4641_v59, %s6805_s14  ;;  %v1144_v59 = vadd.f32 %v10348_v36, %v10347_v12  ;;  %v4781_v0 = vadd.f32 %v9353_v39, %v4292_v34  ;;  %v10360_v39 = vld [vmem:[#allocation67_spill] sm:$0xff] }
 0x59f   : > { %v9408_v4 = vpop.permute.xlu0 %4214  ;;  %v1605_v32 = vadd.f32 %v10349_v48, %v1143_v28  ;;  %v10357_v28 = vld [vmem:[#allocation12_spill] sm:$0xff]  ;;  %v1608_v36 = vadd.f32 %v10360_v39, %v1146_v31  ;;  %v4156_v48 = vmul.f32 0.0, %v9358_v56  ;;  %v10364_v31 = vld [vmem:[#allocation13_spill] sm:$0xff] }
 0x5a0   : > { %3794 = vrot.lane.b32.xlu0 %v3699_v18, %s6805_s14  ;;  %v10350_v18 = vld [vmem:[#allocation106_spill] sm:$0xff]  ;;  %v1145_v55 = vadd.f32 %v10358_v61, %v10357_v28 }
 0x5a1   : > { %v9414_v50 = vpop.permute.xlu1 %4612  ;;  %v2107_v14 = vadd.f32 %v10350_v18, %v1603_v20  ;;  %v10359_v20 = vld [vmem:[#allocation107_spill] sm:$0xff]  ;;  %v4845_v18 = vsel %vm4844_vm4, %v4812_v62, %v10334_v8  ;;  %v10369_v62 = vld [vmem:[#allocation110_spill] sm:$0xff] }
 0x5a2   : > { %3780 = vrot.lane.b32.xlu1 %v3692_v33, %s6805_s14  ;;  %v10353_v33 = vld [vmem:[#allocation65_spill] sm:$0xff]  ;;  %v2112_v61 = vadd.f32 %v10369_v62, %v1608_v36  ;;  %v4878_v39 = vsel %vm4877_vm5, %v4845_v18, %v10334_v8  ;;  %v10371_v36 = vld [vmem:[#allocation40_spill] sm:$0xff] }
 0x5a3   : > { %v1606_v15 = vadd.f32 %v10353_v33, %v1144_v59  ;;  %v2716_v60 = vadd.f32 %v8540_v25, %v2107_v14  ;;  %v10361_v59 = vld [vmem:[#allocation101_spill] sm:$0xff]  ;;  %v4814_v14 = vsel %vm4811_vm3, %v10338_v37, %v4781_v0  ;;  %v1150_v33 = vadd.f32 %v10364_v31, %v10363_v30 }
 0x5a4   : > { %v9423_v10 = vpop.permute.xlu0 %4699  ;;  %4252 = vrot.lane.b32.xlu0 %v4159_v41, %s6805_s14  ;;  %v2109_v41 = vadd.f32 %v10354_v9, %v1605_v32  ;;  %v10374_v8 = vld [vmem:[#allocation69_spill] sm:$0xff] }
 0x5a5   : > { %v4617_v6 = vpop.permute.xlu1 %4616  ;;  %v3325_v53 = vadd.f32 %v8870_v54, %v2716_v60  ;;  %v10365_v54 = vld [vmem:[#allocation14_spill] sm:$0xff]  ;;  %v10367_v60 = vld [vmem:[#allocation16_spill] sm:$0xff]  ;;  %v10375_v18 = vld [vmem:[#allocation137_spill] sm:$0xff] }
 0x5a6   : > { %3784 = vrot.lane.b32.xlu1 %v3694_v3, %s6805_s14  ;;  %v10355_v3 = vld [vmem:[#allocation32_spill] sm:$0xff]  ;;  %v2718_v25 = vadd.f32 %v10361_v59, %v2109_v41  ;;  %v4650_v41 = vmul.f32 0.0, %v4617_v6  ;;  %v4847_v6 = vsel %vm4844_vm4, %v4814_v14, %v10338_v37  ;;  %v4643_v59 = vmul.f32 0.0, %v9365_v63 }
 0x5a7   : > { %v1147_v52 = vadd.f32 %v10356_v13, %v10355_v3  ;;  %v3829_v9 = vadd.f32 %v9131_v40, %v3325_v53  ;;  %v9487_v40 = vld [vmem:[%s10075_s4] ss:$0 sm:$0xff]  ;;  %v2721_v30 = vadd.f32 %v10375_v18, %v2112_v61 }
 0x5a8   : > { %v9439_v29 = vpop.permute.xlu0 %4703  ;;  %4256 = vrot.lane.b32.xlu0 %v4161_v44, %s6805_s14  ;;  %v2110_v44 = vadd.f32 %v10359_v20, %v1606_v15  ;;  %v10366_v15 = vld [vmem:[#allocation33_spill] sm:$0xff]  ;;  %v10370_v20 = vld [vmem:[#allocation162_spill] sm:$0xff]  ;;  %v4917_v61 = vadd.f32 %v9487_v40, %v4878_v39 }
 0x5a9   : > { %v4197_v1 = vpop.permute.xlu1 %4196  ;;  %v1148_v56 = vadd.f32 %v10366_v15, %v10365_v54 }
 0x5aa   : > { %4242 = vrot.lane.b32.xlu1 %v4154_v19, %s6805_s14  ;;  %v2719_v34 = vadd.f32 %v10362_v57, %v2110_v44  ;;  %v3327_v44 = vadd.f32 %v10370_v20, %v2718_v25  ;;  %v4291_v53 = vadd.f32 %v4197_v1, %v3829_v9  ;;  %v10373_v25 = vld [vmem:[#allocation68_spill] sm:$0xff]  ;;  %vm4949_vm6 = vcmp.ge.f32.partialorder %v4917_v61, 0.0 }
 0x5ab   : > { %v1607_v57 = vadd.f32 %v10373_v25, %v1145_v55 }
 0x5ac   : > { %v9461_v32 = vpop.permute.xlu0 %3762  ;;  %4741 = vrot.lane.b32.xlu0 %v4648_v47, %s6805_s14  ;;  %v10368_v47 = vld [vmem:[#allocation37_spill] sm:$0xff]  ;;  %v3328_v0 = vadd.f32 %v8881_v46, %v2719_v34  ;;  %v10372_v46 = vld [vmem:[#allocation15_spill] sm:$0xff]  ;;  %v1610_v34 = vadd.f32 %v10374_v8, %v1148_v56  ;;  %v3831_v14 = vadd.f32 %v9139_v23, %v3327_v44  ;;  %v4880_v56 = vsel %vm4877_vm5, %v4847_v6, %v10338_v37  ;;  %v10381_v6 = vld [vmem:[#allocation112_spill] sm:$0xff] }
 0x5ad   : > { %v4201_v19 = vpop.permute.xlu1 %4200  ;;  %v9477_v3 = vadd.f32 %v10368_v47, %v10367_v60  ;;  %v10376_v47 = vld [vmem:[#allocation70_spill] sm:$0xff]  ;;  %v4645_v23 = vmul.f32 0.0, %v9372_v16 }
 0x5ae   : > { %4246 = vrot.lane.b32.xlu1 %v4156_v48, %s6805_s14  ;;  %v9495_v48 = vadd.f32 %v10372_v46, %v10371_v36  ;;  %v1609_v62 = vadd.f32 %v10376_v47, %v1147_v52  ;;  %v3832_v63 = vadd.f32 %v9143_v35, %v3328_v0  ;;  %v10378_v36 = vld [vmem:[#allocation163_spill] sm:$0xff]  ;;  %v4293_v44 = vadd.f32 %v4201_v19, %v3831_v14 }
 0x5af   : > { %v3330_v55 = vadd.f32 %v10378_v36, %v2721_v30  ;;  %v10379_v0 = vld [vmem:[#allocation111_spill] sm:$0xff]  ;;  %v2114_v39 = vadd.f32 %v10381_v6, %v1610_v34  ;;  %v4981_v30 = vmul.f32 0.01, %v4917_v61  ;;  %v10384_v36 = vld [vmem:[#allocation138_spill] sm:$0xff] }
 0x5b0   : > { %4745 = vrot.lane.b32.xlu0 %v4650_v41, %s6805_s14  ;;  %v10377_v41 = vld [vmem:[#allocation71_spill] sm:$0xff]  ;;  %v4294_v52 = vadd.f32 %v9361_v17, %v3832_v63 }
 0x5b1   : > { %v4686_v15 = vpop.permute.xlu1 %4685  ;;  %v9503_v1 = vpop.permute.xlu0 %4220  ;;  %v1612_v20 = vadd.f32 %v10377_v41, %v1150_v33  ;;  %v3834_v33 = vadd.f32 %v9149_v5, %v3330_v55  ;;  %v2723_v55 = vadd.f32 %v10384_v36, %v2114_v39  ;;  %v10387_v39 = vld [vmem:[#allocation165_spill] sm:$0xff] }
 0x5b2   : > { %v4780_v9 = vadd.f32 %v4686_v15, %v4291_v53  ;;  %4731 = vrot.lane.b32.xlu1 %v4643_v59, %s6805_s14  ;;  %v2111_v53 = vadd.f32 %v10379_v0, %v1607_v57  ;;  %v10380_v59 = vld [vmem:[#allocation113_spill] sm:$0xff]  ;;  %v4783_v17 = vadd.f32 %v9378_v26, %v4294_v52  ;;  %v4919_v57 = vadd.f32 %v9487_v40, %v4880_v56  ;;  %v10382_v15 = vld [vmem:[#allocation102_spill] sm:$0xff] }
 0x5b3   : > { %v2113_v25 = vadd.f32 %v10380_v59, %v1609_v62  ;;  %v4296_v18 = vadd.f32 %v9369_v51, %v3834_v33  ;;  %v3696_v62 = vmul.f32 0.0, %v9116_v58 }
 0x5b4   : > { %v4813_v35 = vsel %vm4811_vm3, %v10342_v45, %v4780_v9  ;;  %v2720_v47 = vadd.f32 %v10382_v15, %v2111_v53  ;;  %v10383_v9 = vld [vmem:[#allocation104_spill] sm:$0xff]  ;;  %v4816_v58 = vsel %vm4811_vm3, %v10347_v12, %v4783_v17  ;;  %v4983_v52 = vmul.f32 0.01, %v4919_v57 }
 0x5b5   : > { %v4846_v8 = vsel %vm4844_vm4, %v4813_v35, %v10342_v45  ;;  %v4690_v37 = vpop.permute.xlu1 %4689  ;;  %v9530_v34 = vpop.permute.xlu0 %4224  ;;  %v2722_v41 = vadd.f32 %v10383_v9, %v2113_v25  ;;  %v10385_v35 = vld [vmem:[#allocation164_spill] sm:$0xff]  ;;  %v3698_v53 = vmul.f32 0.0, %v9125_v49  ;;  %vm4951_vm8 = vcmp.ge.f32.partialorder %v4919_v57, 0.0  ;;  %v10388_v49 = vld [vmem:[#allocation166_spill] sm:$0xff]  ;;  %v10392_v9 = vld [vmem:[#allocation21_spill] sm:$0xff] }
 0x5b6   : > { %v4879_v16 = vsel %vm4877_vm5, %v4846_v8, %v10342_v45  ;;  %v4782_v19 = vadd.f32 %v4690_v37, %v4293_v44  ;;  %4735 = vrot.lane.b32.xlu1 %v4645_v23, %s6805_s14  ;;  %v4785_v45 = vadd.f32 %v9384_v7, %v4296_v18  ;;  %v5013_v23 = vsel %vm4949_vm6, %v4917_v61, %v4981_v30  ;;  %v10386_v37 = vld [vmem:[#allocation114_spill] sm:$0xff] }
 0x5b7   : > { %v4918_v5 = vadd.f32 %v9487_v40, %v4879_v16  ;;  %v3329_v0 = vadd.f32 %v10385_v35, %v2720_v47  ;;  %v4849_v25 = vsel %vm4844_vm4, %v4816_v58, %v10347_v12  ;;  %v2116_v6 = vadd.f32 %v10386_v37, %v1612_v20 }
 0x5b8   : > { %v4815_v26 = vsel %vm4811_vm3, %v10345_v21, %v4782_v19  ;;  %v4818_v33 = vsel %vm4811_vm3, %v10352_v38, %v4785_v45  ;;  %v3332_v61 = vadd.f32 %v10387_v39, %v2723_v55  ;;  %v3331_v19 = vadd.f32 %v10388_v49, %v2722_v41  ;;  %v10393_v41 = vld [vmem:[#allocation46_spill] sm:$0xff]  ;;  %v10400_v39 = vld [vmem:[#allocation191_spill] sm:$0xff]  ;;  %v10401_v49 = vld [vmem:[#allocation117_spill] sm:$0xff] }
 0x5b9   : > { %v4848_v14 = vsel %vm4844_vm4, %v4815_v26, %v10345_v21  ;;  %v4205_v63 = vpop.permute.xlu1 %4204  ;;  %vm4950_vm7 = vcmp.ge.f32.partialorder %v4918_v5, 0.0  ;;  %v4982_v51 = vmul.f32 0.01, %v4918_v5  ;;  %v3833_v17 = vadd.f32 %v9145_v42, %v3329_v0  ;;  %v9554_v16 = vpop.permute.xlu0 %4709  ;;  %v10389_v42 = vld [vmem:[#allocation51_spill] sm:$0xff]  ;;  %v10390_v26 = vld [vmem:[#allocation20_spill] sm:$0xff] }
 0x5ba   : > { %v4881_v56 = vsel %vm4877_vm5, %v4848_v14, %v10345_v21  ;;  %3788 = vrot.lane.b32.xlu1 %v3696_v62, %s6805_s14  ;;  %v4158_v18 = vmul.f32 0.0, %v9269_v2  ;;  %v4882_v15 = vsel %vm4877_vm5, %v4849_v25, %v10347_v12  ;;  %v4851_v20 = vsel %vm4844_vm4, %v4818_v33, %v10352_v38  ;;  %v10391_v14 = vld [vmem:[#allocation72_spill] sm:$0xff]  ;;  %v10394_v2 = vld [vmem:[#allocation141_spill] sm:$0xff]  ;;  %v10398_v33 = vld [vmem:[#allocation78_spill] sm:$0xff] }
 0x5bb   : > { %v4920_v7 = vadd.f32 %v9487_v40, %v4881_v56  ;;  %v5014_v44 = vsel %vm4950_vm7, %v4918_v5, %v4982_v51  ;;  %v5015_v5 = vsel %vm4951_vm8, %v4919_v57, %v4983_v52  ;;  %v4295_v47 = vadd.f32 %v4205_v63, %v3833_v17  ;;  %v10395_v63 = vld [vmem:[#allocation74_spill] sm:$0xff] }
 0x5bc   : > { %v5045_v59 = vpack.c.bf16 %v5014_v44, %v5013_v23  ;;  %v1155_v45 = vadd.f32 %v10390_v26, %v10389_v42  ;;  %v1611_v51 = vadd.f32 %v10391_v14, %v9477_v3  ;;  %v1153_v36 = vadd.f32 %v10393_v41, %v10392_v9  ;;  %v10396_v3 = vld [vmem:[#allocation167_spill] sm:$0xff] }
 0x5bd   : > { %vm4952_vm9 = vcmp.ge.f32.partialorder %v4920_v7, 0.0  ;;  %v4984_v21 = vmul.f32 0.01, %v4920_v7  ;;  %v4209_v8 = vpop.permute.xlu1 %4208  ;;  %v2725_v57 = vadd.f32 %v10394_v2, %v2116_v6  ;;  %v3835_v58 = vadd.f32 %v9151_v27, %v3331_v19  ;;  %v10403_v14 = vld [vmem:[#allocation139_spill] sm:$0xff] }
 0x5be   : > { %3792 = vrot.lane.b32.xlu1 %v3698_v53, %s6805_s14  ;;  %6483 = vmatprep.mubr.bf16.mxu1 %v5045_v59  ;;  %v3836_v12 = vadd.f32 %v9154_v22, %v3332_v61  ;;  %v4884_v44 = vsel %vm4877_vm5, %v4851_v20, %v10352_v38  ;;  %v4921_v35 = vadd.f32 %v9487_v40, %v4882_v15  ;;  %v4160_v22 = vmul.f32 0.0, %v9390_v43  ;;  %v10397_v59 = vld [vmem:[#allocation76_spill] sm:$0xff] }
 0x5bf   : > { %v5016_v30 = vsel %vm4952_vm9, %v4920_v7, %v4984_v21  ;;  %v1613_v7 = vadd.f32 %v10395_v63, %v9495_v48  ;;  %v3334_v23 = vadd.f32 %v10396_v3, %v2725_v57  ;;  %v4297_v0 = vadd.f32 %v4209_v8, %v3835_v58  ;;  %v10399_v48 = vld [vmem:[#allocation115_spill] sm:$0xff]  ;;  %v10405_v3 = vld [vmem:[#allocation140_spill] sm:$0xff] }
 0x5c0   : > { %v5046_v62 = vpack.c.bf16 %v5016_v30, %v5015_v5  ;;  %v4298_v27 = vadd.f32 %v9397_v24, %v3836_v12  ;;  %v1615_v25 = vadd.f32 %v10397_v59, %v1153_v36  ;;  %v1617_v21 = vadd.f32 %v10398_v33, %v1155_v45  ;;  %v10404_v12 = vld [vmem:[#allocation168_spill] sm:$0xff]  ;;  %v10409_v33 = vld [vmem:[#allocation170_spill] sm:$0xff] }
 0x5c1   : > { %v4694_v55 = vpop.permute.xlu1 %4693  ;;  %v2115_v37 = vadd.f32 %v10399_v48, %v1611_v51  ;;  %v3838_v61 = vadd.f32 %v10400_v39, %v3334_v23  ;;  %v2117_v19 = vadd.f32 %v10401_v49, %v1613_v7  ;;  %v4985_v5 = vmul.f32 0.01, %v4921_v35 }
 0x5c2   : > { %v4784_v56 = vadd.f32 %v4694_v55, %v4295_v47  ;;  %v9572_v52 = vpop.permute.xlu0 %4713  ;;  %4250 = vrot.lane.b32.xlu1 %v4158_v18, %s6805_s14  ;;  %6484 = vmatmul.mubr.bf16.vlgmr.msra.gmra.mrb[128].mxu1 %v5046_v62  ;;  %v4787_v24 = vadd.f32 %v9423_v10, %v4298_v27  ;;  %v4923_v30 = vadd.f32 %v9487_v40, %v4884_v44  ;;  %v4647_v15 = vmul.f32 0.0, %v9402_v11  ;;  %v10406_v27 = vld [vmem:[#allocation143_spill] sm:$0xff] }
 0x5c3   : > { %v4300_v20 = vadd.f32 %v9408_v4, %v3838_v61  ;;  %vm4953_vm10 = vcmp.ge.f32.partialorder %v4921_v35, 0.0  ;;  %v2724_v51 = vadd.f32 %v10403_v14, %v2115_v37  ;;  %v4649_v63 = vmul.f32 0.0, %v9414_v50  ;;  %v10408_v50 = vld [vmem:[#allocation121_spill] sm:$0xff] }
 0x5c4   : > { %v4817_v53 = vsel %vm4811_vm3, %v10357_v28, %v4784_v56  ;;  %v4820_v41 = vsel %vm4811_vm3, %v10365_v54, %v4787_v24  ;;  %v5017_v2 = vsel %vm4953_vm10, %v4921_v35, %v4985_v5  ;;  %v4987_v58 = vmul.f32 0.01, %v4923_v30  ;;  %v10412_v5 = vld [vmem:[#allocation192_spill] sm:$0xff] }
 0x5c5   : > { %v4850_v6 = vsel %vm4844_vm4, %v4817_v53, %v10357_v28  ;;  %v4698_v38 = vpop.permute.xlu1 %4697  ;;  %v4789_v11 = vadd.f32 %v9439_v29, %v4300_v20  ;;  %v3333_v56 = vadd.f32 %v10404_v12, %v2724_v51  ;;  %vm4955_vm12 = vcmp.ge.f32.partialorder %v4923_v30, 0.0 }
 0x5c6   : > { %v4883_v43 = vsel %vm4877_vm5, %v4850_v6, %v10357_v28  ;;  %v4786_v8 = vadd.f32 %v4698_v38, %v4297_v0  ;;  %v9594_v17 = vpop.permute.xlu0 %3766  ;;  %4254 = vrot.lane.b32.xlu1 %v4160_v22, %s6805_s14  ;;  %v10402_v28 = vld [vmem:[#allocation119_spill] sm:$0xff]  ;;  %v2726_v29 = vadd.f32 %v10405_v3, %v2117_v19  ;;  %v10407_v22 = vld [vmem:[#allocation190_spill] sm:$0xff]  ;;  %v5019_v37 = vsel %vm4955_vm12, %v4923_v30, %v4987_v58  ;;  %v10410_v38 = vld [vmem:[#allocation172_spill] sm:$0xff] }
 0x5c7   : > { %v4922_v18 = vadd.f32 %v9487_v40, %v4883_v43  ;;  %v2119_v47 = vadd.f32 %v10402_v28, %v1615_v25  ;;  %v3837_v0 = vadd.f32 %v10407_v22, %v3333_v56  ;;  %v4822_v53 = vsel %vm4811_vm3, %v10364_v31, %v4789_v11  ;;  %v10414_v28 = vld [vmem:[#allocation19_spill] sm:$0xff] }
 0x5c8   : > { %v4819_v10 = vsel %vm4811_vm3, %v10356_v13, %v4786_v8  ;;  %v2121_v25 = vadd.f32 %v10408_v50, %v1617_v21  ;;  %v3335_v48 = vadd.f32 %v10409_v33, %v2726_v29  ;;  %v10411_v8 = vld [vmem:[#allocation144_spill] sm:$0xff]  ;;  %v4855_v19 = vsel %vm4844_vm4, %v4822_v53, %v10364_v31  ;;  %v10413_v21 = vld [vmem:[#allocation194_spill] sm:$0xff] }
 0x5c9   : > { %v4852_v62 = vsel %vm4844_vm4, %v4819_v10, %v10356_v13  ;;  %v4213_v42 = vpop.permute.xlu1 %4212  ;;  %vm4954_vm11 = vcmp.ge.f32.partialorder %v4922_v18, 0.0  ;;  %v4986_v45 = vmul.f32 0.01, %v4922_v18  ;;  %v2728_v35 = vadd.f32 %v10406_v27, %v2119_v47  ;;  %v10415_v47 = vld [vmem:[#allocation41_spill] sm:$0xff]  ;;  %v10422_v50 = vld [vmem:[#allocation142_spill] sm:$0xff] }
 0x5ca   : > { %v4885_v4 = vsel %vm4877_vm5, %v4852_v62, %v10356_v13  ;;  %v9613_v36 = vpop.permute.xlu0 %3770  ;;  %4739 = vrot.lane.b32.xlu1 %v4647_v15, %s6805_s14  ;;  %v4853_v13 = vsel %vm4844_vm4, %v4820_v41, %v10365_v54  ;;  %v4299_v24 = vadd.f32 %v4213_v42, %v3837_v0  ;;  %v2730_v49 = vadd.f32 %v10411_v8, %v2121_v25  ;;  %v10424_v8 = vld [vmem:[#allocation169_spill] sm:$0xff] }
 0x5cb   : > { %v5018_v57 = vsel %vm4954_vm11, %v4922_v18, %v4986_v45  ;;  %v4924_v55 = vadd.f32 %v9487_v40, %v4885_v4  ;;  %v3337_v39 = vadd.f32 %v10410_v38, %v2728_v35  ;;  %v4886_v61 = vsel %vm4877_vm5, %v4853_v13, %v10365_v54  ;;  %v10416_v54 = vld [vmem:[#allocation174_spill] sm:$0xff]  ;;  %v10417_v4 = vld [vmem:[#allocation73_spill] sm:$0xff] }
 0x5cc   : > { %v5047_v7 = vpack.c.bf16 %v5018_v57, %v5017_v2  ;;  %v3839_v15 = vadd.f32 %v10412_v5, %v3335_v48  ;;  %v1152_v62 = vadd.f32 %v10415_v47, %v10414_v28  ;;  %v3339_v42 = vadd.f32 %v10416_v54, %v2730_v49  ;;  %v10428_v54 = vld [vmem:[#allocation54_spill] sm:$0xff] }
 0x5cd   : > { %v4217_v23 = vpop.permute.xlu1 %4216  ;;  %vm4956_vm13 = vcmp.ge.f32.partialorder %v4924_v55, 0.0  ;;  %v4988_v44 = vmul.f32 0.01, %v4924_v55  ;;  %v3841_v20 = vadd.f32 %v10413_v21, %v3337_v39  ;;  %v4925_v45 = vadd.f32 %v9487_v40, %v4886_v61  ;;  %v10426_v21 = vld [vmem:[#allocation193_spill] sm:$0xff] }
 0x5ce   : > { %v9626_v59 = vpop.permute.xlu0 %4228  ;;  %4743 = vrot.lane.b32.xlu1 %v4649_v63, %s6805_s14  ;;  %6487 = vmatprep.mubr.bf16.mxu1 %v5047_v7  ;;  %v4888_v14 = vsel %vm4877_vm5, %v4855_v19, %v10364_v31  ;;  %v4301_v41 = vadd.f32 %v4217_v23, %v3839_v15  ;;  %v1614_v2 = vadd.f32 %v10417_v4, %v1152_v62  ;;  %v10419_v7 = vld [vmem:[#allocation18_spill] sm:$0xff]  ;;  %v10427_v62 = vld [vmem:[#allocation31_spill] sm:$0xff]  ;;  %s6812_s14 = smov [#allocation2]  }
 0x5cf   : > { %v5020_v6 = vsel %vm4956_vm13, %v4924_v55, %v4988_v44  ;;  %v4303_v51 = vadd.f32 %v9503_v1, %v3841_v20  ;;  %v3843_v58 = vadd.f32 %v9461_v32, %v3339_v42  ;;  %v10418_v1 = vld [vmem:[#allocation47_spill] sm:$0xff]  ;;  %v4989_v13 = vmul.f32 0.01, %v4925_v45  ;;  %v10420_v44 = vld [vmem:[#allocation116_spill] sm:$0xff]  ;;  %s6743_s21 = sshll.u32 %s6812_s14, 4  ;;  %s6744_s21 = int_to_ptr.vmem [resolvable:$false] %s6743_s21 }
 0x5d0   : > { %v5048_v43 = vpack.c.bf16 %v5020_v6, %v5019_v37  ;;  %v1154_v3 = vadd.f32 %v10419_v7, %v10418_v1  ;;  %v4927_v23 = vadd.f32 %v9487_v40, %v4888_v14  ;;  %v2118_v27 = vadd.f32 %v10420_v44, %v1614_v2  ;;  %s6745_s22 = scalar_lea.vmem %s6744_s21, 4096  ;;  %p6746_p0 = scmp.lt.s32.totalorder %s10024_s16, %s6744_s21 }
 0x5d1   : > { %v4702_v18 = vpop.permute.xlu1 %4701  ;;  %v4792_v12 = vadd.f32 %v9554_v16, %v4303_v51  ;;  %v4305_v32 = vadd.f32 %v9530_v34, %v3843_v58  ;;  %vm4957_vm14 = vcmp.ge.f32.partialorder %v4925_v45, 0.0  ;;  %v1157_v42 = vadd.f32 %v10428_v54, %v10427_v62  ;;  %v10429_v51 = vld [vmem:[#allocation171_spill] sm:$0xff]  ;;  %v10430_v58 = vld [vmem:[#allocation80_spill] sm:$0xff]  ;;  %p6747_p1 = scmp.lt.s32.totalorder %s6745_s22, %s6739_s20 }
 0x5d2   : > { %v4788_v10 = vadd.f32 %v4702_v18, %v4299_v24  ;;  %v9639_v30 = vpop.permute.xlu0 %4232  ;;  %6488 = vmatmul.mubr.bf16.gmra.mrb[132].mxu1 %v5048_v43  ;;  %v2727_v25 = vadd.f32 %v10422_v50, %v2118_v27  ;;  %v5021_v6 = vsel %vm4957_vm14, %v4925_v45, %v4989_v13  ;;  %v4991_v61 = vmul.f32 0.01, %v4927_v23  ;;  %v10423_v24 = vld [vmem:[#allocation118_spill] sm:$0xff]  ;;  %v10433_v13 = vld [vmem:[#allocation28_spill] sm:$0xff]  ;;  %v10436_v50 = vld [vmem:[#allocation147_spill] sm:$0xff] }
 0x5d3   : > { %v4825_v33 = vsel %vm4811_vm3, %v10392_v9, %v4792_v12  ;;  %v4794_v48 = vadd.f32 %v9572_v52, %v4305_v32  ;;  %vm4959_vm0 = vcmp.ge.f32.partialorder %v4927_v23, 0.0  ;;  %v1619_v12 = vadd.f32 %v10430_v58, %v1157_v42  ;;  %p6748_p2 = por %p6747_p1, %p6746_p0 }
 0x5d4   : > { %v4821_v11 = vsel %vm4811_vm3, %v10367_v60, %v4788_v10  ;;  %v3336_v49 = vadd.f32 %v10424_v8, %v2727_v25  ;;  %v4858_v18 = vsel %vm4844_vm4, %v4825_v33, %v10392_v9  ;;  %v5023_v45 = vsel %vm4959_vm0, %v4927_v23, %v4991_v61 }
 0x5d5   : > { %v4854_v57 = vsel %vm4844_vm4, %v4821_v11, %v10367_v60  ;;  %v4706_v55 = vpop.permute.xlu1 %4705  ;;  %v4827_v10 = vsel %vm4811_vm3, %v10390_v26, %v4794_v48  ;;  %v4891_v11 = vsel %vm4877_vm5, %v4858_v18, %v10392_v9  ;;  %v10434_v9 = vld [vmem:[#allocation123_spill] sm:$0xff]  ;;  %p6749_p3 = pnand %p6748_p2, %p6742_p13 }
 0x5d6   : > { %v4887_v56 = vsel %vm4877_vm5, %v4854_v57, %v10367_v60  ;;  %v4790_v31 = vadd.f32 %v4706_v55, %v4301_v41  ;;  %v9657_v63 = vpop.permute.xlu0 %4717  ;;  %v10421_v60 = vld [vmem:[#allocation75_spill] sm:$0xff]  ;;  %v3840_v20 = vadd.f32 %v10426_v21, %v3336_v49  ;;  %v4860_v57 = vsel %vm4844_vm4, %v4827_v10, %v10390_v26 }
 0x5d7   : > { %v4926_v29 = vadd.f32 %v9487_v40, %v4887_v56  ;;  %v1616_v35 = vadd.f32 %v10421_v60, %v1154_v3  ;;  %v10431_v56 = vld [vmem:[#allocation195_spill] sm:$0xff]  ;;  %v4930_v44 = vadd.f32 %v9487_v40, %v4891_v11  ;;  %v2123_v27 = vadd.f32 %v10434_v9, %v1619_v12 }
 0x5d8   : > { %v4823_v16 = vsel %vm4811_vm3, %v10372_v46, %v4790_v31  ;;  %v4893_v32 = vsel %vm4877_vm5, %v4860_v57, %v10390_v26  ;;  %v10439_v18 = vld [vmem:[#allocation27_spill] sm:$0xff] }
 0x5d9   : > { %v4856_v22 = vsel %vm4844_vm4, %v4823_v16, %v10372_v46  ;;  %v4219_v0 = vpop.permute.xlu1 %4218  ;;  %vm4958_vm15 = vcmp.ge.f32.partialorder %v4926_v29, 0.0  ;;  %v4990_v53 = vmul.f32 0.01, %v4926_v29  ;;  %v2120_v43 = vadd.f32 %v10423_v24, %v1616_v35  ;;  %v10438_v24 = vld [vmem:[#allocation176_spill] sm:$0xff] }
 0x5da   : > { %v4889_v34 = vsel %vm4877_vm5, %v4856_v22, %v10372_v46  ;;  %v9676_v37 = vpop.permute.xlu0 %4721  ;;  %v10425_v46 = vld [vmem:[#allocation145_spill] sm:$0xff]  ;;  %v4302_v4 = vadd.f32 %v4219_v0, %v3840_v20  ;;  %v10435_v0 = vld [vmem:[#allocation82_spill] sm:$0xff]  ;;  %v2732_v25 = vadd.f32 %v10436_v50, %v2123_v27  ;;  %vm4962_vm2 = vcmp.ge.f32.partialorder %v4930_v44, 0.0 }
 0x5db   : > { %v5022_v38 = vsel %vm4958_vm15, %v4926_v29, %v4990_v53  ;;  %v4928_v39 = vadd.f32 %v9487_v40, %v4889_v34  ;;  %v2729_v15 = vadd.f32 %v10425_v46, %v2120_v43  ;;  %v10432_v29 = vld [vmem:[#allocation56_spill] sm:$0xff]  ;;  %v10441_v46 = vld [vmem:[#allocation149_spill] sm:$0xff] }
 0x5dc   : > { %v5049_v19 = vpack.c.bf16 %v5022_v38, %v5021_v6  ;;  %v1159_v23 = vadd.f32 %v10433_v13, %v10432_v29  ;;  %v4994_v6 = vmul.f32 0.01, %v4930_v44  ;;  %v4932_v38 = vadd.f32 %v9487_v40, %v4893_v32  ;;  %v10445_v29 = vld [vmem:[#allocation26_spill] sm:$0xff] }
 0x5dd   : > { %v4223_v52 = vpop.permute.xlu1 %4222  ;;  %vm4960_vm1 = vcmp.ge.f32.partialorder %v4928_v39, 0.0  ;;  %v4992_v5 = vmul.f32 0.01, %v4928_v39  ;;  %v3338_v41 = vadd.f32 %v10429_v51, %v2729_v15  ;;  %v3341_v43 = vadd.f32 %v10438_v24, %v2732_v25  ;;  %v10442_v51 = vld [vmem:[#allocation178_spill] sm:$0xff]  ;;  %v10450_v25 = vld [vmem:[#allocation173_spill] sm:$0xff] }
 0x5de   : > { %v9687_v47 = vpop.permute.xlu0 %3774  ;;  %6491 = vmatprep.mubr.bf16.mxu1 %v5049_v19  ;;  %v1621_v53 = vadd.f32 %v10435_v0, %v1159_v23  ;;  %v5026_v42 = vsel %vm4962_vm2, %v4930_v44, %v4994_v6  ;;  %vm4964_vm7 = vcmp.ge.f32.partialorder %v4932_v38, 0.0  ;;  %v10453_v24 = vld [vmem:[#allocation58_spill] sm:$0xff] }
 0x5df   : > { %v5024_v14 = vsel %vm4960_vm1, %v4928_v39, %v4992_v5  ;;  %v3842_v31 = vadd.f32 %v10431_v56, %v3338_v41  ;;  %v10437_v39 = vld [vmem:[#allocation125_spill] sm:$0xff]  ;;  %v3845_v21 = vadd.f32 %v9594_v17, %v3341_v43 }
 0x5e0   : > { %v5050_v2 = vpack.c.bf16 %v5024_v14, %v5023_v45  ;;  %v2125_v61 = vadd.f32 %v10437_v39, %v1621_v53  ;;  %v4996_v14 = vmul.f32 0.01, %v4932_v38  ;;  %v10443_v17 = vld [vmem:[#allocation77_spill] sm:$0xff]  ;;  %v10449_v53 = vld [vmem:[#allocation122_spill] sm:$0xff] }
 0x5e1   : > { %v4708_v55 = vpop.permute.xlu1 %4707  ;;  %v4304_v16 = vadd.f32 %v4223_v52, %v3842_v31  ;;  %v10440_v52 = vld [vmem:[#allocation52_spill] sm:$0xff]  ;;  %v4307_v11 = vadd.f32 %v9626_v59, %v3845_v21 }
 0x5e2   : > { %v4791_v1 = vadd.f32 %v4708_v55, %v4302_v4  ;;  %v9698_v3 = vpop.permute.xlu0 %3778  ;;  %6492 = vmatmul.mubr.bf16.gmra.mrb[136].mxu1 %v5050_v2  ;;  %v1156_v5 = vadd.f32 %v10440_v52, %v10439_v18  ;;  %v2734_v15 = vadd.f32 %v10441_v46, %v2125_v61  ;;  %v5028_v31 = vsel %vm4964_vm7, %v4932_v38, %v4996_v14  ;;  %v10446_v59 = vld [vmem:[#allocation120_spill] sm:$0xff] }
 0x5e3   : > { %v4796_v58 = vadd.f32 %v9657_v63, %v4307_v11 }
 0x5e4   : > { %v4824_v60 = vsel %vm4811_vm3, %v10414_v28, %v4791_v1  ;;  %v3343_v41 = vadd.f32 %v10442_v51, %v2734_v15  ;;  %v1618_v55 = vadd.f32 %v10443_v17, %v1156_v5  ;;  %v10444_v1 = vld [vmem:[#allocation55_spill] sm:$0xff]  ;;  %v10455_v15 = vld [vmem:[#allocation88_spill] sm:$0xff] }
 0x5e5   : > { %v4857_v35 = vsel %vm4844_vm4, %v4824_v60, %v10414_v28  ;;  %v4712_v22 = vpop.permute.xlu1 %4711  ;;  %v1158_v23 = vadd.f32 %v10445_v29, %v10444_v1  ;;  %v4829_v63 = vsel %vm4811_vm3, %v10427_v62, %v4796_v58  ;;  %v10460_v58 = vld [vmem:[#allocation151_spill] sm:$0xff] }
 0x5e6   : > { %v4890_v33 = vsel %vm4877_vm5, %v4857_v35, %v10414_v28  ;;  %v4793_v48 = vadd.f32 %v4712_v22, %v4304_v16  ;;  %v9714_v34 = vpop.permute.xlu0 %4236  ;;  %v2122_v44 = vadd.f32 %v10446_v59, %v1618_v55  ;;  %v10447_v16 = vld [vmem:[#allocation79_spill] sm:$0xff]  ;;  %v10448_v35 = vld [vmem:[#allocation146_spill] sm:$0xff]  ;;  %v10459_v55 = vld [vmem:[#allocation92_spill] sm:$0xff] }
 0x5e7   : > { %v4929_v26 = vadd.f32 %v9487_v40, %v4890_v33  ;;  %v1620_v60 = vadd.f32 %v10447_v16, %v1158_v23 }
 0x5e8   : > { %v4826_v8 = vsel %vm4811_vm3, %v10419_v7, %v4793_v48 }
 0x5e9   : > { %v4859_v49 = vsel %vm4844_vm4, %v4826_v8, %v10419_v7  ;;  %v3765_v28 = vpop.permute.xlu1 %3764  ;;  %vm4961_vm6 = vcmp.ge.f32.partialorder %v4929_v26, 0.0  ;;  %v4993_v19 = vmul.f32 0.01, %v4929_v26  ;;  %v2124_v50 = vadd.f32 %v10449_v53, %v1620_v60  ;;  %v10454_v8 = vld [vmem:[#allocation175_spill] sm:$0xff] }
 0x5ea   : > { %v4892_v20 = vsel %vm4877_vm5, %v4859_v49, %v10419_v7  ;;  %v9730_v10 = vpop.permute.xlu0 %4240  ;;  %v3847_v7 = vadd.f32 %v9613_v36, %v3343_v41  ;;  %v2731_v36 = vadd.f32 %v10448_v35, %v2122_v44  ;;  %v10458_v41 = vld [vmem:[#allocation127_spill] sm:$0xff]  ;;  %v10461_v44 = vld [vmem:[#allocation129_spill] sm:$0xff] }
 0x5eb   : > { %v5025_v54 = vsel %vm4961_vm6, %v4929_v26, %v4993_v19  ;;  %v4931_v45 = vadd.f32 %v9487_v40, %v4892_v20  ;;  %v10451_v26 = vld [vmem:[#allocation148_spill] sm:$0xff] }
 0x5ec   : > { %v5051_v4 = vpack.c.bf16 %v5026_v42, %v5025_v54  ;;  %v4309_v9 = vadd.f32 %v9639_v30, %v3847_v7  ;;  %v3340_v33 = vadd.f32 %v10450_v25, %v2731_v36  ;;  %v4862_v30 = vsel %vm4844_vm4, %v4829_v63, %v10427_v62  ;;  %v10457_v42 = vld [vmem:[#allocation36_spill] sm:$0xff]  ;;  %v10463_v63 = vld [vmem:[#allocation35_spill] sm:$0xff] }
 0x5ed   : > { %v3769_v2 = vpop.permute.xlu1 %3768  ;;  %vm4963_vm8 = vcmp.ge.f32.partialorder %v4931_v45, 0.0  ;;  %v4995_v57 = vmul.f32 0.01, %v4931_v45  ;;  %v2733_v6 = vadd.f32 %v10451_v26, %v2124_v50  ;;  %v4895_v19 = vsel %vm4877_vm5, %v4862_v30, %v10427_v62  ;;  %v10465_v50 = vld [vmem:[#allocation153_spill] sm:$0xff] }
 0x5ee   : > { %v9738_v12 = vpop.permute.xlu0 %4725  ;;  %6495 = vmatprep.mubr.bf16.mxu1 %v5051_v4  ;;  %v4798_v22 = vadd.f32 %v9676_v37, %v4309_v9  ;;  %v3844_v39 = vadd.f32 %v3765_v28, %v3340_v33  ;;  %v10452_v37 = vld [vmem:[#allocation39_spill] sm:$0xff]  ;;  %v10456_v28 = vld [vmem:[#allocation60_spill] sm:$0xff]  ;;  %v4934_v51 = vadd.f32 %v9487_v40, %v4895_v19 }
 0x5ef   : > { %v5027_v56 = vsel %vm4963_vm8, %v4931_v45, %v4995_v57  ;;  %v1161_v43 = vadd.f32 %v10453_v24, %v10452_v37  ;;  %v3342_v49 = vadd.f32 %v10454_v8, %v2733_v6  ;;  %v1163_v45 = vadd.f32 %v10457_v42, %v10456_v28 }
 0x5f0   : > { %v5052_v27 = vpack.c.bf16 %v5028_v31, %v5027_v56  ;;  %v4831_v38 = vsel %vm4811_vm3, %v10433_v13, %v4798_v22  ;;  %v4998_v59 = vmul.f32 0.01, %v4934_v51  ;;  %vm4966_vm9 = vcmp.ge.f32.partialorder %v4934_v51, 0.0  ;;  %v10464_v22 = vld [vmem:[#allocation57_spill] sm:$0xff] }
 0x5f1   : > { %v4227_v32 = vpop.permute.xlu1 %4226  ;;  %v4864_v5 = vsel %vm4844_vm4, %v4831_v38, %v10433_v13  ;;  %v1623_v21 = vadd.f32 %v10455_v15, %v1161_v43  ;;  %v3846_v20 = vadd.f32 %v3769_v2, %v3342_v49  ;;  %v1625_v7 = vadd.f32 %v10459_v55, %v1163_v45 }
 0x5f2   : > { %v9749_v0 = vpop.permute.xlu0 %4729  ;;  %6496 = vmatmul.mubr.bf16.gmra.mrb[140].mxu1 %v5052_v27  ;;  %v4306_v52 = vadd.f32 %v4227_v32, %v3844_v39  ;;  %v4897_v62 = vsel %vm4877_vm5, %v4864_v5, %v10433_v13  ;;  %v10462_v27 = vld [vmem:[#allocation179_spill] sm:$0xff]  ;;  %v1160_v53 = vadd.f32 %v10464_v22, %v10463_v63  ;;  %v5030_v26 = vsel %vm4966_vm9, %v4934_v51, %v4998_v59  ;;  %v10466_v39 = vld [vmem:[#allocation181_spill] sm:$0xff] }
 0x5f3   : > { %v2127_v11 = vadd.f32 %v10458_v41, %v1623_v21  ;;  %v4936_v13 = vadd.f32 %v9487_v40, %v4897_v62  ;;  %v2129_v9 = vadd.f32 %v10461_v44, %v1625_v7  ;;  %v10471_v62 = vld [vmem:[#allocation85_spill] sm:$0xff] }
 0x5f4   : > { %v10474_v7 = vld [vmem:[#allocation177_spill] sm:$0xff] }
 0x5f5   : > { %v4231_v48 = vpop.permute.xlu1 %4230  ;;  %v2736_v56 = vadd.f32 %v10460_v58, %v2127_v11  ;;  %v2738_v25 = vadd.f32 %v10465_v50, %v2129_v9  ;;  %v5000_v38 = vmul.f32 0.01, %v4936_v13  ;;  %vm4968_vm11 = vcmp.ge.f32.partialorder %v4936_v13, 0.0  ;;  %v10476_v44 = vld [vmem:[#allocation45_spill] sm:$0xff]  ;;  %v10477_v9 = vld [vmem:[#allocation83_spill] sm:$0xff] }
 0x5f6   : > { %v9758_v61 = vpop.permute.xlu0 %3782  ;;  %v4308_v4 = vadd.f32 %v4231_v48, %v3846_v20  ;;  %v10468_v20 = vld [vmem:[#allocation59_spill] sm:$0xff] }
 0x5f7   : > { %v3345_v32 = vadd.f32 %v10462_v27, %v2736_v56  ;;  %v3347_v24 = vadd.f32 %v10466_v39, %v2738_v25  ;;  %v5032_v21 = vsel %vm4968_vm11, %v4936_v13, %v5000_v38  ;;  %v1165_v27 = vadd.f32 %v10477_v9, %v10476_v44  ;;  %v10482_v38 = vld [vmem:[#allocation131_spill] sm:$0xff] }
 0x5f9   : > { %v4716_v46 = vpop.permute.xlu1 %4715  ;;  %v3849_v33 = vadd.f32 %v9687_v47, %v3345_v32  ;;  %v3851_v47 = vadd.f32 %v9698_v3, %v3347_v24 }
 0x5fa   : > { %v4795_v54 = vadd.f32 %v4716_v46, %v4306_v52  ;;  %v9770_v14 = vpop.permute.xlu0 %3786  ;;  %v10467_v52 = vld [vmem:[#allocation81_spill] sm:$0xff] }
 0x5fb   : > { %v4311_v43 = vadd.f32 %v9714_v34, %v3849_v33  ;;  %v1622_v5 = vadd.f32 %v10467_v52, %v1160_v53  ;;  %v10470_v34 = vld [vmem:[#allocation124_spill] sm:$0xff]  ;;  %v4313_v51 = vadd.f32 %v9730_v10, %v3851_v47  ;;  %v10479_v53 = vld [vmem:[#allocation94_spill] sm:$0xff] }
 0x5fc   : > { %v4828_v57 = vsel %vm4811_vm3, %v10439_v18, %v4795_v54  ;;  %v10469_v54 = vld [vmem:[#allocation34_spill] sm:$0xff]  ;;  %v1627_v50 = vadd.f32 %v10479_v53, %v1165_v27 }
 0x5fd   : > { %v4861_v2 = vsel %vm4844_vm4, %v4828_v57, %v10439_v18  ;;  %v4720_v17 = vpop.permute.xlu1 %4719  ;;  %v1162_v28 = vadd.f32 %v10469_v54, %v10468_v20  ;;  %v2126_v45 = vadd.f32 %v10470_v34, %v1622_v5  ;;  %v10472_v57 = vld [vmem:[#allocation150_spill] sm:$0xff]  ;;  %v10484_v5 = vld [vmem:[#allocation155_spill] sm:$0xff] }
 0x5fe   : > { %v4894_v31 = vsel %vm4877_vm5, %v4861_v2, %v10439_v18  ;;  %v4797_v1 = vadd.f32 %v4720_v17, %v4308_v4  ;;  %v9792_v35 = vpop.permute.xlu0 %4244  ;;  %v4802_v2 = vadd.f32 %v9749_v0, %v4313_v51  ;;  %v10473_v17 = vld [vmem:[#allocation126_spill] sm:$0xff]  ;;  %v10478_v0 = vld [vmem:[#allocation180_spill] sm:$0xff]  ;;  %v2131_v39 = vadd.f32 %v10482_v38, %v1627_v50  ;;  %v10495_v38 = vld [vmem:[#allocation95_spill] sm:$0xff] }
 0x5ff   : > { %v4933_v23 = vadd.f32 %v9487_v40, %v4894_v31  ;;  %v1624_v4 = vadd.f32 %v10471_v62, %v1162_v28  ;;  %v2735_v3 = vadd.f32 %v10472_v57, %v2126_v45  ;;  %v10485_v28 = vld [vmem:[#allocation133_spill] sm:$0xff]  ;;  %v10486_v45 = vld [vmem:[#allocation183_spill] sm:$0xff]  ;;  %v10492_v53 = vld [vmem:[#allocation86_spill] sm:$0xff] }
 0x600   : > { %v4830_v16 = vsel %vm4811_vm3, %v10445_v29, %v4797_v1  ;;  %v10475_v1 = vld [vmem:[#allocation152_spill] sm:$0xff]  ;;  %v4835_v59 = vsel %vm4811_vm3, %v10457_v42, %v4802_v2  ;;  %v2740_v47 = vadd.f32 %v10484_v5, %v2131_v39  ;;  %v10487_v57 = vld [vmem:[#allocation43_spill] sm:$0xff]  ;;  %v10489_v2 = vld [vmem:[#allocation157_spill] sm:$0xff] }
 0x601   : > { %v4863_v60 = vsel %vm4844_vm4, %v4830_v16, %v10445_v29  ;;  %v3773_v18 = vpop.permute.xlu1 %3772  ;;  %vm4965_vm10 = vcmp.ge.f32.partialorder %v4933_v23, 0.0  ;;  %v4997_v36 = vmul.f32 0.01, %v4933_v23  ;;  %v2128_v55 = vadd.f32 %v10473_v17, %v1624_v4  ;;  %v10493_v50 = vld [vmem:[#allocation42_spill] sm:$0xff] }
 0x602   : > { %v4896_v30 = vsel %vm4877_vm5, %v4863_v60, %v10445_v29  ;;  %v4800_v29 = vadd.f32 %v9738_v12, %v4311_v43  ;;  %v9806_v46 = vpop.permute.xlu0 %4248  ;;  %v3344_v58 = vadd.f32 %v10474_v7, %v2735_v3  ;;  %v3349_v51 = vadd.f32 %v10486_v45, %v2740_v47  ;;  %v10488_v3 = vld [vmem:[#allocation61_spill] sm:$0xff]  ;;  %v10499_v47 = vld [vmem:[#allocation156_spill] sm:$0xff] }
 0x603   : > { %v5029_v48 = vsel %vm4965_vm10, %v4933_v23, %v4997_v36  ;;  %v4935_v6 = vadd.f32 %v9487_v40, %v4896_v30  ;;  %v2737_v23 = vadd.f32 %v10475_v1, %v2128_v55  ;;  %v4868_v36 = vsel %vm4844_vm4, %v4835_v59, %v10457_v42  ;;  %v10480_v30 = vld [vmem:[#allocation87_spill] sm:$0xff] }
 0x604   : > { %v5053_v8 = vpack.c.bf16 %v5030_v26, %v5029_v48  ;;  %v4833_v12 = vsel %vm4811_vm3, %v10452_v37, %v4800_v29  ;;  %v3848_v13 = vadd.f32 %v3773_v18, %v3344_v58  ;;  %v10481_v48 = vld [vmem:[#allocation44_spill] sm:$0xff]  ;;  %v3853_v55 = vadd.f32 %v9758_v61, %v3349_v51 }
 0x605   : > { %v3777_v49 = vpop.permute.xlu1 %3776  ;;  %vm4967_vm12 = vcmp.ge.f32.partialorder %v4935_v6, 0.0  ;;  %v4999_v19 = vmul.f32 0.01, %v4935_v6  ;;  %v4866_v56 = vsel %vm4844_vm4, %v4833_v12, %v10452_v37  ;;  %v3346_v32 = vadd.f32 %v10478_v0, %v2737_v23  ;;  %v10490_v23 = vld [vmem:[#allocation185_spill] sm:$0xff] }
 0x606   : > { %6499 = vmatprep.mubr.bf16.mxu1 %v5053_v8  ;;  %v4734_v10 = vpop.permute.xlu0 %4733  ;;  %v4899_v16 = vsel %vm4877_vm5, %v4866_v56, %v10452_v37  ;;  %v1167_v18 = vadd.f32 %v10481_v48, %v10480_v30  ;;  %v4901_v37 = vsel %vm4877_vm5, %v4868_v36, %v10457_v42  ;;  %v1164_v12 = vadd.f32 %v10488_v3, %v10487_v57 }
 0x607   : > { %v5031_v15 = vsel %vm4967_vm12, %v4935_v6, %v4999_v19  ;;  %v3850_v25 = vadd.f32 %v3777_v49, %v3346_v32  ;;  %v4938_v6 = vadd.f32 %v9487_v40, %v4899_v16  ;;  %v10483_v19 = vld [vmem:[#allocation93_spill] sm:$0xff]  ;;  %v4940_v42 = vadd.f32 %v9487_v40, %v4901_v37  ;;  %v10496_v37 = vld [vmem:[#allocation154_spill] sm:$0xff] }
 0x608   : > { %v5054_v41 = vpack.c.bf16 %v5032_v21, %v5031_v15  ;;  %v1629_v52 = vadd.f32 %v10483_v19, %v1167_v18  ;;  %v10491_v32 = vld [vmem:[#allocation97_spill] sm:$0xff] }
 0x609   : > { %v4235_v11 = vpop.permute.xlu1 %4234  ;;  %v5002_v20 = vmul.f32 0.01, %v4938_v6  ;;  %vm4970_vm13 = vcmp.ge.f32.partialorder %v4938_v6, 0.0  ;;  %v5004_v1 = vmul.f32 0.01, %v4940_v42  ;;  %vm4972_vm15 = vcmp.ge.f32.partialorder %v4940_v42, 0.0 }
 0x60a   : > { %6500 = vmatmul.mubr.bf16.gmra.mrb[144].mxu1 %v5054_v41  ;;  %v4310_v60 = vadd.f32 %v4235_v11, %v3848_v13  ;;  %v4738_v26 = vpop.permute.xlu0 %4737  ;;  %v2133_v34 = vadd.f32 %v10485_v28, %v1629_v52  ;;  %v4315_v13 = vadd.f32 %v9792_v35, %v3853_v55  ;;  %v1626_v16 = vadd.f32 %v10491_v32, %v1164_v12  ;;  %v10505_v55 = vld [vmem:[#allocation50_spill] sm:$0xff] }
 0x60b   : > { %v5034_v56 = vsel %vm4970_vm13, %v4938_v6, %v5002_v20  ;;  %v10500_v20 = vld [vmem:[#allocation53_spill] sm:$0xff] }
 0x60c   : > { %v2742_v17 = vadd.f32 %v10489_v2, %v2133_v34 }
 0x60d   : > { %v4239_v31 = vpop.permute.xlu1 %4238 }
 0x60e   : > { %v4312_v24 = vadd.f32 %v4239_v31, %v3850_v25  ;;  %v9852_v11 = vpop.permute.xlu0 %3790  ;;  %v3351_v59 = vadd.f32 %v10490_v23, %v2742_v17  ;;  %v1166_v25 = vadd.f32 %v10493_v50, %v10492_v53  ;;  %v10504_v17 = vld [vmem:[#allocation91_spill] sm:$0xff] }
 0x610   : > { %v3855_v61 = vadd.f32 %v9770_v14, %v3351_v59  ;;  %v1628_v39 = vadd.f32 %v10495_v38, %v1166_v25  ;;  %v10510_v25 = vld [vmem:[#allocation187_spill] sm:$0xff]  ;;  %v10511_v38 = vld [vmem:[#allocation49_spill] sm:$0xff] }
 0x611   : > { %v4724_v22 = vpop.permute.xlu1 %4723 }
 0x612   : > { %v4799_v33 = vadd.f32 %v4724_v22, %v4310_v60  ;;  %v4804_v60 = vadd.f32 %v4734_v10, %v4315_v13  ;;  %v5036_v22 = vsel %vm4972_vm15, %v4940_v42, %v5004_v1  ;;  %v4317_v30 = vadd.f32 %v9806_v46, %v3855_v61  ;;  %v10501_v42 = vld [vmem:[#allocation89_spill] sm:$0xff] }
 0x613   : > { %v1169_v28 = vadd.f32 %v10501_v42, %v10500_v20 }
 0x614   : > { %v4832_v43 = vsel %vm4811_vm3, %v10463_v63, %v4799_v33  ;;  %v10494_v33 = vld [vmem:[#allocation128_spill] sm:$0xff]  ;;  %v4837_v14 = vsel %vm4811_vm3, %v10476_v44, %v4804_v60  ;;  %v4806_v10 = vadd.f32 %v4738_v26, %v4317_v30 }
 0x615   : > { %v4865_v8 = vsel %vm4844_vm4, %v4832_v43, %v10463_v63  ;;  %v4728_v49 = vpop.permute.xlu1 %4727  ;;  %v2130_v35 = vadd.f32 %v10494_v33, %v1626_v16  ;;  %v10497_v43 = vld [vmem:[#allocation130_spill] sm:$0xff]  ;;  %v4870_v52 = vsel %vm4844_vm4, %v4837_v14, %v10476_v44  ;;  %v10502_v26 = vld [vmem:[#allocation184_spill] sm:$0xff] }
 0x616   : > { %v4898_v29 = vsel %vm4877_vm5, %v4865_v8, %v10463_v63  ;;  %v4801_v15 = vadd.f32 %v4728_v49, %v4312_v24  ;;  %v2132_v8 = vadd.f32 %v10497_v43, %v1628_v39  ;;  %v10498_v49 = vld [vmem:[#allocation182_spill] sm:$0xff]  ;;  %v4903_v45 = vsel %vm4877_vm5, %v4870_v52, %v10476_v44  ;;  %v10512_v39 = vld [vmem:[#allocation84_spill] sm:$0xff] }
 0x617   : > { %v4937_v21 = vadd.f32 %v9487_v40, %v4898_v29  ;;  %v2739_v24 = vadd.f32 %v10496_v37, %v2130_v35  ;;  %v1168_v37 = vadd.f32 %v10512_v39, %v10511_v38 }
 0x618   : > { %v4834_v41 = vsel %vm4811_vm3, %v10469_v54, %v4801_v15  ;;  %v2741_v29 = vadd.f32 %v10499_v47, %v2132_v8  ;;  %v4839_v15 = vsel %vm4811_vm3, %v10481_v48, %v4806_v10 }
 0x619   : > { %v4867_v62 = vsel %vm4844_vm4, %v4834_v41, %v10469_v54  ;;  %v3781_v63 = vpop.permute.xlu1 %3780  ;;  %vm4969_vm14 = vcmp.ge.f32.partialorder %v4937_v21, 0.0  ;;  %v5001_v4 = vmul.f32 0.01, %v4937_v21  ;;  %v3348_v19 = vadd.f32 %v10498_v49, %v2739_v24  ;;  %v10513_v24 = vld [vmem:[#allocation160_spill] sm:$0xff] }
 0x61a   : > { %v4900_v7 = vsel %vm4877_vm5, %v4867_v62, %v10469_v54  ;;  %v9867_v54 = vpop.permute.xlu0 %3794  ;;  %v3350_v34 = vadd.f32 %v10502_v26, %v2741_v29  ;;  %v4872_v41 = vsel %vm4844_vm4, %v4839_v15, %v10481_v48 }
 0x61b   : > { %v5033_v58 = vsel %vm4969_vm14, %v4937_v21, %v5001_v4  ;;  %v4939_v31 = vadd.f32 %v9487_v40, %v4900_v7  ;;  %v3852_v21 = vadd.f32 %v3781_v63, %v3348_v19  ;;  %v10503_v4 = vld [vmem:[#allocation98_spill] sm:$0xff]  ;;  %v1171_v63 = vadd.f32 %v10505_v55, %v10504_v17  ;;  %v10519_v17 = vld [vmem:[#allocation99_spill] sm:$0xff] }
 0x61c   : > { %v5055_v9 = vpack.c.bf16 %v5034_v56, %v5033_v58  ;;  %v1631_v3 = vadd.f32 %v10503_v4, %v1169_v28  ;;  %v4942_v58 = vadd.f32 %v9487_v40, %v4903_v45  ;;  %v10506_v56 = vld [vmem:[#allocation135_spill] sm:$0xff]  ;;  %v4905_v44 = vsel %vm4877_vm5, %v4872_v41, %v10481_v48  ;;  %v10515_v28 = vld [vmem:[#allocation100_spill] sm:$0xff]  ;;  %v10516_v41 = vld [vmem:[#allocation90_spill] sm:$0xff] }
 0x61d   : > { %v3785_v27 = vpop.permute.xlu1 %3784  ;;  %vm4971_vm0 = vcmp.ge.f32.partialorder %v4939_v31, 0.0  ;;  %v5003_v0 = vmul.f32 0.01, %v4939_v31  ;;  %v4944_v48 = vadd.f32 %v9487_v40, %v4905_v44  ;;  %v1630_v26 = vadd.f32 %v10515_v28, %v1168_v37  ;;  %v10518_v4 = vld [vmem:[#allocation132_spill] sm:$0xff]  ;;  %v10521_v44 = vld [vmem:[#allocation134_spill] sm:$0xff] }
 0x61e   : > { %6503 = vmatprep.mubr.bf16.mxu1 %v5055_v9  ;;  %v4253_v5 = vpop.permute.xlu0 %4252  ;;  %v3854_v12 = vadd.f32 %v3785_v27, %v3350_v34  ;;  %v10507_v9 = vld [vmem:[#allocation96_spill] sm:$0xff]  ;;  %vm4974_vm1 = vcmp.ge.f32.partialorder %v4942_v58, 0.0  ;;  %v9964_v28 = vld [vmem:[%s290_s29] ss:$0 sm:$0xff] }
 0x61f   : > { %v5035_v36 = vsel %vm4971_vm0, %v4939_v31, %v5003_v0  ;;  %v2135_v31 = vadd.f32 %v10506_v56, %v1631_v3  ;;  %v1633_v27 = vadd.f32 %v10507_v9, %v1171_v63  ;;  %v10508_v0 = vld [vmem:[#allocation159_spill] sm:$0xff]  ;;  %v5008_v52 = vmul.f32 0.01, %v4944_v48 }
 0x620   : > { %v5056_v18 = vpack.c.bf16 %v5036_v22, %v5035_v36  ;;  %v5006_v36 = vmul.f32 0.01, %v4942_v58  ;;  %v10509_v22 = vld [vmem:[#allocation136_spill] sm:$0xff]  ;;  %vm4976_vm6 = vcmp.ge.f32.partialorder %v4944_v48, 0.0  ;;  %v2134_v3 = vadd.f32 %v10518_v4, %v1630_v26 }
 0x621   : > { %v4243_v6 = vpop.permute.xlu1 %4242  ;;  %v2744_v32 = vadd.f32 %v10508_v0, %v2135_v31  ;;  %v2137_v53 = vadd.f32 %v10509_v22, %v1633_v27 }
 0x622   : > { %6504 = vmatmul.mubr.bf16.gmra.mrb[148].mxu1 %v5056_v18  ;;  %v4314_v51 = vadd.f32 %v4243_v6, %v3852_v21  ;;  %v4257_v7 = vpop.permute.xlu0 %4256  ;;  %v5038_v49 = vsel %vm4974_vm1, %v4942_v58, %v5006_v36  ;;  %v10520_v58 = vld [vmem:[#allocation158_spill] sm:$0xff] }
 0x623   : > { %v3353_v33 = vadd.f32 %v10510_v25, %v2744_v32  ;;  %v2746_v14 = vadd.f32 %v10513_v24, %v2137_v53  ;;  %v2743_v56 = vadd.f32 %v10520_v58, %v2134_v3 }
 0x625   : > { %v4247_v46 = vpop.permute.xlu1 %4246  ;;  %v3857_v10 = vadd.f32 %v9852_v11, %v3353_v33  ;;  %v6738_v33 = vld [vmem:[%s10075_s4] ss:$0 sm:$0xff] }
 0x626   : > { %v4316_v1 = vadd.f32 %v4247_v46, %v3854_v12  ;;  %v4742_v30 = vpop.permute.xlu0 %4741  ;;  %v10514_v46 = vld [vmem:[#allocation189_spill] sm:$0xff] }
 0x627   : > { %v3355_v47 = vadd.f32 %v10514_v46, %v2746_v14  ;;  %v4319_v29 = vadd.f32 %v4253_v5, %v3857_v10 }
 0x629   : > { %v4732_v62 = vpop.permute.xlu1 %4731  ;;  %v3859_v11 = vadd.f32 %v9867_v54, %v3355_v47  ;;  %v4808_v34 = vadd.f32 %v4742_v30, %v4319_v29 }
 0x62a   : > { %v4803_v2 = vadd.f32 %v4732_v62, %v4314_v51  ;;  %v5040_v51 = vsel %vm4976_vm6, %v4944_v48, %v5008_v52 }
 0x62b   : > { %v4321_v5 = vadd.f32 %v4257_v7, %v3859_v11  ;;  %v4841_v54 = vsel %vm4811_vm3, %v10500_v20, %v4808_v34  ;;  %v10523_v7 = vld [vmem:[#allocation161_spill] sm:$0xff] }
 0x62c   : > { %v4836_v23 = vsel %vm4811_vm3, %v10487_v57, %v4803_v2 }
 0x62d   : > { %v4869_v59 = vsel %vm4844_vm4, %v4836_v23, %v10487_v57  ;;  %v4736_v13 = vpop.permute.xlu1 %4735  ;;  %v10522_v23 = vld [vmem:[#allocation186_spill] sm:$0xff] }
 0x62e   : > { %v4902_v16 = vsel %vm4877_vm5, %v4869_v59, %v10487_v57  ;;  %v4805_v61 = vadd.f32 %v4736_v13, %v4316_v1  ;;  %v3352_v59 = vadd.f32 %v10522_v23, %v2743_v56  ;;  %v4874_v13 = vsel %vm4844_vm4, %v4841_v54, %v10500_v20 }
 0x62f   : > { %v4941_v60 = vadd.f32 %v9487_v40, %v4902_v16  ;;  %v10524_v16 = vld [vmem:[#allocation188_spill] sm:$0xff] }
 0x630   : > { %v4838_v35 = vsel %vm4811_vm3, %v10493_v50, %v4805_v61 }
 0x631   : > { %v4871_v18 = vsel %vm4844_vm4, %v4838_v35, %v10493_v50  ;;  %v3789_v6 = vpop.permute.xlu1 %3788  ;;  %vm4973_vm2 = vcmp.ge.f32.partialorder %v4941_v60, 0.0  ;;  %v5005_v57 = vmul.f32 0.01, %v4941_v60 }
 0x632   : > { %v4904_v43 = vsel %vm4877_vm5, %v4871_v18, %v10493_v50  ;;  %v4746_v50 = vpop.permute.xlu0 %4745  ;;  %v3856_v32 = vadd.f32 %v3789_v6, %v3352_v59 }
 0x633   : > { %v5037_v8 = vsel %vm4973_vm2, %v4941_v60, %v5005_v57  ;;  %v4943_v19 = vadd.f32 %v9487_v40, %v4904_v43  ;;  %v10517_v40 = vld [vmem:[#allocation48_spill] sm:$0xff]  ;;  %v4810_v31 = vadd.f32 %v4746_v50, %v4321_v5  ;;  %v4907_v60 = vsel %vm4877_vm5, %v4874_v13, %v10500_v20 }
 0x634   : > { %v5057_v15 = vpack.c.bf16 %v5038_v49, %v5037_v8  ;;  %v1170_v62 = vadd.f32 %v10517_v40, %v10516_v41  ;;  %v4946_v35 = vadd.f32 %v6738_v33, %v4907_v60 }
 0x635   : > { %v3793_v21 = vpop.permute.xlu1 %3792  ;;  %vm4975_vm7 = vcmp.ge.f32.partialorder %v4943_v19, 0.0  ;;  %v5007_v42 = vmul.f32 0.01, %v4943_v19  ;;  %v4843_v0 = vsel %vm4811_vm3, %v10505_v55, %v4810_v31 }
 0x636   : > { %6507 = vmatprep.mubr.bf16.mxu1 %v5057_v15  ;;  %v1632_v63 = vadd.f32 %v10519_v17, %v1170_v62  ;;  %v4876_v48 = vsel %vm4844_vm4, %v4843_v0, %v10505_v55  ;;  %v5010_v14 = vmul.f32 0.01, %v4946_v35  ;;  %vm4978_vm8 = vcmp.ge.f32.partialorder %v4946_v35, 0.0 }
 0x637   : > { %v5039_v45 = vsel %vm4975_vm7, %v4943_v19, %v5007_v42  ;;  %v4909_v30 = vsel %vm4877_vm5, %v4876_v48, %v10505_v55 }
 0x638   : > { %v5058_v12 = vpack.c.bf16 %v5040_v51, %v5039_v45  ;;  %v2136_v1 = vadd.f32 %v10521_v44, %v1632_v63  ;;  %v4948_v10 = vadd.f32 %v6738_v33, %v4909_v30  ;;  %v5042_v52 = vsel %vm4978_vm8, %v4946_v35, %v5010_v14 }
 0x639   : > { %v4251_v2 = vpop.permute.xlu1 %4250 }
 0x63a   : > { %6508 = vmatmul.mubr.bf16.gmra.mrb[152].mxu1 %v5058_v12  ;;  %v2745_v27 = vadd.f32 %v10523_v7, %v2136_v1  ;;  %v4318_v36 = vadd.f32 %v4251_v2, %v3856_v32  ;;  %v5012_v46 = vmul.f32 0.01, %v4948_v10  ;;  %vm4980_vm10 = vcmp.ge.f32.partialorder %v4948_v10, 0.0 }
 0x63c   : > { %v3354_v61 = vadd.f32 %v10524_v16, %v2745_v27 }
 0x63d   : > { %v4255_v9 = vpop.permute.xlu1 %4254 }
 0x63e   : > { %v3858_v53 = vadd.f32 %v3793_v21, %v3354_v61  ;;  %v5044_v21 = vsel %vm4980_vm10, %v4948_v10, %v5012_v46 }
 0x640   : > { %v4320_v18 = vadd.f32 %v4255_v9, %v3858_v53 }
 0x641   : > { %v4740_v22 = vpop.permute.xlu1 %4739 }
 0x642   : > { %v4807_v25 = vadd.f32 %v4740_v22, %v4318_v36 }
 0x644   : > { %v4840_v6 = vsel %vm4811_vm3, %v10511_v38, %v4807_v25 }
 0x645   : > { %v4873_v20 = vsel %vm4844_vm4, %v4840_v6, %v10511_v38  ;;  %v4744_v57 = vpop.permute.xlu1 %4743 }
 0x646   : > { %v4906_v39 = vsel %vm4877_vm5, %v4873_v20, %v10511_v38  ;;  %v4809_v37 = vadd.f32 %v4744_v57, %v4320_v18 }
 0x647   : > { %v4945_v24 = vadd.f32 %v6738_v33, %v4906_v39 }
 0x648   : > { %v4842_v43 = vsel %vm4811_vm3, %v10517_v40, %v4809_v37 }
 0x649   : > { %v4875_v55 = vsel %vm4844_vm4, %v4842_v43, %v10517_v40  ;;  %vm4977_vm9 = vcmp.ge.f32.partialorder %v4945_v24, 0.0  ;;  %v5009_v8 = vmul.f32 0.01, %v4945_v24 }
 0x64a   : > { %v4908_v49 = vsel %vm4877_vm5, %v4875_v55, %v10517_v40 }
 0x64b   : > { %v5041_v19 = vsel %vm4977_vm9, %v4945_v24, %v5009_v8  ;;  %v4947_v38 = vadd.f32 %v6738_v33, %v4908_v49 }
 0x64c   : > { %v5059_v47 = vpack.c.bf16 %v5042_v52, %v5041_v19 }
 0x64d   : > { %vm4979_vm11 = vcmp.ge.f32.partialorder %v4947_v38, 0.0  ;;  %v5011_v29 = vmul.f32 0.01, %v4947_v38 }
 0x64e   : > { %6511 = vmatprep.mubr.bf16.mxu1 %v5059_v47 }
 0x64f   : > { %v5043_v15 = vsel %vm4979_vm11, %v4947_v38, %v5011_v29 }
 0x650   : > { %v5060_v42 = vpack.c.bf16 %v5044_v21, %v5043_v15 }
 0x652   : > { %6512 = vmatmul.mubr.bf16.gmra.mrb[156].mxu1 %v5060_v42 }
 0x695   : > { %v6485_v26 = vpop.f32.mrb[128].mxu1 }
 0x696   : > { %v5175_v11 = vadd.f32 %v6485_v26, %v9964_v28  ;;  %v5166_v34 = vpop.f32.mrb[129].mxu1 }
 0x697   : > { %v5167_v50 = vadd.f32 %v9964_v28, %v5166_v34  ;;  %v6486_v45 = vpop.f32.mrb[130].mxu1 }
 0x698   : > { %v5327_v51 = vmul.f32 0.01, %v5175_v11  ;;  %v5178_v41 = vadd.f32 %v6486_v45, %v9964_v28  ;;  %v5169_v40 = vpop.f32.mrb[131].mxu1  ;;  %vm5295_vm3 = vcmp.ge.f32.partialorder %v5175_v11, 0.0 }
 0x699   : > { %v5325_v62 = vmul.f32 0.01, %v5167_v50  ;;  %v5170_v4 = vadd.f32 %v9964_v28, %v5169_v40  ;;  %vm5293_vm4 = vcmp.ge.f32.partialorder %v5167_v50, 0.0 }
 0x69a   : > { %vm5296_vm5 = vcmp.ge.f32.partialorder %v5178_v41, 0.0  ;;  %v5328_v3 = vmul.f32 0.01, %v5178_v41  ;;  %v5359_v12 = vsel %vm5295_vm3, %v5175_v11, %v5327_v51 }
 0x69b   : > { %vm5294_vm12 = vcmp.ge.f32.partialorder %v5170_v4, 0.0  ;;  %v5326_v5 = vmul.f32 0.01, %v5170_v4  ;;  %v5357_v17 = vsel %vm5293_vm4, %v5167_v50, %v5325_v62 }
 0x69c   : > { %v5360_v2 = vsel %vm5296_vm5, %v5178_v41, %v5328_v3 }
 0x69d   : > { %v5897_v63 = vpack.c.bf16 %v5360_v2, %v5359_v12  ;;  %v5358_v58 = vsel %vm5294_vm12, %v5170_v4, %v5326_v5 }
 0x69e   : > { %v5892_v56 = vpack.c.bf16 %v5358_v58, %v5357_v17 }
 0x69f   : > { %5969 = vst [vmem:[%s9973_s19 + $0x8] sm:$0xff] %v5897_v63  }
 0x6a0   : > { %5893 = vst [vmem:[%s9973_s19] sm:$0xff] %v5892_v56  }
 0x6a5   : > { %v6489_v54 = vpop.f32.mrb[132].mxu1 }
 0x6a6   : > { %v5191_v31 = vadd.f32 %v6489_v54, %v9964_v28  ;;  %v5182_v44 = vpop.f32.mrb[133].mxu1 }
 0x6a7   : > { %v5183_v1 = vadd.f32 %v9964_v28, %v5182_v44  ;;  %v6490_v23 = vpop.f32.mrb[134].mxu1 }
 0x6a8   : > { %v5331_v59 = vmul.f32 0.01, %v5191_v31  ;;  %v5194_v13 = vadd.f32 %v6490_v23, %v9964_v28  ;;  %v5185_v9 = vpop.f32.mrb[135].mxu1  ;;  %vm5299_vm13 = vcmp.ge.f32.partialorder %v5191_v31, 0.0 }
 0x6a9   : > { %v5329_v7 = vmul.f32 0.01, %v5183_v1  ;;  %v5186_v27 = vadd.f32 %v9964_v28, %v5185_v9  ;;  %vm5297_vm14 = vcmp.ge.f32.partialorder %v5183_v1, 0.0 }
 0x6aa   : > { %vm5300_vm15 = vcmp.ge.f32.partialorder %v5194_v13, 0.0  ;;  %v5332_v0 = vmul.f32 0.01, %v5194_v13  ;;  %v5363_v16 = vsel %vm5299_vm13, %v5191_v31, %v5331_v59 }
 0x6ab   : > { %vm5298_vm0 = vcmp.ge.f32.partialorder %v5186_v27, 0.0  ;;  %v5330_v32 = vmul.f32 0.01, %v5186_v27  ;;  %v5361_v60 = vsel %vm5297_vm14, %v5183_v1, %v5329_v7 }
 0x6ac   : > { %v5364_v61 = vsel %vm5300_vm15, %v5194_v13, %v5332_v0 }
 0x6ad   : > { %v5907_v36 = vpack.c.bf16 %v5364_v61, %v5363_v16  ;;  %v5362_v48 = vsel %vm5298_vm0, %v5186_v27, %v5330_v32 }
 0x6ae   : > { %v5902_v22 = vpack.c.bf16 %v5362_v48, %v5361_v60 }
 0x6af   : > { %5971 = vst [vmem:[%s9973_s19 + $0x18] sm:$0xff] %v5907_v36  }
 0x6b0   : > { %5970 = vst [vmem:[%s9973_s19 + $0x10] sm:$0xff] %v5902_v22  }
 0x6b5   : > { %v6493_v53 = vpop.f32.mrb[136].mxu1 }
 0x6b6   : > { %v5207_v25 = vadd.f32 %v6493_v53, %v9964_v28  ;;  %v5198_v33 = vpop.f32.mrb[137].mxu1 }
 0x6b7   : > { %v5199_v35 = vadd.f32 %v9964_v28, %v5198_v33  ;;  %v6494_v30 = vpop.f32.mrb[138].mxu1 }
 0x6b8   : > { %v5335_v18 = vmul.f32 0.01, %v5207_v25  ;;  %v5210_v6 = vadd.f32 %v6494_v30, %v9964_v28  ;;  %v5201_v20 = vpop.f32.mrb[139].mxu1  ;;  %vm5303_vm1 = vcmp.ge.f32.partialorder %v5207_v25, 0.0 }
 0x6b9   : > { %v5333_v57 = vmul.f32 0.01, %v5199_v35  ;;  %v5202_v39 = vadd.f32 %v9964_v28, %v5201_v20  ;;  %vm5301_vm2 = vcmp.ge.f32.partialorder %v5199_v35, 0.0 }
 0x6ba   : > { %vm5304_vm6 = vcmp.ge.f32.partialorder %v5210_v6, 0.0  ;;  %v5336_v37 = vmul.f32 0.01, %v5210_v6  ;;  %v5367_v14 = vsel %vm5303_vm1, %v5207_v25, %v5335_v18 }
 0x6bb   : > { %vm5302_vm7 = vcmp.ge.f32.partialorder %v5202_v39, 0.0  ;;  %v5334_v24 = vmul.f32 0.01, %v5202_v39  ;;  %v5365_v43 = vsel %vm5301_vm2, %v5199_v35, %v5333_v57 }
 0x6bc   : > { %v5368_v10 = vsel %vm5304_vm6, %v5210_v6, %v5336_v37 }
 0x6bd   : > { %v5917_v55 = vpack.c.bf16 %v5368_v10, %v5367_v14  ;;  %v5366_v8 = vsel %vm5302_vm7, %v5202_v39, %v5334_v24 }
 0x6be   : > { %v5912_v49 = vpack.c.bf16 %v5366_v8, %v5365_v43 }
 0x6bf   : > { %5973 = vst [vmem:[%s9973_s19 + $0x28] sm:$0xff] %v5917_v55  }
 0x6c0   : > { %5972 = vst [vmem:[%s9973_s19 + $0x20] sm:$0xff] %v5912_v49  }
 0x6c5   : > { %v6497_v19 = vpop.f32.mrb[140].mxu1 }
 0x6c6   : > { %v5223_v52 = vadd.f32 %v6497_v19, %v9964_v28  ;;  %v5214_v38 = vpop.f32.mrb[141].mxu1 }
 0x6c7   : > { %v5215_v46 = vadd.f32 %v9964_v28, %v5214_v38  ;;  %v6498_v47 = vpop.f32.mrb[142].mxu1 }
 0x6c8   : > { %v5339_v29 = vmul.f32 0.01, %v5223_v52  ;;  %v5226_v15 = vadd.f32 %v6498_v47, %v9964_v28  ;;  %v5217_v21 = vpop.f32.mrb[143].mxu1  ;;  %vm5307_vm8 = vcmp.ge.f32.partialorder %v5223_v52, 0.0 }
 0x6c9   : > { %v5337_v42 = vmul.f32 0.01, %v5215_v46  ;;  %v5218_v26 = vadd.f32 %v9964_v28, %v5217_v21  ;;  %vm5305_vm9 = vcmp.ge.f32.partialorder %v5215_v46, 0.0 }
 0x6ca   : > { %vm5308_vm10 = vcmp.ge.f32.partialorder %v5226_v15, 0.0  ;;  %v5340_v11 = vmul.f32 0.01, %v5226_v15  ;;  %v5371_v50 = vsel %vm5307_vm8, %v5223_v52, %v5339_v29 }
 0x6cb   : > { %vm5306_vm11 = vcmp.ge.f32.partialorder %v5218_v26, 0.0  ;;  %v5338_v34 = vmul.f32 0.01, %v5218_v26  ;;  %v5369_v51 = vsel %vm5305_vm9, %v5215_v46, %v5337_v42 }
 0x6cc   : > { %v5372_v45 = vsel %vm5308_vm10, %v5226_v15, %v5340_v11 }
 0x6cd   : > { %v5927_v41 = vpack.c.bf16 %v5372_v45, %v5371_v50  ;;  %v5370_v40 = vsel %vm5306_vm11, %v5218_v26, %v5338_v34 }
 0x6ce   : > { %v5922_v62 = vpack.c.bf16 %v5370_v40, %v5369_v51 }
 0x6cf   : > { %5975 = vst [vmem:[%s9973_s19 + $0x38] sm:$0xff] %v5927_v41  }
 0x6d0   : > { %5974 = vst [vmem:[%s9973_s19 + $0x30] sm:$0xff] %v5922_v62  }
 0x6dd   : > { %v6501_v4 = vpop.f32.mrb[144].mxu1 }
 0x6de   : > { %v5239_v3 = vadd.f32 %v6501_v4, %v9964_v28  ;;  %v5230_v5 = vpop.f32.mrb[145].mxu1 }
 0x6df   : > { %v5231_v12 = vadd.f32 %v9964_v28, %v5230_v5  ;;  %v6502_v2 = vpop.f32.mrb[146].mxu1 }
 0x6e0   : > { %v5343_v17 = vmul.f32 0.01, %v5239_v3  ;;  %v5242_v63 = vadd.f32 %v6502_v2, %v9964_v28  ;;  %v5233_v58 = vpop.f32.mrb[147].mxu1  ;;  %vm5311_vm3 = vcmp.ge.f32.partialorder %v5239_v3, 0.0 }
 0x6e1   : > { %v5341_v56 = vmul.f32 0.01, %v5231_v12  ;;  %v5234_v54 = vadd.f32 %v9964_v28, %v5233_v58  ;;  %vm5309_vm4 = vcmp.ge.f32.partialorder %v5231_v12, 0.0 }
 0x6e2   : > { %vm5312_vm5 = vcmp.ge.f32.partialorder %v5242_v63, 0.0  ;;  %v5344_v31 = vmul.f32 0.01, %v5242_v63  ;;  %v5375_v1 = vsel %vm5311_vm3, %v5239_v3, %v5343_v17 }
 0x6e3   : > { %vm5310_vm12 = vcmp.ge.f32.partialorder %v5234_v54, 0.0  ;;  %v5342_v44 = vmul.f32 0.01, %v5234_v54  ;;  %v5373_v59 = vsel %vm5309_vm4, %v5231_v12, %v5341_v56 }
 0x6e4   : > { %v5376_v23 = vsel %vm5312_vm5, %v5242_v63, %v5344_v31 }
 0x6e5   : > { %v5937_v13 = vpack.c.bf16 %v5376_v23, %v5375_v1  ;;  %v5374_v9 = vsel %vm5310_vm12, %v5234_v54, %v5342_v44 }
 0x6e6   : > { %v5932_v7 = vpack.c.bf16 %v5374_v9, %v5373_v59 }
 0x6e7   : > { %5977 = vst [vmem:[%s9973_s19 + $0x48] sm:$0xff] %v5937_v13  }
 0x6e8   : > { %5976 = vst [vmem:[%s9973_s19 + $0x40] sm:$0xff] %v5932_v7  }
 0x6f5   : > { %v6505_v27 = vpop.f32.mrb[148].mxu1 }
 0x6f6   : > { %v5255_v0 = vadd.f32 %v6505_v27, %v9964_v28  ;;  %v5246_v32 = vpop.f32.mrb[149].mxu1 }
 0x6f7   : > { %v5247_v16 = vadd.f32 %v9964_v28, %v5246_v32  ;;  %v6506_v61 = vpop.f32.mrb[150].mxu1 }
 0x6f8   : > { %v5347_v60 = vmul.f32 0.01, %v5255_v0  ;;  %v5258_v36 = vadd.f32 %v6506_v61, %v9964_v28  ;;  %v5249_v48 = vpop.f32.mrb[151].mxu1  ;;  %vm5315_vm13 = vcmp.ge.f32.partialorder %v5255_v0, 0.0 }
 0x6f9   : > { %v5345_v22 = vmul.f32 0.01, %v5247_v16  ;;  %v5250_v53 = vadd.f32 %v9964_v28, %v5249_v48  ;;  %vm5313_vm14 = vcmp.ge.f32.partialorder %v5247_v16, 0.0 }
 0x6fa   : > { %vm5316_vm15 = vcmp.ge.f32.partialorder %v5258_v36, 0.0  ;;  %v5348_v25 = vmul.f32 0.01, %v5258_v36  ;;  %v5379_v35 = vsel %vm5315_vm13, %v5255_v0, %v5347_v60 }
 0x6fb   : > { %vm5314_vm0 = vcmp.ge.f32.partialorder %v5250_v53, 0.0  ;;  %v5346_v33 = vmul.f32 0.01, %v5250_v53  ;;  %v5377_v18 = vsel %vm5313_vm14, %v5247_v16, %v5345_v22 }
 0x6fc   : > { %v5380_v30 = vsel %vm5316_vm15, %v5258_v36, %v5348_v25 }
 0x6fd   : > { %v5947_v6 = vpack.c.bf16 %v5380_v30, %v5379_v35  ;;  %v5378_v20 = vsel %vm5314_vm0, %v5250_v53, %v5346_v33 }
 0x6fe   : > { %v5942_v57 = vpack.c.bf16 %v5378_v20, %v5377_v18 }
 0x6ff   : > { %5979 = vst [vmem:[%s9973_s19 + $0x58] sm:$0xff] %v5947_v6  }
 0x700   : > { %5978 = vst [vmem:[%s9973_s19 + $0x50] sm:$0xff] %v5942_v57  }
 0x70d   : > { %v6509_v39 = vpop.f32.mrb[152].mxu1 }
 0x70e   : > { %v5271_v37 = vadd.f32 %v6509_v39, %v9964_v28  ;;  %v5262_v24 = vpop.f32.mrb[153].mxu1 }
 0x70f   : > { %v5263_v14 = vadd.f32 %v9964_v28, %v5262_v24  ;;  %v6510_v10 = vpop.f32.mrb[154].mxu1 }
 0x710   : > { %v5351_v43 = vmul.f32 0.01, %v5271_v37  ;;  %v5274_v55 = vadd.f32 %v6510_v10, %v9964_v28  ;;  %v5265_v8 = vpop.f32.mrb[155].mxu1  ;;  %vm5319_vm1 = vcmp.ge.f32.partialorder %v5271_v37, 0.0 }
 0x711   : > { %v5349_v49 = vmul.f32 0.01, %v5263_v14  ;;  %v5266_v19 = vadd.f32 %v9964_v28, %v5265_v8  ;;  %vm5317_vm2 = vcmp.ge.f32.partialorder %v5263_v14, 0.0 }
 0x712   : > { %vm5320_vm6 = vcmp.ge.f32.partialorder %v5274_v55, 0.0  ;;  %v5352_v52 = vmul.f32 0.01, %v5274_v55  ;;  %v5383_v46 = vsel %vm5319_vm1, %v5271_v37, %v5351_v43 }
 0x713   : > { %vm5318_vm7 = vcmp.ge.f32.partialorder %v5266_v19, 0.0  ;;  %v5350_v38 = vmul.f32 0.01, %v5266_v19  ;;  %v5381_v29 = vsel %vm5317_vm2, %v5263_v14, %v5349_v49 }
 0x714   : > { %v5384_v47 = vsel %vm5320_vm6, %v5274_v55, %v5352_v52 }
 0x715   : > { %v5957_v15 = vpack.c.bf16 %v5384_v47, %v5383_v46  ;;  %v5382_v21 = vsel %vm5318_vm7, %v5266_v19, %v5350_v38 }
 0x716   : > { %v5952_v42 = vpack.c.bf16 %v5382_v21, %v5381_v29 }
 0x717   : > { %5981 = vst [vmem:[%s9973_s19 + $0x68] sm:$0xff] %v5957_v15  }
 0x718   : > { %5980 = vst [vmem:[%s9973_s19 + $0x60] sm:$0xff] %v5952_v42  }
 0x725   : > { %v6513_v26 = vpop.f32.mrb[156].mxu1 }
 0x726   : > { %v5287_v11 = vadd.f32 %v6513_v26, %v9964_v28  ;;  %v5278_v34 = vpop.f32.mrb[157].mxu1 }
 0x727   : > { %v5279_v50 = vadd.f32 %v9964_v28, %v5278_v34  ;;  %v6514_v45 = vpop.f32.mrb[158].mxu1 }
 0x728   : > { %v5355_v51 = vmul.f32 0.01, %v5287_v11  ;;  %v5290_v41 = vadd.f32 %v6514_v45, %v9964_v28  ;;  %v5281_v40 = vpop.f32.mrb[159].mxu1  ;;  %vm5323_vm8 = vcmp.ge.f32.partialorder %v5287_v11, 0.0 }
 0x729   : > { %v5353_v62 = vmul.f32 0.01, %v5279_v50  ;;  %v5282_v4 = vadd.f32 %v9964_v28, %v5281_v40  ;;  %vm5321_vm9 = vcmp.ge.f32.partialorder %v5279_v50, 0.0 }
 0x72a   : > { %vm5324_vm10 = vcmp.ge.f32.partialorder %v5290_v41, 0.0  ;;  %v5356_v3 = vmul.f32 0.01, %v5290_v41  ;;  %v5387_v12 = vsel %vm5323_vm8, %v5287_v11, %v5355_v51 }
 0x72b   : > { %vm5322_vm11 = vcmp.ge.f32.partialorder %v5282_v4, 0.0  ;;  %v5354_v5 = vmul.f32 0.01, %v5282_v4  ;;  %v5385_v17 = vsel %vm5321_vm9, %v5279_v50, %v5353_v62 }
 0x72c   : > { %v5388_v2 = vsel %vm5324_vm10, %v5290_v41, %v5356_v3 }
 0x72d   : > { %v5967_v63 = vpack.c.bf16 %v5388_v2, %v5387_v12  ;;  %v5386_v58 = vsel %vm5322_vm11, %v5282_v4, %v5354_v5 }
 0x72e   : > { %v5962_v28 = vpack.c.bf16 %v5386_v58, %v5385_v17 }
 0x72f   : > { %5983 = vst [vmem:[%s9973_s19 + $0x78] sm:$0xff] %v5967_v63  }
 0x730   : > { %5982 = vst [vmem:[%s9973_s19 + $0x70] sm:$0xff] %v5962_v28  }
 0x731   : > { %6752 = shalt.err (!%p6749_p3)
}
 0x732   : > { %s6753_s23 = scalar_lea.hbm %s10022_s13, 2048  ;;  %s6757_s9 = scalar_lea.hbm %s10078_s7, 4096 }
 0x733   : > { %p6754_p4 = scmp.ne.s32.totalorder %s10022_s13, %s6753_s23  ;;  %p6758_p9 = scmp.lt.u32.totalorder %s10022_s13, %s10078_s7 }
 0x734   : > { %p6759_p10 = scmp.lt.u32.totalorder %s6757_s9, %s6753_s23  ;;  %p6761_p12 = scmp.lt.u32.totalorder %s6753_s23, %s10022_s13 }
 0x735   : > { %p6755_p7 = pnand %p6754_p4, %p6893_p5 }
 0x736   : > { %p6760_p11 = por %p6759_p10, %p6758_p9 }
 0x737   : > { %p6756_p8 = pneg %p6755_p7 }
 0x738   : > { %p6762_p13 = por %p6761_p12, %p6760_p11 }
 0x73a   : > { %p6763_p0 = pnand %p6762_p13, %p6756_p8 }
 0x73c   : > { %6766 = shalt.err (!%p6763_p0)
}
 0x73d   : > { %s6813_s17 = smov 64   ;;  %s6814_s18 = smov 4  }
 0x73e   : > { %6524 = dma.vmem_to_hbm [thread:$0]  (%p6893_p5), %s10024_s16, 2048, %s10022_s13, %s10030_s28, %s6813_s17, %s6813_s17, %s6814_s18  }
 0x73f PF: > { %p6530_p1 = scmp.ge.s32.totalorder %s6801_s27, 2  ;;  %s5578_s20 = sand.u32 1, %s6789_s24  }
 0x740   : > { %s5579_s14 = scalar_lea.sflag [#allocation3], %s5578_s20 }
 0x741   : > { %p6527_p2 = pnand %p6530_p1, %p6897_p6 }
 0x743   : > { %6784 = dma.done.wait (!%p6527_p2), %s5579_s14, 2048  }
 0x744   : > { %6786 = vsyncadd (!%p6527_p2), %s5579_s14, 4294965248  ;;  %p17_p3 = scmp.ge.s32.totalorder %s6880_s30, 4   ;;  %s10525_s24 = smov %s6793_s25 }
 0x745   : > { %s10526_s25 = smov %s6797_s26  ;;  %s10527_s26 = smov %s6891_s10 }
 0x746   : > { %s10528_s27 = smov %s6880_s30  ;;  %19 = sbr.rel (!%p17_p3) target bundleno = 3 (0x3), region = 93 }
 0x74d   :  { %5584 = vsyncpa [#allocation3], 1 }
 0x74e   :  { %5586 = vsyncpa [#allocation3 + $0x1], 1 }

// kernel: tpu_custom_call.1
= control target key start
LH: loop header
LB: loop body
LE: loop exit
PB: predicated region body
PF: predicated region fallthrough
CT: control target
= control target key end

     0   :  { %12 = vsyncpa [#allocation3], 0  ;;  %s10071_s0 = inlined_call_operand.vmem [shape: bf16[2,256,4], index: 0, kind: input, shape index: {}]   ;;  %s10072_s1 = inlined_call_operand.vmem [shape: bf16[4,128], index: 1, kind: input, shape index: {}]   ;;  %s10073_s2 = inlined_call_operand.vmem [shape: bf16[8,4,32], index: 2, kind: input, shape index: {}]   ;;  %s10074_s3 = inlined_call_operand.vmem [shape: f32[256,8], index: 3, kind: input, shape index: {}]   ;;  %s10075_s4 = inlined_call_operand.vmem [shape: f32[1,128], index: 4, kind: input, shape index: {}]   ;;  %s10076_s5 = inlined_call_operand.vmem [shape: bf16[128,128], index: 5, kind: input, shape index: {}]   ;;  %s10077_s6 = inlined_call_operand.vmem [shape: f32[2,1,128], index: 6, kind: input, shape index: {}]   ;;  %s10078_s7 = inlined_call_operand.hbm [shape: bf16[2,256,128], index: 7, kind: output, shape index: {}]  }
   0x1   :  { %14 = vsyncpa [#allocation3 + $0x1], 0  ;;  %s6855_s24 = smov 0   ;;  %s6857_s25 = smov 0  }
   0x2   :  { %s6859_s26 = smov 0   ;;  %s6861_s27 = smov 0  }
   0x3 LB: > { %s6876_s28 = sadd.s32 4294967295, %s6801_s27   ;;  %s5634_s29 = sadd.s32 4294967294, %s6801_s27   ;;  %s6801_s27 = sphi %s6861_s27, %s10528_s27   ;;  %s6797_s26 = sphi %s6859_s26, %s10527_s26   ;;  %s6793_s25 = sphi %s6857_s25, %s10526_s25   ;;  %s6789_s24 = sphi %s6855_s24, %s10525_s24  }
   0x4   : > { %s6880_s30 = sadd.s32 1, %s6801_s27   ;;  %s184_s8 = sadd.s32 1, %s6797_s26 }
   0x5   : > { %s181_s9 = ssub.s32 %s6801_s27, %s6880_s30  ;;  %p194_p0 = scmp.ne.s32.totalorder %s6797_s26, %s6793_s25 }
   0x6   : > { %p182_p1 = scmp.eq.s32.totalorder %s181_s9, 0  ;;  %p195_p2 = scmp.eq.s32.totalorder %s6876_s28, 1 }
   0x7   : > { %p200_p3 = scmp.ne.s32.totalorder %s6793_s25, %s6789_s24  ;;  %p201_p4 = scmp.eq.s32.totalorder %s5634_s29, 1 }
   0x8   : > { %s6891_s10 = scalar_select %p182_p1, %s6797_s26, %s184_s8  }
   0x9   : > { %p6893_p5 = por %p195_p2, %p194_p0  ;;  %p6897_p6 = por %p201_p4, %p200_p3 }
   0xa   : > { %p5637_p7 = scmp.ge.s32.totalorder %s6801_s27, 1  ;;  %p248_p8 = scmp.lt.s32.totalorder %s6801_s27, 3 }
   0xc   : > { %p249_p9 = pnand %p5637_p7, %p248_p8 }
   0xe   : > { %252 = sbr.rel (%p249_p9) target bundleno = 1855 (0x73f), region = 48 }
  0x15   : > { %v6906_v0 = vld [vmem:[%s10074_s3 + $0x10] sm:$0xff]  ;;  %v6911_v1 = vld [vmem:[%s10074_s3] sm:$0xff]  ;;  %vm454_vm0 = vcmask 1041408   ;;  %p283_p10 = scmp.lt.s32.totalorder %s6876_s28, 1  ;;  %v6803_v2 = vmov 0   ;;  %v6926_v5 = vld [vmem:[%s10074_s3 + $0x18] sm:$0xff] }
  0x16   : > { %6575 = vset.pattern.permute.xlu1 %v6803_v2  ;;  %6574 = vset.pattern.permute.xlu0 %v6803_v2  ;;  %v651_v3 = vld [vmem:[%s10073_s2] sm:$0x3]  ;;  %v6931_v6 = vld [vmem:[%s10074_s3 + $0x8] sm:$0xff]  ;;  %vm405_vm1 = vcmask 31744   ;;  %v6977_v14 = vld [vmem:[%s10074_s3 + $0x38] sm:$0xff]  ;;  %v6804_v55 = vmov 1  }
  0x17   : > { %832 = vperm.xlu1 %6575, %v6906_v0   ;;  %822 = vperm.xlu0 %6574, %v6911_v1   ;;  %v653_v4 = vsel %vm454_vm0, %v651_v3, 0  ;;  %s6921_s19 = scalar_select %p283_p10, %s6876_s28, 1  ;;  %v6943_v7 = vld [vmem:[%s10074_s3 + $0x28] sm:$0xff]  ;;  %v6948_v8 = vld [vmem:[%s10074_s3 + $0x20] sm:$0xff]  ;;  %v6982_v15 = vld [vmem:[%s10074_s3 + $0x30] sm:$0xff]  ;;  %vm798_vm2 = vcmask 1043456  }
  0x18   : > { %6516 = vmatprep.subr.msk.bf16.mxu1 %vm454_vm0, %v651_v3  ;;  %v324_v9 = vld [vmem:[%s10072_s1] sm:$0x3]  ;;  %v6998_v17 = vld [vmem:[%s10074_s3 + $0x48] sm:$0xff]  ;;  %v7015_v20 = vld [vmem:[%s10074_s3 + $0x58] sm:$0xff]  ;;  %s6805_s14 = smov 32   ;;  %vm4811_vm3 = vcmask 261120  }
  0x19   : > { %6196 = vmatpush3.bf16.msra.mxu1 %v653_v4  ;;  %s5855_s29 = sshll.u32 %s6921_s19, 7  ;;  %v456_v11 = vsel %vm454_vm0, %v324_v9, 0  ;;  %6515 = vmatprep.subr.msk.bf16.mxu0 %vm454_vm0, %v324_v9  ;;  %v7003_v18 = vld [vmem:[%s10074_s3 + $0x40] sm:$0xff]  ;;  %v7020_v21 = vld [vmem:[%s10074_s3 + $0x50] sm:$0xff]  ;;  %v7031_v22 = vld [vmem:[%s10074_s3 + $0x68] sm:$0xff]  ;;  %vm4844_vm4 = vcmask 523264  }
  0x1a   : > { %s6938_s13 = scalar_lea.vmem %s10071_s0, %s5855_s29  ;;  %6162 = vmatpush3.bf16.msra.mxu0 %v456_v11  ;;  %v7038_v23 = vld [vmem:[%s10074_s3 + $0x60] sm:$0xff]  ;;  %v7053_v26 = vld [vmem:[%s10074_s3 + $0x78] sm:$0xff]  ;;  %v7058_v27 = vld [vmem:[%s10074_s3 + $0x70] sm:$0xff]  ;;  %vm4877_vm5 = vcmask 785408   ;;  %s290_s29 = scalar_lea.vmem %s10077_s6, %s6921_s19 }
  0x1b   : > { %837 = vperm.xlu1 %6575, %v6926_v5   ;;  %827 = vperm.xlu0 %6574, %v6931_v6   ;;  %v6956_v10 = vld [vmem:[%s6938_s13] sm:$0xff]   ;;  %v6960_v12 = vld [vmem:[%s6938_s13 + $0x8] sm:$0xff]   ;;  %v6966_v13 = vld [vmem:[%s6938_s13 + $0x10] sm:$0xff]   ;;  %s280_s8 = sand.u32 1, %s6793_s25   ;;  %s5888_s15 = sshll.u32 %s6876_s28, 11 }
  0x1c   : > { %6197 = vmatprep.mubr.msk.bf16.mxu1 %vm405_vm1, %v6956_v10  ;;  %6163 = vmatprep.mubr.msk.bf16.mxu0 %vm405_vm1, %v6956_v10  ;;  %v6991_v16 = vld [vmem:[%s6938_s13 + $0x18] sm:$0xff]   ;;  %v7006_v19 = vld [vmem:[%s6938_s13 + $0x20] sm:$0xff]   ;;  %v7041_v24 = vld [vmem:[%s6938_s13 + $0x28] sm:$0xff]   ;;  %s5638_s9 = sshll.u32 %s280_s8, 7  ;;  %s10030_s28 = scalar_lea.sflag [#allocation3], %s280_s8 }
  0x1d   : > { %6198 = vmatmul.mubr.msk.bf16.vlgmr.msra.gmra.mrb[0].mxu1 %vm405_vm1, %v6960_v12  ;;  %6164 = vmatmul.mubr.msk.bf16.vlgmr.msra.gmra.mrb[0].mxu0 %vm405_vm1, %v6960_v12  ;;  %v7044_v25 = vld [vmem:[%s6938_s13 + $0x30] sm:$0xff]   ;;  %v5689_v28 = vld [vmem:[%s10073_s2 + $0x2] sm:$0x3]  ;;  %v7074_v30 = vld [vmem:[%s10074_s3 + $0x88] sm:$0xff]  ;;  %s9973_s19 = scalar_lea.vmem [#allocation2], %s5638_s9 }
  0x1e   : > { %6201 = vmatprep.mubr.msk.bf16.mxu1 %vm405_vm1, %v6966_v13  ;;  %6167 = vmatprep.mubr.msk.bf16.mxu0 %vm405_vm1, %v6966_v13  ;;  %v1175_v29 = vsel %vm454_vm0, %v5689_v28, 0  ;;  %v7079_v31 = vld [vmem:[%s10074_s3 + $0x80] sm:$0xff]  ;;  %v7082_v32 = vld [vmem:[%s6938_s13 + $0x38] sm:$0xff]   ;;  %v7101_v35 = vld [vmem:[%s10074_s3 + $0x90] sm:$0xff]  ;;  %s5563_s16 = sshll.u32 %s9973_s19, 4  ;;  %s10024_s16 = int_to_ptr.vmem [resolvable:$true] %s5563_s16 }
  0x1f   : > { %847 = vperm.xlu1 %6575, %v6943_v7   ;;  %842 = vperm.xlu0 %6574, %v6948_v8   ;;  %v7087_v33 = vld [vmem:[%s6938_s13 + $0x40] sm:$0xff]   ;;  %v7096_v34 = vld [vmem:[%s10074_s3 + $0x98] sm:$0xff]  ;;  %v7114_v36 = vld [vmem:[%s10074_s3 + $0xa8] sm:$0xff]  ;;  %s6739_s20 = scalar_lea.vmem %s10024_s16, 2048 }
  0x20   : > { %6517 = vmatprep.subr.msk.bf16.mxu0 %vm454_vm0, %v5689_v28  ;;  %v7119_v37 = vld [vmem:[%s10074_s3 + $0xa0] sm:$0xff]  ;;  %v7122_v38 = vld [vmem:[%s6938_s13 + $0x48] sm:$0xff]   ;;  %v7125_v39 = vld [vmem:[%s6938_s13 + $0x50] sm:$0xff]   ;;  %p6740_p11 = scmp.ne.s32.totalorder %s10024_s16, %s6739_s20 }
  0x21   : > { %6230 = vmatpush3.bf16.msra.mxu0 %v1175_v29  ;;  %v7134_v40 = vld [vmem:[%s10074_s3 + $0xb8] sm:$0xff]  ;;  %v7139_v41 = vld [vmem:[%s10074_s3 + $0xb0] sm:$0xff]  ;;  %v7152_v42 = vld [vmem:[%s10074_s3 + $0xc8] sm:$0xff] }
  0x22   : > { %v7157_v43 = vld [vmem:[%s10074_s3 + $0xc0] sm:$0xff]  ;;  %v7160_v44 = vld [vmem:[%s6938_s13 + $0x58] sm:$0xff]   ;;  %v7177_v47 = vld [vmem:[%s10074_s3 + $0xd0] sm:$0xff]  ;;  %p6741_p12 = pnand %p6740_p11, %p6893_p5 }
  0x23   : > { %857 = vperm.xlu1 %6575, %v6977_v14   ;;  %852 = vperm.xlu0 %6574, %v6982_v15   ;;  %v7163_v45 = vld [vmem:[%s6938_s13 + $0x60] sm:$0xff]   ;;  %v7172_v46 = vld [vmem:[%s10074_s3 + $0xd8] sm:$0xff]  ;;  %v7190_v48 = vld [vmem:[%s10074_s3 + $0xe8] sm:$0xff] }
  0x24   : > { %v7195_v49 = vld [vmem:[%s10074_s3 + $0xe0] sm:$0xff]  ;;  %v7198_v50 = vld [vmem:[%s6938_s13 + $0x68] sm:$0xff]   ;;  %v7201_v51 = vld [vmem:[%s6938_s13 + $0x70] sm:$0xff]   ;;  %p6742_p13 = pneg %p6741_p12 }
  0x25   : > { %6202 = vmatmul.mubr.msk.bf16.gmra.mrb[4].mxu1 %vm405_vm1, %v6991_v16  ;;  %6168 = vmatmul.mubr.msk.bf16.gmra.mrb[4].mxu0 %vm405_vm1, %v6991_v16  ;;  %v7210_v52 = vld [vmem:[%s10074_s3 + $0xf8] sm:$0xff]  ;;  %v7215_v53 = vld [vmem:[%s10074_s3 + $0xf0] sm:$0xff]  ;;  %v5706_v3 = vld [vmem:[%s10073_s2 + $0x4] sm:$0x3] }
  0x26   : > { %6205 = vmatprep.mubr.msk.bf16.mxu1 %vm405_vm1, %v7006_v19  ;;  %6171 = vmatprep.mubr.msk.bf16.mxu0 %vm405_vm1, %v7006_v19  ;;  %v7226_v54 = vld [vmem:[%s6938_s13 + $0x78] sm:$0xff]   ;;  %v1637_v4 = vsel %vm454_vm0, %v5706_v3, 0 }
  0x27   : > { %867 = vperm.xlu1 %6575, %v6998_v17   ;;  %862 = vperm.xlu0 %6574, %v7003_v18  }
  0x28   : > { %6518 = vmatprep.subr.msk.bf16.mxu1 %vm454_vm0, %v5706_v3 }
  0x29   : > { %6264 = vmatpush3.bf16.msra.mxu1 %v1637_v4 }
  0x2b   : > { %877 = vperm.xlu1 %6575, %v7015_v20   ;;  %872 = vperm.xlu0 %6574, %v7020_v21  }
  0x2d   : > { %6206 = vmatmul.mubr.msk.bf16.gmra.mrb[8].mxu1 %vm405_vm1, %v7041_v24  ;;  %6172 = vmatmul.mubr.msk.bf16.gmra.mrb[8].mxu0 %vm405_vm1, %v7041_v24 }
  0x2e   : > { %6209 = vmatprep.mubr.msk.bf16.mxu1 %vm405_vm1, %v7044_v25  ;;  %6175 = vmatprep.mubr.msk.bf16.mxu0 %vm405_vm1, %v7044_v25 }
  0x2f   : > { %887 = vperm.xlu1 %6575, %v7031_v22   ;;  %882 = vperm.xlu0 %6574, %v7038_v23  }
  0x33   : > { %897 = vperm.xlu1 %6575, %v7053_v26   ;;  %892 = vperm.xlu0 %6574, %v7058_v27  }
  0x35   : > { %6210 = vmatmul.mubr.msk.bf16.gmra.mrb[12].mxu1 %vm405_vm1, %v7082_v32  ;;  %6176 = vmatmul.mubr.msk.bf16.gmra.mrb[12].mxu0 %vm405_vm1, %v7082_v32 }
  0x36   : > { %6213 = vmatprep.mubr.msk.bf16.mxu1 %vm405_vm1, %v7087_v33  ;;  %6179 = vmatprep.mubr.msk.bf16.mxu0 %vm405_vm1, %v7087_v33 }
  0x37   : > { %907 = vperm.xlu1 %6575, %v7074_v30   ;;  %902 = vperm.xlu0 %6574, %v7079_v31  }
  0x3b   : > { %917 = vperm.xlu1 %6575, %v7096_v34   ;;  %912 = vperm.xlu0 %6574, %v7101_v35  }
  0x3d   : > { %6214 = vmatmul.mubr.msk.bf16.gmra.mrb[16].mxu1 %vm405_vm1, %v7122_v38  ;;  %6180 = vmatmul.mubr.msk.bf16.gmra.mrb[16].mxu0 %vm405_vm1, %v7122_v38 }
  0x3e   : > { %6217 = vmatprep.mubr.msk.bf16.mxu1 %vm405_vm1, %v7125_v39  ;;  %6183 = vmatprep.mubr.msk.bf16.mxu0 %vm405_vm1, %v7125_v39 }
  0x3f   : > { %927 = vperm.xlu1 %6575, %v7114_v36   ;;  %922 = vperm.xlu0 %6574, %v7119_v37  }
  0x43   : > { %937 = vperm.xlu1 %6575, %v7134_v40   ;;  %932 = vperm.xlu0 %6574, %v7139_v41  }
  0x45   : > { %6218 = vmatmul.mubr.msk.bf16.gmra.mrb[20].mxu1 %vm405_vm1, %v7160_v44  ;;  %6184 = vmatmul.mubr.msk.bf16.gmra.mrb[20].mxu0 %vm405_vm1, %v7160_v44 }
  0x46   : > { %6221 = vmatprep.mubr.msk.bf16.mxu1 %vm405_vm1, %v7163_v45  ;;  %6187 = vmatprep.mubr.msk.bf16.mxu0 %vm405_vm1, %v7163_v45 }
  0x47   : > { %947 = vperm.xlu1 %6575, %v7152_v42   ;;  %942 = vperm.xlu0 %6574, %v7157_v43  }
  0x4b   : > { %957 = vperm.xlu1 %6575, %v7172_v46   ;;  %952 = vperm.xlu0 %6574, %v7177_v47  }
  0x4d   : > { %6222 = vmatmul.mubr.msk.bf16.gmra.mrb[24].mxu1 %vm405_vm1, %v7198_v50  ;;  %6188 = vmatmul.mubr.msk.bf16.gmra.mrb[24].mxu0 %vm405_vm1, %v7198_v50 }
  0x4e   : > { %6225 = vmatprep.mubr.msk.bf16.mxu1 %vm405_vm1, %v7201_v51  ;;  %6191 = vmatprep.mubr.msk.bf16.mxu0 %vm405_vm1, %v7201_v51 }
  0x4f   : > { %967 = vperm.xlu1 %6575, %v7190_v48   ;;  %962 = vperm.xlu0 %6574, %v7195_v49  }
  0x53   : > { %977 = vperm.xlu1 %6575, %v7210_v52   ;;  %972 = vperm.xlu0 %6574, %v7215_v53  }
  0x55   : > { %6226 = vmatmul.mubr.msk.bf16.gmra.mrb[28].mxu1 %vm405_vm1, %v7226_v54  ;;  %6192 = vmatmul.mubr.msk.bf16.gmra.mrb[28].mxu0 %vm405_vm1, %v7226_v54 }
  0x56   : > { %6265 = vmatprep.mubr.msk.bf16.mxu1 %vm405_vm1, %v6956_v10  ;;  %6231 = vmatprep.mubr.msk.bf16.mxu0 %vm405_vm1, %v6956_v10 }
  0x57   : > { %6577 = vset.pattern.permute.xlu1 %v6804_v55  ;;  %6576 = vset.pattern.permute.xlu0 %v6804_v55 }
  0x58   : > { %1319 = vperm.xlu1 %6577, %v6931_v6   ;;  %1315 = vperm.xlu0 %6576, %v6911_v1  }
  0x5c   : > { %1323 = vperm.xlu1 %6577, %v6906_v0   ;;  %1327 = vperm.xlu0 %6576, %v6926_v5  }
  0x5d   : > { %6232 = vmatmul.mubr.msk.bf16.vlgmr.msra.gmra.mrb[32].mxu0 %vm405_vm1, %v6960_v12  ;;  %6266 = vmatmul.mubr.msk.bf16.vlgmr.msra.gmra.mrb[32].mxu1 %vm405_vm1, %v6960_v12 }
  0x5e   : > { %6235 = vmatprep.mubr.msk.bf16.mxu0 %vm405_vm1, %v6966_v13  ;;  %6269 = vmatprep.mubr.msk.bf16.mxu1 %vm405_vm1, %v6966_v13 }
  0x60   : > { %1331 = vperm.xlu1 %6577, %v6948_v8   ;;  %1335 = vperm.xlu0 %6576, %v6943_v7  }
  0x64   : > { %1339 = vperm.xlu1 %6577, %v6982_v15   ;;  %1343 = vperm.xlu0 %6576, %v6977_v14  }
  0x65   : > { %6236 = vmatmul.mubr.msk.bf16.gmra.mrb[36].mxu0 %vm405_vm1, %v6991_v16  ;;  %6270 = vmatmul.mubr.msk.bf16.gmra.mrb[36].mxu1 %vm405_vm1, %v6991_v16 }
  0x66   : > { %6239 = vmatprep.mubr.msk.bf16.mxu0 %vm405_vm1, %v7006_v19  ;;  %6273 = vmatprep.mubr.msk.bf16.mxu1 %vm405_vm1, %v7006_v19 }
  0x68   : > { %1347 = vperm.xlu1 %6577, %v7003_v18  }
  0x6d   : > { %6240 = vmatmul.mubr.msk.bf16.gmra.mrb[40].mxu0 %vm405_vm1, %v7041_v24  ;;  %6274 = vmatmul.mubr.msk.bf16.gmra.mrb[40].mxu1 %vm405_vm1, %v7041_v24 }
  0x6e   : > { %6243 = vmatprep.mubr.msk.bf16.mxu0 %vm405_vm1, %v7044_v25  ;;  %6277 = vmatprep.mubr.msk.bf16.mxu1 %vm405_vm1, %v7044_v25 }
  0x75   : > { %6244 = vmatmul.mubr.msk.bf16.gmra.mrb[44].mxu0 %vm405_vm1, %v7082_v32  ;;  %6278 = vmatmul.mubr.msk.bf16.gmra.mrb[44].mxu1 %vm405_vm1, %v7082_v32 }
  0x76   : > { %6247 = vmatprep.mubr.msk.bf16.mxu0 %vm405_vm1, %v7087_v33  ;;  %6281 = vmatprep.mubr.msk.bf16.mxu1 %vm405_vm1, %v7087_v33 }
  0x7d   : > { %6248 = vmatmul.mubr.msk.bf16.gmra.mrb[48].mxu0 %vm405_vm1, %v7122_v38  ;;  %6282 = vmatmul.mubr.msk.bf16.gmra.mrb[48].mxu1 %vm405_vm1, %v7122_v38 }
  0x7e   : > { %6251 = vmatprep.mubr.msk.bf16.mxu0 %vm405_vm1, %v7125_v39  ;;  %6285 = vmatprep.mubr.msk.bf16.mxu1 %vm405_vm1, %v7125_v39 }
  0x85   : > { %6252 = vmatmul.mubr.msk.bf16.gmra.mrb[52].mxu0 %vm405_vm1, %v7160_v44  ;;  %6286 = vmatmul.mubr.msk.bf16.gmra.mrb[52].mxu1 %vm405_vm1, %v7160_v44 }
  0x86   : > { %6255 = vmatprep.mubr.msk.bf16.mxu0 %vm405_vm1, %v7163_v45  ;;  %6289 = vmatprep.mubr.msk.bf16.mxu1 %vm405_vm1, %v7163_v45 }
  0x8d   : > { %6256 = vmatmul.mubr.msk.bf16.gmra.mrb[56].mxu0 %vm405_vm1, %v7198_v50  ;;  %6290 = vmatmul.mubr.msk.bf16.gmra.mrb[56].mxu1 %vm405_vm1, %v7198_v50 }
  0x8e   : > { %6259 = vmatprep.mubr.msk.bf16.mxu0 %vm405_vm1, %v7201_v51  ;;  %6293 = vmatprep.mubr.msk.bf16.mxu1 %vm405_vm1, %v7201_v51 }
  0x95   : > { %6260 = vmatmul.mubr.msk.bf16.gmra.mrb[60].mxu0 %vm405_vm1, %v7226_v54  ;;  %6294 = vmatmul.mubr.msk.bf16.gmra.mrb[60].mxu1 %vm405_vm1, %v7226_v54 }
  0x96   : > { %v833_v56 = vpop.permute.xlu1 %832  ;;  %v823_v57 = vpop.permute.xlu0 %822  ;;  %6299 = vmatprep.mubr.msk.bf16.mxu0 %vm405_vm1, %v6956_v10  ;;  %6333 = vmatprep.mubr.msk.bf16.mxu1 %vm405_vm1, %v6956_v10 }
  0x97   : > { %v980_v58 = vmul.f32 0.0, %v823_v57  ;;  %v982_v59 = vmul.f32 0.0, %v833_v56 }
  0x99   : > { %1044 = vrot.lane.b32.xlu0 %v980_v58, %s6805_s14 }
  0x9a   : > { %v838_v60 = vpop.permute.xlu1 %837  ;;  %v828_v61 = vpop.permute.xlu0 %827 }
  0x9b   : > { %v981_v62 = vmul.f32 0.0, %v828_v61  ;;  %v983_v1 = vmul.f32 0.0, %v838_v60 }
  0x9d   : > { %1048 = vrot.lane.b32.xlu0 %v982_v59, %s6805_s14  ;;  %1046 = vrot.lane.b32.xlu1 %v981_v62, %s6805_s14 }
  0x9e   : > { %v848_v63 = vpop.permute.xlu1 %847  ;;  %v843_v0 = vpop.permute.xlu0 %842 }
  0x9f   : > { %v984_v2 = vmul.f32 0.0, %v843_v0  ;;  %v985_v7 = vmul.f32 0.0, %v848_v63 }
  0xa1   : > { %1050 = vrot.lane.b32.xlu1 %v983_v1, %s6805_s14  ;;  %1052 = vrot.lane.b32.xlu0 %v984_v2, %s6805_s14 }
  0xa2   : > { %v858_v5 = vpop.permute.xlu1 %857  ;;  %v853_v6 = vpop.permute.xlu0 %852 }
  0xa3   : > { %v986_v8 = vmul.f32 0.0, %v853_v6  ;;  %v987_v14 = vmul.f32 0.0, %v858_v5 }
  0xa5   : > { %1054 = vrot.lane.b32.xlu1 %v985_v7, %s6805_s14  ;;  %1056 = vrot.lane.b32.xlu0 %v986_v8, %s6805_s14 }
  0xa6   : > { %v868_v9 = vpop.permute.xlu1 %867  ;;  %v863_v11 = vpop.permute.xlu0 %862 }
  0xa7   : > { %v988_v15 = vmul.f32 0.0, %v863_v11  ;;  %v989_v29 = vmul.f32 0.0, %v868_v9 }
  0xa9   : > { %1058 = vrot.lane.b32.xlu1 %v987_v14, %s6805_s14  ;;  %1060 = vrot.lane.b32.xlu0 %v988_v15, %s6805_s14 }
  0xaa   : > { %v878_v18 = vpop.permute.xlu1 %877  ;;  %v873_v28 = vpop.permute.xlu0 %872 }
  0xab   : > { %v990_v55 = vmul.f32 0.0, %v873_v28  ;;  %v991_v58 = vmul.f32 0.0, %v878_v18 }
  0xad   : > { %1062 = vrot.lane.b32.xlu1 %v989_v29, %s6805_s14  ;;  %1064 = vrot.lane.b32.xlu0 %v990_v55, %s6805_s14 }
  0xae   : > { %v888_v56 = vpop.permute.xlu1 %887  ;;  %v883_v57 = vpop.permute.xlu0 %882 }
  0xaf   : > { %v992_v59 = vmul.f32 0.0, %v883_v57  ;;  %v993_v62 = vmul.f32 0.0, %v888_v56 }
  0xb1   : > { %1066 = vrot.lane.b32.xlu1 %v991_v58, %s6805_s14  ;;  %1068 = vrot.lane.b32.xlu0 %v992_v59, %s6805_s14 }
  0xb2   : > { %v898_v60 = vpop.permute.xlu1 %897  ;;  %v893_v61 = vpop.permute.xlu0 %892 }
  0xb3   : > { %v994_v63 = vmul.f32 0.0, %v893_v61  ;;  %v995_v2 = vmul.f32 0.0, %v898_v60 }
  0xb5   : > { %1070 = vrot.lane.b32.xlu1 %v993_v62, %s6805_s14  ;;  %1072 = vrot.lane.b32.xlu0 %v994_v63, %s6805_s14 }
  0xb6   : > { %v908_v0 = vpop.permute.xlu1 %907  ;;  %v903_v1 = vpop.permute.xlu0 %902 }
  0xb7   : > { %v996_v3 = vmul.f32 0.0, %v903_v1  ;;  %v997_v6 = vmul.f32 0.0, %v908_v0 }
  0xb9   : > { %1074 = vrot.lane.b32.xlu1 %v995_v2, %s6805_s14  ;;  %1076 = vrot.lane.b32.xlu0 %v996_v3, %s6805_s14 }
  0xba   : > { %v918_v4 = vpop.permute.xlu1 %917  ;;  %v913_v5 = vpop.permute.xlu0 %912 }
  0xbb   : > { %v998_v7 = vmul.f32 0.0, %v913_v5  ;;  %v999_v11 = vmul.f32 0.0, %v918_v4 }
  0xbd   : > { %1078 = vrot.lane.b32.xlu1 %v997_v6, %s6805_s14  ;;  %1080 = vrot.lane.b32.xlu0 %v998_v7, %s6805_s14 }
  0xbe   : > { %v928_v8 = vpop.permute.xlu1 %927  ;;  %v923_v9 = vpop.permute.xlu0 %922 }
  0xbf   : > { %v1000_v14 = vmul.f32 0.0, %v923_v9  ;;  %v1001_v18 = vmul.f32 0.0, %v928_v8 }
  0xc1   : > { %1082 = vrot.lane.b32.xlu1 %v999_v11, %s6805_s14  ;;  %1084 = vrot.lane.b32.xlu0 %v1000_v14, %s6805_s14 }
  0xc2   : > { %v933_v15 = vpop.permute.xlu0 %932  ;;  %v938_v29 = vpop.permute.xlu1 %937 }
  0xc3   : > { %v1002_v28 = vmul.f32 0.0, %v933_v15  ;;  %v1003_v56 = vmul.f32 0.0, %v938_v29 }
  0xc5   : > { %1086 = vrot.lane.b32.xlu1 %v1001_v18, %s6805_s14  ;;  %1088 = vrot.lane.b32.xlu0 %v1002_v28, %s6805_s14 }
  0xc6   : > { %v943_v55 = vpop.permute.xlu0 %942  ;;  %v7333_v58 = vpop.permute.xlu1 %947 }
  0xc7   : > { %v1004_v57 = vmul.f32 0.0, %v943_v55 }
  0xc9   : > { %1090 = vrot.lane.b32.xlu1 %v1003_v56, %s6805_s14  ;;  %1092 = vrot.lane.b32.xlu0 %v1004_v57, %s6805_s14  ;;  %v6806_v57 = vmov 2  }
  0xca   : > { %v7339_v59 = vpop.permute.xlu1 %957 }
  0xcd   : > { %1355 = vperm.xlu1 %6577, %v7020_v21   ;;  %1351 = vperm.xlu0 %6576, %v6998_v17   ;;  %v7349_v21 = vpop.permute.xlu0 %952 }
  0xce   : > { %v7347_v17 = vpop.permute.xlu1 %967 }
  0xd1   : > { %1363 = vperm.xlu1 %6577, %v7038_v23   ;;  %1359 = vperm.xlu0 %6576, %v7015_v20  }
  0xd2   : > { %v7359_v20 = vpop.permute.xlu1 %977 }
  0xd5   : > { %1371 = vperm.xlu1 %6577, %v7058_v27   ;;  %1367 = vperm.xlu0 %6576, %v7031_v22   ;;  %v7361_v22 = vpop.permute.xlu0 %962 }
  0xd7   : > { %v1320_v23 = vpop.permute.xlu1 %1319 }
  0xd8   : > { %v1443_v18 = vmul.f32 0.0, %v1320_v23 }
  0xd9   : > { %1379 = vperm.xlu1 %6577, %v7079_v31   ;;  %1375 = vperm.xlu0 %6576, %v7053_v26   ;;  %v7365_v60 = vpop.permute.xlu0 %972 }
  0xdb   : > { %v1324_v10 = vpop.permute.xlu1 %1323 }
  0xdc   : > { %v1444_v28 = vmul.f32 0.0, %v1324_v10 }
  0xdd   : > { %1387 = vperm.xlu1 %6577, %v7101_v35   ;;  %1383 = vperm.xlu0 %6576, %v7074_v30   ;;  %v1316_v61 = vpop.permute.xlu0 %1315 }
  0xde   : > { %v1442_v7 = vmul.f32 0.0, %v1316_v61 }
  0xdf   : > { %v1332_v2 = vpop.permute.xlu1 %1331 }
  0xe1   : > { %1395 = vperm.xlu1 %6577, %v7119_v37   ;;  %1391 = vperm.xlu0 %6576, %v7096_v34   ;;  %v1328_v63 = vpop.permute.xlu0 %1327 }
  0xe2   : > { %v1445_v10 = vmul.f32 0.0, %v1328_v63 }
  0xe3   : > { %v1340_v56 = vpop.permute.xlu1 %1339 }
  0xe5   : > { %1403 = vperm.xlu1 %6577, %v7139_v41   ;;  %1399 = vperm.xlu0 %6576, %v7114_v36   ;;  %v1336_v29 = vpop.permute.xlu0 %1335 }
  0xe9   : > { %1411 = vperm.xlu1 %6577, %v7157_v43   ;;  %1407 = vperm.xlu0 %6576, %v7134_v40  }
  0xed   : > { %1419 = vperm.xlu1 %6577, %v7177_v47   ;;  %1415 = vperm.xlu0 %6576, %v7152_v42  }
  0xf0   : > { %v6199_v62 = vpop.f32.mrb[0].mxu1  ;;  %v7375_v4 = vpop.f32.mrb[0].mxu0 }
  0xf1   : > { %1427 = vperm.xlu1 %6577, %v7195_v49   ;;  %1423 = vperm.xlu0 %6576, %v7172_v46   ;;  %v802_v0 = vrot.slane %v6199_v62, 4  ;;  %v7373_v1 = vpop.f32.mrb[1].mxu1  ;;  %10127 = vst [vmem:[#allocation5_spill] sm:$0xff] %v7375_v4  ;;  %v7377_v6 = vpop.f32.mrb[1].mxu0 }
  0xf2   : > { %v6200_v3 = vpop.f32.mrb[2].mxu1  ;;  %10128 = vst [vmem:[#allocation6_spill] sm:$0xff] %v7377_v6  ;;  %v10079_v42 = vrot.slane %v7373_v1, 4  ;;  %v7382_v8 = vpop.f32.mrb[2].mxu0 }
  0xf3   : > { %v804_v40 = vrot.slane %v6200_v3, 4  ;;  %v692_v5 = vpop.f32.mrb[3].mxu1  ;;  %10129 = vst [vmem:[#allocation7_spill] sm:$0xff] %v7382_v8  ;;  %v7387_v11 = vpop.f32.mrb[3].mxu0 }
  0xf4   : > { %v800_v46 = vrot.slane %v692_v5, 4  ;;  %10130 = vst [vmem:[#allocation8_spill] sm:$0xff] %v7387_v11 }
  0xf5   : > { %1435 = vperm.xlu1 %6577, %v7215_v53   ;;  %1431 = vperm.xlu0 %6576, %v7190_v48   ;;  %v7385_v9 = vsel %vm798_vm2, %v802_v0, %v804_v40 }
  0xf6   : > { %v7392_v14 = vsel %vm798_vm2, %v10079_v42, %v800_v46  ;;  %v7395_v15 = vsel %vm798_vm2, %v800_v46, %v802_v0  ;;  %v1446_v46 = vmul.f32 0.0, %v1332_v2  ;;  %v1348_v2 = vpop.permute.xlu1 %1347 }
  0xf8   : > { %v6203_v48 = vpop.f32.mrb[4].mxu1  ;;  %v7399_v5 = vpop.f32.mrb[4].mxu0 }
  0xf9   : > { %1439 = vperm.xlu0 %6576, %v7210_v52   ;;  %1506 = vrot.lane.b32.xlu1 %v1442_v7, %s6805_s14  ;;  %v705_v55 = vpop.f32.mrb[5].mxu1  ;;  %v810_v61 = vrot.slane %v6203_v48, 4  ;;  %10131 = vst [vmem:[#allocation9_spill] sm:$0xff] %v7399_v5  ;;  %v7401_v0 = vpop.f32.mrb[5].mxu0 }
  0xfa   : > { %6578 = vset.pattern.permute.xlu1 %v6806_v57  ;;  %v806_v62 = vrot.slane %v705_v55, 4  ;;  %v6204_v3 = vpop.f32.mrb[6].mxu1  ;;  %10132 = vst [vmem:[#allocation10_spill] sm:$0xff] %v7401_v0  ;;  %v7408_v7 = vpop.f32.mrb[6].mxu0 }
  0xfb   : > { %v708_v42 = vpop.f32.mrb[7].mxu1  ;;  %10133 = vst [vmem:[#allocation11_spill] sm:$0xff] %v7408_v7  ;;  %v7410_v48 = vpop.f32.mrb[7].mxu0 }
  0xfc   : > { %v7404_v23 = vsel %vm798_vm2, %v804_v40, %v806_v62  ;;  %v808_v52 = vrot.slane %v708_v42, 4  ;;  %10134 = vst [vmem:[#allocation12_spill] sm:$0xff] %v7410_v48  ;;  %v1447_v40 = vmul.f32 0.0, %v1336_v29  ;;  %v1448_v42 = vmul.f32 0.0, %v1340_v56 }
  0xfd   : > { %1510 = vrot.lane.b32.xlu1 %v1444_v28, %s6805_s14  ;;  %1508 = vrot.lane.b32.xlu0 %v1443_v18, %s6805_s14  ;;  %v1344_v28 = vpop.permute.xlu0 %1343 }
  0xfe   : > { %6579 = vset.pattern.permute.xlu0 %v6806_v57  ;;  %v7413_v55 = vsel %vm798_vm2, %v806_v62, %v808_v52  ;;  %v7416_v3 = vsel %vm798_vm2, %v808_v52, %v810_v61  ;;  %v1449_v61 = vmul.f32 0.0, %v1344_v28  ;;  %v1450_v52 = vmul.f32 0.0, %v1348_v2 }
 0x100   : > { %v6207_v63 = vpop.f32.mrb[8].mxu1  ;;  %v7420_v7 = vpop.f32.mrb[8].mxu0 }
 0x101   : > { %1514 = vrot.lane.b32.xlu1 %v1446_v46, %s6805_s14  ;;  %1512 = vrot.lane.b32.xlu0 %v1445_v10, %s6805_s14  ;;  %v720_v18 = vpop.f32.mrb[9].mxu1  ;;  %10135 = vst [vmem:[#allocation13_spill] sm:$0xff] %v7420_v7  ;;  %v7422_v57 = vpop.f32.mrb[9].mxu0 }
 0x102   : > { %v6208_v48 = vpop.f32.mrb[10].mxu1  ;;  %10136 = vst [vmem:[#allocation14_spill] sm:$0xff] %v7422_v57  ;;  %v7426_v29 = vpop.f32.mrb[10].mxu0 }
 0x103   : > { %v722_v62 = vpop.f32.mrb[11].mxu1  ;;  %10137 = vst [vmem:[#allocation15_spill] sm:$0xff] %v7426_v29  ;;  %v7428_v56 = vpop.f32.mrb[11].mxu0 }
 0x104   : > { %10138 = vst [vmem:[#allocation16_spill] sm:$0xff] %v7428_v56 }
 0x105   : > { %1518 = vrot.lane.b32.xlu1 %v1448_v42, %s6805_s14  ;;  %1516 = vrot.lane.b32.xlu0 %v1447_v40, %s6805_s14 }
 0x108   : > { %v6211_v10 = vpop.f32.mrb[12].mxu1  ;;  %v7434_v63 = vpop.f32.mrb[12].mxu0 }
 0x109   : > { %1522 = vrot.lane.b32.xlu1 %v1450_v52, %s6805_s14  ;;  %1520 = vrot.lane.b32.xlu0 %v1449_v61, %s6805_s14  ;;  %v732_v46 = vpop.f32.mrb[13].mxu1  ;;  %10140 = vst [vmem:[#allocation18_spill] sm:$0xff] %v7434_v63  ;;  %v7436_v18 = vpop.f32.mrb[13].mxu0 }
 0x10a   : > { %10141 = vst [vmem:[#allocation19_spill] sm:$0xff] %v7436_v18  ;;  %v6212_v42 = vpop.f32.mrb[14].mxu1  ;;  %v7438_v28 = vpop.f32.mrb[14].mxu0 }
 0x10b   : > { %v7432_v48 = vpop.permute.xlu0 %1044  ;;  %10142 = vst [vmem:[#allocation20_spill] sm:$0xff] %v7438_v28  ;;  %v734_v40 = vpop.f32.mrb[15].mxu1 }
 0x10c   : > { %10139 = vst [vmem:[#allocation17_spill] sm:$0xff] %v7432_v48  ;;  %v7440_v2 = vpop.f32.mrb[15].mxu0  ;;  %v8134_v48 = vld [vmem:[%s10074_s3 + $0xa0] sm:$0xff] }
 0x10d   : > { %10143 = vst [vmem:[#allocation21_spill] sm:$0xff] %v7440_v2 }
 0x10f   : > { %v7442_v62 = vpop.permute.xlu1 %1046  ;;  %v7444_v29 = vpop.permute.xlu0 %1048 }
 0x110   : > { %10144 = vst [vmem:[#allocation22_spill] sm:$0xff] %v7442_v62  ;;  %10145 = vst [vmem:[#allocation23_spill] sm:$0xff] %v7444_v29  ;;  %v6215_v52 = vpop.f32.mrb[16].mxu1  ;;  %v7450_v56 = vpop.f32.mrb[16].mxu0 }
 0x111   : > { %v744_v61 = vpop.f32.mrb[17].mxu1  ;;  %10148 = vst [vmem:[#allocation26_spill] sm:$0xff] %v7450_v56  ;;  %v7452_v18 = vpop.f32.mrb[17].mxu0 }
 0x112   : > { %v6216_v63 = vpop.f32.mrb[18].mxu1  ;;  %10149 = vst [vmem:[#allocation27_spill] sm:$0xff] %v7452_v18  ;;  %v7454_v28 = vpop.f32.mrb[18].mxu0 }
 0x113   : > { %v7446_v10 = vpop.permute.xlu1 %1050  ;;  %v7448_v46 = vpop.permute.xlu0 %1052  ;;  %10150 = vst [vmem:[#allocation28_spill] sm:$0xff] %v7454_v28 }
 0x114   : > { %10146 = vst [vmem:[#allocation24_spill] sm:$0xff] %v7446_v10  ;;  %10147 = vst [vmem:[#allocation25_spill] sm:$0xff] %v7448_v46  ;;  %v746_v42 = vpop.f32.mrb[19].mxu1  ;;  %v7460_v57 = vpop.f32.mrb[19].mxu0 }
 0x115   : > { %10153 = vst [vmem:[#allocation31_spill] sm:$0xff] %v7460_v57 }
 0x117   : > { %v7456_v40 = vpop.permute.xlu1 %1054  ;;  %v7458_v2 = vpop.permute.xlu0 %1056 }
 0x118   : > { %10151 = vst [vmem:[#allocation29_spill] sm:$0xff] %v7456_v40  ;;  %10152 = vst [vmem:[#allocation30_spill] sm:$0xff] %v7458_v2  ;;  %v6219_v52 = vpop.f32.mrb[20].mxu1  ;;  %v7466_v46 = vpop.f32.mrb[20].mxu0 }
 0x119   : > { %v756_v61 = vpop.f32.mrb[21].mxu1  ;;  %10156 = vst [vmem:[#allocation34_spill] sm:$0xff] %v7466_v46  ;;  %v7468_v56 = vpop.f32.mrb[21].mxu0 }
 0x11a   : > { %v6220_v63 = vpop.f32.mrb[22].mxu1  ;;  %10157 = vst [vmem:[#allocation35_spill] sm:$0xff] %v7468_v56  ;;  %v7470_v18 = vpop.f32.mrb[22].mxu0 }
 0x11b   : > { %v7462_v7 = vpop.permute.xlu1 %1058  ;;  %v7464_v5 = vpop.permute.xlu0 %1060  ;;  %10158 = vst [vmem:[#allocation36_spill] sm:$0xff] %v7470_v18 }
 0x11c   : > { %10154 = vst [vmem:[#allocation32_spill] sm:$0xff] %v7462_v7  ;;  %10155 = vst [vmem:[#allocation33_spill] sm:$0xff] %v7464_v5  ;;  %v758_v42 = vpop.f32.mrb[23].mxu1  ;;  %v7476_v2 = vpop.f32.mrb[23].mxu0 }
 0x11d   : > { %10161 = vst [vmem:[#allocation39_spill] sm:$0xff] %v7476_v2 }
 0x11f   : > { %v7472_v28 = vpop.permute.xlu1 %1062  ;;  %v7474_v40 = vpop.permute.xlu0 %1064 }
 0x120   : > { %10159 = vst [vmem:[#allocation37_spill] sm:$0xff] %v7472_v28  ;;  %10160 = vst [vmem:[#allocation38_spill] sm:$0xff] %v7474_v40  ;;  %v6223_v52 = vpop.f32.mrb[24].mxu1  ;;  %v7482_v5 = vpop.f32.mrb[24].mxu0 }
 0x121   : > { %v768_v61 = vpop.f32.mrb[25].mxu1  ;;  %10164 = vst [vmem:[#allocation42_spill] sm:$0xff] %v7482_v5  ;;  %v7484_v46 = vpop.f32.mrb[25].mxu0 }
 0x122   : > { %v6224_v63 = vpop.f32.mrb[26].mxu1  ;;  %10165 = vst [vmem:[#allocation43_spill] sm:$0xff] %v7484_v46  ;;  %v7486_v56 = vpop.f32.mrb[26].mxu0 }
 0x123   : > { %v7478_v57 = vpop.permute.xlu1 %1066  ;;  %v7480_v7 = vpop.permute.xlu0 %1068  ;;  %10166 = vst [vmem:[#allocation44_spill] sm:$0xff] %v7486_v56 }
 0x124   : > { %10162 = vst [vmem:[#allocation40_spill] sm:$0xff] %v7478_v57  ;;  %10163 = vst [vmem:[#allocation41_spill] sm:$0xff] %v7480_v7  ;;  %v770_v42 = vpop.f32.mrb[27].mxu1  ;;  %v7488_v18 = vpop.f32.mrb[27].mxu0 }
 0x125   : > { %10167 = vst [vmem:[#allocation45_spill] sm:$0xff] %v7488_v18 }
 0x127   : > { %v7490_v28 = vpop.permute.xlu1 %1070  ;;  %v7492_v2 = vpop.permute.xlu0 %1072 }
 0x128   : > { %10168 = vst [vmem:[#allocation46_spill] sm:$0xff] %v7490_v28  ;;  %v6227_v40 = vpop.f32.mrb[28].mxu1  ;;  %10169 = vst [vmem:[#allocation47_spill] sm:$0xff] %v7492_v2  ;;  %v7494_v61 = vpop.f32.mrb[28].mxu0 }
 0x129   : > { %v780_v52 = vpop.f32.mrb[29].mxu1  ;;  %10170 = vst [vmem:[#allocation48_spill] sm:$0xff] %v7494_v61  ;;  %v7496_v7 = vpop.f32.mrb[29].mxu0 }
 0x12a   : > { %v6228_v57 = vpop.f32.mrb[30].mxu1  ;;  %10171 = vst [vmem:[#allocation49_spill] sm:$0xff] %v7496_v7  ;;  %v7498_v63 = vpop.f32.mrb[30].mxu0 }
 0x12b   : > { %v782_v5 = vpop.f32.mrb[31].mxu1  ;;  %10172 = vst [vmem:[#allocation50_spill] sm:$0xff] %v7498_v63  ;;  %v7500_v46 = vpop.permute.xlu1 %1074 }
 0x12c   : > { %10173 = vst [vmem:[#allocation51_spill] sm:$0xff] %v7500_v46  ;;  %v7502_v42 = vpop.permute.xlu0 %1076  ;;  %v7504_v56 = vpop.f32.mrb[31].mxu0  ;;  %v5723_v5 = vld [vmem:[%s10073_s2 + $0x6] sm:$0x3] }
 0x12d   : > { %10174 = vst [vmem:[#allocation52_spill] sm:$0xff] %v7502_v42  ;;  %10175 = vst [vmem:[#allocation53_spill] sm:$0xff] %v7504_v56  ;;  %6519 = vmatprep.subr.msk.bf16.mxu0 %vm454_vm0, %v5723_v5  ;;  %v2141_v7 = vsel %vm454_vm0, %v5723_v5, 0 }
 0x12e   : > { %6298 = vmatpush3.bf16.msra.mxu0 %v2141_v7 }
 0x12f   : > { %v7508_v40 = vpop.permute.xlu1 %1078 }
 0x130   : > { %v7506_v18 = vpop.f32.mrb[32].mxu0  ;;  %10176 = vst [vmem:[#allocation54_spill] sm:$0xff] %v7508_v40  ;;  %v7512_v52 = vpop.permute.xlu0 %1080 }
 0x131   : > { %v7510_v2 = vpop.f32.mrb[33].mxu0  ;;  %10177 = vst [vmem:[#allocation55_spill] sm:$0xff] %v7512_v52  ;;  %6300 = vmatmul.mubr.msk.bf16.vlgmr.msra.gmra.mrb[64].mxu0 %vm405_vm1, %v6960_v12 }
 0x132   : > { %v7514_v57 = vpop.f32.mrb[34].mxu0  ;;  %6303 = vmatprep.mubr.msk.bf16.mxu0 %vm405_vm1, %v6966_v13 }
 0x133   : > { %v7519_v61 = vpop.f32.mrb[35].mxu0  ;;  %v7523_v63 = vpop.permute.xlu1 %1082 }
 0x134   : > { %10178 = vst [vmem:[#allocation56_spill] sm:$0xff] %v7523_v63  ;;  %v7525_v56 = vpop.permute.xlu0 %1084 }
 0x135   : > { %10179 = vst [vmem:[#allocation57_spill] sm:$0xff] %v7525_v56 }
 0x137   : > { %v7539_v5 = vpop.permute.xlu1 %1086 }
 0x138   : > { %v7527_v42 = vpop.f32.mrb[36].mxu0  ;;  %10180 = vst [vmem:[#allocation58_spill] sm:$0xff] %v7539_v5  ;;  %v7541_v7 = vpop.permute.xlu0 %1088 }
 0x139   : > { %v7531_v52 = vpop.f32.mrb[37].mxu0  ;;  %10181 = vst [vmem:[#allocation59_spill] sm:$0xff] %v7541_v7  ;;  %6304 = vmatmul.mubr.msk.bf16.gmra.mrb[68].mxu0 %vm405_vm1, %v6991_v16 }
 0x13a   : > { %v7535_v40 = vpop.f32.mrb[38].mxu0  ;;  %6307 = vmatprep.mubr.msk.bf16.mxu0 %vm405_vm1, %v7006_v19 }
 0x13b   : > { %v7537_v28 = vpop.f32.mrb[39].mxu0  ;;  %v7547_v0 = vpop.permute.xlu1 %1090 }
 0x13c   : > { %10182 = vst [vmem:[#allocation60_spill] sm:$0xff] %v7547_v0  ;;  %v7549_v13 = vpop.permute.xlu0 %1092 }
 0x13d   : > { %10183 = vst [vmem:[#allocation61_spill] sm:$0xff] %v7549_v13 }
 0x140   : > { %v6241_v56 = vpop.f32.mrb[40].mxu0 }
 0x141   : > { %v1243_v12 = vpop.f32.mrb[41].mxu0  ;;  %6308 = vmatmul.mubr.msk.bf16.gmra.mrb[72].mxu0 %vm405_vm1, %v7041_v24 }
 0x142   : > { %v6242_v63 = vpop.f32.mrb[42].mxu0  ;;  %6311 = vmatprep.mubr.msk.bf16.mxu0 %vm405_vm1, %v7044_v25 }
 0x143   : > { %v1245_v46 = vpop.f32.mrb[43].mxu0 }
 0x148   : > { %v6245_v16 = vpop.f32.mrb[44].mxu0 }
 0x149   : > { %v1255_v56 = vpop.f32.mrb[45].mxu0  ;;  %6312 = vmatmul.mubr.msk.bf16.gmra.mrb[76].mxu0 %vm405_vm1, %v7082_v32 }
 0x14a   : > { %v6246_v19 = vpop.f32.mrb[46].mxu0  ;;  %6315 = vmatprep.mubr.msk.bf16.mxu0 %vm405_vm1, %v7087_v33 }
 0x14b   : > { %v1257_v0 = vpop.f32.mrb[47].mxu0 }
 0x14c   : > { %v1356_v8 = vpop.permute.xlu1 %1355  ;;  %v1352_v10 = vpop.permute.xlu0 %1351 }
 0x14d   : > { %v1452_v7 = vmul.f32 0.0, %v1356_v8  ;;  %v1451_v5 = vmul.f32 0.0, %v1352_v10 }
 0x14f   : > { %1526 = vrot.lane.b32.xlu1 %v1452_v7, %s6805_s14  ;;  %1524 = vrot.lane.b32.xlu0 %v1451_v5, %s6805_s14 }
 0x150   : > { %v1364_v46 = vpop.permute.xlu1 %1363  ;;  %v1360_v63 = vpop.permute.xlu0 %1359 }
 0x151   : > { %v1454_v12 = vmul.f32 0.0, %v1364_v46  ;;  %v1453_v13 = vmul.f32 0.0, %v1360_v63  ;;  %v6249_v5 = vpop.f32.mrb[48].mxu0  ;;  %6316 = vmatmul.mubr.msk.bf16.gmra.mrb[80].mxu0 %vm405_vm1, %v7122_v38 }
 0x152   : > { %v1267_v7 = vpop.f32.mrb[49].mxu0  ;;  %6319 = vmatprep.mubr.msk.bf16.mxu0 %vm405_vm1, %v7125_v39 }
 0x153   : > { %1530 = vrot.lane.b32.xlu1 %v1454_v12, %s6805_s14  ;;  %1528 = vrot.lane.b32.xlu0 %v1453_v13, %s6805_s14  ;;  %v6250_v0 = vpop.f32.mrb[50].mxu0 }
 0x154   : > { %v1372_v24 = vpop.permute.xlu1 %1371  ;;  %v1368_v8 = vpop.permute.xlu0 %1367 }
 0x155   : > { %v1456_v25 = vmul.f32 0.0, %v1372_v24  ;;  %v1455_v10 = vmul.f32 0.0, %v1368_v8  ;;  %v1269_v46 = vpop.f32.mrb[51].mxu0 }
 0x157   : > { %1534 = vrot.lane.b32.xlu1 %v1456_v25, %s6805_s14  ;;  %1532 = vrot.lane.b32.xlu0 %v1455_v10, %s6805_s14 }
 0x158   : > { %v1380_v16 = vpop.permute.xlu1 %1379  ;;  %v1376_v56 = vpop.permute.xlu0 %1375 }
 0x159   : > { %v1458_v13 = vmul.f32 0.0, %v1380_v16  ;;  %v1457_v19 = vmul.f32 0.0, %v1376_v56  ;;  %v6253_v24 = vpop.f32.mrb[52].mxu0  ;;  %v10184_v56 = vrot.slane %v7373_v1, 4  ;;  %6320 = vmatmul.mubr.msk.bf16.gmra.mrb[84].mxu0 %vm405_vm1, %v7160_v44 }
 0x15a   : > { %v1279_v8 = vpop.f32.mrb[53].mxu0  ;;  %6323 = vmatprep.mubr.msk.bf16.mxu0 %vm405_vm1, %v7163_v45  ;;  %v1007_v45 = vmul.f32 %v7339_v59, %v7395_v15 }
 0x15b   : > { %1538 = vrot.lane.b32.xlu1 %v1458_v13, %s6805_s14  ;;  %1536 = vrot.lane.b32.xlu0 %v1457_v19, %s6805_s14  ;;  %v6254_v25 = vpop.f32.mrb[54].mxu0  ;;  %v819_v38 = vsel %vm798_vm2, 0.0, %v10184_v56  ;;  %v1008_v13 = vmul.f32 %v7361_v22, %v7385_v9  ;;  %v7610_v8 = vld [vmem:[%s6938_s13] sm:$0xff]  }
 0x15c   : > { %v1388_v32 = vpop.permute.xlu1 %1387  ;;  %v1384_v63 = vpop.permute.xlu0 %1383  ;;  %v1005_v39 = vmul.f32 %v7333_v58, %v819_v38  ;;  %v7661_v25 = vld [vmem:[%s10074_s3 + $0x40] sm:$0xff] }
 0x15d   : > { %v1460_v33 = vmul.f32 0.0, %v1388_v32  ;;  %v1459_v12 = vmul.f32 0.0, %v1384_v63  ;;  %v1281_v16 = vpop.f32.mrb[55].mxu0  ;;  %v1006_v63 = vmul.f32 %v7349_v21, %v7392_v14 }
 0x15e   : > { %v7685_v16 = vld [vmem:[%s10074_s3 + $0x60] sm:$0xff] }
 0x15f   : > { %1542 = vrot.lane.b32.xlu1 %v1460_v33, %s6805_s14  ;;  %1540 = vrot.lane.b32.xlu0 %v1459_v12, %s6805_s14  ;;  %v1009_v12 = vmul.f32 %v7347_v17, %v7404_v23  ;;  %v7619_v17 = vld [vmem:[%s10074_s3] sm:$0xff]  ;;  %v7643_v23 = vld [vmem:[%s10074_s3 + $0x18] sm:$0xff] }
 0x160   : > { %v1396_v10 = vpop.permute.xlu1 %1395  ;;  %v1392_v5 = vpop.permute.xlu0 %1391 }
 0x161   : > { %v1462_v7 = vmul.f32 0.0, %v1396_v10  ;;  %v1461_v0 = vmul.f32 0.0, %v1392_v5  ;;  %v6257_v19 = vpop.f32.mrb[56].mxu0  ;;  %6324 = vmatmul.mubr.msk.bf16.gmra.mrb[88].mxu0 %vm405_vm1, %v7198_v50  ;;  %v1010_v50 = vmul.f32 %v7365_v60, %v7413_v55  ;;  %v7637_v60 = vld [vmem:[%s10074_s3 + $0x20] sm:$0xff]  ;;  %v7649_v55 = vld [vmem:[%s10074_s3 + $0x30] sm:$0xff]  ;;  %v7667_v10 = vld [vmem:[%s10074_s3 + $0x38] sm:$0xff] }
 0x162   : > { %v1291_v1 = vpop.f32.mrb[57].mxu0  ;;  %6327 = vmatprep.mubr.msk.bf16.mxu0 %vm405_vm1, %v7201_v51  ;;  %v1011_v51 = vmul.f32 %v7359_v20, %v7416_v3  ;;  %v7631_v20 = vld [vmem:[%s10074_s3 + $0x10] sm:$0xff]  ;;  %v7655_v3 = vld [vmem:[%s10074_s3 + $0x28] sm:$0xff] }
 0x163   : > { %1546 = vrot.lane.b32.xlu1 %v1462_v7, %s6805_s14  ;;  %1544 = vrot.lane.b32.xlu0 %v1461_v0, %s6805_s14  ;;  %v6258_v32 = vpop.f32.mrb[58].mxu0  ;;  %v7673_v5 = vld [vmem:[%s10074_s3 + $0x50] sm:$0xff]  ;;  %v7679_v0 = vld [vmem:[%s10074_s3 + $0x48] sm:$0xff] }
 0x164   : > { %v1404_v46 = vpop.permute.xlu1 %1403  ;;  %v1293_v33 = vpop.f32.mrb[59].mxu0  ;;  %v7698_v19 = vld [vmem:[%s10074_s3 + $0x68] sm:$0xff] }
 0x165   : > { %v1464_v44 = vmul.f32 0.0, %v1404_v46  ;;  %v1400_v58 = vpop.permute.xlu0 %1399 }
 0x166   : > { %v1463_v22 = vmul.f32 0.0, %v1400_v58 }
 0x167   : > { %1094 = vrot.lane.b32.xlu1 %v1005_v39, %s6805_s14  ;;  %1100 = vrot.lane.b32.xlu0 %v1008_v13, %s6805_s14  ;;  %v7691_v39 = vld [vmem:[%s10074_s3 + $0x58] sm:$0xff] }
 0x168   : > { %v6261_v9 = vpop.f32.mrb[60].mxu0  ;;  %v1412_v7 = vpop.permute.xlu1 %1411 }
 0x169   : > { %v1303_v21 = vpop.f32.mrb[61].mxu0  ;;  %v1408_v59 = vpop.permute.xlu0 %1407  ;;  %6328 = vmatmul.mubr.msk.bf16.gmra.mrb[92].mxu0 %vm405_vm1, %v7226_v54  ;;  %v7625_v54 = vld [vmem:[%s10074_s3 + $0x8] sm:$0xff] }
 0x16a   : > { %v6262_v14 = vpop.f32.mrb[62].mxu0  ;;  %v1465_v15 = vmul.f32 0.0, %v1408_v59  ;;  %6367 = vmatprep.mubr.msk.bf16.mxu0 %vm405_vm1, %v7610_v8 }
 0x16b   : > { %1550 = vrot.lane.b32.xlu1 %v1464_v44, %s6805_s14  ;;  %1096 = vrot.lane.b32.xlu0 %v1006_v63, %s6805_s14  ;;  %v1305_v24 = vpop.f32.mrb[63].mxu0 }
 0x16c   : > { %v1420_v38 = vpop.permute.xlu1 %1419 }
 0x16d   : > { %v1416_v56 = vpop.permute.xlu0 %1415 }
 0x16f   : > { %1098 = vrot.lane.b32.xlu1 %v1007_v45, %s6805_s14  ;;  %1548 = vrot.lane.b32.xlu0 %v1463_v22, %s6805_s14 }
 0x170   : > { %v1428_v46 = vpop.permute.xlu1 %1427 }
 0x171   : > { %v1424_v13 = vpop.permute.xlu0 %1423  ;;  %v1470_v58 = vmul.f32 %v1428_v46, %v7531_v52 }
 0x172   : > { %v1469_v32 = vmul.f32 %v7514_v57, %v1424_v13 }
 0x173   : > { %1102 = vrot.lane.b32.xlu1 %v1009_v12, %s6805_s14  ;;  %1104 = vrot.lane.b32.xlu0 %v1010_v50, %s6805_s14 }
 0x174   : > { %v1436_v63 = vpop.permute.xlu1 %1435 }
 0x175   : > { %v1432_v1 = vpop.permute.xlu0 %1431 }
 0x176   : > { %v1471_v57 = vmul.f32 %v1432_v1, %v7537_v28 }
 0x177   : > { %1106 = vrot.lane.b32.xlu1 %v1011_v51, %s6805_s14  ;;  %1552 = vrot.lane.b32.xlu0 %v1465_v15, %s6805_s14 }
 0x179   : > { %v1440_v44 = vpop.permute.xlu0 %1439 }
 0x17b   : > { %1819 = vperm.xlu1 %6578, %v7619_v17   ;;  %1823 = vperm.xlu0 %6579, %v7625_v54  }
 0x17d   : > { %v7720_v33 = vpop.permute.xlu0 %1508 }
 0x17e   : > { %10187 = vst [vmem:[#allocation64_spill] sm:$0xff] %v7720_v33  ;;  %v8103_v33 = vld [vmem:[%s10074_s3 + $0xa8] sm:$0xff] }
 0x17f   : > { %1827 = vperm.xlu1 %6578, %v7631_v20   ;;  %1835 = vperm.xlu0 %6579, %v7637_v60   ;;  %10228 = vst [vmem:[#allocation104_spill] sm:$0xff] %v8103_v33 }
 0x181   : > { %v7732_v45 = vpop.permute.xlu0 %1512 }
 0x182   : > { %10189 = vst [vmem:[#allocation66_spill] sm:$0xff] %v7732_v45  ;;  %v8097_v45 = vld [vmem:[%s10074_s3 + $0x80] sm:$0xff] }
 0x183   : > { %1831 = vperm.xlu1 %6578, %v7643_v23   ;;  %1843 = vperm.xlu0 %6579, %v7649_v55  }
 0x185   : > { %v7742_v52 = vpop.permute.xlu0 %1516 }
 0x186   : > { %10191 = vst [vmem:[#allocation68_spill] sm:$0xff] %v7742_v52 }
 0x187   : > { %1839 = vperm.xlu1 %6578, %v7655_v3   ;;  %1851 = vperm.xlu0 %6579, %v7661_v25  }
 0x18b   : > { %1847 = vperm.xlu1 %6578, %v7667_v10   ;;  %1859 = vperm.xlu0 %6579, %v7673_v5  }
 0x18f   : > { %1855 = vperm.xlu1 %6578, %v7679_v0   ;;  %1867 = vperm.xlu0 %6579, %v7685_v16  }
 0x193   : > { %1863 = vperm.xlu1 %6578, %v7691_v39   ;;  %1875 = vperm.xlu0 %6579, %v7058_v27   ;;  %v1467_v27 = vmul.f32 %v1416_v56, %v7519_v61 }
 0x197   : > { %1871 = vperm.xlu1 %6578, %v7698_v19   ;;  %1883 = vperm.xlu0 %6579, %v7079_v31   ;;  %v7710_v31 = vpop.permute.xlu1 %1506 }
 0x198   : > { %10185 = vst [vmem:[#allocation62_spill] sm:$0xff] %v7710_v31  ;;  %v8120_v31 = vld [vmem:[%s10074_s3 + $0x90] sm:$0xff] }
 0x19b   : > { %1879 = vperm.xlu1 %6578, %v7053_v26   ;;  %1891 = vperm.xlu0 %6579, %v7101_v35   ;;  %v1468_v26 = vmul.f32 %v7506_v18, %v1420_v38  ;;  %v1473_v35 = vmul.f32 %v7535_v40, %v1440_v44  ;;  %v7718_v61 = vpop.permute.xlu1 %1510  ;;  %v1472_v18 = vmul.f32 %v7527_v42, %v1436_v63  ;;  %v7766_v44 = vpop.permute.xlu0 %1520 }
 0x19c   : > { %10186 = vst [vmem:[#allocation63_spill] sm:$0xff] %v7718_v61  ;;  %10193 = vst [vmem:[#allocation70_spill] sm:$0xff] %v7766_v44 }
 0x19f   : > { %1887 = vperm.xlu1 %6578, %v7074_v30   ;;  %1560 = vrot.lane.b32.xlu0 %v1469_v32, %s6805_s14  ;;  %v1466_v30 = vmul.f32 %v1412_v7, %v7510_v2  ;;  %v7729_v2 = vpop.permute.xlu1 %1514 }
 0x1a0   : > { %10188 = vst [vmem:[#allocation65_spill] sm:$0xff] %v7729_v2 }
 0x1a3   : > { %1895 = vperm.xlu1 %6578, %v7096_v34   ;;  %1556 = vrot.lane.b32.xlu0 %v1467_v27, %s6805_s14  ;;  %v6267_v34 = vpop.f32.mrb[32].mxu1  ;;  %v7737_v24 = vpop.permute.xlu1 %1518 }
 0x1a4   : > { %v7727_v40 = vpop.f32.mrb[33].mxu1  ;;  %v1791_v9 = vrot.slane %v6267_v34, 4  ;;  %10190 = vst [vmem:[#allocation67_spill] sm:$0xff] %v7737_v24 }
 0x1a5   : > { %v6268_v28 = vpop.f32.mrb[34].mxu1  ;;  %v10223_v44 = vrot.slane %v7727_v40, 4 }
 0x1a6   : > { %v1676_v22 = vpop.f32.mrb[35].mxu1  ;;  %v1793_v42 = vrot.slane %v6268_v28, 4  ;;  %v7794_v28 = vld [vmem:[%s10074_s3 + $0xd8] sm:$0xff] }
 0x1a7   : > { %1558 = vrot.lane.b32.xlu1 %v1468_v26, %s6805_s14  ;;  %1568 = vrot.lane.b32.xlu0 %v1473_v35, %s6805_s14  ;;  %v1789_v21 = vrot.slane %v1676_v22, 4  ;;  %v6271_v14 = vpop.f32.mrb[36].mxu1  ;;  %v7764_v27 = vpop.permute.xlu1 %1522  ;;  %v7774_v35 = vld [vmem:[%s10074_s3 + $0xc8] sm:$0xff] }
 0x1a8   : > { %v1689_v12 = vpop.f32.mrb[37].mxu1  ;;  %v7755_v7 = vsel %vm798_vm2, %v1791_v9, %v1793_v42  ;;  %v1799_v38 = vrot.slane %v6271_v14, 4  ;;  %10192 = vst [vmem:[#allocation69_spill] sm:$0xff] %v7764_v27  ;;  %v7805_v14 = vld [vmem:[%s10074_s3 + $0xe8] sm:$0xff] }
 0x1a9   : > { %v1795_v50 = vrot.slane %v1689_v12, 4  ;;  %v7740_v59 = vsel %vm798_vm2, %v1789_v21, %v1791_v9  ;;  %v6272_v51 = vpop.f32.mrb[38].mxu1 }
 0x1aa   : > { %v1692_v56 = vpop.f32.mrb[39].mxu1 }
 0x1ab   : > { %1554 = vrot.lane.b32.xlu1 %v1466_v30, %s6805_s14  ;;  %1564 = vrot.lane.b32.xlu0 %v1471_v57, %s6805_s14  ;;  %v7752_v15 = vsel %vm798_vm2, %v1793_v42, %v1795_v50  ;;  %v1797_v13 = vrot.slane %v1692_v56, 4  ;;  %v6275_v46 = vpop.f32.mrb[40].mxu1 }
 0x1ac   : > { %v1705_v1 = vpop.f32.mrb[41].mxu1  ;;  %v7818_v46 = vld [vmem:[%s10074_s3 + $0xf8] sm:$0xff] }
 0x1ad   : > { %v1803_v32 = vrot.slane %v1705_v1, 4  ;;  %v6276_v63 = vpop.f32.mrb[42].mxu1  ;;  %v7769_v26 = vsel %vm798_vm2, %v1797_v13, %v1799_v38 }
 0x1af   : > { %1566 = vrot.lane.b32.xlu1 %v1472_v18, %s6805_s14  ;;  %1899 = vperm.xlu0 %6579, %v7119_v37   ;;  %v10109_v37 = vrot.slane %v7727_v40, 4 }
 0x1b3   : > { %1562 = vrot.lane.b32.xlu1 %v1470_v58, %s6805_s14  ;;  %1907 = vperm.xlu0 %6579, %v7139_v41   ;;  %v7749_v41 = vsel %vm798_vm2, %v10109_v37, %v1789_v21 }
 0x1b7   : > { %1903 = vperm.xlu1 %6578, %v7114_v36   ;;  %1915 = vperm.xlu0 %6579, %v7157_v43   ;;  %v7760_v36 = vld [vmem:[%s10074_s3 + $0xb8] sm:$0xff]  ;;  %v1801_v43 = vrot.slane %v6272_v51, 4 }
 0x1b9   : > { %v7782_v30 = vsel %vm798_vm2, %v1801_v43, %v1803_v32  ;;  %v7785_v57 = vsel %vm798_vm2, %v1799_v38, %v1801_v43 }
 0x1bb   : > { %1911 = vperm.xlu1 %6578, %v7760_v36   ;;  %1923 = vperm.xlu0 %6579, %v7177_v47   ;;  %v7779_v47 = vsel %vm798_vm2, %v1795_v50, %v1797_v13 }
 0x1bf   : > { %1919 = vperm.xlu1 %6578, %v7774_v35   ;;  %1931 = vperm.xlu0 %6579, %v7195_v49   ;;  %v1708_v49 = vpop.f32.mrb[43].mxu1 }
 0x1c0   : > { %v1805_v58 = vrot.slane %v1708_v49, 4  ;;  %v6279_v22 = vpop.f32.mrb[44].mxu1 }
 0x1c1   : > { %v7787_v34 = vpop.permute.xlu1 %1526  ;;  %v7789_v18 = vpop.permute.xlu0 %1524 }
 0x1c2   : > { %10194 = vst [vmem:[#allocation71_spill] sm:$0xff] %v7787_v34  ;;  %10195 = vst [vmem:[#allocation72_spill] sm:$0xff] %v7789_v18  ;;  %v1719_v42 = vpop.f32.mrb[45].mxu1  ;;  %v7809_v12 = vsel %vm798_vm2, %v1803_v32, %v1805_v58  ;;  %v7907_v18 = vld [vmem:[%s6938_s13 + $0x40] sm:$0xff]   ;;  %v7923_v34 = vld [vmem:[%s6938_s13 + $0x50] sm:$0xff]  }
 0x1c3   : > { %1927 = vperm.xlu1 %6578, %v7794_v28   ;;  %1939 = vperm.xlu0 %6579, %v7215_v53   ;;  %v6280_v50 = vpop.f32.mrb[46].mxu1  ;;  %v6807_v53 = vmov 3  }
 0x1c4   : > { %v1721_v51 = vpop.f32.mrb[47].mxu1 }
 0x1c5   : > { %v7798_v9 = vpop.permute.xlu1 %1530  ;;  %v7800_v21 = vpop.permute.xlu0 %1528 }
 0x1c6   : > { %10196 = vst [vmem:[#allocation73_spill] sm:$0xff] %v7798_v9  ;;  %10197 = vst [vmem:[#allocation74_spill] sm:$0xff] %v7800_v21  ;;  %v6283_v13 = vpop.f32.mrb[48].mxu1 }
 0x1c7   : > { %1935 = vperm.xlu1 %6578, %v7805_v14   ;;  %6580 = vset.pattern.permute.xlu0 %v6807_v53  ;;  %v1731_v43 = vpop.f32.mrb[49].mxu1 }
 0x1c8   : > { %v6284_v1 = vpop.f32.mrb[50].mxu1 }
 0x1c9   : > { %v7811_v56 = vpop.permute.xlu1 %1534  ;;  %v7813_v38 = vpop.permute.xlu0 %1532 }
 0x1ca   : > { %10198 = vst [vmem:[#allocation75_spill] sm:$0xff] %v7811_v56  ;;  %10199 = vst [vmem:[#allocation76_spill] sm:$0xff] %v7813_v38  ;;  %v1733_v49 = vpop.f32.mrb[51].mxu1 }
 0x1cb   : > { %1943 = vperm.xlu1 %6578, %v7818_v46   ;;  %v6287_v58 = vpop.f32.mrb[52].mxu1 }
 0x1cc   : > { %v1743_v22 = vpop.f32.mrb[53].mxu1 }
 0x1cd   : > { %v7821_v32 = vpop.permute.xlu1 %1538  ;;  %v7823_v63 = vpop.permute.xlu0 %1536 }
 0x1ce   : > { %10200 = vst [vmem:[#allocation77_spill] sm:$0xff] %v7821_v32  ;;  %10201 = vst [vmem:[#allocation78_spill] sm:$0xff] %v7823_v63  ;;  %v6288_v51 = vpop.f32.mrb[54].mxu1 }
 0x1cf   : > { %6581 = vset.pattern.permute.xlu1 %v6807_v53  ;;  %v1745_v13 = vpop.f32.mrb[55].mxu1 }
 0x1d0   : > { %v6291_v37 = vpop.f32.mrb[56].mxu1 }
 0x1d1   : > { %v7825_v42 = vpop.permute.xlu1 %1542  ;;  %v7827_v50 = vpop.permute.xlu0 %1540 }
 0x1d2   : > { %10202 = vst [vmem:[#allocation79_spill] sm:$0xff] %v7825_v42  ;;  %10203 = vst [vmem:[#allocation80_spill] sm:$0xff] %v7827_v50  ;;  %v1755_v56 = vpop.f32.mrb[57].mxu1  ;;  %v7893_v50 = vld [vmem:[%s6938_s13 + $0x30] sm:$0xff]  }
 0x1d3   : > { %v6292_v43 = vpop.f32.mrb[58].mxu1 }
 0x1d4   : > { %v1757_v32 = vpop.f32.mrb[59].mxu1  ;;  %v5740_v43 = vld [vmem:[%s10073_s2 + $0x8] sm:$0x3] }
 0x1d5   : > { %v7829_v9 = vpop.permute.xlu1 %1546  ;;  %v7831_v1 = vpop.permute.xlu0 %1544  ;;  %6520 = vmatprep.subr.msk.bf16.mxu1 %vm454_vm0, %v5740_v43 }
 0x1d6   : > { %10204 = vst [vmem:[#allocation81_spill] sm:$0xff] %v7829_v9  ;;  %10205 = vst [vmem:[#allocation82_spill] sm:$0xff] %v7831_v1  ;;  %v6295_v38 = vpop.f32.mrb[60].mxu1  ;;  %v7874_v9 = vld [vmem:[%s6938_s13 + $0x18] sm:$0xff]  }
 0x1d7   : > { %v1767_v63 = vpop.f32.mrb[61].mxu1 }
 0x1d8   : > { %v6296_v49 = vpop.f32.mrb[62].mxu1 }
 0x1d9   : > { %v7833_v53 = vpop.permute.xlu1 %1094  ;;  %v7835_v58 = vpop.permute.xlu0 %1100  ;;  %v2750_v49 = vsel %vm454_vm0, %v5740_v43, 0  ;;  %v7866_v43 = vld [vmem:[%s6938_s13 + $0x10] sm:$0xff]  }
 0x1da   : > { %10206 = vst [vmem:[#allocation83_spill] sm:$0xff] %v7833_v53  ;;  %10207 = vst [vmem:[#allocation84_spill] sm:$0xff] %v7835_v58  ;;  %v1769_v22 = vpop.f32.mrb[63].mxu1  ;;  %6332 = vmatpush3.bf16.msra.mxu1 %v2750_v49 }
 0x1dd   : > { %v7837_v42 = vpop.permute.xlu1 %1550  ;;  %v7839_v51 = vpop.permute.xlu0 %1096 }
 0x1de   : > { %10208 = vst [vmem:[#allocation85_spill] sm:$0xff] %v7837_v42  ;;  %10209 = vst [vmem:[#allocation86_spill] sm:$0xff] %v7839_v51 }
 0x1e1   : > { %v7841_v37 = vpop.permute.xlu1 %1098  ;;  %v7843_v56 = vpop.permute.xlu0 %1548 }
 0x1e2   : > { %10210 = vst [vmem:[#allocation87_spill] sm:$0xff] %v7841_v37  ;;  %10211 = vst [vmem:[#allocation88_spill] sm:$0xff] %v7843_v56  ;;  %v7861_v37 = vld [vmem:[%s6938_s13 + $0x8] sm:$0xff]  }
 0x1e3   : > { %6334 = vmatmul.mubr.msk.bf16.vlgmr.msra.gmra.mrb[64].mxu1 %vm405_vm1, %v7861_v37  ;;  %v7888_v56 = vld [vmem:[%s6938_s13 + $0x28] sm:$0xff]  }
 0x1e4   : > { %6337 = vmatprep.mubr.msk.bf16.mxu1 %vm405_vm1, %v7866_v43 }
 0x1e5   : > { %v7845_v13 = vpop.permute.xlu1 %1102  ;;  %v7847_v32 = vpop.permute.xlu0 %1104 }
 0x1e6   : > { %10212 = vst [vmem:[#allocation89_spill] sm:$0xff] %v7845_v13  ;;  %10213 = vst [vmem:[#allocation90_spill] sm:$0xff] %v7847_v32 }
 0x1e9   : > { %v7849_v38 = vpop.permute.xlu1 %1106  ;;  %v7851_v63 = vpop.permute.xlu0 %1552 }
 0x1ea   : > { %10214 = vst [vmem:[#allocation91_spill] sm:$0xff] %v7849_v38  ;;  %10215 = vst [vmem:[#allocation92_spill] sm:$0xff] %v7851_v63 }
 0x1eb   : > { %6338 = vmatmul.mubr.msk.bf16.gmra.mrb[68].mxu1 %vm405_vm1, %v7874_v9 }
 0x1fa   : > { %v1820_v22 = vpop.permute.xlu1 %1819  ;;  %v1824_v58 = vpop.permute.xlu0 %1823 }
 0x1fb   : > { %v1946_v13 = vmul.f32 0.0, %v1820_v22  ;;  %v1947_v51 = vmul.f32 0.0, %v1824_v58 }
 0x1fd   : > { %2012 = vrot.lane.b32.xlu1 %v1947_v51, %s6805_s14  ;;  %2010 = vrot.lane.b32.xlu0 %v1946_v13, %s6805_s14 }
 0x1fe   : > { %v1828_v32 = vpop.permute.xlu1 %1827  ;;  %v1836_v38 = vpop.permute.xlu0 %1835 }
 0x1ff   : > { %v1948_v53 = vmul.f32 0.0, %v1828_v32  ;;  %v1950_v58 = vmul.f32 0.0, %v1836_v38  ;;  %v7879_v38 = vld [vmem:[%s6938_s13 + $0x20] sm:$0xff]  }
 0x200   : > { %6341 = vmatprep.mubr.msk.bf16.mxu1 %vm405_vm1, %v7879_v38 }
 0x201   : > { %2014 = vrot.lane.b32.xlu0 %v1948_v53, %s6805_s14  ;;  %6342 = vmatmul.mubr.msk.bf16.gmra.mrb[72].mxu1 %vm405_vm1, %v7888_v56 }
 0x202   : > { %v1832_v51 = vpop.permute.xlu1 %1831  ;;  %v1844_v13 = vpop.permute.xlu0 %1843  ;;  %6345 = vmatprep.mubr.msk.bf16.mxu1 %vm405_vm1, %v7893_v50 }
 0x203   : > { %v1949_v49 = vmul.f32 0.0, %v1832_v51  ;;  %v1952_v32 = vmul.f32 0.0, %v1844_v13 }
 0x205   : > { %2016 = vrot.lane.b32.xlu1 %v1949_v49, %s6805_s14  ;;  %2018 = vrot.lane.b32.xlu0 %v1950_v58, %s6805_s14 }
 0x206   : > { %v1840_v22 = vpop.permute.xlu1 %1839  ;;  %v1852_v42 = vpop.permute.xlu0 %1851 }
 0x207   : > { %v1951_v63 = vmul.f32 0.0, %v1840_v22  ;;  %v1954_v51 = vmul.f32 0.0, %v1852_v42 }
 0x209   : > { %2020 = vrot.lane.b32.xlu1 %v1951_v63, %s6805_s14  ;;  %2022 = vrot.lane.b32.xlu0 %v1952_v32, %s6805_s14 }
 0x20a   : > { %v1848_v53 = vpop.permute.xlu1 %1847  ;;  %v1860_v58 = vpop.permute.xlu0 %1859 }
 0x20b   : > { %v1953_v49 = vmul.f32 0.0, %v1848_v53  ;;  %v1956_v1 = vmul.f32 0.0, %v1860_v58 }
 0x20d   : > { %2024 = vrot.lane.b32.xlu1 %v1953_v49, %s6805_s14  ;;  %2026 = vrot.lane.b32.xlu0 %v1954_v51, %s6805_s14 }
 0x20e   : > { %v1856_v13 = vpop.permute.xlu1 %1855  ;;  %v1868_v22 = vpop.permute.xlu0 %1867 }
 0x20f   : > { %v1955_v63 = vmul.f32 0.0, %v1856_v13  ;;  %v1958_v53 = vmul.f32 0.0, %v1868_v22  ;;  %v7902_v13 = vld [vmem:[%s6938_s13 + $0x38] sm:$0xff]  }
 0x210   : > { %6346 = vmatmul.mubr.msk.bf16.gmra.mrb[76].mxu1 %vm405_vm1, %v7902_v13 }
 0x211   : > { %2028 = vrot.lane.b32.xlu1 %v1955_v63, %s6805_s14  ;;  %2030 = vrot.lane.b32.xlu0 %v1956_v1, %s6805_s14 }
 0x212   : > { %v1864_v42 = vpop.permute.xlu1 %1863  ;;  %v1876_v32 = vpop.permute.xlu0 %1875  ;;  %6349 = vmatprep.mubr.msk.bf16.mxu1 %vm405_vm1, %v7907_v18 }
 0x213   : > { %v1957_v51 = vmul.f32 0.0, %v1864_v42  ;;  %v1960_v21 = vmul.f32 0.0, %v1876_v32 }
 0x215   : > { %2032 = vrot.lane.b32.xlu1 %v1957_v51, %s6805_s14  ;;  %2034 = vrot.lane.b32.xlu0 %v1958_v53, %s6805_s14 }
 0x216   : > { %v1872_v58 = vpop.permute.xlu1 %1871  ;;  %v1884_v49 = vpop.permute.xlu0 %1883 }
 0x217   : > { %v1959_v63 = vmul.f32 0.0, %v1872_v58  ;;  %v1962_v42 = vmul.f32 0.0, %v1884_v49  ;;  %v7918_v58 = vld [vmem:[%s6938_s13 + $0x48] sm:$0xff]  }
 0x218   : > { %6350 = vmatmul.mubr.msk.bf16.gmra.mrb[80].mxu1 %vm405_vm1, %v7918_v58 }
 0x219   : > { %2036 = vrot.lane.b32.xlu1 %v1959_v63, %s6805_s14  ;;  %2038 = vrot.lane.b32.xlu0 %v1960_v21, %s6805_s14 }
 0x21a   : > { %v1880_v1 = vpop.permute.xlu1 %1879  ;;  %v1892_v22 = vpop.permute.xlu0 %1891  ;;  %6353 = vmatprep.mubr.msk.bf16.mxu1 %vm405_vm1, %v7923_v34 }
 0x21b   : > { %v1961_v53 = vmul.f32 0.0, %v1880_v1  ;;  %v1964_v63 = vmul.f32 0.0, %v1892_v22 }
 0x21d   : > { %2040 = vrot.lane.b32.xlu1 %v1961_v53, %s6805_s14  ;;  %2042 = vrot.lane.b32.xlu0 %v1962_v42, %s6805_s14 }
 0x21e   : > { %v1888_v32 = vpop.permute.xlu1 %1887  ;;  %v7915_v51 = vpop.permute.xlu0 %1560 }
 0x21f   : > { %10216 = vst [vmem:[#allocation93_spill] sm:$0xff] %v7915_v51  ;;  %v1963_v21 = vmul.f32 0.0, %v1888_v32  ;;  %v7937_v32 = vld [vmem:[%s6938_s13 + $0x58] sm:$0xff]  }
 0x220   : > { %6354 = vmatmul.mubr.msk.bf16.gmra.mrb[84].mxu1 %vm405_vm1, %v7937_v32 }
 0x221   : > { %2044 = vrot.lane.b32.xlu1 %v1963_v21, %s6805_s14  ;;  %2046 = vrot.lane.b32.xlu0 %v1964_v63, %s6805_s14  ;;  %v7942_v21 = vld [vmem:[%s6938_s13 + $0x60] sm:$0xff]  }
 0x222   : > { %v1896_v49 = vpop.permute.xlu1 %1895  ;;  %v7929_v1 = vpop.permute.xlu0 %1556  ;;  %6357 = vmatprep.mubr.msk.bf16.mxu1 %vm405_vm1, %v7942_v21 }
 0x223   : > { %10217 = vst [vmem:[#allocation94_spill] sm:$0xff] %v7929_v1  ;;  %v1965_v42 = vmul.f32 0.0, %v1896_v49  ;;  %v7958_v1 = vld [vmem:[%s6938_s13 + $0x70] sm:$0xff]  }
 0x225   : > { %2048 = vrot.lane.b32.xlu1 %v1965_v42, %s6805_s14 }
 0x226   : > { %v7932_v53 = vpop.permute.xlu1 %1558  ;;  %v7934_v22 = vpop.permute.xlu0 %1568 }
 0x227   : > { %10218 = vst [vmem:[#allocation95_spill] sm:$0xff] %v7932_v53  ;;  %10219 = vst [vmem:[#allocation96_spill] sm:$0xff] %v7934_v22  ;;  %v7953_v53 = vld [vmem:[%s6938_s13 + $0x68] sm:$0xff]  }
 0x228   : > { %6358 = vmatmul.mubr.msk.bf16.gmra.mrb[88].mxu1 %vm405_vm1, %v7953_v53 }
 0x229   : > { %6361 = vmatprep.mubr.msk.bf16.mxu1 %vm405_vm1, %v7958_v1 }
 0x22a   : > { %v7946_v63 = vpop.permute.xlu1 %1554  ;;  %v7948_v51 = vpop.permute.xlu0 %1564 }
 0x22b   : > { %10220 = vst [vmem:[#allocation97_spill] sm:$0xff] %v7946_v63  ;;  %10221 = vst [vmem:[#allocation98_spill] sm:$0xff] %v7948_v51  ;;  %v1817_v63 = vsel %vm798_vm2, 0.0, %v10223_v44 }
 0x22e   : > { %v7950_v49 = vpop.permute.xlu1 %1566  ;;  %v1900_v42 = vpop.permute.xlu0 %1899 }
 0x22f   : > { %10222 = vst [vmem:[#allocation99_spill] sm:$0xff] %v7950_v49  ;;  %v1966_v22 = vmul.f32 0.0, %v1900_v42  ;;  %v7970_v42 = vld [vmem:[%s6938_s13 + $0x78] sm:$0xff]  }
 0x230   : > { %6362 = vmatmul.mubr.msk.bf16.gmra.mrb[92].mxu1 %vm405_vm1, %v7970_v42 }
 0x231   : > { %2050 = vrot.lane.b32.xlu0 %v1966_v22, %s6805_s14  ;;  %6401 = vmatprep.mubr.msk.bf16.mxu1 %vm405_vm1, %v7610_v8 }
 0x232   : > { %v7966_v51 = vpop.permute.xlu1 %1562  ;;  %v1908_v49 = vpop.permute.xlu0 %1907 }
 0x233   : > { %10224 = vst [vmem:[#allocation100_spill] sm:$0xff] %v7966_v51  ;;  %v1968_v27 = vmul.f32 %v1908_v49, %v1817_v63 }
 0x235   : > { %2054 = vrot.lane.b32.xlu0 %v1968_v27, %s6805_s14 }
 0x236   : > { %v1904_v52 = vpop.permute.xlu1 %1903  ;;  %v1916_v24 = vpop.permute.xlu0 %1915 }
 0x237   : > { %v1967_v2 = vmul.f32 0.0, %v1904_v52  ;;  %v1970_v40 = vmul.f32 %v1916_v24, %v7740_v59 }
 0x239   : > { %2052 = vrot.lane.b32.xlu1 %v1967_v2, %s6805_s14  ;;  %2058 = vrot.lane.b32.xlu0 %v1970_v40, %s6805_s14 }
 0x23a   : > { %v1912_v44 = vpop.permute.xlu1 %1911  ;;  %v1924_v22 = vpop.permute.xlu0 %1923 }
 0x23b   : > { %v1969_v27 = vmul.f32 %v1912_v44, %v7749_v41  ;;  %v1972_v63 = vmul.f32 %v1924_v22, %v7752_v15 }
 0x23d   : > { %2056 = vrot.lane.b32.xlu1 %v1969_v27, %s6805_s14  ;;  %2062 = vrot.lane.b32.xlu0 %v1972_v63, %s6805_s14 }
 0x23e   : > { %v1920_v52 = vpop.permute.xlu1 %1919  ;;  %v1932_v49 = vpop.permute.xlu0 %1931 }
 0x23f   : > { %v1971_v24 = vmul.f32 %v1920_v52, %v7755_v7  ;;  %v1974_v59 = vmul.f32 %v1932_v49, %v7769_v26  ;;  %v6301_v7 = vpop.f32.mrb[64].mxu0 }
 0x240   : > { %v7994_v26 = vpop.f32.mrb[65].mxu0  ;;  %v2337_v63 = vrot.slane %v6301_v7, 4 }
 0x241   : > { %2060 = vrot.lane.b32.xlu1 %v1971_v24, %s6805_s14  ;;  %2066 = vrot.lane.b32.xlu0 %v1974_v59, %s6805_s14  ;;  %v6302_v52 = vpop.f32.mrb[66].mxu0 }
 0x242   : > { %v1928_v2 = vpop.permute.xlu1 %1927  ;;  %v1940_v40 = vpop.permute.xlu0 %1939  ;;  %v2339_v49 = vrot.slane %v6302_v52, 4 }
 0x243   : > { %v1973_v41 = vmul.f32 %v1928_v2, %v7779_v47  ;;  %v1976_v15 = vmul.f32 %v1940_v40, %v7782_v30  ;;  %v2180_v30 = vpop.f32.mrb[67].mxu0 }
 0x244   : > { %v2335_v24 = vrot.slane %v2180_v30, 4  ;;  %v6305_v59 = vpop.f32.mrb[68].mxu0 }
 0x245   : > { %2064 = vrot.lane.b32.xlu1 %v1973_v41, %s6805_s14  ;;  %2070 = vrot.lane.b32.xlu0 %v1976_v15, %s6805_s14  ;;  %v2193_v2 = vpop.f32.mrb[69].mxu0  ;;  %v2345_v41 = vrot.slane %v6305_v59, 4 }
 0x246   : > { %v1936_v44 = vpop.permute.xlu1 %1935  ;;  %v2341_v40 = vrot.slane %v2193_v2, 4 }
 0x247   : > { %v1975_v22 = vmul.f32 %v1936_v44, %v7785_v57  ;;  %v10110_v57 = vrot.slane %v7994_v26, 4 }
 0x248   : > { %v8004_v15 = vsel %vm798_vm2, %v2339_v49, %v2341_v40 }
 0x249   : > { %2068 = vrot.lane.b32.xlu1 %v1975_v22, %s6805_s14  ;;  %2428 = vperm.xlu0 %6580, %v7619_v17   ;;  %v8001_v17 = vsel %vm798_vm2, %v2335_v24, %v2337_v63  ;;  %v8014_v22 = vsel %vm798_vm2, %v2337_v63, %v2339_v49 }
 0x24a   : > { %v1944_v27 = vpop.permute.xlu1 %1943 }
 0x24b   : > { %v1977_v47 = vmul.f32 %v1944_v27, %v7809_v12  ;;  %v6306_v12 = vpop.f32.mrb[70].mxu0 }
 0x24c   : > { %v2196_v44 = vpop.f32.mrb[71].mxu0  ;;  %v2347_v27 = vrot.slane %v6306_v12, 4 }
 0x24d   : > { %2072 = vrot.lane.b32.xlu1 %v1977_v47, %s6805_s14  ;;  %2440 = vperm.xlu0 %6580, %v7643_v23   ;;  %v8011_v23 = vsel %vm798_vm2, %v10110_v57, %v2335_v24  ;;  %v2343_v7 = vrot.slane %v2196_v44, 4  ;;  %v6309_v47 = vpop.f32.mrb[72].mxu0  ;;  %v8080_v57 = vld [vmem:[%s10074_s3 + $0x70] sm:$0xff] }
 0x24e   : > { %v2353_v30 = vrot.slane %v6309_v47, 4  ;;  %v8030_v2 = vsel %vm798_vm2, %v2345_v41, %v2347_v27 }
 0x24f   : > { %v8017_v52 = vsel %vm798_vm2, %v2343_v7, %v2345_v41  ;;  %v8027_v49 = vsel %vm798_vm2, %v2341_v40, %v2343_v7 }
 0x251   : > { %2432 = vperm.xlu1 %6581, %v7625_v54   ;;  %2448 = vperm.xlu0 %6580, %v7655_v3   ;;  %v2209_v54 = vpop.f32.mrb[73].mxu0 }
 0x252   : > { %v2349_v3 = vrot.slane %v2209_v54, 4  ;;  %v6310_v24 = vpop.f32.mrb[74].mxu0 }
 0x253   : > { %v2212_v63 = vpop.f32.mrb[75].mxu0 }
 0x254   : > { %v8022_v59 = vsel %vm798_vm2, %v2347_v27, %v2349_v3  ;;  %v6313_v44 = vpop.f32.mrb[76].mxu0 }
 0x255   : > { %2436 = vperm.xlu1 %6581, %v7631_v20   ;;  %2456 = vperm.xlu0 %6580, %v7667_v10   ;;  %v2351_v20 = vrot.slane %v2212_v63, 4  ;;  %v2355_v10 = vrot.slane %v6310_v24, 4 }
 0x257   : > { %v8033_v12 = vsel %vm798_vm2, %v2351_v20, %v2353_v30  ;;  %v8043_v7 = vsel %vm798_vm2, %v2349_v3, %v2351_v20  ;;  %v8046_v27 = vsel %vm798_vm2, %v2353_v30, %v2355_v10 }
 0x259   : > { %2444 = vperm.xlu1 %6581, %v7637_v60   ;;  %2464 = vperm.xlu0 %6580, %v7679_v0   ;;  %v2225_v60 = vpop.f32.mrb[77].mxu0  ;;  %v2361_v0 = vrot.slane %v6313_v44, 4 }
 0x25a   : > { %v2357_v47 = vrot.slane %v2225_v60, 4  ;;  %v6314_v40 = vpop.f32.mrb[78].mxu0 }
 0x25b   : > { %v2228_v41 = vpop.f32.mrb[79].mxu0 }
 0x25c   : > { %v8038_v54 = vsel %vm798_vm2, %v2355_v10, %v2357_v47  ;;  %v6317_v63 = vpop.f32.mrb[80].mxu0 }
 0x25d   : > { %2452 = vperm.xlu1 %6581, %v7649_v55   ;;  %2472 = vperm.xlu0 %6580, %v7691_v39   ;;  %v2359_v55 = vrot.slane %v2228_v41, 4  ;;  %v2363_v39 = vrot.slane %v6314_v40, 4  ;;  %v2369_v20 = vrot.slane %v6317_v63, 4 }
 0x25f   : > { %v8049_v24 = vsel %vm798_vm2, %v2359_v55, %v2361_v0  ;;  %v8069_v60 = vsel %vm798_vm2, %v2357_v47, %v2359_v55  ;;  %v8072_v40 = vsel %vm798_vm2, %v2361_v0, %v2363_v39  ;;  %v8086_v47 = vld [vmem:[%s10074_s3 + $0x98] sm:$0xff] }
 0x260   : > { %10226 = vst [vmem:[#allocation102_spill] sm:$0xff] %v8086_v47 }
 0x261   : > { %2460 = vperm.xlu1 %6581, %v7661_v25   ;;  %2480 = vperm.xlu0 %6580, %v7698_v19   ;;  %v8055_v25 = vld [vmem:[%s10074_s3 + $0x78] sm:$0xff]  ;;  %v2241_v19 = vpop.f32.mrb[81].mxu0 }
 0x262   : > { %v2365_v3 = vrot.slane %v2241_v19, 4  ;;  %v6318_v10 = vpop.f32.mrb[82].mxu0 }
 0x263   : > { %v2244_v44 = vpop.f32.mrb[83].mxu0  ;;  %v2371_v63 = vrot.slane %v6318_v10, 4 }
 0x264   : > { %v8059_v30 = vsel %vm798_vm2, %v2363_v39, %v2365_v3  ;;  %v2367_v41 = vrot.slane %v2244_v44, 4 }
 0x265   : > { %2468 = vperm.xlu1 %6581, %v7673_v5   ;;  %2488 = vperm.xlu0 %6580, %v8055_v25   ;;  %v8065_v5 = vld [vmem:[%s10074_s3 + $0x88] sm:$0xff]  ;;  %v8110_v62 = vsel %vm798_vm2, %v2369_v20, %v2371_v63 }
 0x266   : > { %10225 = vst [vmem:[#allocation101_spill] sm:$0xff] %v8065_v5  ;;  %v8075_v19 = vsel %vm798_vm2, %v2367_v41, %v2369_v20 }
 0x269   : > { %2476 = vperm.xlu1 %6581, %v7685_v16   ;;  %2496 = vperm.xlu0 %6580, %v8065_v5   ;;  %v6321_v16 = vpop.f32.mrb[84].mxu0  ;;  %v8152_v5 = vld [vmem:[%s10074_s3 + $0xb0] sm:$0xff] }
 0x26a   : > { %v2257_v0 = vpop.f32.mrb[85].mxu0  ;;  %v2377_v10 = vrot.slane %v6321_v16, 4  ;;  %v8107_v16 = vsel %vm798_vm2, %v2365_v3, %v2367_v41  ;;  %10233 = vst [vmem:[#allocation109_spill] sm:$0xff] %v8152_v5 }
 0x26b   : > { %v2373_v55 = vrot.slane %v2257_v0, 4  ;;  %v6322_v51 = vpop.f32.mrb[86].mxu0 }
 0x26c   : > { %v2260_v0 = vpop.f32.mrb[87].mxu0 }
 0x26d   : > { %2484 = vperm.xlu1 %6581, %v8080_v57   ;;  %2504 = vperm.xlu0 %6580, %v8086_v47   ;;  %v8092_v44 = vsel %vm798_vm2, %v2371_v63, %v2373_v55  ;;  %v2375_v11 = vrot.slane %v2260_v0, 4  ;;  %v6325_v29 = vpop.f32.mrb[88].mxu0 }
 0x26e   : > { %v2273_v3 = vpop.f32.mrb[89].mxu0 }
 0x26f   : > { %v8089_v39 = vpop.permute.xlu0 %2010  ;;  %v8115_v4 = vsel %vm798_vm2, %v2375_v11, %v2377_v10  ;;  %v8124_v20 = vpop.permute.xlu1 %2012  ;;  %v2381_v41 = vrot.slane %v2273_v3, 4 }
 0x270   : > { %10227 = vst [vmem:[#allocation103_spill] sm:$0xff] %v8089_v39  ;;  %v2379_v39 = vrot.slane %v6322_v51, 4  ;;  %10230 = vst [vmem:[#allocation106_spill] sm:$0xff] %v8124_v20  ;;  %v2385_v51 = vrot.slane %v6325_v29, 4  ;;  %v8139_v20 = vsel %vm798_vm2, %v2373_v55, %v2375_v11 }
 0x271   : > { %2492 = vperm.xlu1 %6581, %v8097_v45   ;;  %2512 = vperm.xlu0 %6580, %v8103_v33  }
 0x272   : > { %v8129_v0 = vsel %vm798_vm2, %v2379_v39, %v2381_v41  ;;  %v8142_v3 = vsel %vm798_vm2, %v2377_v10, %v2379_v39 }
 0x273   : > { %v8112_v61 = vpop.permute.xlu0 %2014 }
 0x274   : > { %10229 = vst [vmem:[#allocation105_spill] sm:$0xff] %v8112_v61  ;;  %v6326_v61 = vpop.f32.mrb[90].mxu0 }
 0x275   : > { %2500 = vperm.xlu1 %6581, %v8120_v31   ;;  %2520 = vperm.xlu0 %6580, %v7760_v36   ;;  %v2276_v36 = vpop.f32.mrb[91].mxu0  ;;  %v2387_v6 = vrot.slane %v6326_v61, 4 }
 0x276   : > { %v6329_v47 = vpop.f32.mrb[92].mxu0 }
 0x277   : > { %v8126_v63 = vpop.permute.xlu0 %2018  ;;  %v8144_v29 = vpop.permute.xlu1 %2016  ;;  %v2393_v61 = vrot.slane %v6329_v47, 4 }
 0x278   : > { %10231 = vst [vmem:[#allocation107_spill] sm:$0xff] %v8126_v63  ;;  %10232 = vst [vmem:[#allocation108_spill] sm:$0xff] %v8144_v29  ;;  %v2383_v63 = vrot.slane %v2276_v36, 4  ;;  %v2289_v11 = vpop.f32.mrb[93].mxu0  ;;  %v8166_v29 = vld [vmem:[%s10074_s3 + $0xc0] sm:$0xff] }
 0x279   : > { %2508 = vperm.xlu1 %6581, %v8134_v48   ;;  %2528 = vperm.xlu0 %6580, %v7774_v35   ;;  %v2389_v55 = vrot.slane %v2289_v11, 4  ;;  %v6330_v39 = vpop.f32.mrb[94].mxu0  ;;  %v8174_v11 = vsel %vm798_vm2, %v2385_v51, %v2387_v6 }
 0x27a   : > { %v8147_v33 = vsel %vm798_vm2, %v2383_v63, %v2385_v51 }
 0x27b   : > { %v8156_v35 = vpop.permute.xlu0 %2022  ;;  %v8158_v10 = vpop.permute.xlu1 %2020  ;;  %v8161_v36 = vsel %vm798_vm2, %v2387_v6, %v2389_v55  ;;  %v8193_v6 = vld [vmem:[%s10074_s3 + $0xe0] sm:$0xff] }
 0x27c   : > { %10234 = vst [vmem:[#allocation110_spill] sm:$0xff] %v8156_v35  ;;  %10235 = vst [vmem:[#allocation111_spill] sm:$0xff] %v8158_v10  ;;  %v8171_v35 = vsel %vm798_vm2, %v2381_v41, %v2383_v63 }
 0x27d   : > { %2516 = vperm.xlu1 %6581, %v8152_v5   ;;  %2536 = vperm.xlu0 %6580, %v7794_v28   ;;  %v2292_v28 = vpop.f32.mrb[95].mxu0  ;;  %v8184_v5 = vld [vmem:[%s10074_s3 + $0xd0] sm:$0xff] }
 0x27e   : > { %v2391_v47 = vrot.slane %v2292_v28, 4 }
 0x27f   : > { %v8176_v39 = vpop.permute.xlu0 %2026 }
 0x280   : > { %10236 = vst [vmem:[#allocation112_spill] sm:$0xff] %v8176_v39  ;;  %v8179_v10 = vsel %vm798_vm2, %v2391_v47, %v2393_v61  ;;  %v8197_v41 = vsel %vm798_vm2, %v2389_v55, %v2391_v47  ;;  %v5757_v61 = vld [vmem:[%s10073_s2 + $0xa] sm:$0x3]  ;;  %v6808_v55 = vmov 4  }
 0x281   : > { %2524 = vperm.xlu1 %6581, %v8166_v29   ;;  %2544 = vperm.xlu0 %6580, %v7805_v14   ;;  %v8188_v14 = vpop.permute.xlu1 %2024  ;;  %v3359_v47 = vsel %vm454_vm0, %v5757_v61, 0 }
 0x282   : > { %10237 = vst [vmem:[#allocation113_spill] sm:$0xff] %v8188_v14  ;;  %6521 = vmatprep.subr.msk.bf16.mxu0 %vm454_vm0, %v5757_v61 }
 0x283   : > { %v8199_v63 = vpop.permute.xlu0 %2030  ;;  %6366 = vmatpush3.bf16.msra.mxu0 %v3359_v47 }
 0x284   : > { %10238 = vst [vmem:[#allocation114_spill] sm:$0xff] %v8199_v63 }
 0x285   : > { %2532 = vperm.xlu1 %6581, %v8184_v5   ;;  %2552 = vperm.xlu0 %6580, %v7818_v46   ;;  %v8201_v51 = vpop.permute.xlu1 %2028  ;;  %v8206_v46 = vld [vmem:[%s10074_s3 + $0xf0] sm:$0xff] }
 0x286   : > { %10239 = vst [vmem:[#allocation115_spill] sm:$0xff] %v8201_v51  ;;  %6368 = vmatmul.mubr.msk.bf16.vlgmr.msra.gmra.mrb[96].mxu0 %vm405_vm1, %v7861_v37 }
 0x287   : > { %v8212_v28 = vpop.permute.xlu0 %2034  ;;  %6371 = vmatprep.mubr.msk.bf16.mxu0 %vm405_vm1, %v7866_v43 }
 0x288   : > { %10240 = vst [vmem:[#allocation116_spill] sm:$0xff] %v8212_v28 }
 0x289   : > { %2540 = vperm.xlu1 %6581, %v8193_v6   ;;  %6583 = vset.pattern.permute.xlu0 %v6808_v55  ;;  %v8216_v51 = vpop.permute.xlu1 %2032 }
 0x28a   : > { %10241 = vst [vmem:[#allocation117_spill] sm:$0xff] %v8216_v51 }
 0x28b   : > { %v8222_v63 = vpop.permute.xlu0 %2038 }
 0x28c   : > { %10242 = vst [vmem:[#allocation118_spill] sm:$0xff] %v8222_v63 }
 0x28d   : > { %2548 = vperm.xlu1 %6581, %v8206_v46   ;;  %v8224_v39 = vpop.permute.xlu1 %2036 }
 0x28e   : > { %10243 = vst [vmem:[#allocation119_spill] sm:$0xff] %v8224_v39  ;;  %6372 = vmatmul.mubr.msk.bf16.gmra.mrb[100].mxu0 %vm405_vm1, %v7874_v9 }
 0x28f   : > { %v8226_v28 = vpop.permute.xlu0 %2042  ;;  %6375 = vmatprep.mubr.msk.bf16.mxu0 %vm405_vm1, %v7879_v38 }
 0x290   : > { %10244 = vst [vmem:[#allocation120_spill] sm:$0xff] %v8226_v28 }
 0x291   : > { %6582 = vset.pattern.permute.xlu1 %v6808_v55  ;;  %v8232_v61 = vpop.permute.xlu1 %2040 }
 0x292   : > { %10245 = vst [vmem:[#allocation121_spill] sm:$0xff] %v8232_v61 }
 0x293   : > { %v8234_v55 = vpop.permute.xlu0 %2046 }
 0x294   : > { %10246 = vst [vmem:[#allocation122_spill] sm:$0xff] %v8234_v55 }
 0x295   : > { %v8236_v37 = vpop.permute.xlu1 %2044 }
 0x296   : > { %10247 = vst [vmem:[#allocation123_spill] sm:$0xff] %v8236_v37  ;;  %6376 = vmatmul.mubr.msk.bf16.gmra.mrb[104].mxu0 %vm405_vm1, %v7888_v56  ;;  %v6809_v37 = vmov 5  }
 0x297   : > { %6379 = vmatprep.mubr.msk.bf16.mxu0 %vm405_vm1, %v7893_v50 }
 0x299   : > { %v8244_v47 = vpop.permute.xlu1 %2048 }
 0x29a   : > { %10249 = vst [vmem:[#allocation125_spill] sm:$0xff] %v8244_v47 }
 0x29e   : > { %6380 = vmatmul.mubr.msk.bf16.gmra.mrb[108].mxu0 %vm405_vm1, %v7902_v13 }
 0x29f   : > { %6383 = vmatprep.mubr.msk.bf16.mxu0 %vm405_vm1, %v7907_v18 }
 0x2a3   : > { %v8242_v43 = vpop.permute.xlu0 %2050 }
 0x2a4   : > { %10248 = vst [vmem:[#allocation124_spill] sm:$0xff] %v8242_v43 }
 0x2a6   : > { %6384 = vmatmul.mubr.msk.bf16.gmra.mrb[112].mxu0 %vm405_vm1, %v7918_v58 }
 0x2a7   : > { %v8246_v9 = vpop.permute.xlu0 %2054  ;;  %6387 = vmatprep.mubr.msk.bf16.mxu0 %vm405_vm1, %v7923_v34 }
 0x2a8   : > { %10250 = vst [vmem:[#allocation126_spill] sm:$0xff] %v8246_v9 }
 0x2ab   : > { %v8252_v38 = vpop.permute.xlu1 %2052  ;;  %v8254_v55 = vpop.permute.xlu0 %2058 }
 0x2ac   : > { %10251 = vst [vmem:[#allocation127_spill] sm:$0xff] %v8252_v38  ;;  %10252 = vst [vmem:[#allocation128_spill] sm:$0xff] %v8254_v55 }
 0x2ae   : > { %6388 = vmatmul.mubr.msk.bf16.gmra.mrb[116].mxu0 %vm405_vm1, %v7937_v32 }
 0x2af   : > { %v8256_v56 = vpop.permute.xlu1 %2056  ;;  %v8262_v50 = vpop.permute.xlu0 %2062  ;;  %6391 = vmatprep.mubr.msk.bf16.mxu0 %vm405_vm1, %v7942_v21 }
 0x2b0   : > { %10253 = vst [vmem:[#allocation129_spill] sm:$0xff] %v8256_v56  ;;  %10254 = vst [vmem:[#allocation130_spill] sm:$0xff] %v8262_v50 }
 0x2b3   : > { %v8264_v9 = vpop.permute.xlu1 %2060  ;;  %v8270_v18 = vpop.permute.xlu0 %2066 }
 0x2b4   : > { %10255 = vst [vmem:[#allocation131_spill] sm:$0xff] %v8264_v9  ;;  %10256 = vst [vmem:[#allocation132_spill] sm:$0xff] %v8270_v18 }
 0x2b6   : > { %6392 = vmatmul.mubr.msk.bf16.gmra.mrb[120].mxu0 %vm405_vm1, %v7953_v53  ;;  %v10261_v53 = vrot.slane %v7994_v26, 4 }
 0x2b7   : > { %v8272_v13 = vpop.permute.xlu1 %2064  ;;  %v8274_v55 = vpop.permute.xlu0 %2070  ;;  %6395 = vmatprep.mubr.msk.bf16.mxu0 %vm405_vm1, %v7958_v1 }
 0x2b8   : > { %10257 = vst [vmem:[#allocation133_spill] sm:$0xff] %v8272_v13  ;;  %10258 = vst [vmem:[#allocation134_spill] sm:$0xff] %v8274_v55  ;;  %v2426_v55 = vsel %vm798_vm2, 0.0, %v10261_v53 }
 0x2bb   : > { %v8280_v34 = vpop.permute.xlu1 %2068 }
 0x2bc   : > { %10259 = vst [vmem:[#allocation135_spill] sm:$0xff] %v8280_v34 }
 0x2be   : > { %6396 = vmatmul.mubr.msk.bf16.gmra.mrb[124].mxu0 %vm405_vm1, %v7970_v42 }
 0x2bf   : > { %v8283_v32 = vpop.permute.xlu1 %2072  ;;  %6435 = vmatprep.mubr.msk.bf16.mxu0 %vm405_vm1, %v7610_v8 }
 0x2c0   : > { %10260 = vst [vmem:[#allocation136_spill] sm:$0xff] %v8283_v32 }
 0x2c8   : > { %v2429_v58 = vpop.permute.xlu0 %2428 }
 0x2c9   : > { %v2555_v50 = vmul.f32 0.0, %v2429_v58 }
 0x2cb   : > { %2619 = vrot.lane.b32.xlu1 %v2555_v50, %s6805_s14 }
 0x2cc   : > { %v2441_v21 = vpop.permute.xlu0 %2440 }
 0x2cd   : > { %v2558_v32 = vmul.f32 %v2441_v21, %v8001_v17 }
 0x2d0   : > { %v2433_v1 = vpop.permute.xlu1 %2432  ;;  %v2449_v18 = vpop.permute.xlu0 %2448 }
 0x2d1   : > { %v2556_v34 = vmul.f32 %v2433_v1, %v2426_v55  ;;  %v2560_v26 = vmul.f32 %v2449_v18, %v8004_v15 }
 0x2d3   : > { %2621 = vrot.lane.b32.xlu0 %v2556_v34, %s6805_s14 }
 0x2d4   : > { %v2437_v58 = vpop.permute.xlu1 %2436  ;;  %v2457_v50 = vpop.permute.xlu0 %2456 }
 0x2d5   : > { %v2557_v13 = vmul.f32 %v2437_v58, %v8011_v23  ;;  %v2562_v17 = vmul.f32 %v2457_v50, %v8017_v52 }
 0x2d7   : > { %2625 = vrot.lane.b32.xlu0 %v2558_v32, %s6805_s14  ;;  %2623 = vrot.lane.b32.xlu1 %v2557_v13, %s6805_s14 }
 0x2d8   : > { %v2445_v8 = vpop.permute.xlu1 %2444  ;;  %v2465_v42 = vpop.permute.xlu0 %2464 }
 0x2d9   : > { %v2559_v53 = vmul.f32 %v2445_v8, %v8014_v22  ;;  %v2564_v15 = vmul.f32 %v2465_v42, %v8022_v59 }
 0x2db   : > { %2627 = vrot.lane.b32.xlu1 %v2559_v53, %s6805_s14  ;;  %2629 = vrot.lane.b32.xlu0 %v2560_v26, %s6805_s14 }
 0x2dc   : > { %v2453_v55 = vpop.permute.xlu1 %2452  ;;  %v2473_v34 = vpop.permute.xlu0 %2472 }
 0x2dd   : > { %v2561_v23 = vmul.f32 %v2453_v55, %v8027_v49  ;;  %v2566_v52 = vmul.f32 %v2473_v34, %v8033_v12 }
 0x2df   : > { %2633 = vrot.lane.b32.xlu0 %v2562_v17, %s6805_s14  ;;  %2631 = vrot.lane.b32.xlu1 %v2561_v23, %s6805_s14 }
 0x2e0   : > { %v2461_v13 = vpop.permute.xlu1 %2460  ;;  %v2481_v32 = vpop.permute.xlu0 %2480 }
 0x2e1   : > { %v2563_v22 = vmul.f32 %v2461_v13, %v8030_v2  ;;  %v2568_v59 = vmul.f32 %v2481_v32, %v8038_v54 }
 0x2e3   : > { %2635 = vrot.lane.b32.xlu1 %v2563_v22, %s6805_s14  ;;  %2637 = vrot.lane.b32.xlu0 %v2564_v15, %s6805_s14 }
 0x2e4   : > { %v2469_v18 = vpop.permute.xlu1 %2468  ;;  %v2489_v21 = vpop.permute.xlu0 %2488 }
 0x2e5   : > { %v2565_v49 = vmul.f32 %v2469_v18, %v8043_v7  ;;  %v2570_v12 = vmul.f32 %v2489_v21, %v8049_v24 }
 0x2e7   : > { %2641 = vrot.lane.b32.xlu0 %v2566_v52, %s6805_s14  ;;  %2639 = vrot.lane.b32.xlu1 %v2565_v49, %s6805_s14 }
 0x2e8   : > { %v2477_v1 = vpop.permute.xlu1 %2476  ;;  %v2497_v58 = vpop.permute.xlu0 %2496 }
 0x2e9   : > { %v2567_v2 = vmul.f32 %v2477_v1, %v8046_v27  ;;  %v2572_v54 = vmul.f32 %v2497_v58, %v8059_v30 }
 0x2eb   : > { %2643 = vrot.lane.b32.xlu1 %v2567_v2, %s6805_s14  ;;  %2645 = vrot.lane.b32.xlu0 %v2568_v59, %s6805_s14 }
 0x2ec   : > { %v2485_v50 = vpop.permute.xlu1 %2484  ;;  %v2505_v8 = vpop.permute.xlu0 %2504 }
 0x2ed   : > { %v2569_v7 = vmul.f32 %v2485_v50, %v8069_v60  ;;  %v2574_v24 = vmul.f32 %v2505_v8, %v8075_v19 }
 0x2ef   : > { %2649 = vrot.lane.b32.xlu0 %v2570_v12, %s6805_s14  ;;  %2647 = vrot.lane.b32.xlu1 %v2569_v7, %s6805_s14 }
 0x2f0   : > { %v2493_v42 = vpop.permute.xlu1 %2492  ;;  %v2513_v26 = vpop.permute.xlu0 %2512 }
 0x2f1   : > { %v2571_v27 = vmul.f32 %v2493_v42, %v8072_v40  ;;  %v2576_v30 = vmul.f32 %v2513_v26, %v8092_v44 }
 0x2f3   : > { %2651 = vrot.lane.b32.xlu1 %v2571_v27, %s6805_s14  ;;  %2653 = vrot.lane.b32.xlu0 %v2572_v54, %s6805_s14 }
 0x2f4   : > { %v2501_v53 = vpop.permute.xlu1 %2500  ;;  %v2521_v55 = vpop.permute.xlu0 %2520 }
 0x2f5   : > { %v2573_v60 = vmul.f32 %v2501_v53, %v8107_v16  ;;  %v2578_v13 = vmul.f32 %v2521_v55, %v8115_v4 }
 0x2f7   : > { %2657 = vrot.lane.b32.xlu0 %v2574_v24, %s6805_s14  ;;  %2655 = vrot.lane.b32.xlu1 %v2573_v60, %s6805_s14  ;;  %v8365_v24 = vld [vmem:[%s10074_s3 + $0x8] sm:$0xff] }
 0x2f8   : > { %v2509_v34 = vpop.permute.xlu1 %2508  ;;  %v2529_v17 = vpop.permute.xlu0 %2528 }
 0x2f9   : > { %v2575_v40 = vmul.f32 %v2509_v34, %v8110_v62  ;;  %v2580_v15 = vmul.f32 %v2529_v17, %v8129_v0  ;;  %v6335_v62 = vpop.f32.mrb[64].mxu1 }
 0x2fa   : > { %v2786_v22 = vpop.f32.mrb[65].mxu1  ;;  %v2944_v21 = vrot.slane %v6335_v62, 4 }
 0x2fb   : > { %2659 = vrot.lane.b32.xlu1 %v2575_v40, %s6805_s14  ;;  %2661 = vrot.lane.b32.xlu0 %v2576_v30, %s6805_s14  ;;  %v6336_v49 = vpop.f32.mrb[66].mxu1  ;;  %v8380_v40 = vld [vmem:[%s10074_s3 + $0x20] sm:$0xff]  ;;  %v8401_v22 = vld [vmem:[%s10074_s3 + $0x30] sm:$0xff] }
 0x2fc   : > { %v2517_v23 = vpop.permute.xlu1 %2516  ;;  %v2537_v16 = vpop.permute.xlu0 %2536  ;;  %v2946_v1 = vrot.slane %v6336_v49, 4 }
 0x2fd   : > { %v2577_v19 = vmul.f32 %v2517_v23, %v8139_v20  ;;  %v2582_v20 = vmul.f32 %v2537_v16, %v8147_v33  ;;  %v2788_v58 = vpop.f32.mrb[67].mxu1  ;;  %v8386_v23 = vld [vmem:[%s10074_s3 + $0x10] sm:$0xff] }
 0x2fe   : > { %v6339_v0 = vpop.f32.mrb[68].mxu1  ;;  %v8346_v2 = vsel %vm798_vm2, %v2944_v21, %v2946_v1  ;;  %v2943_v7 = vrot.slane %v2788_v58, 4  ;;  %v8422_v58 = vld [vmem:[%s10074_s3 + $0x28] sm:$0xff] }
 0x2ff   : > { %2665 = vrot.lane.b32.xlu0 %v2578_v13, %s6805_s14  ;;  %2663 = vrot.lane.b32.xlu1 %v2577_v19, %s6805_s14  ;;  %v2801_v59 = vpop.f32.mrb[69].mxu1  ;;  %v2952_v53 = vrot.slane %v6339_v0, 4 }
 0x300   : > { %v2525_v32 = vpop.permute.xlu1 %2524  ;;  %v2545_v18 = vpop.permute.xlu0 %2544  ;;  %v2948_v42 = vrot.slane %v2801_v59, 4 }
 0x301   : > { %v2579_v44 = vmul.f32 %v2525_v32, %v8142_v3  ;;  %v2584_v50 = vmul.f32 %v2545_v18, %v8161_v36  ;;  %v6340_v33 = vpop.f32.mrb[70].mxu1  ;;  %v8357_v36 = vsel %vm798_vm2, %v2943_v7, %v2944_v21  ;;  %v8407_v18 = vld [vmem:[%s10074_s3 + $0x18] sm:$0xff] }
 0x302   : > { %v8443_v7 = vld [vmem:[%s10074_s3 + $0x38] sm:$0xff] }
 0x303   : > { %2667 = vrot.lane.b32.xlu1 %v2579_v44, %s6805_s14  ;;  %2669 = vrot.lane.b32.xlu0 %v2580_v15, %s6805_s14 }
 0x304   : > { %v2533_v4 = vpop.permute.xlu1 %2532  ;;  %v2553_v12 = vpop.permute.xlu0 %2552 }
 0x305   : > { %v2581_v52 = vmul.f32 %v2533_v4, %v8171_v35  ;;  %v2804_v35 = vpop.f32.mrb[71].mxu1  ;;  %v2586_v54 = vmul.f32 %v2553_v12, %v8179_v10  ;;  %v8371_v10 = vld [vmem:[%s10074_s3] sm:$0xff] }
 0x306   : > { %v2950_v55 = vrot.slane %v2804_v35, 4  ;;  %v6343_v60 = vpop.f32.mrb[72].mxu1  ;;  %v8437_v35 = vld [vmem:[%s10074_s3 + $0x50] sm:$0xff] }
 0x307   : > { %2673 = vrot.lane.b32.xlu0 %v2582_v20, %s6805_s14  ;;  %2671 = vrot.lane.b32.xlu1 %v2581_v52, %s6805_s14  ;;  %v2817_v34 = vpop.f32.mrb[73].mxu1  ;;  %v2960_v15 = vrot.slane %v6343_v60, 4 }
 0x308   : > { %v2541_v3 = vpop.permute.xlu1 %2540  ;;  %v2956_v17 = vrot.slane %v2817_v34, 4  ;;  %v8375_v30 = vsel %vm798_vm2, %v2950_v55, %v2952_v53  ;;  %v6344_v13 = vpop.f32.mrb[74].mxu1  ;;  %v8393_v16 = vsel %vm798_vm2, %v2948_v42, %v2950_v55  ;;  %v8452_v55 = vld [vmem:[%s10074_s3 + $0x60] sm:$0xff] }
 0x309   : > { %v2583_v8 = vmul.f32 %v2541_v3, %v8174_v11  ;;  %v8360_v11 = vsel %vm798_vm2, %v2946_v1, %v2948_v42  ;;  %v2820_v44 = vpop.f32.mrb[75].mxu1  ;;  %v2962_v4 = vrot.slane %v6344_v13, 4  ;;  %v8416_v1 = vld [vmem:[%s10074_s3 + $0x40] sm:$0xff] }
 0x30a   : > { %v2958_v62 = vrot.slane %v2820_v44, 4  ;;  %v6347_v21 = vpop.f32.mrb[76].mxu1 }
 0x30b   : > { %2675 = vrot.lane.b32.xlu1 %v2583_v8, %s6805_s14  ;;  %2677 = vrot.lane.b32.xlu0 %v2584_v50, %s6805_s14  ;;  %v2833_v20 = vpop.f32.mrb[77].mxu1  ;;  %v8432_v50 = vsel %vm798_vm2, %v2960_v15, %v2962_v4  ;;  %v2968_v8 = vrot.slane %v6347_v21, 4 }
 0x30c   : > { %v2549_v26 = vpop.permute.xlu1 %2548  ;;  %v2964_v52 = vrot.slane %v2833_v20, 4  ;;  %v8411_v49 = vsel %vm798_vm2, %v2958_v62, %v2960_v15  ;;  %v6348_v0 = vpop.f32.mrb[78].mxu1  ;;  %v8429_v59 = vsel %vm798_vm2, %v2956_v17, %v2958_v62 }
 0x30d   : > { %v2585_v27 = vmul.f32 %v2549_v26, %v8197_v41  ;;  %v2954_v41 = vrot.slane %v6340_v33, 4  ;;  %v2836_v33 = vpop.f32.mrb[79].mxu1  ;;  %v2970_v42 = vrot.slane %v6348_v0, 4 }
 0x30e   : > { %v8426_v3 = vsel %vm798_vm2, %v2962_v4, %v2964_v52  ;;  %v2966_v12 = vrot.slane %v2836_v33, 4  ;;  %v6351_v26 = vpop.f32.mrb[80].mxu1  ;;  %v8474_v4 = vld [vmem:[%s10074_s3 + $0x58] sm:$0xff] }
 0x30f   : > { %2681 = vrot.lane.b32.xlu0 %v2586_v54, %s6805_s14  ;;  %2679 = vrot.lane.b32.xlu1 %v2585_v27, %s6805_s14  ;;  %v8390_v19 = vsel %vm798_vm2, %v2954_v41, %v2956_v17  ;;  %v8396_v32 = vsel %vm798_vm2, %v2952_v53, %v2954_v41  ;;  %v2849_v54 = vpop.f32.mrb[81].mxu1  ;;  %v8458_v41 = vld [vmem:[%s10074_s3 + $0x48] sm:$0xff]  ;;  %v8468_v13 = vsel %vm798_vm2, %v2968_v8, %v2970_v42  ;;  %v2976_v15 = vrot.slane %v6351_v26, 4 }
 0x310   : > { %v2972_v27 = vrot.slane %v2849_v54, 4  ;;  %v8447_v53 = vsel %vm798_vm2, %v2966_v12, %v2968_v8  ;;  %v6352_v60 = vpop.f32.mrb[82].mxu1  ;;  %v8465_v17 = vsel %vm798_vm2, %v2964_v52, %v2966_v12 }
 0x311   : > { %v2852_v44 = vpop.f32.mrb[83].mxu1  ;;  %v2978_v21 = vrot.slane %v6352_v60, 4 }
 0x312   : > { %v8462_v34 = vsel %vm798_vm2, %v2970_v42, %v2972_v27  ;;  %v2974_v62 = vrot.slane %v2852_v44, 4  ;;  %v6355_v20 = vpop.f32.mrb[84].mxu1 }
 0x313   : > { %3041 = vperm.xlu0 %6583, %v8365_v24   ;;  %3037 = vperm.xlu1 %6582, %v8371_v10   ;;  %v2865_v0 = vpop.f32.mrb[85].mxu1  ;;  %v8494_v26 = vsel %vm798_vm2, %v2976_v15, %v2978_v21  ;;  %v2984_v54 = vrot.slane %v6355_v20, 4 }
 0x314   : > { %v2980_v52 = vrot.slane %v2865_v0, 4  ;;  %v8478_v33 = vsel %vm798_vm2, %v2974_v62, %v2976_v15  ;;  %v6356_v8 = vpop.f32.mrb[86].mxu1  ;;  %v8491_v42 = vsel %vm798_vm2, %v2972_v27, %v2974_v62  ;;  %v10262_v27 = vld [vmem:[#allocation101_spill] sm:$0xff] }
 0x315   : > { %v2868_v60 = vpop.f32.mrb[87].mxu1  ;;  %v2986_v44 = vrot.slane %v6356_v8, 4  ;;  %v10263_v8 = vld [vmem:[#allocation109_spill] sm:$0xff] }
 0x316   : > { %v8488_v12 = vsel %vm798_vm2, %v2978_v21, %v2980_v52  ;;  %v6359_v0 = vpop.f32.mrb[88].mxu1 }
 0x317   : > { %3053 = vperm.xlu0 %6583, %v8380_v40   ;;  %3045 = vperm.xlu1 %6582, %v8386_v23   ;;  %v2881_v9 = vpop.f32.mrb[89].mxu1 }
 0x318   : > { %v2988_v43 = vrot.slane %v2881_v9, 4  ;;  %v6360_v15 = vpop.f32.mrb[90].mxu1 }
 0x319   : > { %v2884_v20 = vpop.f32.mrb[91].mxu1 }
 0x31a   : > { %v8504_v62 = vsel %vm798_vm2, %v2986_v44, %v2988_v43  ;;  %v2990_v9 = vrot.slane %v2884_v20, 4  ;;  %v6363_v38 = vpop.f32.mrb[92].mxu1 }
 0x31b   : > { %3061 = vperm.xlu0 %6583, %v8401_v22   ;;  %3049 = vperm.xlu1 %6582, %v8407_v18  }
 0x31f   : > { %3069 = vperm.xlu0 %6583, %v8416_v1   ;;  %3057 = vperm.xlu1 %6582, %v8422_v58  }
 0x323   : > { %3077 = vperm.xlu0 %6583, %v8437_v35   ;;  %3065 = vperm.xlu1 %6582, %v8443_v7  }
 0x327   : > { %3085 = vperm.xlu0 %6583, %v8452_v55   ;;  %3073 = vperm.xlu1 %6582, %v8458_v41  }
 0x32b   : > { %3093 = vperm.xlu0 %6583, %v8080_v57   ;;  %3081 = vperm.xlu1 %6582, %v8474_v4   ;;  %v8484_v57 = vld [vmem:[%s10074_s3 + $0x68] sm:$0xff] }
 0x32f   : > { %3101 = vperm.xlu0 %6583, %v8097_v45   ;;  %3089 = vperm.xlu1 %6582, %v8484_v57   ;;  %v2982_v45 = vrot.slane %v2868_v60, 4  ;;  %v10264_v60 = vld [vmem:[#allocation102_spill] sm:$0xff] }
 0x331   : > { %v8499_v56 = vsel %vm798_vm2, %v2982_v45, %v2984_v54  ;;  %v8507_v21 = vsel %vm798_vm2, %v2980_v52, %v2982_v45  ;;  %v10265_v52 = vld [vmem:[#allocation104_spill] sm:$0xff]  ;;  %v8523_v45 = vsel %vm798_vm2, %v2988_v43, %v2990_v9 }
 0x333   : > { %3109 = vperm.xlu0 %6583, %v8120_v31   ;;  %3097 = vperm.xlu1 %6582, %v8055_v25   ;;  %v8510_v31 = vsel %vm798_vm2, %v2984_v54, %v2986_v44  ;;  %v2992_v25 = vrot.slane %v6359_v0, 4 }
 0x335   : > { %v8515_v47 = vsel %vm798_vm2, %v2990_v9, %v2992_v25 }
 0x337   : > { %3117 = vperm.xlu0 %6583, %v8134_v48   ;;  %3105 = vperm.xlu1 %6582, %v10262_v27   ;;  %v2994_v48 = vrot.slane %v6360_v15, 4  ;;  %v2897_v27 = vpop.f32.mrb[93].mxu1  ;;  %v3000_v15 = vrot.slane %v6363_v38, 4 }
 0x338   : > { %v2996_v28 = vrot.slane %v2897_v27, 4  ;;  %v8528_v0 = vpop.f32.mrb[94].mxu1 }
 0x339   : > { %v8526_v44 = vsel %vm798_vm2, %v2992_v25, %v2994_v48  ;;  %v10118_v20 = vrot.slane %v8528_v0, 4 }
 0x33a   : > { %v8520_v54 = vsel %vm798_vm2, %v2994_v48, %v2996_v28 }
 0x33b   : > { %3125 = vperm.xlu0 %6583, %v10263_v8   ;;  %3113 = vperm.xlu1 %6582, %v10264_v60   ;;  %v2900_v8 = vpop.f32.mrb[95].mxu1  ;;  %v8558_v48 = vsel %vm798_vm2, %v3000_v15, %v10118_v20  ;;  %v8588_v20 = vld [vmem:[%s10074_s3 + $0xf8] sm:$0xff] }
 0x33c   : > { %v2998_v43 = vrot.slane %v2900_v8, 4 }
 0x33d   : > { %v8538_v9 = vpop.permute.xlu1 %2619 }
 0x33e   : > { %v8543_v60 = vsel %vm798_vm2, %v2998_v43, %v3000_v15  ;;  %v8553_v38 = vsel %vm798_vm2, %v2996_v28, %v2998_v43  ;;  %v8578_v15 = vld [vmem:[%s10074_s3 + $0xe8] sm:$0xff] }
 0x33f   : > { %3133 = vperm.xlu0 %6583, %v8166_v29   ;;  %3121 = vperm.xlu1 %6582, %v10265_v52   ;;  %v8534_v29 = vld [vmem:[%s10074_s3 + $0xb8] sm:$0xff] }
 0x343   : > { %3141 = vperm.xlu0 %6583, %v8184_v5   ;;  %3129 = vperm.xlu1 %6582, %v8534_v29   ;;  %v8549_v5 = vld [vmem:[%s10074_s3 + $0xc8] sm:$0xff] }
 0x345   : > { %v8540_v25 = vpop.permute.xlu0 %2621 }
 0x347   : > { %3149 = vperm.xlu0 %6583, %v8193_v6   ;;  %3137 = vperm.xlu1 %6582, %v8549_v5   ;;  %v8568_v6 = vld [vmem:[%s10074_s3 + $0xd8] sm:$0xff] }
 0x349   : > { %v8560_v27 = vpop.permute.xlu0 %2625  ;;  %v8562_v52 = vpop.permute.xlu1 %2623 }
 0x34a   : > { %10266 = vst [vmem:[#allocation101_spill] sm:$0xff] %v8560_v27 }
 0x34b   : > { %3157 = vperm.xlu0 %6583, %v8206_v46   ;;  %3145 = vperm.xlu1 %6582, %v8568_v6  }
 0x34d   : > { %v8571_v28 = vpop.permute.xlu1 %2627  ;;  %v8573_v8 = vpop.permute.xlu0 %2629 }
 0x34e   : > { %10267 = vst [vmem:[#allocation109_spill] sm:$0xff] %v8571_v28  ;;  %10268 = vst [vmem:[#allocation102_spill] sm:$0xff] %v8573_v8 }
 0x34f   : > { %3153 = vperm.xlu1 %6582, %v8578_v15   ;;  %6584 = vset.pattern.permute.xlu0 %v6809_v37 }
 0x351   : > { %v8581_v43 = vpop.permute.xlu0 %2633  ;;  %v8583_v46 = vpop.permute.xlu1 %2631 }
 0x352   : > { %10269 = vst [vmem:[#allocation104_spill] sm:$0xff] %v8581_v43  ;;  %10270 = vst [vmem:[#allocation137_spill] sm:$0xff] %v8583_v46 }
 0x353   : > { %3161 = vperm.xlu1 %6582, %v8588_v20  }
 0x355   : > { %v8591_v63 = vpop.permute.xlu1 %2635  ;;  %v8593_v61 = vpop.permute.xlu0 %2637 }
 0x356   : > { %10271 = vst [vmem:[#allocation138_spill] sm:$0xff] %v8591_v63  ;;  %10272 = vst [vmem:[#allocation139_spill] sm:$0xff] %v8593_v61 }
 0x357   : > { %6585 = vset.pattern.permute.xlu1 %v6809_v37 }
 0x359   : > { %v8595_v39 = vpop.permute.xlu0 %2641  ;;  %v8597_v51 = vpop.permute.xlu1 %2639 }
 0x35a   : > { %10273 = vst [vmem:[#allocation140_spill] sm:$0xff] %v8595_v39  ;;  %10274 = vst [vmem:[#allocation141_spill] sm:$0xff] %v8597_v51  ;;  %v6369_v63 = vpop.f32.mrb[96].mxu0  ;;  %v6703_v51 = vld [vmem:[%s6938_s13 + $0x48] sm:$0xff]  }
 0x35b   : > { %v3395_v61 = vpop.f32.mrb[97].mxu0 }
 0x35c   : > { %v6370_v61 = vpop.f32.mrb[98].mxu0 }
 0x35d   : > { %v8599_v43 = vpop.permute.xlu1 %2643  ;;  %v8601_v8 = vpop.permute.xlu0 %2645 }
 0x35e   : > { %10275 = vst [vmem:[#allocation142_spill] sm:$0xff] %v8599_v43  ;;  %10276 = vst [vmem:[#allocation143_spill] sm:$0xff] %v8601_v8  ;;  %v5774_v43 = vld [vmem:[%s10073_s2 + $0xc] sm:$0x3] }
 0x35f   : > { %6522 = vmatprep.subr.msk.bf16.mxu1 %vm454_vm0, %v5774_v43 }
 0x361   : > { %v8603_v14 = vpop.permute.xlu0 %2649  ;;  %v8605_v46 = vpop.permute.xlu1 %2647 }
 0x362   : > { %10277 = vst [vmem:[#allocation144_spill] sm:$0xff] %v8603_v14  ;;  %10278 = vst [vmem:[#allocation145_spill] sm:$0xff] %v8605_v46  ;;  %v5791_v14 = vld [vmem:[%s10073_s2 + $0xe] sm:$0x3]  ;;  %v6696_v46 = vld [vmem:[%s6938_s13 + $0x10] sm:$0xff]  }
 0x363   : > { %6523 = vmatprep.subr.msk.bf16.mxu0 %vm454_vm0, %v5791_v14  ;;  %v4325_v63 = vsel %vm454_vm0, %v5791_v14, 0 }
 0x364   : > { %6434 = vmatpush3.bf16.msra.mxu0 %v4325_v63 }
 0x365   : > { %v8607_v28 = vpop.permute.xlu1 %2651  ;;  %v8609_v27 = vpop.permute.xlu0 %2653 }
 0x366   : > { %10279 = vst [vmem:[#allocation146_spill] sm:$0xff] %v8607_v28  ;;  %10280 = vst [vmem:[#allocation147_spill] sm:$0xff] %v8609_v27  ;;  %v3863_v28 = vsel %vm454_vm0, %v5774_v43, 0  ;;  %v6695_v27 = vld [vmem:[%s6938_s13 + $0x8] sm:$0xff]  }
 0x367   : > { %6400 = vmatpush3.bf16.msra.mxu1 %v3863_v28  ;;  %6436 = vmatmul.mubr.msk.bf16.vlgmr.msra.gmra.mrb[128].mxu0 %vm405_vm1, %v6695_v27 }
 0x368   : > { %6439 = vmatprep.mubr.msk.bf16.mxu0 %vm405_vm1, %v6696_v46 }
 0x369   : > { %v8611_v37 = vpop.permute.xlu1 %2655  ;;  %v8619_v8 = vpop.permute.xlu0 %2657 }
 0x36a   : > { %10281 = vst [vmem:[#allocation148_spill] sm:$0xff] %v8611_v37  ;;  %10282 = vst [vmem:[#allocation149_spill] sm:$0xff] %v8619_v8  ;;  %v3397_v37 = vpop.f32.mrb[99].mxu0  ;;  %6402 = vmatmul.mubr.msk.bf16.vlgmr.msra.gmra.mrb[96].mxu1 %vm405_vm1, %v6695_v27  ;;  %v6697_v27 = vld [vmem:[%s6938_s13 + $0x18] sm:$0xff]  }
 0x36b   : > { %6405 = vmatprep.mubr.msk.bf16.mxu1 %vm405_vm1, %v6696_v46  ;;  %v6373_v43 = vpop.f32.mrb[100].mxu0 }
 0x36c   : > { %v3407_v28 = vpop.f32.mrb[101].mxu0 }
 0x36d   : > { %v8628_v8 = vpop.permute.xlu1 %2659  ;;  %v8633_v14 = vpop.permute.xlu0 %2661 }
 0x36e   : > { %10283 = vst [vmem:[#allocation150_spill] sm:$0xff] %v8628_v8  ;;  %10284 = vst [vmem:[#allocation151_spill] sm:$0xff] %v8633_v14  ;;  %v6374_v63 = vpop.f32.mrb[102].mxu0  ;;  %v6698_v8 = vld [vmem:[%s6938_s13 + $0x20] sm:$0xff]  }
 0x36f   : > { %v3409_v37 = vpop.f32.mrb[103].mxu0  ;;  %6440 = vmatmul.mubr.msk.bf16.gmra.mrb[132].mxu0 %vm405_vm1, %v6697_v27  ;;  %v6702_v14 = vld [vmem:[%s6938_s13 + $0x40] sm:$0xff]  }
 0x370   : > { %6443 = vmatprep.mubr.msk.bf16.mxu0 %vm405_vm1, %v6698_v8  ;;  %v6377_v46 = vpop.f32.mrb[104].mxu0 }
 0x371   : > { %v8635_v61 = vpop.permute.xlu1 %2663  ;;  %v8637_v39 = vpop.permute.xlu0 %2665 }
 0x372   : > { %10285 = vst [vmem:[#allocation152_spill] sm:$0xff] %v8635_v61  ;;  %10286 = vst [vmem:[#allocation153_spill] sm:$0xff] %v8637_v39  ;;  %6406 = vmatmul.mubr.msk.bf16.gmra.mrb[100].mxu1 %vm405_vm1, %v6697_v27  ;;  %v3419_v43 = vpop.f32.mrb[105].mxu0  ;;  %v6699_v39 = vld [vmem:[%s6938_s13 + $0x28] sm:$0xff]   ;;  %v6700_v27 = vld [vmem:[%s6938_s13 + $0x30] sm:$0xff]  }
 0x373   : > { %6409 = vmatprep.mubr.msk.bf16.mxu1 %vm405_vm1, %v6698_v8  ;;  %v6378_v28 = vpop.f32.mrb[106].mxu0 }
 0x374   : > { %v3421_v37 = vpop.f32.mrb[107].mxu0 }
 0x375   : > { %v8645_v63 = vpop.permute.xlu1 %2667  ;;  %v8647_v61 = vpop.permute.xlu0 %2669 }
 0x376   : > { %10287 = vst [vmem:[#allocation154_spill] sm:$0xff] %v8645_v63  ;;  %10288 = vst [vmem:[#allocation155_spill] sm:$0xff] %v8647_v61  ;;  %v6381_v8 = vpop.f32.mrb[108].mxu0  ;;  %v6701_v61 = vld [vmem:[%s6938_s13 + $0x38] sm:$0xff]  }
 0x377   : > { %6444 = vmatmul.mubr.msk.bf16.gmra.mrb[136].mxu0 %vm405_vm1, %v6699_v39  ;;  %v3431_v46 = vpop.f32.mrb[109].mxu0 }
 0x378   : > { %6447 = vmatprep.mubr.msk.bf16.mxu0 %vm405_vm1, %v6700_v27  ;;  %v6382_v37 = vpop.f32.mrb[110].mxu0 }
 0x379   : > { %v8655_v43 = vpop.permute.xlu1 %2671  ;;  %v8657_v28 = vpop.permute.xlu0 %2673 }
 0x37a   : > { %6410 = vmatmul.mubr.msk.bf16.gmra.mrb[104].mxu1 %vm405_vm1, %v6699_v39  ;;  %10289 = vst [vmem:[#allocation156_spill] sm:$0xff] %v8655_v43  ;;  %10290 = vst [vmem:[#allocation157_spill] sm:$0xff] %v8657_v28  ;;  %v3433_v63 = vpop.f32.mrb[111].mxu0 }
 0x37b   : > { %6413 = vmatprep.mubr.msk.bf16.mxu1 %vm405_vm1, %v6700_v27  ;;  %v6385_v27 = vpop.f32.mrb[112].mxu0 }
 0x37c   : > { %v3443_v46 = vpop.f32.mrb[113].mxu0 }
 0x37d   : > { %v8662_v39 = vpop.permute.xlu1 %2675  ;;  %v8667_v8 = vpop.permute.xlu0 %2677 }
 0x37e   : > { %10291 = vst [vmem:[#allocation158_spill] sm:$0xff] %v8662_v39  ;;  %10292 = vst [vmem:[#allocation159_spill] sm:$0xff] %v8667_v8  ;;  %v6386_v37 = vpop.f32.mrb[114].mxu0  ;;  %v6705_v39 = vld [vmem:[%s6938_s13 + $0x58] sm:$0xff]  }
 0x37f   : > { %6448 = vmatmul.mubr.msk.bf16.gmra.mrb[140].mxu0 %vm405_vm1, %v6701_v61  ;;  %v3445_v43 = vpop.f32.mrb[115].mxu0 }
 0x380   : > { %6451 = vmatprep.mubr.msk.bf16.mxu0 %vm405_vm1, %v6702_v14 }
 0x381   : > { %v8669_v63 = vpop.permute.xlu0 %2681  ;;  %v8671_v28 = vpop.permute.xlu1 %2679 }
 0x382   : > { %6414 = vmatmul.mubr.msk.bf16.gmra.mrb[108].mxu1 %vm405_vm1, %v6701_v61  ;;  %10293 = vst [vmem:[#allocation160_spill] sm:$0xff] %v8669_v63  ;;  %10294 = vst [vmem:[#allocation161_spill] sm:$0xff] %v8671_v28  ;;  %v6704_v61 = vld [vmem:[%s6938_s13 + $0x50] sm:$0xff]  }
 0x383   : > { %6417 = vmatprep.mubr.msk.bf16.mxu1 %vm405_vm1, %v6702_v14 }
 0x387   : > { %6452 = vmatmul.mubr.msk.bf16.gmra.mrb[144].mxu0 %vm405_vm1, %v6703_v51 }
 0x388   : > { %6455 = vmatprep.mubr.msk.bf16.mxu0 %vm405_vm1, %v6704_v61 }
 0x38a   : > { %6418 = vmatmul.mubr.msk.bf16.gmra.mrb[112].mxu1 %vm405_vm1, %v6703_v51 }
 0x38b   : > { %6421 = vmatprep.mubr.msk.bf16.mxu1 %vm405_vm1, %v6704_v61  ;;  %v6706_v61 = vld [vmem:[%s6938_s13 + $0x60] sm:$0xff]  }
 0x38f   : > { %6456 = vmatmul.mubr.msk.bf16.gmra.mrb[148].mxu0 %vm405_vm1, %v6705_v39 }
 0x390   : > { %6459 = vmatprep.mubr.msk.bf16.mxu0 %vm405_vm1, %v6706_v61 }
 0x392   : > { %v3042_v14 = vpop.permute.xlu0 %3041  ;;  %v3038_v27 = vpop.permute.xlu1 %3037  ;;  %6422 = vmatmul.mubr.msk.bf16.gmra.mrb[116].mxu1 %vm405_vm1, %v6705_v39 }
 0x393   : > { %v3165_v43 = vmul.f32 %v3042_v14, %v8346_v2  ;;  %v3164_v46 = vmul.f32 %v3038_v27, %v8357_v36  ;;  %6425 = vmatprep.mubr.msk.bf16.mxu1 %vm405_vm1, %v6706_v61 }
 0x395   : > { %3230 = vrot.lane.b32.xlu1 %v3165_v43, %s6805_s14  ;;  %3228 = vrot.lane.b32.xlu0 %v3164_v46, %s6805_s14 }
 0x396   : > { %v3054_v37 = vpop.permute.xlu0 %3053  ;;  %v3046_v28 = vpop.permute.xlu1 %3045 }
 0x397   : > { %v3166_v51 = vmul.f32 %v3046_v28, %v8360_v11  ;;  %v3168_v14 = vmul.f32 %v3054_v37, %v8375_v30  ;;  %v6707_v28 = vld [vmem:[%s6938_s13 + $0x68] sm:$0xff]  }
 0x398   : > { %6460 = vmatmul.mubr.msk.bf16.gmra.mrb[152].mxu0 %vm405_vm1, %v6707_v28 }
 0x399   : > { %3232 = vrot.lane.b32.xlu0 %v3166_v51, %s6805_s14  ;;  %v6708_v51 = vld [vmem:[%s6938_s13 + $0x70] sm:$0xff]  }
 0x39a   : > { %v3062_v2 = vpop.permute.xlu0 %3061  ;;  %v3050_v36 = vpop.permute.xlu1 %3049  ;;  %6426 = vmatmul.mubr.msk.bf16.gmra.mrb[120].mxu1 %vm405_vm1, %v6707_v28  ;;  %6463 = vmatprep.mubr.msk.bf16.mxu0 %vm405_vm1, %v6708_v51 }
 0x39b   : > { %v3167_v27 = vmul.f32 %v3050_v36, %v8393_v16  ;;  %v3170_v43 = vmul.f32 %v3062_v2, %v8390_v19  ;;  %6429 = vmatprep.mubr.msk.bf16.mxu1 %vm405_vm1, %v6708_v51  ;;  %v6709_v2 = vld [vmem:[%s6938_s13 + $0x78] sm:$0xff]   ;;  %s10022_s13 = scalar_lea.hbm %s10078_s7, %s5888_s15 }
 0x39d   : > { %3236 = vrot.lane.b32.xlu0 %v3168_v14, %s6805_s14  ;;  %3234 = vrot.lane.b32.xlu1 %v3167_v27, %s6805_s14 }
 0x39e   : > { %v3070_v39 = vpop.permute.xlu0 %3069  ;;  %v3058_v11 = vpop.permute.xlu1 %3057 }
 0x39f   : > { %v3169_v46 = vmul.f32 %v3058_v11, %v8396_v32  ;;  %v3172_v37 = vmul.f32 %v3070_v39, %v8411_v49 }
 0x3a0   : > { %6464 = vmatmul.mubr.msk.bf16.gmra.mrb[156].mxu0 %vm405_vm1, %v6709_v2 }
 0x3a1   : > { %3240 = vrot.lane.b32.xlu0 %v3170_v43, %s6805_s14  ;;  %3238 = vrot.lane.b32.xlu1 %v3169_v46, %s6805_s14 }
 0x3a2   : > { %v3078_v30 = vpop.permute.xlu0 %3077  ;;  %v3066_v16 = vpop.permute.xlu1 %3065  ;;  %6430 = vmatmul.mubr.msk.bf16.gmra.mrb[124].mxu1 %vm405_vm1, %v6709_v2 }
 0x3a3   : > { %v3171_v61 = vmul.f32 %v3066_v16, %v8429_v59  ;;  %v3174_v36 = vmul.f32 %v3078_v30, %v8426_v3 }
 0x3a5   : > { %3244 = vrot.lane.b32.xlu0 %v3172_v37, %s6805_s14  ;;  %3242 = vrot.lane.b32.xlu1 %v3171_v61, %s6805_s14 }
 0x3a6   : > { %v3086_v19 = vpop.permute.xlu0 %3085  ;;  %v3074_v32 = vpop.permute.xlu1 %3073 }
 0x3a7   : > { %v3173_v14 = vmul.f32 %v3074_v32, %v8432_v50  ;;  %v3176_v27 = vmul.f32 %v3086_v19, %v8447_v53 }
 0x3a9   : > { %3248 = vrot.lane.b32.xlu0 %v3174_v36, %s6805_s14  ;;  %3246 = vrot.lane.b32.xlu1 %v3173_v14, %s6805_s14 }
 0x3aa   : > { %v3094_v49 = vpop.permute.xlu0 %3093  ;;  %v3082_v59 = vpop.permute.xlu1 %3081 }
 0x3ab   : > { %v3175_v39 = vmul.f32 %v3082_v59, %v8465_v17  ;;  %v3178_v3 = vmul.f32 %v3094_v49, %v8462_v34  ;;  %v6389_v49 = vpop.f32.mrb[116].mxu0 }
 0x3ac   : > { %v3455_v59 = vpop.f32.mrb[117].mxu0 }
 0x3ad   : > { %3252 = vrot.lane.b32.xlu0 %v3176_v27, %s6805_s14  ;;  %3250 = vrot.lane.b32.xlu1 %v3175_v39, %s6805_s14 }
 0x3ae   : > { %v3102_v11 = vpop.permute.xlu0 %3101  ;;  %v3090_v28 = vpop.permute.xlu1 %3089 }
 0x3af   : > { %v3177_v50 = vmul.f32 %v3090_v28, %v8468_v13  ;;  %v3180_v53 = vmul.f32 %v3102_v11, %v8478_v33  ;;  %v6390_v11 = vpop.f32.mrb[118].mxu0 }
 0x3b1   : > { %3256 = vrot.lane.b32.xlu0 %v3178_v3, %s6805_s14  ;;  %3254 = vrot.lane.b32.xlu1 %v3177_v50, %s6805_s14  ;;  %v3511_v3 = vrot.slane %v6390_v11, 4  ;;  %v3457_v50 = vpop.f32.mrb[119].mxu0  ;;  %v8851_v11 = vld [vmem:[%s10074_s3 + $0xa0] sm:$0xff] }
 0x3b2   : > { %v3110_v43 = vpop.permute.xlu0 %3109  ;;  %v3098_v46 = vpop.permute.xlu1 %3097  ;;  %v8867_v50 = vld [vmem:[%s10074_s3 + $0xc0] sm:$0xff] }
 0x3b3   : > { %v3179_v17 = vmul.f32 %v3098_v46, %v8491_v42  ;;  %v3182_v34 = vmul.f32 %v3110_v43, %v8488_v12 }
 0x3b5   : > { %3260 = vrot.lane.b32.xlu0 %v3180_v53, %s6805_s14  ;;  %3258 = vrot.lane.b32.xlu1 %v3179_v17, %s6805_s14 }
 0x3b6   : > { %v3118_v51 = vpop.permute.xlu0 %3117  ;;  %v3106_v30 = vpop.permute.xlu1 %3105 }
 0x3b7   : > { %v3181_v13 = vmul.f32 %v3106_v30, %v8494_v26  ;;  %v3184_v33 = vmul.f32 %v3118_v51, %v8499_v56 }
 0x3b9   : > { %3264 = vrot.lane.b32.xlu0 %v3182_v34, %s6805_s14  ;;  %3262 = vrot.lane.b32.xlu1 %v3181_v13, %s6805_s14 }
 0x3ba   : > { %v3126_v16 = vpop.permute.xlu0 %3125  ;;  %v3114_v37 = vpop.permute.xlu1 %3113 }
 0x3bb   : > { %v3183_v42 = vmul.f32 %v3114_v37, %v8507_v21  ;;  %v3186_v12 = vmul.f32 %v3126_v16, %v8504_v62 }
 0x3bd   : > { %3268 = vrot.lane.b32.xlu0 %v3184_v33, %s6805_s14  ;;  %3266 = vrot.lane.b32.xlu1 %v3183_v42, %s6805_s14 }
 0x3be   : > { %v3134_v61 = vpop.permute.xlu0 %3133  ;;  %v3122_v19 = vpop.permute.xlu1 %3121 }
 0x3bf   : > { %v3185_v26 = vmul.f32 %v3122_v19, %v8510_v31  ;;  %v3188_v56 = vmul.f32 %v3134_v61, %v8515_v47  ;;  %v3510_v47 = vrot.slane %v6389_v49, 4 }
 0x3c1   : > { %3272 = vrot.lane.b32.xlu0 %v3186_v12, %s6805_s14  ;;  %3270 = vrot.lane.b32.xlu1 %v3185_v26, %s6805_s14  ;;  %v8756_v17 = vsel %vm798_vm2, %v3510_v47, %v3511_v3  ;;  %v8832_v47 = vld [vmem:[%s10074_s3 + $0x80] sm:$0xff] }
 0x3c2   : > { %v3142_v32 = vpop.permute.xlu0 %3141  ;;  %v3130_v2 = vpop.permute.xlu1 %3129 }
 0x3c3   : > { %v3187_v21 = vmul.f32 %v3130_v2, %v8523_v45  ;;  %v3190_v62 = vmul.f32 %v3142_v32, %v8520_v54  ;;  %v6393_v54 = vpop.f32.mrb[120].mxu0 }
 0x3c4   : > { %v3469_v53 = vpop.f32.mrb[121].mxu0  ;;  %v3517_v37 = vrot.slane %v6393_v54, 4 }
 0x3c5   : > { %3276 = vrot.lane.b32.xlu0 %v3188_v56, %s6805_s14  ;;  %3274 = vrot.lane.b32.xlu1 %v3187_v21, %s6805_s14  ;;  %v3513_v51 = vrot.slane %v3469_v53, 4  ;;  %v6394_v30 = vpop.f32.mrb[122].mxu0 }
 0x3c6   : > { %v3150_v36 = vpop.permute.xlu0 %3149  ;;  %v3138_v14 = vpop.permute.xlu1 %3137  ;;  %v3519_v42 = vrot.slane %v6394_v30, 4  ;;  %v8899_v30 = vld [vmem:[%s10074_s3 + $0xf0] sm:$0xff] }
 0x3c7   : > { %v3189_v31 = vmul.f32 %v3138_v14, %v8526_v44  ;;  %v3192_v45 = vmul.f32 %v3150_v36, %v8543_v60  ;;  %v10295_v44 = vrot.slane %v8528_v0, 4  ;;  %v3472_v34 = vpop.f32.mrb[123].mxu0  ;;  %v8762_v13 = vsel %vm798_vm2, %v3511_v3, %v3513_v51 }
 0x3c8   : > { %v3515_v33 = vrot.slane %v3472_v34, 4  ;;  %v8778_v2 = vsel %vm798_vm2, %v3517_v37, %v3519_v42  ;;  %v10120_v34 = vmov 6  }
 0x3c9   : > { %3280 = vrot.lane.b32.xlu0 %v3190_v62, %s6805_s14  ;;  %3278 = vrot.lane.b32.xlu1 %v3189_v31, %s6805_s14  ;;  %v3035_v43 = vsel %vm798_vm2, %v10295_v44, 0.0 }
 0x3ca   : > { %v3146_v27 = vpop.permute.xlu1 %3145  ;;  %v3158_v28 = vpop.permute.xlu0 %3157  ;;  %v8767_v12 = vsel %vm798_vm2, %v3515_v33, %v3517_v37  ;;  %v8775_v32 = vsel %vm798_vm2, %v3513_v51, %v3515_v33 }
 0x3cb   : > { %v3191_v39 = vmul.f32 %v3146_v27, %v8553_v38  ;;  %v3194_v60 = vmul.f32 %v3158_v28, %v3035_v43  ;;  %v8807_v27 = vld [vmem:[%s10074_s3 + $0x78] sm:$0xff]  ;;  %v8858_v28 = vld [vmem:[%s10074_s3 + $0xb0] sm:$0xff] }
 0x3cc   : > { %v8878_v43 = vld [vmem:[%s10074_s3 + $0xd0] sm:$0xff] }
 0x3cd   : > { %3284 = vrot.lane.b32.xlu0 %v3192_v45, %s6805_s14  ;;  %3282 = vrot.lane.b32.xlu1 %v3191_v39, %s6805_s14  ;;  %v8838_v45 = vld [vmem:[%s10074_s3 + $0xa8] sm:$0xff]  ;;  %v8844_v39 = vld [vmem:[%s10074_s3 + $0x90] sm:$0xff] }
 0x3ce   : > { %v3154_v46 = vpop.permute.xlu1 %3153 }
 0x3cf   : > { %v3193_v38 = vmul.f32 %v3154_v46, %v8558_v48  ;;  %v6397_v48 = vpop.f32.mrb[124].mxu0 }
 0x3d0   : > { %v3485_v61 = vpop.f32.mrb[125].mxu0  ;;  %v3525_v21 = vrot.slane %v6397_v48, 4 }
 0x3d1   : > { %3288 = vrot.lane.b32.xlu0 %v3194_v60, %s6805_s14  ;;  %3286 = vrot.lane.b32.xlu1 %v3193_v38, %s6805_s14  ;;  %v3521_v19 = vrot.slane %v3485_v61, 4  ;;  %v8780_v56 = vpop.f32.mrb[126].mxu0  ;;  %v8889_v60 = vld [vmem:[%s10074_s3 + $0xe0] sm:$0xff] }
 0x3d2   : > { %v3162_v0 = vpop.permute.xlu1 %3161  ;;  %v10119_v36 = vrot.slane %v8780_v56, 4  ;;  %v3488_v14 = vpop.f32.mrb[127].mxu0 }
 0x3d3   : > { %v3195_v16 = vmul.f32 0.0, %v3162_v0  ;;  %v8772_v26 = vsel %vm798_vm2, %v3519_v42, %v3521_v19  ;;  %v3523_v62 = vrot.slane %v3488_v14, 4 }
 0x3d4   : > { %v8796_v59 = vsel %vm798_vm2, %v3525_v21, %v10119_v36 }
 0x3d5   : > { %3541 = vperm.xlu0 %6584, %v8371_v10   ;;  %3290 = vrot.lane.b32.xlu1 %v3195_v16, %s6805_s14  ;;  %v8786_v31 = vsel %vm798_vm2, %v3523_v62, %v3525_v21  ;;  %v8791_v49 = vsel %vm798_vm2, %v3521_v19, %v3523_v62 }
 0x3d9   : > { %3553 = vperm.xlu0 %6584, %v8407_v18   ;;  %3545 = vperm.xlu1 %6585, %v8365_v24  }
 0x3dd   : > { %3561 = vperm.xlu0 %6584, %v8422_v58   ;;  %3549 = vperm.xlu1 %6585, %v8386_v23  }
 0x3e1   : > { %3569 = vperm.xlu0 %6584, %v8443_v7   ;;  %3557 = vperm.xlu1 %6585, %v8380_v40  }
 0x3e5   : > { %3577 = vperm.xlu0 %6584, %v8458_v41   ;;  %3565 = vperm.xlu1 %6585, %v8401_v22   ;;  %v8814_v22 = vld [vmem:[%s10074_s3 + $0x88] sm:$0xff] }
 0x3e9   : > { %3585 = vperm.xlu0 %6584, %v8474_v4   ;;  %3573 = vperm.xlu1 %6585, %v8416_v1  }
 0x3ed   : > { %3593 = vperm.xlu0 %6584, %v8484_v57   ;;  %3581 = vperm.xlu1 %6585, %v8437_v35   ;;  %v8820_v35 = vld [vmem:[%s10074_s3 + $0x70] sm:$0xff]  ;;  %v8826_v57 = vld [vmem:[%s10074_s3 + $0x98] sm:$0xff] }
 0x3f1   : > { %3601 = vperm.xlu0 %6584, %v8807_v27   ;;  %3589 = vperm.xlu1 %6585, %v8452_v55  }
 0x3f5   : > { %3609 = vperm.xlu0 %6584, %v8814_v22   ;;  %3597 = vperm.xlu1 %6585, %v8820_v35  }
 0x3f9   : > { %3617 = vperm.xlu0 %6584, %v8826_v57   ;;  %3605 = vperm.xlu1 %6585, %v8832_v47  }
 0x3fd   : > { %3625 = vperm.xlu0 %6584, %v8838_v45   ;;  %3613 = vperm.xlu1 %6585, %v8844_v39  }
 0x401   : > { %3633 = vperm.xlu0 %6584, %v8534_v29   ;;  %3621 = vperm.xlu1 %6585, %v8851_v11  }
 0x405   : > { %3641 = vperm.xlu0 %6584, %v8549_v5   ;;  %3629 = vperm.xlu1 %6585, %v8858_v28  }
 0x407   : > { %v8861_v3 = vpop.permute.xlu0 %3228  ;;  %v8870_v54 = vpop.permute.xlu1 %3230 }
 0x409   : > { %3649 = vperm.xlu0 %6584, %v8568_v6   ;;  %3637 = vperm.xlu1 %6585, %v8867_v50  }
 0x40b   : > { %v8872_v44 = vpop.permute.xlu0 %3232 }
 0x40d   : > { %3657 = vperm.xlu0 %6584, %v8578_v15   ;;  %3645 = vperm.xlu1 %6585, %v8878_v43  }
 0x40f   : > { %v8881_v46 = vpop.permute.xlu0 %3236  ;;  %v8883_v53 = vpop.permute.xlu1 %3234 }
 0x410   : > { %10296 = vst [vmem:[#allocation162_spill] sm:$0xff] %v8883_v53 }
 0x411   : > { %3665 = vperm.xlu0 %6584, %v8588_v20   ;;  %3653 = vperm.xlu1 %6585, %v8889_v60  }
 0x413   : > { %v8892_v38 = vpop.permute.xlu0 %3240  ;;  %v8894_v51 = vpop.permute.xlu1 %3238 }
 0x414   : > { %10297 = vst [vmem:[#allocation163_spill] sm:$0xff] %v8892_v38  ;;  %10298 = vst [vmem:[#allocation164_spill] sm:$0xff] %v8894_v51 }
 0x415   : > { %3661 = vperm.xlu1 %6585, %v8899_v30   ;;  %6586 = vset.pattern.permute.xlu0 %v10120_v34 }
 0x417   : > { %v8903_v0 = vpop.permute.xlu0 %3244  ;;  %v8905_v16 = vpop.permute.xlu1 %3242 }
 0x418   : > { %10299 = vst [vmem:[#allocation165_spill] sm:$0xff] %v8903_v0  ;;  %10300 = vst [vmem:[#allocation166_spill] sm:$0xff] %v8905_v16 }
 0x419   : > { %6587 = vset.pattern.permute.xlu1 %v10120_v34 }
 0x41b   : > { %v8908_v37 = vpop.permute.xlu0 %3248  ;;  %v8910_v33 = vpop.permute.xlu1 %3246 }
 0x41c   : > { %10301 = vst [vmem:[#allocation167_spill] sm:$0xff] %v8908_v37  ;;  %10302 = vst [vmem:[#allocation168_spill] sm:$0xff] %v8910_v33 }
 0x41f   : > { %v8912_v42 = vpop.permute.xlu0 %3252  ;;  %v8914_v48 = vpop.permute.xlu1 %3250 }
 0x420   : > { %10303 = vst [vmem:[#allocation169_spill] sm:$0xff] %v8912_v42  ;;  %10304 = vst [vmem:[#allocation170_spill] sm:$0xff] %v8914_v48 }
 0x423   : > { %v8916_v61 = vpop.permute.xlu0 %3256  ;;  %v8918_v19 = vpop.permute.xlu1 %3254 }
 0x424   : > { %10305 = vst [vmem:[#allocation171_spill] sm:$0xff] %v8916_v61  ;;  %10306 = vst [vmem:[#allocation172_spill] sm:$0xff] %v8918_v19 }
 0x427   : > { %v8920_v21 = vpop.permute.xlu0 %3260  ;;  %v8922_v14 = vpop.permute.xlu1 %3258 }
 0x428   : > { %10307 = vst [vmem:[#allocation173_spill] sm:$0xff] %v8920_v21  ;;  %10308 = vst [vmem:[#allocation174_spill] sm:$0xff] %v8922_v14 }
 0x42b   : > { %v8924_v62 = vpop.permute.xlu0 %3264  ;;  %v8926_v36 = vpop.permute.xlu1 %3262 }
 0x42c   : > { %10309 = vst [vmem:[#allocation175_spill] sm:$0xff] %v8924_v62  ;;  %10310 = vst [vmem:[#allocation176_spill] sm:$0xff] %v8926_v36 }
 0x42f   : > { %v8928_v34 = vpop.permute.xlu0 %3268  ;;  %v8930_v63 = vpop.permute.xlu1 %3266 }
 0x430   : > { %10311 = vst [vmem:[#allocation177_spill] sm:$0xff] %v8928_v34  ;;  %10312 = vst [vmem:[#allocation178_spill] sm:$0xff] %v8930_v63 }
 0x433   : > { %v8932_v8 = vpop.permute.xlu1 %3270  ;;  %v8934_v42 = vpop.permute.xlu0 %3272 }
 0x434   : > { %10313 = vst [vmem:[#allocation179_spill] sm:$0xff] %v8932_v8  ;;  %10314 = vst [vmem:[#allocation180_spill] sm:$0xff] %v8934_v42 }
 0x437   : > { %v8936_v48 = vpop.permute.xlu1 %3274  ;;  %v8938_v61 = vpop.permute.xlu0 %3276 }
 0x438   : > { %10315 = vst [vmem:[#allocation181_spill] sm:$0xff] %v8936_v48  ;;  %10316 = vst [vmem:[#allocation182_spill] sm:$0xff] %v8938_v61 }
 0x43a   : > { %v6437_v36 = vpop.f32.mrb[128].mxu0 }
 0x43b   : > { %v8940_v19 = vpop.permute.xlu1 %3278  ;;  %v8942_v21 = vpop.permute.xlu0 %3280 }
 0x43c   : > { %10317 = vst [vmem:[#allocation183_spill] sm:$0xff] %v8940_v19  ;;  %10318 = vst [vmem:[#allocation184_spill] sm:$0xff] %v8942_v21  ;;  %v4361_v34 = vpop.f32.mrb[129].mxu0 }
 0x43d   : > { %v6403_v62 = vpop.f32.mrb[96].mxu1  ;;  %v6438_v63 = vpop.f32.mrb[130].mxu0 }
 0x43e   : > { %v3899_v33 = vpop.f32.mrb[97].mxu1  ;;  %v4363_v8 = vpop.f32.mrb[131].mxu0 }
 0x43f   : > { %v8944_v14 = vpop.permute.xlu1 %3282  ;;  %v6404_v37 = vpop.f32.mrb[98].mxu1 }
 0x440   : > { %10319 = vst [vmem:[#allocation185_spill] sm:$0xff] %v8944_v14  ;;  %v3901_v16 = vpop.f32.mrb[99].mxu1  ;;  %v8946_v0 = vpop.permute.xlu0 %3284 }
 0x441   : > { %10320 = vst [vmem:[#allocation186_spill] sm:$0xff] %v8946_v0 }
 0x442   : > { %v6441_v61 = vpop.f32.mrb[132].mxu0 }
 0x443   : > { %v8948_v42 = vpop.permute.xlu1 %3286  ;;  %v4373_v19 = vpop.f32.mrb[133].mxu0 }
 0x444   : > { %10321 = vst [vmem:[#allocation187_spill] sm:$0xff] %v8948_v42  ;;  %v6442_v21 = vpop.f32.mrb[134].mxu0  ;;  %v8950_v62 = vpop.permute.xlu0 %3288 }
 0x445   : > { %v6407_v48 = vpop.f32.mrb[100].mxu1  ;;  %v4375_v14 = vpop.f32.mrb[135].mxu0  ;;  %10322 = vst [vmem:[#allocation188_spill] sm:$0xff] %v8950_v62  ;;  %v10330_v62 = vmov 7  }
 0x446   : > { %v3911_v51 = vpop.f32.mrb[101].mxu1 }
 0x447   : > { %v6408_v38 = vpop.f32.mrb[102].mxu1  ;;  %v8952_v36 = vpop.permute.xlu1 %3290 }
 0x448   : > { %v3913_v53 = vpop.f32.mrb[103].mxu1  ;;  %10323 = vst [vmem:[#allocation189_spill] sm:$0xff] %v8952_v36 }
 0x44a   : > { %v6445_v63 = vpop.f32.mrb[136].mxu0 }
 0x44b   : > { %v4385_v8 = vpop.f32.mrb[137].mxu0 }
 0x44c   : > { %v6446_v33 = vpop.f32.mrb[138].mxu0 }
 0x44d   : > { %v6411_v34 = vpop.f32.mrb[104].mxu1  ;;  %v4387_v51 = vpop.f32.mrb[139].mxu0 }
 0x44e   : > { %v3923_v16 = vpop.f32.mrb[105].mxu1 }
 0x44f   : > { %v6412_v37 = vpop.f32.mrb[106].mxu1 }
 0x450   : > { %v3925_v42 = vpop.f32.mrb[107].mxu1 }
 0x452   : > { %v6449_v21 = vpop.f32.mrb[140].mxu0 }
 0x453   : > { %v4397_v34 = vpop.f32.mrb[141].mxu0 }
 0x454   : > { %v3542_v0 = vpop.permute.xlu0 %3541  ;;  %v6450_v16 = vpop.f32.mrb[142].mxu0 }
 0x455   : > { %v3668_v48 = vmul.f32 %v3542_v0, %v8756_v17  ;;  %v6415_v19 = vpop.f32.mrb[108].mxu1  ;;  %v4399_v33 = vpop.f32.mrb[143].mxu0 }
 0x456   : > { %v3935_v14 = vpop.f32.mrb[109].mxu1 }
 0x457   : > { %3732 = vrot.lane.b32.xlu1 %v3668_v48, %s6805_s14  ;;  %v6416_v63 = vpop.f32.mrb[110].mxu1 }
 0x458   : > { %v3554_v38 = vpop.permute.xlu0 %3553  ;;  %v3546_v53 = vpop.permute.xlu1 %3545 }
 0x459   : > { %v3669_v61 = vmul.f32 %v3546_v53, %v8762_v13  ;;  %v3671_v42 = vmul.f32 %v3554_v38, %v8767_v12  ;;  %v3937_v0 = vpop.f32.mrb[111].mxu1 }
 0x45a   : > { %v6453_v19 = vpop.f32.mrb[144].mxu0 }
 0x45b   : > { %3734 = vrot.lane.b32.xlu0 %v3669_v61, %s6805_s14  ;;  %v4409_v14 = vpop.f32.mrb[145].mxu0 }
 0x45c   : > { %v3562_v8 = vpop.permute.xlu0 %3561  ;;  %v3550_v37 = vpop.permute.xlu1 %3549 }
 0x45d   : > { %v3670_v17 = vmul.f32 %v3550_v37, %v8775_v32  ;;  %v3673_v51 = vmul.f32 %v3562_v8, %v8772_v26  ;;  %v6419_v61 = vpop.f32.mrb[112].mxu1  ;;  %v6454_v32 = vpop.f32.mrb[146].mxu0 }
 0x45e   : > { %v3947_v21 = vpop.f32.mrb[113].mxu1  ;;  %v4411_v26 = vpop.f32.mrb[147].mxu0 }
 0x45f   : > { %3738 = vrot.lane.b32.xlu0 %v3671_v42, %s6805_s14  ;;  %3736 = vrot.lane.b32.xlu1 %v3670_v17, %s6805_s14  ;;  %v6420_v12 = vpop.f32.mrb[114].mxu1 }
 0x460   : > { %v3570_v13 = vpop.permute.xlu0 %3569  ;;  %v3558_v48 = vpop.permute.xlu1 %3557 }
 0x461   : > { %v3672_v53 = vmul.f32 %v3558_v48, %v8778_v2  ;;  %v3675_v63 = vmul.f32 %v3570_v13, %v8786_v31  ;;  %v3949_v37 = vpop.f32.mrb[115].mxu1  ;;  %v10324_v2 = vrot.slane %v8780_v56, 4 }
 0x463   : > { %3742 = vrot.lane.b32.xlu0 %v3673_v51, %s6805_s14  ;;  %3740 = vrot.lane.b32.xlu1 %v3672_v53, %s6805_s14  ;;  %v3539_v8 = vsel %vm798_vm2, %v10324_v2, 0.0  ;;  %v6457_v51 = vpop.f32.mrb[148].mxu0 }
 0x464   : > { %v3578_v38 = vpop.permute.xlu0 %3577  ;;  %v3566_v34 = vpop.permute.xlu1 %3565 }
 0x465   : > { %v3674_v16 = vmul.f32 %v3566_v34, %v8791_v49  ;;  %v3677_v0 = vmul.f32 %v3578_v38, %v3539_v8  ;;  %v6423_v48 = vpop.f32.mrb[116].mxu1  ;;  %v4421_v13 = vpop.f32.mrb[149].mxu0 }
 0x466   : > { %v3959_v31 = vpop.f32.mrb[117].mxu1  ;;  %v6458_v53 = vpop.f32.mrb[150].mxu0 }
 0x467   : > { %3746 = vrot.lane.b32.xlu0 %v3675_v63, %s6805_s14  ;;  %3744 = vrot.lane.b32.xlu1 %v3674_v16, %s6805_s14  ;;  %v6424_v49 = vpop.f32.mrb[118].mxu1  ;;  %v4423_v14 = vpop.f32.mrb[151].mxu0 }
 0x468   : > { %v3586_v42 = vpop.permute.xlu0 %3585  ;;  %v3574_v17 = vpop.permute.xlu1 %3573 }
 0x469   : > { %v3676_v33 = vmul.f32 %v3574_v17, %v8796_v59  ;;  %v3679_v19 = vmul.f32 0.0, %v3586_v42  ;;  %v3961_v21 = vpop.f32.mrb[119].mxu1 }
 0x46b   : > { %3750 = vrot.lane.b32.xlu0 %v3677_v0, %s6805_s14  ;;  %3748 = vrot.lane.b32.xlu1 %v3676_v33, %s6805_s14  ;;  %v8994_v42 = vpop.f32.mrb[152].mxu0 }
 0x46c   : > { %v3582_v61 = vpop.permute.xlu1 %3581  ;;  %v3594_v12 = vpop.permute.xlu0 %3593  ;;  %v4471_v48 = vrot.slane %v8994_v42, 4  ;;  %v6725_v42 = vld [vmem:[%s10074_s3 + $0x50] sm:$0xff] }
 0x46d   : > { %v3678_v56 = vmul.f32 0.0, %v3582_v61  ;;  %v3681_v32 = vmul.f32 0.0, %v3594_v12  ;;  %v8978_v34 = vpop.f32.mrb[120].mxu1  ;;  %v4433_v0 = vpop.f32.mrb[153].mxu0 }
 0x46e   : > { %v8982_v63 = vpop.f32.mrb[121].mxu1  ;;  %v9000_v33 = vpop.f32.mrb[154].mxu0  ;;  %v6726_v0 = vld [vmem:[%s10074_s3 + $0x40] sm:$0xff] }
 0x46f   : > { %3754 = vrot.lane.b32.xlu0 %v3679_v19, %s6805_s14  ;;  %3752 = vrot.lane.b32.xlu1 %v3678_v56, %s6805_s14  ;;  %v8986_v26 = vpop.f32.mrb[122].mxu1  ;;  %v4435_v51 = vpop.f32.mrb[155].mxu0 }
 0x470   : > { %v3590_v59 = vpop.permute.xlu1 %3589  ;;  %v8988_v2 = vpop.f32.mrb[123].mxu1  ;;  %v4470_v13 = vrot.slane %v4435_v51, 4 }
 0x471   : > { %v3680_v38 = vmul.f32 0.0, %v3590_v59 }
 0x472   : > { %v9012_v53 = vsel %vm798_vm2, %v4470_v13, %v4471_v48 }
 0x473   : > { %3758 = vrot.lane.b32.xlu0 %v3681_v32, %s6805_s14  ;;  %3756 = vrot.lane.b32.xlu1 %v3680_v38, %s6805_s14  ;;  %v9007_v49 = vpop.f32.mrb[156].mxu0 }
 0x474   : > { %v3598_v16 = vpop.permute.xlu1 %3597  ;;  %v4448_v61 = vpop.f32.mrb[157].mxu0 }
 0x475   : > { %v3682_v37 = vmul.f32 0.0, %v3598_v16  ;;  %v8992_v8 = vpop.f32.mrb[124].mxu1  ;;  %v4475_v19 = vrot.slane %v4448_v61, 4  ;;  %v9015_v56 = vpop.f32.mrb[158].mxu0  ;;  %v6728_v61 = vld [vmem:[%s10074_s3 + $0x58] sm:$0xff] }
 0x476   : > { %v8996_v17 = vpop.f32.mrb[125].mxu1  ;;  %v4451_v14 = vpop.f32.mrb[159].mxu0 }
 0x477   : > { %4003 = vperm.xlu0 %6586, %v8371_v10   ;;  %3760 = vrot.lane.b32.xlu1 %v3682_v37, %s6805_s14  ;;  %v9003_v31 = vpop.f32.mrb[126].mxu1  ;;  %v4477_v12 = vrot.slane %v4451_v14, 4 }
 0x478   : > { %v9027_v59 = vpop.f32.mrb[127].mxu1  ;;  %v9050_v38 = vpop.permute.xlu1 %3605 }
 0x47b   : > { %4015 = vperm.xlu0 %6586, %v8407_v18   ;;  %4007 = vperm.xlu1 %6587, %v8365_v24   ;;  %v10123_v24 = vmov 7  }
 0x47c   : > { %v9056_v37 = vpop.permute.xlu1 %3613 }
 0x47f   : > { %4019 = vperm.xlu0 %6586, %v8380_v40   ;;  %4011 = vperm.xlu1 %6587, %v8386_v23   ;;  %v4473_v40 = vrot.slane %v9000_v33, 4 }
 0x481   : > { %v9019_v21 = vsel %vm798_vm2, %v4473_v40, %v4475_v19  ;;  %v9080_v33 = vsel %vm798_vm2, %v4471_v48, %v4473_v40  ;;  %v6729_v40 = vld [vmem:[%s10074_s3 + $0x28] sm:$0xff] }
 0x483   : > { %4031 = vperm.xlu0 %6586, %v8443_v7   ;;  %6588 = vset.pattern.permute.xlu1 %v10123_v24 }
 0x484   : > { %4492 = vperm.xlu1 %6588, %v8371_v10   ;;  %v9024_v10 = vsel %vm798_vm2, %v4475_v19, %v4477_v12  ;;  %v6730_v19 = vld [vmem:[%s10074_s3 + $0x68] sm:$0xff] }
 0x487   : > { %4035 = vperm.xlu0 %6586, %v8416_v1   ;;  %v10325_v1 = vmov 6  }
 0x488   : > { %4500 = vperm.xlu1 %6588, %v8386_v23   ;;  %v6723_v23 = vld [vmem:[%s10074_s3 + $0x30] sm:$0xff] }
 0x48b   : > { %4047 = vperm.xlu0 %6586, %v8474_v4   ;;  %v9041_v4 = vpop.permute.xlu0 %3601 }
 0x48c   : > { %4504 = vperm.xlu1 %6588, %v8407_v18   ;;  %v4479_v18 = vrot.slane %v9007_v49, 4  ;;  %v6727_v49 = vld [vmem:[%s10074_s3 + $0x8] sm:$0xff] }
 0x48f   : > { %4051 = vperm.xlu0 %6586, %v8452_v55   ;;  %v9039_v55 = vsel %vm798_vm2, %v4477_v12, %v4479_v18  ;;  %v9048_v32 = vpop.permute.xlu0 %3609 }
 0x490   : > { %6589 = vset.pattern.permute.xlu1 %v10325_v1 }
 0x491   : > { %4023 = vperm.xlu1 %6589, %v8422_v58   ;;  %v6724_v58 = vld [vmem:[%s10074_s3 + $0x20] sm:$0xff] }
 0x493   : > { %4063 = vperm.xlu0 %6586, %v8807_v27   ;;  %v9054_v16 = vpop.permute.xlu0 %3617 }
 0x495   : > { %4027 = vperm.xlu1 %6589, %v6723_v23  }
 0x497   : > { %4067 = vperm.xlu0 %6586, %v8832_v47  }
 0x499   : > { %6590 = vset.pattern.permute.xlu1 %v10123_v24 }
 0x49a   : > { %4508 = vperm.xlu1 %6590, %v6724_v58  }
 0x49b   : > { %4079 = vperm.xlu0 %6586, %v8826_v57  }
 0x49e   : > { %4516 = vperm.xlu1 %6590, %v6723_v23   ;;  %v6731_v23 = vld [vmem:[%s10074_s3 + $0x48] sm:$0xff] }
 0x49f   : > { %4083 = vperm.xlu0 %6586, %v8851_v11  }
 0x4a2   : > { %4520 = vperm.xlu1 %6590, %v8443_v7   ;;  %v9065_v7 = vpop.permute.xlu0 %3625 }
 0x4a3   : > { %4095 = vperm.xlu0 %6586, %v8534_v29   ;;  %v9067_v29 = vpop.permute.xlu1 %3621 }
 0x4a6   : > { %6591 = vset.pattern.permute.xlu1 %v10325_v1 }
 0x4a7   : > { %4099 = vperm.xlu0 %6586, %v8867_v50   ;;  %4039 = vperm.xlu1 %6591, %v8458_v41   ;;  %v9074_v41 = vpop.permute.xlu0 %3633 }
 0x4ab   : > { %4111 = vperm.xlu0 %6586, %v8568_v6   ;;  %4043 = vperm.xlu1 %6591, %v6725_v42   ;;  %v9076_v6 = vpop.permute.xlu1 %3629  ;;  %v9083_v51 = vpop.permute.xlu0 %3641 }
 0x4af   : > { %4115 = vperm.xlu0 %6586, %v8889_v60   ;;  %6592 = vset.pattern.permute.xlu1 %v10123_v24  ;;  %v9085_v13 = vpop.permute.xlu1 %3637  ;;  %v9106_v14 = vpop.permute.xlu0 %3649 }
 0x4b0   : > { %4524 = vperm.xlu1 %6592, %v6726_v0  }
 0x4b3   : > { %4127 = vperm.xlu0 %6586, %v8588_v20   ;;  %v10122_v20 = vrot.slane %v9015_v56, 4  ;;  %v9108_v12 = vpop.permute.xlu1 %3645 }
 0x4b4   : > { %4532 = vperm.xlu1 %6592, %v6725_v42   ;;  %v6732_v42 = vld [vmem:[%s10074_s3 + $0x60] sm:$0xff] }
 0x4b5   : > { %v9097_v48 = vsel %vm798_vm2, %v4479_v18, %v10122_v20  ;;  %v9114_v18 = vpop.permute.xlu0 %3657 }
 0x4b7   : > { %6602 = vset.pattern.permute.xlu0 %v10123_v24  ;;  %v9116_v58 = vpop.permute.xlu1 %3653 }
 0x4b8   : > { %4496 = vperm.xlu0 %6602, %v6727_v49   ;;  %4536 = vperm.xlu1 %6592, %v6728_v61  }
 0x4b9   : > { %v9123_v0 = vpop.permute.xlu0 %3665 }
 0x4bb   : > { %v9125_v49 = vpop.permute.xlu1 %3661 }
 0x4bc   : > { %4512 = vperm.xlu0 %6602, %v6729_v40   ;;  %6593 = vset.pattern.permute.xlu1 %v10325_v1 }
 0x4bd   : > { %4055 = vperm.xlu1 %6593, %v6730_v19  }
 0x4c0   : > { %4528 = vperm.xlu0 %6602, %v6731_v23  }
 0x4c1   : > { %4059 = vperm.xlu1 %6593, %v8820_v35  }
 0x4c4   : > { %4544 = vperm.xlu0 %6602, %v6730_v19  }
 0x4c5   : > { %6594 = vset.pattern.permute.xlu1 %v10123_v24 }
 0x4c6   : > { %4540 = vperm.xlu1 %6594, %v6732_v42  }
 0x4c8   : > { %4560 = vperm.xlu0 %6602, %v8814_v22  }
 0x4c9   : > { %v9129_v61 = vpop.permute.xlu1 %3732 }
 0x4ca   : > { %4548 = vperm.xlu1 %6594, %v8820_v35  }
 0x4cc   : > { %4576 = vperm.xlu0 %6602, %v8838_v45  }
 0x4cd   : > { %v9131_v40 = vpop.permute.xlu0 %3734 }
 0x4ce   : > { %4552 = vperm.xlu1 %6594, %v8807_v27  }
 0x4d0   : > { %4592 = vperm.xlu0 %6602, %v8549_v5  }
 0x4d1   : > { %v9135_v19 = vpop.permute.xlu1 %3736  ;;  %v9139_v23 = vpop.permute.xlu0 %3738 }
 0x4d2   : > { %6595 = vset.pattern.permute.xlu1 %v10325_v1 }
 0x4d3   : > { %4071 = vperm.xlu1 %6595, %v8814_v22  }
 0x4d4   : > { %4608 = vperm.xlu0 %6602, %v8578_v15  }
 0x4d5   : > { %v9143_v35 = vpop.permute.xlu1 %3740  ;;  %v9145_v42 = vpop.permute.xlu0 %3742 }
 0x4d7   : > { %4075 = vperm.xlu1 %6595, %v8844_v39  }
 0x4d9   : > { %v9149_v5 = vpop.permute.xlu1 %3744  ;;  %v9151_v27 = vpop.permute.xlu0 %3746 }
 0x4db   : > { %6596 = vset.pattern.permute.xlu1 %v10123_v24 }
 0x4dc   : > { %4556 = vperm.xlu1 %6596, %v8832_v47  }
 0x4dd   : > { %v9154_v22 = vpop.permute.xlu1 %3748  ;;  %v9157_v15 = vpop.permute.xlu0 %3750 }
 0x4de   : > { %10326 = vst [vmem:[#allocation190_spill] sm:$0xff] %v9157_v15 }
 0x4e0   : > { %4564 = vperm.xlu1 %6596, %v8844_v39  }
 0x4e1   : > { %v9161_v20 = vpop.permute.xlu1 %3752  ;;  %v9163_v24 = vpop.permute.xlu0 %3754 }
 0x4e2   : > { %10327 = vst [vmem:[#allocation191_spill] sm:$0xff] %v9161_v20  ;;  %10328 = vst [vmem:[#allocation192_spill] sm:$0xff] %v9163_v24 }
 0x4e4   : > { %4568 = vperm.xlu1 %6596, %v8826_v57  }
 0x4e5   : > { %v9166_v47 = vpop.permute.xlu1 %3756  ;;  %v9169_v39 = vpop.permute.xlu0 %3758 }
 0x4e6   : > { %10329 = vst [vmem:[#allocation193_spill] sm:$0xff] %v9166_v47  ;;  %10331 = vst [vmem:[#allocation194_spill] sm:$0xff] %v9169_v39  ;;  %v6733_v47 = vld [vmem:[%s10074_s3 + $0xb8] sm:$0xff] }
 0x4e8   : > { %6597 = vset.pattern.permute.xlu1 %v10325_v1 }
 0x4e9   : > { %4087 = vperm.xlu1 %6597, %v8838_v45   ;;  %v9172_v57 = vpop.permute.xlu1 %3760 }
 0x4ea   : > { %10332 = vst [vmem:[#allocation195_spill] sm:$0xff] %v9172_v57 }
 0x4ed   : > { %4091 = vperm.xlu1 %6597, %v8858_v28  }
 0x4f1   : > { %6598 = vset.pattern.permute.xlu1 %v10330_v62 }
 0x4f2   : > { %4572 = vperm.xlu1 %6598, %v8851_v11  }
 0x4f6   : > { %v4004_v36 = vpop.permute.xlu0 %4003  ;;  %4580 = vperm.xlu1 %6598, %v8858_v28   ;;  %v6734_v28 = vld [vmem:[%s10074_s3 + $0xc8] sm:$0xff] }
 0x4f7   : > { %v4130_v45 = vmul.f32 %v4004_v36, %v8982_v63 }
 0x4f9   : > { %4194 = vrot.lane.b32.xlu0 %v4130_v45, %s6805_s14 }
 0x4fa   : > { %v9177_v24 = vpop.permute.xlu0 %4015  ;;  %4584 = vperm.xlu1 %6598, %v6733_v47   ;;  %v9182_v15 = vpop.permute.xlu1 %4007 }
 0x4fe   : > { %v4020_v39 = vpop.permute.xlu0 %4019  ;;  %6599 = vset.pattern.permute.xlu1 %v10325_v1  ;;  %v4012_v11 = vpop.permute.xlu1 %4011 }
 0x4ff   : > { %v4132_v57 = vmul.f32 %v8978_v34, %v4012_v11  ;;  %4103 = vperm.xlu1 %6599, %v6734_v28   ;;  %v4134_v20 = vmul.f32 %v4020_v39, %v8996_v17 }
 0x501   : > { %4198 = vrot.lane.b32.xlu0 %v4132_v57, %s6805_s14 }
 0x502   : > { %v9190_v36 = vpop.permute.xlu0 %4031 }
 0x503   : > { %4107 = vperm.xlu1 %6599, %v8878_v43   ;;  %v4493_v63 = vpop.permute.xlu1 %4492 }
 0x504   : > { %v4619_v47 = vmul.f32 %v4493_v63, %v9012_v53 }
 0x506   : > { %v4036_v45 = vpop.permute.xlu0 %4035  ;;  %4683 = vrot.lane.b32.xlu0 %v4619_v47, %s6805_s14 }
 0x507   : > { %6600 = vset.pattern.permute.xlu1 %v10330_v62  ;;  %v4501_v34 = vpop.permute.xlu1 %4500 }
 0x508   : > { %v4621_v11 = vmul.f32 %v4501_v34, %v9019_v21  ;;  %4588 = vperm.xlu1 %6600, %v8867_v50   ;;  %v6735_v21 = vld [vmem:[%s10074_s3 + $0xd8] sm:$0xff] }
 0x50a   : > { %v9198_v28 = vpop.permute.xlu0 %4047  ;;  %4687 = vrot.lane.b32.xlu0 %v4621_v11, %s6805_s14 }
 0x50b   : > { %v9201_v57 = vpop.permute.xlu1 %4504 }
 0x50c   : > { %4596 = vperm.xlu1 %6600, %v8878_v43   ;;  %v6736_v43 = vld [vmem:[%s10074_s3 + $0xe8] sm:$0xff] }
 0x50e   : > { %v9205_v53 = vpop.permute.xlu0 %4051  ;;  %4202 = vrot.lane.b32.xlu0 %v4134_v20, %s6805_s14 }
 0x510   : > { %4600 = vperm.xlu1 %6600, %v6735_v21   ;;  %v9211_v50 = vpop.permute.xlu1 %4023 }
 0x512   : > { %v9213_v63 = vpop.permute.xlu0 %4063 }
 0x514   : > { %6601 = vset.pattern.permute.xlu1 %v10325_v1  ;;  %v4028_v47 = vpop.permute.xlu1 %4027  ;;  %v10333_v1 = vrot.slane %v9015_v56, 4  ;;  %v4138_v56 = vmul.f32 0.0, %v4036_v45 }
 0x515   : > { %v4136_v17 = vmul.f32 %v8992_v8, %v4028_v47  ;;  %4119 = vperm.xlu1 %6601, %v6736_v43  }
 0x516   : > { %v9220_v20 = vpop.permute.xlu0 %4067  ;;  %v4490_v8 = vsel %vm798_vm2, %v10333_v1, 0.0  ;;  %v6622_v1 = vld [vmem:[%s10076_s5 + $0x10] sm:$0xff]  }
 0x517   : > { %4206 = vrot.lane.b32.xlu0 %v4136_v17, %s6805_s14 }
 0x519   : > { %4123 = vperm.xlu1 %6601, %v8899_v30   ;;  %v4509_v39 = vpop.permute.xlu1 %4508 }
 0x51a   : > { %v4623_v34 = vmul.f32 %v4509_v39, %v9039_v55  ;;  %v9225_v11 = vpop.permute.xlu0 %4079  ;;  %v6620_v55 = vld [vmem:[%s10076_s5] sm:$0xff]  }
 0x51b   : > { %6467 = vmatprep.subr.bf16.mxu1 %v6620_v55 }
 0x51c   : > { %4691 = vrot.lane.b32.xlu0 %v4623_v34, %s6805_s14  ;;  %6468 = vmatpush3.bf16.msra.mxu1 %v6620_v55  ;;  %v6737_v34 = vld [vmem:[%s10074_s3 + $0xf8] sm:$0xff]  ;;  %v4133_v55 = vmul.f32 %v8986_v26, %v9177_v24 }
 0x51d   : > { %6603 = vset.pattern.permute.xlu1 %v10330_v62  ;;  %v4517_v21 = vpop.permute.xlu1 %4516 }
 0x51e   : > { %v4625_v47 = vmul.f32 %v4517_v21, %v4490_v8  ;;  %v9232_v43 = vpop.permute.xlu0 %4083  ;;  %4604 = vperm.xlu1 %6603, %v8889_v60   ;;  %v6621_v60 = vld [vmem:[%s10076_s5 + $0x8] sm:$0xff]  }
 0x51f   : > { %6469 = vmatprep.subr.bf16.mxu1 %v6621_v60 }
 0x520   : > { %4695 = vrot.lane.b32.xlu0 %v4625_v47, %s6805_s14  ;;  %6470 = vmatpush3.bf16.msra.mxu1 %v6621_v60 }
 0x521   : > { %v9239_v17 = vpop.permute.xlu1 %4520  ;;  %6471 = vmatprep.subr.bf16.mxu1 %v6622_v1 }
 0x522   : > { %v9241_v39 = vpop.permute.xlu0 %4095  ;;  %4612 = vperm.xlu1 %6603, %v8899_v30   ;;  %v4131_v30 = vmul.f32 %v9182_v15, %v8988_v2 }
 0x524   : > { %4210 = vrot.lane.b32.xlu0 %v4138_v56, %s6805_s14  ;;  %6472 = vmatpush3.bf16.msra.mxu1 %v6622_v1  ;;  %v6623_v56 = vld [vmem:[%s10076_s5 + $0x18] sm:$0xff]   ;;  %v6625_v1 = vld [vmem:[%s10076_s5 + $0x28] sm:$0xff]  }
 0x525   : > { %6473 = vmatprep.subr.bf16.mxu1 %v6623_v56 }
 0x526   : > { %v9248_v62 = vpop.permute.xlu0 %4099  ;;  %4616 = vperm.xlu1 %6603, %v6737_v34   ;;  %v9253_v45 = vpop.permute.xlu1 %4039  ;;  %v6624_v34 = vld [vmem:[%s10076_s5 + $0x20] sm:$0xff]  }
 0x528   : > { %6474 = vmatpush3.bf16.msra.mxu1 %v6623_v56 }
 0x529   : > { %6475 = vmatprep.subr.bf16.mxu1 %v6624_v34 }
 0x52a   : > { %v9260_v8 = vpop.permute.xlu0 %4111  ;;  %4196 = vrot.lane.b32.xlu1 %v4131_v30, %s6805_s14  ;;  %v4044_v21 = vpop.permute.xlu1 %4043 }
 0x52b   : > { %v4140_v47 = vmul.f32 0.0, %v4044_v21 }
 0x52c   : > { %6476 = vmatpush3.bf16.msra.mxu1 %v6624_v34  ;;  %v4622_v34 = vmul.f32 %v9201_v57, %v9024_v10  ;;  %v4145_v10 = vmul.f32 0.0, %v9213_v63  ;;  %v4626_v63 = vmul.f32 0.0, %v9239_v17 }
 0x52d   : > { %4214 = vrot.lane.b32.xlu0 %v4140_v47, %s6805_s14  ;;  %6477 = vmatprep.subr.bf16.mxu1 %v6625_v1 }
 0x52e   : > { %v9269_v2 = vpop.permute.xlu0 %4115  ;;  %4200 = vrot.lane.b32.xlu1 %v4133_v55, %s6805_s14  ;;  %v3683_v55 = vmul.f32 0.0, %v9041_v4  ;;  %v6627_v4 = vld [vmem:[%s10076_s5 + $0x38] sm:$0xff]  }
 0x52f   : > { %v4525_v15 = vpop.permute.xlu1 %4524 }
 0x530   : > { %v4627_v60 = vmul.f32 0.0, %v4525_v15  ;;  %6478 = vmatpush3.bf16.msra.mxu1 %v6625_v1  ;;  %v6626_v15 = vld [vmem:[%s10076_s5 + $0x30] sm:$0xff]   ;;  %v4135_v1 = vmul.f32 %v9211_v50, %v9027_v59 }
 0x531   : > { %6479 = vmatprep.subr.bf16.mxu1 %v6626_v15 }
 0x532   : > { %v9275_v30 = vpop.permute.xlu0 %4127  ;;  %4699 = vrot.lane.b32.xlu0 %v4627_v60, %s6805_s14 }
 0x533   : > { %v4533_v26 = vpop.permute.xlu1 %4532 }
 0x534   : > { %v4629_v24 = vmul.f32 0.0, %v4533_v26  ;;  %6480 = vmatpush3.bf16.msra.mxu1 %v6626_v15 }
 0x535   : > { %6481 = vmatprep.subr.bf16.mxu1 %v6627_v4 }
 0x536   : > { %4703 = vrot.lane.b32.xlu0 %v4629_v24, %s6805_s14 }
 0x537   : > { %v4497_v21 = vpop.permute.xlu0 %4496  ;;  %v4537_v47 = vpop.permute.xlu1 %4536 }
 0x538   : > { %v4620_v56 = vmul.f32 %v4497_v21, %v9080_v33  ;;  %6482 = vmatpush3.bf16.msra.mxu1 %v6627_v4  ;;  %v4139_v4 = vmul.f32 0.0, %v9253_v45 }
 0x53a   : > { %4685 = vrot.lane.b32.xlu1 %v4620_v56, %s6805_s14  ;;  %3762 = vrot.lane.b32.xlu0 %v3683_v55, %s6805_s14  ;;  %v4137_v55 = vmul.f32 %v9003_v31, %v9190_v36  ;;  %v3685_v31 = vmul.f32 0.0, %v9048_v32 }
 0x53b   : > { %v4513_v60 = vpop.permute.xlu0 %4512 }
 0x53c   : > { %v4056_v26 = vpop.permute.xlu1 %4055  ;;  %v4624_v59 = vmul.f32 %v4513_v60, %v9097_v48  ;;  %v4141_v48 = vmul.f32 0.0, %v9198_v28  ;;  %v3687_v60 = vmul.f32 0.0, %v9054_v16  ;;  %v4149_v28 = vmul.f32 0.0, %v9225_v11 }
 0x53d   : > { %v4143_v33 = vmul.f32 0.0, %v4056_v26 }
 0x53e   : > { %4689 = vrot.lane.b32.xlu1 %v4622_v34, %s6805_s14 }
 0x53f   : > { %v4529_v24 = vpop.permute.xlu0 %4528  ;;  %4220 = vrot.lane.b32.xlu0 %v4143_v33, %s6805_s14 }
 0x540   : > { %v4060_v21 = vpop.permute.xlu1 %4059  ;;  %v4628_v33 = vmul.f32 0.0, %v4529_v24 }
 0x542   : > { %4204 = vrot.lane.b32.xlu1 %v4135_v1, %s6805_s14 }
 0x543   : > { %v4545_v57 = vpop.permute.xlu0 %4544  ;;  %4224 = vrot.lane.b32.xlu0 %v4145_v10, %s6805_s14  ;;  %v4630_v10 = vmul.f32 0.0, %v4537_v47 }
 0x544   : > { %v4632_v56 = vmul.f32 0.0, %v4545_v57 }
 0x545   : > { %v4541_v15 = vpop.permute.xlu1 %4540 }
 0x546   : > { %4208 = vrot.lane.b32.xlu1 %v4137_v55, %s6805_s14  ;;  %v4142_v55 = vmul.f32 0.0, %v9205_v53  ;;  %v4631_v11 = vmul.f32 0.0, %v4541_v15  ;;  %v3684_v15 = vmul.f32 0.0, %v9050_v38 }
 0x547   : > { %4709 = vrot.lane.b32.xlu0 %v4632_v56, %s6805_s14  ;;  %v4561_v45 = vpop.permute.xlu0 %4560 }
 0x548   : > { %v4636_v24 = vmul.f32 0.0, %v4561_v45  ;;  %v4146_v45 = vmul.f32 0.0, %v9220_v20  ;;  %v3693_v20 = vmul.f32 0.0, %v9083_v51 }
 0x549   : > { %v4549_v50 = vpop.permute.xlu1 %4548 }
 0x54a   : > { %4693 = vrot.lane.b32.xlu1 %v4624_v59, %s6805_s14  ;;  %v4144_v59 = vmul.f32 0.0, %v4060_v21 }
 0x54b   : > { %v4577_v57 = vpop.permute.xlu0 %4576 }
 0x54d   : > { %v4553_v34 = vpop.permute.xlu1 %4552 }
 0x54e   : > { %v4634_v26 = vmul.f32 0.0, %v4553_v34  ;;  %4697 = vrot.lane.b32.xlu1 %v4626_v63, %s6805_s14 }
 0x54f   : > { %v4593_v47 = vpop.permute.xlu0 %4592 }
 0x550   : > { %4713 = vrot.lane.b32.xlu0 %v4634_v26, %s6805_s14  ;;  %v3689_v26 = vmul.f32 0.0, %v9065_v7 }
 0x552   : > { %4212 = vrot.lane.b32.xlu1 %v4139_v4, %s6805_s14  ;;  %v4072_v36 = vpop.permute.xlu1 %4071  ;;  %v4633_v4 = vmul.f32 0.0, %v4549_v50  ;;  %v3686_v50 = vmul.f32 0.0, %v9056_v37 }
 0x553   : > { %v4147_v1 = vmul.f32 0.0, %v4072_v36  ;;  %v9330_v53 = vpop.permute.xlu0 %4608 }
 0x554   : > { %3766 = vrot.lane.b32.xlu0 %v3685_v31, %s6805_s14  ;;  %v3691_v31 = vmul.f32 0.0, %v9074_v41  ;;  %v4153_v41 = vmul.f32 0.0, %v9241_v39 }
 0x556   : > { %4216 = vrot.lane.b32.xlu1 %v4141_v48, %s6805_s14  ;;  %v4076_v17 = vpop.permute.xlu1 %4075 }
 0x558   : > { %3770 = vrot.lane.b32.xlu0 %v3687_v60, %s6805_s14 }
 0x55a   : > { %4701 = vrot.lane.b32.xlu1 %v4628_v33, %s6805_s14 }
 0x55b   : > { %v4557_v32 = vpop.permute.xlu1 %4556 }
 0x55c   : > { %4228 = vrot.lane.b32.xlu0 %v4147_v1, %s6805_s14 }
 0x55e   : > { %4705 = vrot.lane.b32.xlu1 %v4630_v10, %s6805_s14  ;;  %v4640_v10 = vmul.f32 0.0, %v4577_v57 }
 0x55f   : > { %v4565_v16 = vpop.permute.xlu1 %4564 }
 0x560   : > { %4232 = vrot.lane.b32.xlu0 %v4149_v28, %s6805_s14  ;;  %v4148_v28 = vmul.f32 0.0, %v4076_v17  ;;  %v4637_v57 = vmul.f32 0.0, %v4565_v16 }
 0x562   : > { %4218 = vrot.lane.b32.xlu1 %v4142_v55, %s6805_s14 }
 0x563   : > { %v4569_v56 = vpop.permute.xlu1 %4568 }
 0x564   : > { %4717 = vrot.lane.b32.xlu0 %v4636_v24, %s6805_s14  ;;  %v4638_v63 = vmul.f32 0.0, %v4569_v56  ;;  %v4635_v24 = vmul.f32 0.0, %v4557_v32  ;;  %v3688_v32 = vmul.f32 0.0, %v9067_v29 }
 0x566   : > { %4222 = vrot.lane.b32.xlu1 %v4144_v59, %s6805_s14  ;;  %v3695_v59 = vmul.f32 0.0, %v9106_v14  ;;  %v4157_v14 = vmul.f32 0.0, %v9260_v8  ;;  %v10334_v8 = vld [vmem:[#allocation6_spill] sm:$0xff] }
 0x568   : > { %4721 = vrot.lane.b32.xlu0 %v4638_v63, %s6805_s14  ;;  %v4088_v34 = vpop.permute.xlu1 %4087 }
 0x569   : > { %v4151_v7 = vmul.f32 0.0, %v4088_v34  ;;  %v3690_v34 = vmul.f32 0.0, %v9076_v6 }
 0x56a   : > { %4707 = vrot.lane.b32.xlu1 %v4631_v11, %s6805_s14 }
 0x56b   : > { %v9335_v36 = vpop.permute.xlu0 %4194 }
 0x56c   : > { %3774 = vrot.lane.b32.xlu0 %v3689_v26, %s6805_s14  ;;  %v4092_v21 = vpop.permute.xlu1 %4091 }
 0x56e   : > { %4711 = vrot.lane.b32.xlu1 %v4633_v4, %s6805_s14  ;;  %v4150_v4 = vmul.f32 0.0, %v9232_v43 }
 0x570   : > { %3778 = vrot.lane.b32.xlu0 %v3691_v31, %s6805_s14  ;;  %v4644_v31 = vmul.f32 0.0, %v4593_v47  ;;  %v10336_v47 = vld [vmem:[#allocation62_spill] sm:$0xff] }
 0x571   : > { %v4573_v48 = vpop.permute.xlu1 %4572 }
 0x572   : > { %3764 = vrot.lane.b32.xlu1 %v3684_v15, %s6805_s14  ;;  %v4152_v15 = vmul.f32 0.0, %v4092_v21  ;;  %v3697_v21 = vmul.f32 0.0, %v9114_v18  ;;  %v3699_v18 = vmul.f32 0.0, %v9123_v0 }
 0x573   : > { %v9340_v60 = vpop.permute.xlu0 %4198 }
 0x574   : > { %4236 = vrot.lane.b32.xlu0 %v4151_v7, %s6805_s14 }
 0x575   : > { %v4581_v33 = vpop.permute.xlu1 %4580 }
 0x576   : > { %3768 = vrot.lane.b32.xlu1 %v3686_v50, %s6805_s14 }
 0x578   : > { %4240 = vrot.lane.b32.xlu0 %v4153_v41, %s6805_s14  ;;  %v9348_v38 = vpop.permute.xlu0 %4683  ;;  %v10335_v41 = vld [vmem:[#allocation17_spill] sm:$0xff] }
 0x579   : > { %v4585_v1 = vpop.permute.xlu1 %4584 }
 0x57a   : > { %4226 = vrot.lane.b32.xlu1 %v4146_v45, %s6805_s14  ;;  %v4642_v37 = vmul.f32 0.0, %v4585_v1  ;;  %v1140_v45 = vadd.f32 %v10335_v41, %v10334_v8  ;;  %v4639_v1 = vmul.f32 0.0, %v4573_v48  ;;  %v10340_v48 = vld [vmem:[#allocation63_spill] sm:$0xff] }
 0x57c   : > { %4725 = vrot.lane.b32.xlu0 %v4640_v10, %s6805_s14  ;;  %v9353_v39 = vpop.permute.xlu0 %4687  ;;  %v1602_v10 = vadd.f32 %v10336_v47, %v1140_v45  ;;  %v10342_v45 = vld [vmem:[#allocation8_spill] sm:$0xff] }
 0x57e   : > { %4230 = vrot.lane.b32.xlu1 %v4148_v28, %s6805_s14  ;;  %v4104_v55 = vpop.permute.xlu1 %4103  ;;  %v10337_v28 = vld [vmem:[#allocation23_spill] sm:$0xff] }
 0x57f   : > { %v4155_v11 = vmul.f32 0.0, %v4104_v55 }
 0x580   : > { %4729 = vrot.lane.b32.xlu0 %v4642_v37, %s6805_s14  ;;  %v9361_v17 = vpop.permute.xlu0 %4202  ;;  %v10338_v37 = vld [vmem:[#allocation5_spill] sm:$0xff] }
 0x581   : > { %v1142_v55 = vadd.f32 %v10338_v37, %v10337_v28 }
 0x582   : > { %4715 = vrot.lane.b32.xlu1 %v4635_v24, %s6805_s14  ;;  %v9358_v56 = vpop.permute.xlu1 %4107 }
 0x584   : > { %3782 = vrot.lane.b32.xlu0 %v3693_v20, %s6805_s14  ;;  %v10339_v20 = vld [vmem:[#allocation103_spill] sm:$0xff] }
 0x586   : > { %4719 = vrot.lane.b32.xlu1 %v4637_v57, %s6805_s14  ;;  %v2106_v57 = vadd.f32 %v10339_v20, %v1602_v10 }
 0x587   : > { %v9365_v63 = vpop.permute.xlu1 %4588 }
 0x588   : > { %3786 = vrot.lane.b32.xlu0 %v3695_v59, %s6805_s14  ;;  %v4641_v59 = vmul.f32 0.0, %v4581_v33  ;;  %v3692_v33 = vmul.f32 0.0, %v9085_v13 }
 0x589   : > { %v9369_v51 = vpop.permute.xlu0 %4206 }
 0x58a   : > { %3772 = vrot.lane.b32.xlu1 %v3688_v32, %s6805_s14  ;;  %v1604_v32 = vadd.f32 %v10340_v48, %v1142_v55  ;;  %v10346_v55 = vld [vmem:[#allocation64_spill] sm:$0xff]  ;;  %v10349_v48 = vld [vmem:[#allocation66_spill] sm:$0xff] }
 0x58b   : > { %v9372_v16 = vpop.permute.xlu1 %4596 }
 0x58c   : > { %4244 = vrot.lane.b32.xlu0 %v4155_v11, %s6805_s14 }
 0x58e   : > { %3776 = vrot.lane.b32.xlu1 %v3690_v34, %s6805_s14  ;;  %v9378_v26 = vpop.permute.xlu0 %4691  ;;  %v2715_v34 = vadd.f32 %v8538_v9, %v2106_v57 }
 0x58f   : > { %v4601_v29 = vpop.permute.xlu1 %4600 }
 0x590   : > { %4248 = vrot.lane.b32.xlu0 %v4157_v14, %s6805_s14  ;;  %v4646_v50 = vmul.f32 0.0, %v4601_v29  ;;  %v10341_v14 = vld [vmem:[#allocation105_spill] sm:$0xff] }
 0x591   : > { %v2108_v29 = vadd.f32 %v10341_v14, %v1604_v32 }
 0x592   : > { %4234 = vrot.lane.b32.xlu1 %v4150_v4, %s6805_s14  ;;  %v9384_v7 = vpop.permute.xlu0 %4695 }
 0x594   : > { %4733 = vrot.lane.b32.xlu0 %v4644_v31, %s6805_s14  ;;  %v4120_v6 = vpop.permute.xlu1 %4119  ;;  %v3324_v31 = vadd.f32 %v8861_v3, %v2715_v34  ;;  %v3694_v3 = vmul.f32 0.0, %v9108_v12  ;;  %v10347_v12 = vld [vmem:[#allocation10_spill] sm:$0xff] }
 0x595   : > { %v4159_v41 = vmul.f32 0.0, %v4120_v6 }
 0x596   : > { %4238 = vrot.lane.b32.xlu1 %v4152_v15, %s6805_s14  ;;  %v9397_v24 = vpop.permute.xlu0 %4210  ;;  %v2717_v15 = vadd.f32 %v8562_v52, %v2108_v29  ;;  %v3828_v9 = vadd.f32 %v9129_v61, %v3324_v31  ;;  %v10344_v52 = vld [vmem:[#allocation24_spill] sm:$0xff] }
 0x598   : > { %4737 = vrot.lane.b32.xlu0 %v4646_v50, %s6805_s14  ;;  %v9390_v43 = vpop.permute.xlu1 %4123  ;;  %v3326_v0 = vadd.f32 %v8872_v44, %v2717_v15  ;;  %v4290_v13 = vadd.f32 %v9335_v36, %v3828_v9  ;;  %v4161_v44 = vmul.f32 0.0, %v9275_v30  ;;  %v10348_v36 = vld [vmem:[#allocation25_spill] sm:$0xff]  ;;  %v10351_v30 = vld [vmem:[#allocation30_spill] sm:$0xff]  ;;  %v10354_v9 = vld [vmem:[#allocation108_spill] sm:$0xff] }
 0x59a   : > { %4723 = vrot.lane.b32.xlu1 %v4639_v1, %s6805_s14  ;;  %v10343_v1 = vld [vmem:[#allocation22_spill] sm:$0xff]  ;;  %v3830_v61 = vadd.f32 %v9135_v19, %v3326_v0  ;;  %v4779_v57 = vadd.f32 %v9348_v38, %v4290_v13  ;;  %v4154_v19 = vmul.f32 0.0, %v9248_v62  ;;  %v10352_v38 = vld [vmem:[#allocation9_spill] sm:$0xff]  ;;  %v10356_v13 = vld [vmem:[#allocation11_spill] sm:$0xff] }
 0x59b   : > { %v1141_v47 = vadd.f32 %v10343_v1, %v10342_v45  ;;  %v1146_v31 = vadd.f32 %v10352_v38, %v10351_v30  ;;  %v10363_v30 = vld [vmem:[#allocation38_spill] sm:$0xff] }
 0x59c   : > { %3790 = vrot.lane.b32.xlu0 %v3697_v21, %s6805_s14  ;;  %v10345_v21 = vld [vmem:[#allocation7_spill] sm:$0xff]  ;;  %v4292_v34 = vadd.f32 %v9340_v60, %v3830_v61  ;;  %v4812_v62 = vsel %vm4811_vm3, %v10334_v8, %v4779_v57  ;;  %v10358_v61 = vld [vmem:[#allocation29_spill] sm:$0xff] }
 0x59d   : > { %v9402_v11 = vpop.permute.xlu1 %4604  ;;  %v1143_v28 = vadd.f32 %v10345_v21, %v10344_v52  ;;  %v1603_v20 = vadd.f32 %v10346_v55, %v1141_v47  ;;  %v4648_v47 = vmul.f32 0.0, %v9330_v53  ;;  %v10362_v57 = vld [vmem:[#allocation109_spill] sm:$0xff] }
 0x59e   : > { %4727 = vrot.lane.b32.xlu1 %v4641_v59, %s6805_s14  ;;  %v1144_v59 = vadd.f32 %v10348_v36, %v10347_v12  ;;  %v4781_v0 = vadd.f32 %v9353_v39, %v4292_v34  ;;  %v10360_v39 = vld [vmem:[#allocation67_spill] sm:$0xff] }
 0x59f   : > { %v9408_v4 = vpop.permute.xlu0 %4214  ;;  %v1605_v32 = vadd.f32 %v10349_v48, %v1143_v28  ;;  %v10357_v28 = vld [vmem:[#allocation12_spill] sm:$0xff]  ;;  %v1608_v36 = vadd.f32 %v10360_v39, %v1146_v31  ;;  %v4156_v48 = vmul.f32 0.0, %v9358_v56  ;;  %v10364_v31 = vld [vmem:[#allocation13_spill] sm:$0xff] }
 0x5a0   : > { %3794 = vrot.lane.b32.xlu0 %v3699_v18, %s6805_s14  ;;  %v10350_v18 = vld [vmem:[#allocation106_spill] sm:$0xff]  ;;  %v1145_v55 = vadd.f32 %v10358_v61, %v10357_v28 }
 0x5a1   : > { %v9414_v50 = vpop.permute.xlu1 %4612  ;;  %v2107_v14 = vadd.f32 %v10350_v18, %v1603_v20  ;;  %v10359_v20 = vld [vmem:[#allocation107_spill] sm:$0xff]  ;;  %v4845_v18 = vsel %vm4844_vm4, %v4812_v62, %v10334_v8  ;;  %v10369_v62 = vld [vmem:[#allocation110_spill] sm:$0xff] }
 0x5a2   : > { %3780 = vrot.lane.b32.xlu1 %v3692_v33, %s6805_s14  ;;  %v10353_v33 = vld [vmem:[#allocation65_spill] sm:$0xff]  ;;  %v2112_v61 = vadd.f32 %v10369_v62, %v1608_v36  ;;  %v4878_v39 = vsel %vm4877_vm5, %v4845_v18, %v10334_v8  ;;  %v10371_v36 = vld [vmem:[#allocation40_spill] sm:$0xff] }
 0x5a3   : > { %v1606_v15 = vadd.f32 %v10353_v33, %v1144_v59  ;;  %v2716_v60 = vadd.f32 %v8540_v25, %v2107_v14  ;;  %v10361_v59 = vld [vmem:[#allocation101_spill] sm:$0xff]  ;;  %v4814_v14 = vsel %vm4811_vm3, %v10338_v37, %v4781_v0  ;;  %v1150_v33 = vadd.f32 %v10364_v31, %v10363_v30 }
 0x5a4   : > { %v9423_v10 = vpop.permute.xlu0 %4699  ;;  %4252 = vrot.lane.b32.xlu0 %v4159_v41, %s6805_s14  ;;  %v2109_v41 = vadd.f32 %v10354_v9, %v1605_v32  ;;  %v10374_v8 = vld [vmem:[#allocation69_spill] sm:$0xff] }
 0x5a5   : > { %v4617_v6 = vpop.permute.xlu1 %4616  ;;  %v3325_v53 = vadd.f32 %v8870_v54, %v2716_v60  ;;  %v10365_v54 = vld [vmem:[#allocation14_spill] sm:$0xff]  ;;  %v10367_v60 = vld [vmem:[#allocation16_spill] sm:$0xff]  ;;  %v10375_v18 = vld [vmem:[#allocation137_spill] sm:$0xff] }
 0x5a6   : > { %3784 = vrot.lane.b32.xlu1 %v3694_v3, %s6805_s14  ;;  %v10355_v3 = vld [vmem:[#allocation32_spill] sm:$0xff]  ;;  %v2718_v25 = vadd.f32 %v10361_v59, %v2109_v41  ;;  %v4650_v41 = vmul.f32 0.0, %v4617_v6  ;;  %v4847_v6 = vsel %vm4844_vm4, %v4814_v14, %v10338_v37  ;;  %v4643_v59 = vmul.f32 0.0, %v9365_v63 }
 0x5a7   : > { %v1147_v52 = vadd.f32 %v10356_v13, %v10355_v3  ;;  %v3829_v9 = vadd.f32 %v9131_v40, %v3325_v53  ;;  %v9487_v40 = vld [vmem:[%s10075_s4] ss:$0 sm:$0xff]  ;;  %v2721_v30 = vadd.f32 %v10375_v18, %v2112_v61 }
 0x5a8   : > { %v9439_v29 = vpop.permute.xlu0 %4703  ;;  %4256 = vrot.lane.b32.xlu0 %v4161_v44, %s6805_s14  ;;  %v2110_v44 = vadd.f32 %v10359_v20, %v1606_v15  ;;  %v10366_v15 = vld [vmem:[#allocation33_spill] sm:$0xff]  ;;  %v10370_v20 = vld [vmem:[#allocation162_spill] sm:$0xff]  ;;  %v4917_v61 = vadd.f32 %v9487_v40, %v4878_v39 }
 0x5a9   : > { %v4197_v1 = vpop.permute.xlu1 %4196  ;;  %v1148_v56 = vadd.f32 %v10366_v15, %v10365_v54 }
 0x5aa   : > { %4242 = vrot.lane.b32.xlu1 %v4154_v19, %s6805_s14  ;;  %v2719_v34 = vadd.f32 %v10362_v57, %v2110_v44  ;;  %v3327_v44 = vadd.f32 %v10370_v20, %v2718_v25  ;;  %v4291_v53 = vadd.f32 %v4197_v1, %v3829_v9  ;;  %v10373_v25 = vld [vmem:[#allocation68_spill] sm:$0xff]  ;;  %vm4949_vm6 = vcmp.ge.f32.partialorder %v4917_v61, 0.0 }
 0x5ab   : > { %v1607_v57 = vadd.f32 %v10373_v25, %v1145_v55 }
 0x5ac   : > { %v9461_v32 = vpop.permute.xlu0 %3762  ;;  %4741 = vrot.lane.b32.xlu0 %v4648_v47, %s6805_s14  ;;  %v10368_v47 = vld [vmem:[#allocation37_spill] sm:$0xff]  ;;  %v3328_v0 = vadd.f32 %v8881_v46, %v2719_v34  ;;  %v10372_v46 = vld [vmem:[#allocation15_spill] sm:$0xff]  ;;  %v1610_v34 = vadd.f32 %v10374_v8, %v1148_v56  ;;  %v3831_v14 = vadd.f32 %v9139_v23, %v3327_v44  ;;  %v4880_v56 = vsel %vm4877_vm5, %v4847_v6, %v10338_v37  ;;  %v10381_v6 = vld [vmem:[#allocation112_spill] sm:$0xff] }
 0x5ad   : > { %v4201_v19 = vpop.permute.xlu1 %4200  ;;  %v9477_v3 = vadd.f32 %v10368_v47, %v10367_v60  ;;  %v10376_v47 = vld [vmem:[#allocation70_spill] sm:$0xff]  ;;  %v4645_v23 = vmul.f32 0.0, %v9372_v16 }
 0x5ae   : > { %4246 = vrot.lane.b32.xlu1 %v4156_v48, %s6805_s14  ;;  %v9495_v48 = vadd.f32 %v10372_v46, %v10371_v36  ;;  %v1609_v62 = vadd.f32 %v10376_v47, %v1147_v52  ;;  %v3832_v63 = vadd.f32 %v9143_v35, %v3328_v0  ;;  %v10378_v36 = vld [vmem:[#allocation163_spill] sm:$0xff]  ;;  %v4293_v44 = vadd.f32 %v4201_v19, %v3831_v14 }
 0x5af   : > { %v3330_v55 = vadd.f32 %v10378_v36, %v2721_v30  ;;  %v10379_v0 = vld [vmem:[#allocation111_spill] sm:$0xff]  ;;  %v2114_v39 = vadd.f32 %v10381_v6, %v1610_v34  ;;  %v4981_v30 = vmul.f32 0.01, %v4917_v61  ;;  %v10384_v36 = vld [vmem:[#allocation138_spill] sm:$0xff] }
 0x5b0   : > { %4745 = vrot.lane.b32.xlu0 %v4650_v41, %s6805_s14  ;;  %v10377_v41 = vld [vmem:[#allocation71_spill] sm:$0xff]  ;;  %v4294_v52 = vadd.f32 %v9361_v17, %v3832_v63 }
 0x5b1   : > { %v4686_v15 = vpop.permute.xlu1 %4685  ;;  %v9503_v1 = vpop.permute.xlu0 %4220  ;;  %v1612_v20 = vadd.f32 %v10377_v41, %v1150_v33  ;;  %v3834_v33 = vadd.f32 %v9149_v5, %v3330_v55  ;;  %v2723_v55 = vadd.f32 %v10384_v36, %v2114_v39  ;;  %v10387_v39 = vld [vmem:[#allocation165_spill] sm:$0xff] }
 0x5b2   : > { %v4780_v9 = vadd.f32 %v4686_v15, %v4291_v53  ;;  %4731 = vrot.lane.b32.xlu1 %v4643_v59, %s6805_s14  ;;  %v2111_v53 = vadd.f32 %v10379_v0, %v1607_v57  ;;  %v10380_v59 = vld [vmem:[#allocation113_spill] sm:$0xff]  ;;  %v4783_v17 = vadd.f32 %v9378_v26, %v4294_v52  ;;  %v4919_v57 = vadd.f32 %v9487_v40, %v4880_v56  ;;  %v10382_v15 = vld [vmem:[#allocation102_spill] sm:$0xff] }
 0x5b3   : > { %v2113_v25 = vadd.f32 %v10380_v59, %v1609_v62  ;;  %v4296_v18 = vadd.f32 %v9369_v51, %v3834_v33  ;;  %v3696_v62 = vmul.f32 0.0, %v9116_v58 }
 0x5b4   : > { %v4813_v35 = vsel %vm4811_vm3, %v10342_v45, %v4780_v9  ;;  %v2720_v47 = vadd.f32 %v10382_v15, %v2111_v53  ;;  %v10383_v9 = vld [vmem:[#allocation104_spill] sm:$0xff]  ;;  %v4816_v58 = vsel %vm4811_vm3, %v10347_v12, %v4783_v17  ;;  %v4983_v52 = vmul.f32 0.01, %v4919_v57 }
 0x5b5   : > { %v4846_v8 = vsel %vm4844_vm4, %v4813_v35, %v10342_v45  ;;  %v4690_v37 = vpop.permute.xlu1 %4689  ;;  %v9530_v34 = vpop.permute.xlu0 %4224  ;;  %v2722_v41 = vadd.f32 %v10383_v9, %v2113_v25  ;;  %v10385_v35 = vld [vmem:[#allocation164_spill] sm:$0xff]  ;;  %v3698_v53 = vmul.f32 0.0, %v9125_v49  ;;  %vm4951_vm8 = vcmp.ge.f32.partialorder %v4919_v57, 0.0  ;;  %v10388_v49 = vld [vmem:[#allocation166_spill] sm:$0xff]  ;;  %v10392_v9 = vld [vmem:[#allocation21_spill] sm:$0xff] }
 0x5b6   : > { %v4879_v16 = vsel %vm4877_vm5, %v4846_v8, %v10342_v45  ;;  %v4782_v19 = vadd.f32 %v4690_v37, %v4293_v44  ;;  %4735 = vrot.lane.b32.xlu1 %v4645_v23, %s6805_s14  ;;  %v4785_v45 = vadd.f32 %v9384_v7, %v4296_v18  ;;  %v5013_v23 = vsel %vm4949_vm6, %v4917_v61, %v4981_v30  ;;  %v10386_v37 = vld [vmem:[#allocation114_spill] sm:$0xff] }
 0x5b7   : > { %v4918_v5 = vadd.f32 %v9487_v40, %v4879_v16  ;;  %v3329_v0 = vadd.f32 %v10385_v35, %v2720_v47  ;;  %v4849_v25 = vsel %vm4844_vm4, %v4816_v58, %v10347_v12  ;;  %v2116_v6 = vadd.f32 %v10386_v37, %v1612_v20 }
 0x5b8   : > { %v4815_v26 = vsel %vm4811_vm3, %v10345_v21, %v4782_v19  ;;  %v4818_v33 = vsel %vm4811_vm3, %v10352_v38, %v4785_v45  ;;  %v3332_v61 = vadd.f32 %v10387_v39, %v2723_v55  ;;  %v3331_v19 = vadd.f32 %v10388_v49, %v2722_v41  ;;  %v10393_v41 = vld [vmem:[#allocation46_spill] sm:$0xff]  ;;  %v10400_v39 = vld [vmem:[#allocation191_spill] sm:$0xff]  ;;  %v10401_v49 = vld [vmem:[#allocation117_spill] sm:$0xff] }
 0x5b9   : > { %v4848_v14 = vsel %vm4844_vm4, %v4815_v26, %v10345_v21  ;;  %v4205_v63 = vpop.permute.xlu1 %4204  ;;  %vm4950_vm7 = vcmp.ge.f32.partialorder %v4918_v5, 0.0  ;;  %v4982_v51 = vmul.f32 0.01, %v4918_v5  ;;  %v3833_v17 = vadd.f32 %v9145_v42, %v3329_v0  ;;  %v9554_v16 = vpop.permute.xlu0 %4709  ;;  %v10389_v42 = vld [vmem:[#allocation51_spill] sm:$0xff]  ;;  %v10390_v26 = vld [vmem:[#allocation20_spill] sm:$0xff] }
 0x5ba   : > { %v4881_v56 = vsel %vm4877_vm5, %v4848_v14, %v10345_v21  ;;  %3788 = vrot.lane.b32.xlu1 %v3696_v62, %s6805_s14  ;;  %v4158_v18 = vmul.f32 0.0, %v9269_v2  ;;  %v4882_v15 = vsel %vm4877_vm5, %v4849_v25, %v10347_v12  ;;  %v4851_v20 = vsel %vm4844_vm4, %v4818_v33, %v10352_v38  ;;  %v10391_v14 = vld [vmem:[#allocation72_spill] sm:$0xff]  ;;  %v10394_v2 = vld [vmem:[#allocation141_spill] sm:$0xff]  ;;  %v10398_v33 = vld [vmem:[#allocation78_spill] sm:$0xff] }
 0x5bb   : > { %v4920_v7 = vadd.f32 %v9487_v40, %v4881_v56  ;;  %v5014_v44 = vsel %vm4950_vm7, %v4918_v5, %v4982_v51  ;;  %v5015_v5 = vsel %vm4951_vm8, %v4919_v57, %v4983_v52  ;;  %v4295_v47 = vadd.f32 %v4205_v63, %v3833_v17  ;;  %v10395_v63 = vld [vmem:[#allocation74_spill] sm:$0xff] }
 0x5bc   : > { %v5045_v59 = vpack.c.bf16 %v5014_v44, %v5013_v23  ;;  %v1155_v45 = vadd.f32 %v10390_v26, %v10389_v42  ;;  %v1611_v51 = vadd.f32 %v10391_v14, %v9477_v3  ;;  %v1153_v36 = vadd.f32 %v10393_v41, %v10392_v9  ;;  %v10396_v3 = vld [vmem:[#allocation167_spill] sm:$0xff] }
 0x5bd   : > { %vm4952_vm9 = vcmp.ge.f32.partialorder %v4920_v7, 0.0  ;;  %v4984_v21 = vmul.f32 0.01, %v4920_v7  ;;  %v4209_v8 = vpop.permute.xlu1 %4208  ;;  %v2725_v57 = vadd.f32 %v10394_v2, %v2116_v6  ;;  %v3835_v58 = vadd.f32 %v9151_v27, %v3331_v19  ;;  %v10403_v14 = vld [vmem:[#allocation139_spill] sm:$0xff] }
 0x5be   : > { %3792 = vrot.lane.b32.xlu1 %v3698_v53, %s6805_s14  ;;  %6483 = vmatprep.mubr.bf16.mxu1 %v5045_v59  ;;  %v3836_v12 = vadd.f32 %v9154_v22, %v3332_v61  ;;  %v4884_v44 = vsel %vm4877_vm5, %v4851_v20, %v10352_v38  ;;  %v4921_v35 = vadd.f32 %v9487_v40, %v4882_v15  ;;  %v4160_v22 = vmul.f32 0.0, %v9390_v43  ;;  %v10397_v59 = vld [vmem:[#allocation76_spill] sm:$0xff] }
 0x5bf   : > { %v5016_v30 = vsel %vm4952_vm9, %v4920_v7, %v4984_v21  ;;  %v1613_v7 = vadd.f32 %v10395_v63, %v9495_v48  ;;  %v3334_v23 = vadd.f32 %v10396_v3, %v2725_v57  ;;  %v4297_v0 = vadd.f32 %v4209_v8, %v3835_v58  ;;  %v10399_v48 = vld [vmem:[#allocation115_spill] sm:$0xff]  ;;  %v10405_v3 = vld [vmem:[#allocation140_spill] sm:$0xff] }
 0x5c0   : > { %v5046_v62 = vpack.c.bf16 %v5016_v30, %v5015_v5  ;;  %v4298_v27 = vadd.f32 %v9397_v24, %v3836_v12  ;;  %v1615_v25 = vadd.f32 %v10397_v59, %v1153_v36  ;;  %v1617_v21 = vadd.f32 %v10398_v33, %v1155_v45  ;;  %v10404_v12 = vld [vmem:[#allocation168_spill] sm:$0xff]  ;;  %v10409_v33 = vld [vmem:[#allocation170_spill] sm:$0xff] }
 0x5c1   : > { %v4694_v55 = vpop.permute.xlu1 %4693  ;;  %v2115_v37 = vadd.f32 %v10399_v48, %v1611_v51  ;;  %v3838_v61 = vadd.f32 %v10400_v39, %v3334_v23  ;;  %v2117_v19 = vadd.f32 %v10401_v49, %v1613_v7  ;;  %v4985_v5 = vmul.f32 0.01, %v4921_v35 }
 0x5c2   : > { %v4784_v56 = vadd.f32 %v4694_v55, %v4295_v47  ;;  %v9572_v52 = vpop.permute.xlu0 %4713  ;;  %4250 = vrot.lane.b32.xlu1 %v4158_v18, %s6805_s14  ;;  %6484 = vmatmul.mubr.bf16.vlgmr.msra.gmra.mrb[128].mxu1 %v5046_v62  ;;  %v4787_v24 = vadd.f32 %v9423_v10, %v4298_v27  ;;  %v4923_v30 = vadd.f32 %v9487_v40, %v4884_v44  ;;  %v4647_v15 = vmul.f32 0.0, %v9402_v11  ;;  %v10406_v27 = vld [vmem:[#allocation143_spill] sm:$0xff] }
 0x5c3   : > { %v4300_v20 = vadd.f32 %v9408_v4, %v3838_v61  ;;  %vm4953_vm10 = vcmp.ge.f32.partialorder %v4921_v35, 0.0  ;;  %v2724_v51 = vadd.f32 %v10403_v14, %v2115_v37  ;;  %v4649_v63 = vmul.f32 0.0, %v9414_v50  ;;  %v10408_v50 = vld [vmem:[#allocation121_spill] sm:$0xff] }
 0x5c4   : > { %v4817_v53 = vsel %vm4811_vm3, %v10357_v28, %v4784_v56  ;;  %v4820_v41 = vsel %vm4811_vm3, %v10365_v54, %v4787_v24  ;;  %v5017_v2 = vsel %vm4953_vm10, %v4921_v35, %v4985_v5  ;;  %v4987_v58 = vmul.f32 0.01, %v4923_v30  ;;  %v10412_v5 = vld [vmem:[#allocation192_spill] sm:$0xff] }
 0x5c5   : > { %v4850_v6 = vsel %vm4844_vm4, %v4817_v53, %v10357_v28  ;;  %v4698_v38 = vpop.permute.xlu1 %4697  ;;  %v4789_v11 = vadd.f32 %v9439_v29, %v4300_v20  ;;  %v3333_v56 = vadd.f32 %v10404_v12, %v2724_v51  ;;  %vm4955_vm12 = vcmp.ge.f32.partialorder %v4923_v30, 0.0 }
 0x5c6   : > { %v4883_v43 = vsel %vm4877_vm5, %v4850_v6, %v10357_v28  ;;  %v4786_v8 = vadd.f32 %v4698_v38, %v4297_v0  ;;  %v9594_v17 = vpop.permute.xlu0 %3766  ;;  %4254 = vrot.lane.b32.xlu1 %v4160_v22, %s6805_s14  ;;  %v10402_v28 = vld [vmem:[#allocation119_spill] sm:$0xff]  ;;  %v2726_v29 = vadd.f32 %v10405_v3, %v2117_v19  ;;  %v10407_v22 = vld [vmem:[#allocation190_spill] sm:$0xff]  ;;  %v5019_v37 = vsel %vm4955_vm12, %v4923_v30, %v4987_v58  ;;  %v10410_v38 = vld [vmem:[#allocation172_spill] sm:$0xff] }
 0x5c7   : > { %v4922_v18 = vadd.f32 %v9487_v40, %v4883_v43  ;;  %v2119_v47 = vadd.f32 %v10402_v28, %v1615_v25  ;;  %v3837_v0 = vadd.f32 %v10407_v22, %v3333_v56  ;;  %v4822_v53 = vsel %vm4811_vm3, %v10364_v31, %v4789_v11  ;;  %v10414_v28 = vld [vmem:[#allocation19_spill] sm:$0xff] }
 0x5c8   : > { %v4819_v10 = vsel %vm4811_vm3, %v10356_v13, %v4786_v8  ;;  %v2121_v25 = vadd.f32 %v10408_v50, %v1617_v21  ;;  %v3335_v48 = vadd.f32 %v10409_v33, %v2726_v29  ;;  %v10411_v8 = vld [vmem:[#allocation144_spill] sm:$0xff]  ;;  %v4855_v19 = vsel %vm4844_vm4, %v4822_v53, %v10364_v31  ;;  %v10413_v21 = vld [vmem:[#allocation194_spill] sm:$0xff] }
 0x5c9   : > { %v4852_v62 = vsel %vm4844_vm4, %v4819_v10, %v10356_v13  ;;  %v4213_v42 = vpop.permute.xlu1 %4212  ;;  %vm4954_vm11 = vcmp.ge.f32.partialorder %v4922_v18, 0.0  ;;  %v4986_v45 = vmul.f32 0.01, %v4922_v18  ;;  %v2728_v35 = vadd.f32 %v10406_v27, %v2119_v47  ;;  %v10415_v47 = vld [vmem:[#allocation41_spill] sm:$0xff]  ;;  %v10422_v50 = vld [vmem:[#allocation142_spill] sm:$0xff] }
 0x5ca   : > { %v4885_v4 = vsel %vm4877_vm5, %v4852_v62, %v10356_v13  ;;  %v9613_v36 = vpop.permute.xlu0 %3770  ;;  %4739 = vrot.lane.b32.xlu1 %v4647_v15, %s6805_s14  ;;  %v4853_v13 = vsel %vm4844_vm4, %v4820_v41, %v10365_v54  ;;  %v4299_v24 = vadd.f32 %v4213_v42, %v3837_v0  ;;  %v2730_v49 = vadd.f32 %v10411_v8, %v2121_v25  ;;  %v10424_v8 = vld [vmem:[#allocation169_spill] sm:$0xff] }
 0x5cb   : > { %v5018_v57 = vsel %vm4954_vm11, %v4922_v18, %v4986_v45  ;;  %v4924_v55 = vadd.f32 %v9487_v40, %v4885_v4  ;;  %v3337_v39 = vadd.f32 %v10410_v38, %v2728_v35  ;;  %v4886_v61 = vsel %vm4877_vm5, %v4853_v13, %v10365_v54  ;;  %v10416_v54 = vld [vmem:[#allocation174_spill] sm:$0xff]  ;;  %v10417_v4 = vld [vmem:[#allocation73_spill] sm:$0xff] }
 0x5cc   : > { %v5047_v7 = vpack.c.bf16 %v5018_v57, %v5017_v2  ;;  %v3839_v15 = vadd.f32 %v10412_v5, %v3335_v48  ;;  %v1152_v62 = vadd.f32 %v10415_v47, %v10414_v28  ;;  %v3339_v42 = vadd.f32 %v10416_v54, %v2730_v49  ;;  %v10428_v54 = vld [vmem:[#allocation54_spill] sm:$0xff] }
 0x5cd   : > { %v4217_v23 = vpop.permute.xlu1 %4216  ;;  %vm4956_vm13 = vcmp.ge.f32.partialorder %v4924_v55, 0.0  ;;  %v4988_v44 = vmul.f32 0.01, %v4924_v55  ;;  %v3841_v20 = vadd.f32 %v10413_v21, %v3337_v39  ;;  %v4925_v45 = vadd.f32 %v9487_v40, %v4886_v61  ;;  %v10426_v21 = vld [vmem:[#allocation193_spill] sm:$0xff] }
 0x5ce   : > { %v9626_v59 = vpop.permute.xlu0 %4228  ;;  %4743 = vrot.lane.b32.xlu1 %v4649_v63, %s6805_s14  ;;  %6487 = vmatprep.mubr.bf16.mxu1 %v5047_v7  ;;  %v4888_v14 = vsel %vm4877_vm5, %v4855_v19, %v10364_v31  ;;  %v4301_v41 = vadd.f32 %v4217_v23, %v3839_v15  ;;  %v1614_v2 = vadd.f32 %v10417_v4, %v1152_v62  ;;  %v10419_v7 = vld [vmem:[#allocation18_spill] sm:$0xff]  ;;  %v10427_v62 = vld [vmem:[#allocation31_spill] sm:$0xff]  ;;  %s6812_s14 = smov [#allocation2]  }
 0x5cf   : > { %v5020_v6 = vsel %vm4956_vm13, %v4924_v55, %v4988_v44  ;;  %v4303_v51 = vadd.f32 %v9503_v1, %v3841_v20  ;;  %v3843_v58 = vadd.f32 %v9461_v32, %v3339_v42  ;;  %v10418_v1 = vld [vmem:[#allocation47_spill] sm:$0xff]  ;;  %v4989_v13 = vmul.f32 0.01, %v4925_v45  ;;  %v10420_v44 = vld [vmem:[#allocation116_spill] sm:$0xff]  ;;  %s6743_s21 = sshll.u32 %s6812_s14, 4  ;;  %s6744_s21 = int_to_ptr.vmem [resolvable:$false] %s6743_s21 }
 0x5d0   : > { %v5048_v43 = vpack.c.bf16 %v5020_v6, %v5019_v37  ;;  %v1154_v3 = vadd.f32 %v10419_v7, %v10418_v1  ;;  %v4927_v23 = vadd.f32 %v9487_v40, %v4888_v14  ;;  %v2118_v27 = vadd.f32 %v10420_v44, %v1614_v2  ;;  %s6745_s22 = scalar_lea.vmem %s6744_s21, 4096  ;;  %p6746_p0 = scmp.lt.s32.totalorder %s10024_s16, %s6744_s21 }
 0x5d1   : > { %v4702_v18 = vpop.permute.xlu1 %4701  ;;  %v4792_v12 = vadd.f32 %v9554_v16, %v4303_v51  ;;  %v4305_v32 = vadd.f32 %v9530_v34, %v3843_v58  ;;  %vm4957_vm14 = vcmp.ge.f32.partialorder %v4925_v45, 0.0  ;;  %v1157_v42 = vadd.f32 %v10428_v54, %v10427_v62  ;;  %v10429_v51 = vld [vmem:[#allocation171_spill] sm:$0xff]  ;;  %v10430_v58 = vld [vmem:[#allocation80_spill] sm:$0xff]  ;;  %p6747_p1 = scmp.lt.s32.totalorder %s6745_s22, %s6739_s20 }
 0x5d2   : > { %v4788_v10 = vadd.f32 %v4702_v18, %v4299_v24  ;;  %v9639_v30 = vpop.permute.xlu0 %4232  ;;  %6488 = vmatmul.mubr.bf16.gmra.mrb[132].mxu1 %v5048_v43  ;;  %v2727_v25 = vadd.f32 %v10422_v50, %v2118_v27  ;;  %v5021_v6 = vsel %vm4957_vm14, %v4925_v45, %v4989_v13  ;;  %v4991_v61 = vmul.f32 0.01, %v4927_v23  ;;  %v10423_v24 = vld [vmem:[#allocation118_spill] sm:$0xff]  ;;  %v10433_v13 = vld [vmem:[#allocation28_spill] sm:$0xff]  ;;  %v10436_v50 = vld [vmem:[#allocation147_spill] sm:$0xff] }
 0x5d3   : > { %v4825_v33 = vsel %vm4811_vm3, %v10392_v9, %v4792_v12  ;;  %v4794_v48 = vadd.f32 %v9572_v52, %v4305_v32  ;;  %vm4959_vm0 = vcmp.ge.f32.partialorder %v4927_v23, 0.0  ;;  %v1619_v12 = vadd.f32 %v10430_v58, %v1157_v42  ;;  %p6748_p2 = por %p6747_p1, %p6746_p0 }
 0x5d4   : > { %v4821_v11 = vsel %vm4811_vm3, %v10367_v60, %v4788_v10  ;;  %v3336_v49 = vadd.f32 %v10424_v8, %v2727_v25  ;;  %v4858_v18 = vsel %vm4844_vm4, %v4825_v33, %v10392_v9  ;;  %v5023_v45 = vsel %vm4959_vm0, %v4927_v23, %v4991_v61 }
 0x5d5   : > { %v4854_v57 = vsel %vm4844_vm4, %v4821_v11, %v10367_v60  ;;  %v4706_v55 = vpop.permute.xlu1 %4705  ;;  %v4827_v10 = vsel %vm4811_vm3, %v10390_v26, %v4794_v48  ;;  %v4891_v11 = vsel %vm4877_vm5, %v4858_v18, %v10392_v9  ;;  %v10434_v9 = vld [vmem:[#allocation123_spill] sm:$0xff]  ;;  %p6749_p3 = pnand %p6748_p2, %p6742_p13 }
 0x5d6   : > { %v4887_v56 = vsel %vm4877_vm5, %v4854_v57, %v10367_v60  ;;  %v4790_v31 = vadd.f32 %v4706_v55, %v4301_v41  ;;  %v9657_v63 = vpop.permute.xlu0 %4717  ;;  %v10421_v60 = vld [vmem:[#allocation75_spill] sm:$0xff]  ;;  %v3840_v20 = vadd.f32 %v10426_v21, %v3336_v49  ;;  %v4860_v57 = vsel %vm4844_vm4, %v4827_v10, %v10390_v26 }
 0x5d7   : > { %v4926_v29 = vadd.f32 %v9487_v40, %v4887_v56  ;;  %v1616_v35 = vadd.f32 %v10421_v60, %v1154_v3  ;;  %v10431_v56 = vld [vmem:[#allocation195_spill] sm:$0xff]  ;;  %v4930_v44 = vadd.f32 %v9487_v40, %v4891_v11  ;;  %v2123_v27 = vadd.f32 %v10434_v9, %v1619_v12 }
 0x5d8   : > { %v4823_v16 = vsel %vm4811_vm3, %v10372_v46, %v4790_v31  ;;  %v4893_v32 = vsel %vm4877_vm5, %v4860_v57, %v10390_v26  ;;  %v10439_v18 = vld [vmem:[#allocation27_spill] sm:$0xff] }
 0x5d9   : > { %v4856_v22 = vsel %vm4844_vm4, %v4823_v16, %v10372_v46  ;;  %v4219_v0 = vpop.permute.xlu1 %4218  ;;  %vm4958_vm15 = vcmp.ge.f32.partialorder %v4926_v29, 0.0  ;;  %v4990_v53 = vmul.f32 0.01, %v4926_v29  ;;  %v2120_v43 = vadd.f32 %v10423_v24, %v1616_v35  ;;  %v10438_v24 = vld [vmem:[#allocation176_spill] sm:$0xff] }
 0x5da   : > { %v4889_v34 = vsel %vm4877_vm5, %v4856_v22, %v10372_v46  ;;  %v9676_v37 = vpop.permute.xlu0 %4721  ;;  %v10425_v46 = vld [vmem:[#allocation145_spill] sm:$0xff]  ;;  %v4302_v4 = vadd.f32 %v4219_v0, %v3840_v20  ;;  %v10435_v0 = vld [vmem:[#allocation82_spill] sm:$0xff]  ;;  %v2732_v25 = vadd.f32 %v10436_v50, %v2123_v27  ;;  %vm4962_vm2 = vcmp.ge.f32.partialorder %v4930_v44, 0.0 }
 0x5db   : > { %v5022_v38 = vsel %vm4958_vm15, %v4926_v29, %v4990_v53  ;;  %v4928_v39 = vadd.f32 %v9487_v40, %v4889_v34  ;;  %v2729_v15 = vadd.f32 %v10425_v46, %v2120_v43  ;;  %v10432_v29 = vld [vmem:[#allocation56_spill] sm:$0xff]  ;;  %v10441_v46 = vld [vmem:[#allocation149_spill] sm:$0xff] }
 0x5dc   : > { %v5049_v19 = vpack.c.bf16 %v5022_v38, %v5021_v6  ;;  %v1159_v23 = vadd.f32 %v10433_v13, %v10432_v29  ;;  %v4994_v6 = vmul.f32 0.01, %v4930_v44  ;;  %v4932_v38 = vadd.f32 %v9487_v40, %v4893_v32  ;;  %v10445_v29 = vld [vmem:[#allocation26_spill] sm:$0xff] }
 0x5dd   : > { %v4223_v52 = vpop.permute.xlu1 %4222  ;;  %vm4960_vm1 = vcmp.ge.f32.partialorder %v4928_v39, 0.0  ;;  %v4992_v5 = vmul.f32 0.01, %v4928_v39  ;;  %v3338_v41 = vadd.f32 %v10429_v51, %v2729_v15  ;;  %v3341_v43 = vadd.f32 %v10438_v24, %v2732_v25  ;;  %v10442_v51 = vld [vmem:[#allocation178_spill] sm:$0xff]  ;;  %v10450_v25 = vld [vmem:[#allocation173_spill] sm:$0xff] }
 0x5de   : > { %v9687_v47 = vpop.permute.xlu0 %3774  ;;  %6491 = vmatprep.mubr.bf16.mxu1 %v5049_v19  ;;  %v1621_v53 = vadd.f32 %v10435_v0, %v1159_v23  ;;  %v5026_v42 = vsel %vm4962_vm2, %v4930_v44, %v4994_v6  ;;  %vm4964_vm7 = vcmp.ge.f32.partialorder %v4932_v38, 0.0  ;;  %v10453_v24 = vld [vmem:[#allocation58_spill] sm:$0xff] }
 0x5df   : > { %v5024_v14 = vsel %vm4960_vm1, %v4928_v39, %v4992_v5  ;;  %v3842_v31 = vadd.f32 %v10431_v56, %v3338_v41  ;;  %v10437_v39 = vld [vmem:[#allocation125_spill] sm:$0xff]  ;;  %v3845_v21 = vadd.f32 %v9594_v17, %v3341_v43 }
 0x5e0   : > { %v5050_v2 = vpack.c.bf16 %v5024_v14, %v5023_v45  ;;  %v2125_v61 = vadd.f32 %v10437_v39, %v1621_v53  ;;  %v4996_v14 = vmul.f32 0.01, %v4932_v38  ;;  %v10443_v17 = vld [vmem:[#allocation77_spill] sm:$0xff]  ;;  %v10449_v53 = vld [vmem:[#allocation122_spill] sm:$0xff] }
 0x5e1   : > { %v4708_v55 = vpop.permute.xlu1 %4707  ;;  %v4304_v16 = vadd.f32 %v4223_v52, %v3842_v31  ;;  %v10440_v52 = vld [vmem:[#allocation52_spill] sm:$0xff]  ;;  %v4307_v11 = vadd.f32 %v9626_v59, %v3845_v21 }
 0x5e2   : > { %v4791_v1 = vadd.f32 %v4708_v55, %v4302_v4  ;;  %v9698_v3 = vpop.permute.xlu0 %3778  ;;  %6492 = vmatmul.mubr.bf16.gmra.mrb[136].mxu1 %v5050_v2  ;;  %v1156_v5 = vadd.f32 %v10440_v52, %v10439_v18  ;;  %v2734_v15 = vadd.f32 %v10441_v46, %v2125_v61  ;;  %v5028_v31 = vsel %vm4964_vm7, %v4932_v38, %v4996_v14  ;;  %v10446_v59 = vld [vmem:[#allocation120_spill] sm:$0xff] }
 0x5e3   : > { %v4796_v58 = vadd.f32 %v9657_v63, %v4307_v11 }
 0x5e4   : > { %v4824_v60 = vsel %vm4811_vm3, %v10414_v28, %v4791_v1  ;;  %v3343_v41 = vadd.f32 %v10442_v51, %v2734_v15  ;;  %v1618_v55 = vadd.f32 %v10443_v17, %v1156_v5  ;;  %v10444_v1 = vld [vmem:[#allocation55_spill] sm:$0xff]  ;;  %v10455_v15 = vld [vmem:[#allocation88_spill] sm:$0xff] }
 0x5e5   : > { %v4857_v35 = vsel %vm4844_vm4, %v4824_v60, %v10414_v28  ;;  %v4712_v22 = vpop.permute.xlu1 %4711  ;;  %v1158_v23 = vadd.f32 %v10445_v29, %v10444_v1  ;;  %v4829_v63 = vsel %vm4811_vm3, %v10427_v62, %v4796_v58  ;;  %v10460_v58 = vld [vmem:[#allocation151_spill] sm:$0xff] }
 0x5e6   : > { %v4890_v33 = vsel %vm4877_vm5, %v4857_v35, %v10414_v28  ;;  %v4793_v48 = vadd.f32 %v4712_v22, %v4304_v16  ;;  %v9714_v34 = vpop.permute.xlu0 %4236  ;;  %v2122_v44 = vadd.f32 %v10446_v59, %v1618_v55  ;;  %v10447_v16 = vld [vmem:[#allocation79_spill] sm:$0xff]  ;;  %v10448_v35 = vld [vmem:[#allocation146_spill] sm:$0xff]  ;;  %v10459_v55 = vld [vmem:[#allocation92_spill] sm:$0xff] }
 0x5e7   : > { %v4929_v26 = vadd.f32 %v9487_v40, %v4890_v33  ;;  %v1620_v60 = vadd.f32 %v10447_v16, %v1158_v23 }
 0x5e8   : > { %v4826_v8 = vsel %vm4811_vm3, %v10419_v7, %v4793_v48 }
 0x5e9   : > { %v4859_v49 = vsel %vm4844_vm4, %v4826_v8, %v10419_v7  ;;  %v3765_v28 = vpop.permute.xlu1 %3764  ;;  %vm4961_vm6 = vcmp.ge.f32.partialorder %v4929_v26, 0.0  ;;  %v4993_v19 = vmul.f32 0.01, %v4929_v26  ;;  %v2124_v50 = vadd.f32 %v10449_v53, %v1620_v60  ;;  %v10454_v8 = vld [vmem:[#allocation175_spill] sm:$0xff] }
 0x5ea   : > { %v4892_v20 = vsel %vm4877_vm5, %v4859_v49, %v10419_v7  ;;  %v9730_v10 = vpop.permute.xlu0 %4240  ;;  %v3847_v7 = vadd.f32 %v9613_v36, %v3343_v41  ;;  %v2731_v36 = vadd.f32 %v10448_v35, %v2122_v44  ;;  %v10458_v41 = vld [vmem:[#allocation127_spill] sm:$0xff]  ;;  %v10461_v44 = vld [vmem:[#allocation129_spill] sm:$0xff] }
 0x5eb   : > { %v5025_v54 = vsel %vm4961_vm6, %v4929_v26, %v4993_v19  ;;  %v4931_v45 = vadd.f32 %v9487_v40, %v4892_v20  ;;  %v10451_v26 = vld [vmem:[#allocation148_spill] sm:$0xff] }
 0x5ec   : > { %v5051_v4 = vpack.c.bf16 %v5026_v42, %v5025_v54  ;;  %v4309_v9 = vadd.f32 %v9639_v30, %v3847_v7  ;;  %v3340_v33 = vadd.f32 %v10450_v25, %v2731_v36  ;;  %v4862_v30 = vsel %vm4844_vm4, %v4829_v63, %v10427_v62  ;;  %v10457_v42 = vld [vmem:[#allocation36_spill] sm:$0xff]  ;;  %v10463_v63 = vld [vmem:[#allocation35_spill] sm:$0xff] }
 0x5ed   : > { %v3769_v2 = vpop.permute.xlu1 %3768  ;;  %vm4963_vm8 = vcmp.ge.f32.partialorder %v4931_v45, 0.0  ;;  %v4995_v57 = vmul.f32 0.01, %v4931_v45  ;;  %v2733_v6 = vadd.f32 %v10451_v26, %v2124_v50  ;;  %v4895_v19 = vsel %vm4877_vm5, %v4862_v30, %v10427_v62  ;;  %v10465_v50 = vld [vmem:[#allocation153_spill] sm:$0xff] }
 0x5ee   : > { %v9738_v12 = vpop.permute.xlu0 %4725  ;;  %6495 = vmatprep.mubr.bf16.mxu1 %v5051_v4  ;;  %v4798_v22 = vadd.f32 %v9676_v37, %v4309_v9  ;;  %v3844_v39 = vadd.f32 %v3765_v28, %v3340_v33  ;;  %v10452_v37 = vld [vmem:[#allocation39_spill] sm:$0xff]  ;;  %v10456_v28 = vld [vmem:[#allocation60_spill] sm:$0xff]  ;;  %v4934_v51 = vadd.f32 %v9487_v40, %v4895_v19 }
 0x5ef   : > { %v5027_v56 = vsel %vm4963_vm8, %v4931_v45, %v4995_v57  ;;  %v1161_v43 = vadd.f32 %v10453_v24, %v10452_v37  ;;  %v3342_v49 = vadd.f32 %v10454_v8, %v2733_v6  ;;  %v1163_v45 = vadd.f32 %v10457_v42, %v10456_v28 }
 0x5f0   : > { %v5052_v27 = vpack.c.bf16 %v5028_v31, %v5027_v56  ;;  %v4831_v38 = vsel %vm4811_vm3, %v10433_v13, %v4798_v22  ;;  %v4998_v59 = vmul.f32 0.01, %v4934_v51  ;;  %vm4966_vm9 = vcmp.ge.f32.partialorder %v4934_v51, 0.0  ;;  %v10464_v22 = vld [vmem:[#allocation57_spill] sm:$0xff] }
 0x5f1   : > { %v4227_v32 = vpop.permute.xlu1 %4226  ;;  %v4864_v5 = vsel %vm4844_vm4, %v4831_v38, %v10433_v13  ;;  %v1623_v21 = vadd.f32 %v10455_v15, %v1161_v43  ;;  %v3846_v20 = vadd.f32 %v3769_v2, %v3342_v49  ;;  %v1625_v7 = vadd.f32 %v10459_v55, %v1163_v45 }
 0x5f2   : > { %v9749_v0 = vpop.permute.xlu0 %4729  ;;  %6496 = vmatmul.mubr.bf16.gmra.mrb[140].mxu1 %v5052_v27  ;;  %v4306_v52 = vadd.f32 %v4227_v32, %v3844_v39  ;;  %v4897_v62 = vsel %vm4877_vm5, %v4864_v5, %v10433_v13  ;;  %v10462_v27 = vld [vmem:[#allocation179_spill] sm:$0xff]  ;;  %v1160_v53 = vadd.f32 %v10464_v22, %v10463_v63  ;;  %v5030_v26 = vsel %vm4966_vm9, %v4934_v51, %v4998_v59  ;;  %v10466_v39 = vld [vmem:[#allocation181_spill] sm:$0xff] }
 0x5f3   : > { %v2127_v11 = vadd.f32 %v10458_v41, %v1623_v21  ;;  %v4936_v13 = vadd.f32 %v9487_v40, %v4897_v62  ;;  %v2129_v9 = vadd.f32 %v10461_v44, %v1625_v7  ;;  %v10471_v62 = vld [vmem:[#allocation85_spill] sm:$0xff] }
 0x5f4   : > { %v10474_v7 = vld [vmem:[#allocation177_spill] sm:$0xff] }
 0x5f5   : > { %v4231_v48 = vpop.permute.xlu1 %4230  ;;  %v2736_v56 = vadd.f32 %v10460_v58, %v2127_v11  ;;  %v2738_v25 = vadd.f32 %v10465_v50, %v2129_v9  ;;  %v5000_v38 = vmul.f32 0.01, %v4936_v13  ;;  %vm4968_vm11 = vcmp.ge.f32.partialorder %v4936_v13, 0.0  ;;  %v10476_v44 = vld [vmem:[#allocation45_spill] sm:$0xff]  ;;  %v10477_v9 = vld [vmem:[#allocation83_spill] sm:$0xff] }
 0x5f6   : > { %v9758_v61 = vpop.permute.xlu0 %3782  ;;  %v4308_v4 = vadd.f32 %v4231_v48, %v3846_v20  ;;  %v10468_v20 = vld [vmem:[#allocation59_spill] sm:$0xff] }
 0x5f7   : > { %v3345_v32 = vadd.f32 %v10462_v27, %v2736_v56  ;;  %v3347_v24 = vadd.f32 %v10466_v39, %v2738_v25  ;;  %v5032_v21 = vsel %vm4968_vm11, %v4936_v13, %v5000_v38  ;;  %v1165_v27 = vadd.f32 %v10477_v9, %v10476_v44  ;;  %v10482_v38 = vld [vmem:[#allocation131_spill] sm:$0xff] }
 0x5f9   : > { %v4716_v46 = vpop.permute.xlu1 %4715  ;;  %v3849_v33 = vadd.f32 %v9687_v47, %v3345_v32  ;;  %v3851_v47 = vadd.f32 %v9698_v3, %v3347_v24 }
 0x5fa   : > { %v4795_v54 = vadd.f32 %v4716_v46, %v4306_v52  ;;  %v9770_v14 = vpop.permute.xlu0 %3786  ;;  %v10467_v52 = vld [vmem:[#allocation81_spill] sm:$0xff] }
 0x5fb   : > { %v4311_v43 = vadd.f32 %v9714_v34, %v3849_v33  ;;  %v1622_v5 = vadd.f32 %v10467_v52, %v1160_v53  ;;  %v10470_v34 = vld [vmem:[#allocation124_spill] sm:$0xff]  ;;  %v4313_v51 = vadd.f32 %v9730_v10, %v3851_v47  ;;  %v10479_v53 = vld [vmem:[#allocation94_spill] sm:$0xff] }
 0x5fc   : > { %v4828_v57 = vsel %vm4811_vm3, %v10439_v18, %v4795_v54  ;;  %v10469_v54 = vld [vmem:[#allocation34_spill] sm:$0xff]  ;;  %v1627_v50 = vadd.f32 %v10479_v53, %v1165_v27 }
 0x5fd   : > { %v4861_v2 = vsel %vm4844_vm4, %v4828_v57, %v10439_v18  ;;  %v4720_v17 = vpop.permute.xlu1 %4719  ;;  %v1162_v28 = vadd.f32 %v10469_v54, %v10468_v20  ;;  %v2126_v45 = vadd.f32 %v10470_v34, %v1622_v5  ;;  %v10472_v57 = vld [vmem:[#allocation150_spill] sm:$0xff]  ;;  %v10484_v5 = vld [vmem:[#allocation155_spill] sm:$0xff] }
 0x5fe   : > { %v4894_v31 = vsel %vm4877_vm5, %v4861_v2, %v10439_v18  ;;  %v4797_v1 = vadd.f32 %v4720_v17, %v4308_v4  ;;  %v9792_v35 = vpop.permute.xlu0 %4244  ;;  %v4802_v2 = vadd.f32 %v9749_v0, %v4313_v51  ;;  %v10473_v17 = vld [vmem:[#allocation126_spill] sm:$0xff]  ;;  %v10478_v0 = vld [vmem:[#allocation180_spill] sm:$0xff]  ;;  %v2131_v39 = vadd.f32 %v10482_v38, %v1627_v50  ;;  %v10495_v38 = vld [vmem:[#allocation95_spill] sm:$0xff] }
 0x5ff   : > { %v4933_v23 = vadd.f32 %v9487_v40, %v4894_v31  ;;  %v1624_v4 = vadd.f32 %v10471_v62, %v1162_v28  ;;  %v2735_v3 = vadd.f32 %v10472_v57, %v2126_v45  ;;  %v10485_v28 = vld [vmem:[#allocation133_spill] sm:$0xff]  ;;  %v10486_v45 = vld [vmem:[#allocation183_spill] sm:$0xff]  ;;  %v10492_v53 = vld [vmem:[#allocation86_spill] sm:$0xff] }
 0x600   : > { %v4830_v16 = vsel %vm4811_vm3, %v10445_v29, %v4797_v1  ;;  %v10475_v1 = vld [vmem:[#allocation152_spill] sm:$0xff]  ;;  %v4835_v59 = vsel %vm4811_vm3, %v10457_v42, %v4802_v2  ;;  %v2740_v47 = vadd.f32 %v10484_v5, %v2131_v39  ;;  %v10487_v57 = vld [vmem:[#allocation43_spill] sm:$0xff]  ;;  %v10489_v2 = vld [vmem:[#allocation157_spill] sm:$0xff] }
 0x601   : > { %v4863_v60 = vsel %vm4844_vm4, %v4830_v16, %v10445_v29  ;;  %v3773_v18 = vpop.permute.xlu1 %3772  ;;  %vm4965_vm10 = vcmp.ge.f32.partialorder %v4933_v23, 0.0  ;;  %v4997_v36 = vmul.f32 0.01, %v4933_v23  ;;  %v2128_v55 = vadd.f32 %v10473_v17, %v1624_v4  ;;  %v10493_v50 = vld [vmem:[#allocation42_spill] sm:$0xff] }
 0x602   : > { %v4896_v30 = vsel %vm4877_vm5, %v4863_v60, %v10445_v29  ;;  %v4800_v29 = vadd.f32 %v9738_v12, %v4311_v43  ;;  %v9806_v46 = vpop.permute.xlu0 %4248  ;;  %v3344_v58 = vadd.f32 %v10474_v7, %v2735_v3  ;;  %v3349_v51 = vadd.f32 %v10486_v45, %v2740_v47  ;;  %v10488_v3 = vld [vmem:[#allocation61_spill] sm:$0xff]  ;;  %v10499_v47 = vld [vmem:[#allocation156_spill] sm:$0xff] }
 0x603   : > { %v5029_v48 = vsel %vm4965_vm10, %v4933_v23, %v4997_v36  ;;  %v4935_v6 = vadd.f32 %v9487_v40, %v4896_v30  ;;  %v2737_v23 = vadd.f32 %v10475_v1, %v2128_v55  ;;  %v4868_v36 = vsel %vm4844_vm4, %v4835_v59, %v10457_v42  ;;  %v10480_v30 = vld [vmem:[#allocation87_spill] sm:$0xff] }
 0x604   : > { %v5053_v8 = vpack.c.bf16 %v5030_v26, %v5029_v48  ;;  %v4833_v12 = vsel %vm4811_vm3, %v10452_v37, %v4800_v29  ;;  %v3848_v13 = vadd.f32 %v3773_v18, %v3344_v58  ;;  %v10481_v48 = vld [vmem:[#allocation44_spill] sm:$0xff]  ;;  %v3853_v55 = vadd.f32 %v9758_v61, %v3349_v51 }
 0x605   : > { %v3777_v49 = vpop.permute.xlu1 %3776  ;;  %vm4967_vm12 = vcmp.ge.f32.partialorder %v4935_v6, 0.0  ;;  %v4999_v19 = vmul.f32 0.01, %v4935_v6  ;;  %v4866_v56 = vsel %vm4844_vm4, %v4833_v12, %v10452_v37  ;;  %v3346_v32 = vadd.f32 %v10478_v0, %v2737_v23  ;;  %v10490_v23 = vld [vmem:[#allocation185_spill] sm:$0xff] }
 0x606   : > { %6499 = vmatprep.mubr.bf16.mxu1 %v5053_v8  ;;  %v4734_v10 = vpop.permute.xlu0 %4733  ;;  %v4899_v16 = vsel %vm4877_vm5, %v4866_v56, %v10452_v37  ;;  %v1167_v18 = vadd.f32 %v10481_v48, %v10480_v30  ;;  %v4901_v37 = vsel %vm4877_vm5, %v4868_v36, %v10457_v42  ;;  %v1164_v12 = vadd.f32 %v10488_v3, %v10487_v57 }
 0x607   : > { %v5031_v15 = vsel %vm4967_vm12, %v4935_v6, %v4999_v19  ;;  %v3850_v25 = vadd.f32 %v3777_v49, %v3346_v32  ;;  %v4938_v6 = vadd.f32 %v9487_v40, %v4899_v16  ;;  %v10483_v19 = vld [vmem:[#allocation93_spill] sm:$0xff]  ;;  %v4940_v42 = vadd.f32 %v9487_v40, %v4901_v37  ;;  %v10496_v37 = vld [vmem:[#allocation154_spill] sm:$0xff] }
 0x608   : > { %v5054_v41 = vpack.c.bf16 %v5032_v21, %v5031_v15  ;;  %v1629_v52 = vadd.f32 %v10483_v19, %v1167_v18  ;;  %v10491_v32 = vld [vmem:[#allocation97_spill] sm:$0xff] }
 0x609   : > { %v4235_v11 = vpop.permute.xlu1 %4234  ;;  %v5002_v20 = vmul.f32 0.01, %v4938_v6  ;;  %vm4970_vm13 = vcmp.ge.f32.partialorder %v4938_v6, 0.0  ;;  %v5004_v1 = vmul.f32 0.01, %v4940_v42  ;;  %vm4972_vm15 = vcmp.ge.f32.partialorder %v4940_v42, 0.0 }
 0x60a   : > { %6500 = vmatmul.mubr.bf16.gmra.mrb[144].mxu1 %v5054_v41  ;;  %v4310_v60 = vadd.f32 %v4235_v11, %v3848_v13  ;;  %v4738_v26 = vpop.permute.xlu0 %4737  ;;  %v2133_v34 = vadd.f32 %v10485_v28, %v1629_v52  ;;  %v4315_v13 = vadd.f32 %v9792_v35, %v3853_v55  ;;  %v1626_v16 = vadd.f32 %v10491_v32, %v1164_v12  ;;  %v10505_v55 = vld [vmem:[#allocation50_spill] sm:$0xff] }
 0x60b   : > { %v5034_v56 = vsel %vm4970_vm13, %v4938_v6, %v5002_v20  ;;  %v10500_v20 = vld [vmem:[#allocation53_spill] sm:$0xff] }
 0x60c   : > { %v2742_v17 = vadd.f32 %v10489_v2, %v2133_v34 }
 0x60d   : > { %v4239_v31 = vpop.permute.xlu1 %4238 }
 0x60e   : > { %v4312_v24 = vadd.f32 %v4239_v31, %v3850_v25  ;;  %v9852_v11 = vpop.permute.xlu0 %3790  ;;  %v3351_v59 = vadd.f32 %v10490_v23, %v2742_v17  ;;  %v1166_v25 = vadd.f32 %v10493_v50, %v10492_v53  ;;  %v10504_v17 = vld [vmem:[#allocation91_spill] sm:$0xff] }
 0x610   : > { %v3855_v61 = vadd.f32 %v9770_v14, %v3351_v59  ;;  %v1628_v39 = vadd.f32 %v10495_v38, %v1166_v25  ;;  %v10510_v25 = vld [vmem:[#allocation187_spill] sm:$0xff]  ;;  %v10511_v38 = vld [vmem:[#allocation49_spill] sm:$0xff] }
 0x611   : > { %v4724_v22 = vpop.permute.xlu1 %4723 }
 0x612   : > { %v4799_v33 = vadd.f32 %v4724_v22, %v4310_v60  ;;  %v4804_v60 = vadd.f32 %v4734_v10, %v4315_v13  ;;  %v5036_v22 = vsel %vm4972_vm15, %v4940_v42, %v5004_v1  ;;  %v4317_v30 = vadd.f32 %v9806_v46, %v3855_v61  ;;  %v10501_v42 = vld [vmem:[#allocation89_spill] sm:$0xff] }
 0x613   : > { %v1169_v28 = vadd.f32 %v10501_v42, %v10500_v20 }
 0x614   : > { %v4832_v43 = vsel %vm4811_vm3, %v10463_v63, %v4799_v33  ;;  %v10494_v33 = vld [vmem:[#allocation128_spill] sm:$0xff]  ;;  %v4837_v14 = vsel %vm4811_vm3, %v10476_v44, %v4804_v60  ;;  %v4806_v10 = vadd.f32 %v4738_v26, %v4317_v30 }
 0x615   : > { %v4865_v8 = vsel %vm4844_vm4, %v4832_v43, %v10463_v63  ;;  %v4728_v49 = vpop.permute.xlu1 %4727  ;;  %v2130_v35 = vadd.f32 %v10494_v33, %v1626_v16  ;;  %v10497_v43 = vld [vmem:[#allocation130_spill] sm:$0xff]  ;;  %v4870_v52 = vsel %vm4844_vm4, %v4837_v14, %v10476_v44  ;;  %v10502_v26 = vld [vmem:[#allocation184_spill] sm:$0xff] }
 0x616   : > { %v4898_v29 = vsel %vm4877_vm5, %v4865_v8, %v10463_v63  ;;  %v4801_v15 = vadd.f32 %v4728_v49, %v4312_v24  ;;  %v2132_v8 = vadd.f32 %v10497_v43, %v1628_v39  ;;  %v10498_v49 = vld [vmem:[#allocation182_spill] sm:$0xff]  ;;  %v4903_v45 = vsel %vm4877_vm5, %v4870_v52, %v10476_v44  ;;  %v10512_v39 = vld [vmem:[#allocation84_spill] sm:$0xff] }
 0x617   : > { %v4937_v21 = vadd.f32 %v9487_v40, %v4898_v29  ;;  %v2739_v24 = vadd.f32 %v10496_v37, %v2130_v35  ;;  %v1168_v37 = vadd.f32 %v10512_v39, %v10511_v38 }
 0x618   : > { %v4834_v41 = vsel %vm4811_vm3, %v10469_v54, %v4801_v15  ;;  %v2741_v29 = vadd.f32 %v10499_v47, %v2132_v8  ;;  %v4839_v15 = vsel %vm4811_vm3, %v10481_v48, %v4806_v10 }
 0x619   : > { %v4867_v62 = vsel %vm4844_vm4, %v4834_v41, %v10469_v54  ;;  %v3781_v63 = vpop.permute.xlu1 %3780  ;;  %vm4969_vm14 = vcmp.ge.f32.partialorder %v4937_v21, 0.0  ;;  %v5001_v4 = vmul.f32 0.01, %v4937_v21  ;;  %v3348_v19 = vadd.f32 %v10498_v49, %v2739_v24  ;;  %v10513_v24 = vld [vmem:[#allocation160_spill] sm:$0xff] }
 0x61a   : > { %v4900_v7 = vsel %vm4877_vm5, %v4867_v62, %v10469_v54  ;;  %v9867_v54 = vpop.permute.xlu0 %3794  ;;  %v3350_v34 = vadd.f32 %v10502_v26, %v2741_v29  ;;  %v4872_v41 = vsel %vm4844_vm4, %v4839_v15, %v10481_v48 }
 0x61b   : > { %v5033_v58 = vsel %vm4969_vm14, %v4937_v21, %v5001_v4  ;;  %v4939_v31 = vadd.f32 %v9487_v40, %v4900_v7  ;;  %v3852_v21 = vadd.f32 %v3781_v63, %v3348_v19  ;;  %v10503_v4 = vld [vmem:[#allocation98_spill] sm:$0xff]  ;;  %v1171_v63 = vadd.f32 %v10505_v55, %v10504_v17  ;;  %v10519_v17 = vld [vmem:[#allocation99_spill] sm:$0xff] }
 0x61c   : > { %v5055_v9 = vpack.c.bf16 %v5034_v56, %v5033_v58  ;;  %v1631_v3 = vadd.f32 %v10503_v4, %v1169_v28  ;;  %v4942_v58 = vadd.f32 %v9487_v40, %v4903_v45  ;;  %v10506_v56 = vld [vmem:[#allocation135_spill] sm:$0xff]  ;;  %v4905_v44 = vsel %vm4877_vm5, %v4872_v41, %v10481_v48  ;;  %v10515_v28 = vld [vmem:[#allocation100_spill] sm:$0xff]  ;;  %v10516_v41 = vld [vmem:[#allocation90_spill] sm:$0xff] }
 0x61d   : > { %v3785_v27 = vpop.permute.xlu1 %3784  ;;  %vm4971_vm0 = vcmp.ge.f32.partialorder %v4939_v31, 0.0  ;;  %v5003_v0 = vmul.f32 0.01, %v4939_v31  ;;  %v4944_v48 = vadd.f32 %v9487_v40, %v4905_v44  ;;  %v1630_v26 = vadd.f32 %v10515_v28, %v1168_v37  ;;  %v10518_v4 = vld [vmem:[#allocation132_spill] sm:$0xff]  ;;  %v10521_v44 = vld [vmem:[#allocation134_spill] sm:$0xff] }
 0x61e   : > { %6503 = vmatprep.mubr.bf16.mxu1 %v5055_v9  ;;  %v4253_v5 = vpop.permute.xlu0 %4252  ;;  %v3854_v12 = vadd.f32 %v3785_v27, %v3350_v34  ;;  %v10507_v9 = vld [vmem:[#allocation96_spill] sm:$0xff]  ;;  %vm4974_vm1 = vcmp.ge.f32.partialorder %v4942_v58, 0.0  ;;  %v9964_v28 = vld [vmem:[%s290_s29] ss:$0 sm:$0xff] }
 0x61f   : > { %v5035_v36 = vsel %vm4971_vm0, %v4939_v31, %v5003_v0  ;;  %v2135_v31 = vadd.f32 %v10506_v56, %v1631_v3  ;;  %v1633_v27 = vadd.f32 %v10507_v9, %v1171_v63  ;;  %v10508_v0 = vld [vmem:[#allocation159_spill] sm:$0xff]  ;;  %v5008_v52 = vmul.f32 0.01, %v4944_v48 }
 0x620   : > { %v5056_v18 = vpack.c.bf16 %v5036_v22, %v5035_v36  ;;  %v5006_v36 = vmul.f32 0.01, %v4942_v58  ;;  %v10509_v22 = vld [vmem:[#allocation136_spill] sm:$0xff]  ;;  %vm4976_vm6 = vcmp.ge.f32.partialorder %v4944_v48, 0.0  ;;  %v2134_v3 = vadd.f32 %v10518_v4, %v1630_v26 }
 0x621   : > { %v4243_v6 = vpop.permute.xlu1 %4242  ;;  %v2744_v32 = vadd.f32 %v10508_v0, %v2135_v31  ;;  %v2137_v53 = vadd.f32 %v10509_v22, %v1633_v27 }
 0x622   : > { %6504 = vmatmul.mubr.bf16.gmra.mrb[148].mxu1 %v5056_v18  ;;  %v4314_v51 = vadd.f32 %v4243_v6, %v3852_v21  ;;  %v4257_v7 = vpop.permute.xlu0 %4256  ;;  %v5038_v49 = vsel %vm4974_vm1, %v4942_v58, %v5006_v36  ;;  %v10520_v58 = vld [vmem:[#allocation158_spill] sm:$0xff] }
 0x623   : > { %v3353_v33 = vadd.f32 %v10510_v25, %v2744_v32  ;;  %v2746_v14 = vadd.f32 %v10513_v24, %v2137_v53  ;;  %v2743_v56 = vadd.f32 %v10520_v58, %v2134_v3 }
 0x625   : > { %v4247_v46 = vpop.permute.xlu1 %4246  ;;  %v3857_v10 = vadd.f32 %v9852_v11, %v3353_v33  ;;  %v6738_v33 = vld [vmem:[%s10075_s4] ss:$0 sm:$0xff] }
 0x626   : > { %v4316_v1 = vadd.f32 %v4247_v46, %v3854_v12  ;;  %v4742_v30 = vpop.permute.xlu0 %4741  ;;  %v10514_v46 = vld [vmem:[#allocation189_spill] sm:$0xff] }
 0x627   : > { %v3355_v47 = vadd.f32 %v10514_v46, %v2746_v14  ;;  %v4319_v29 = vadd.f32 %v4253_v5, %v3857_v10 }
 0x629   : > { %v4732_v62 = vpop.permute.xlu1 %4731  ;;  %v3859_v11 = vadd.f32 %v9867_v54, %v3355_v47  ;;  %v4808_v34 = vadd.f32 %v4742_v30, %v4319_v29 }
 0x62a   : > { %v4803_v2 = vadd.f32 %v4732_v62, %v4314_v51  ;;  %v5040_v51 = vsel %vm4976_vm6, %v4944_v48, %v5008_v52 }
 0x62b   : > { %v4321_v5 = vadd.f32 %v4257_v7, %v3859_v11  ;;  %v4841_v54 = vsel %vm4811_vm3, %v10500_v20, %v4808_v34  ;;  %v10523_v7 = vld [vmem:[#allocation161_spill] sm:$0xff] }
 0x62c   : > { %v4836_v23 = vsel %vm4811_vm3, %v10487_v57, %v4803_v2 }
 0x62d   : > { %v4869_v59 = vsel %vm4844_vm4, %v4836_v23, %v10487_v57  ;;  %v4736_v13 = vpop.permute.xlu1 %4735  ;;  %v10522_v23 = vld [vmem:[#allocation186_spill] sm:$0xff] }
 0x62e   : > { %v4902_v16 = vsel %vm4877_vm5, %v4869_v59, %v10487_v57  ;;  %v4805_v61 = vadd.f32 %v4736_v13, %v4316_v1  ;;  %v3352_v59 = vadd.f32 %v10522_v23, %v2743_v56  ;;  %v4874_v13 = vsel %vm4844_vm4, %v4841_v54, %v10500_v20 }
 0x62f   : > { %v4941_v60 = vadd.f32 %v9487_v40, %v4902_v16  ;;  %v10524_v16 = vld [vmem:[#allocation188_spill] sm:$0xff] }
 0x630   : > { %v4838_v35 = vsel %vm4811_vm3, %v10493_v50, %v4805_v61 }
 0x631   : > { %v4871_v18 = vsel %vm4844_vm4, %v4838_v35, %v10493_v50  ;;  %v3789_v6 = vpop.permute.xlu1 %3788  ;;  %vm4973_vm2 = vcmp.ge.f32.partialorder %v4941_v60, 0.0  ;;  %v5005_v57 = vmul.f32 0.01, %v4941_v60 }
 0x632   : > { %v4904_v43 = vsel %vm4877_vm5, %v4871_v18, %v10493_v50  ;;  %v4746_v50 = vpop.permute.xlu0 %4745  ;;  %v3856_v32 = vadd.f32 %v3789_v6, %v3352_v59 }
 0x633   : > { %v5037_v8 = vsel %vm4973_vm2, %v4941_v60, %v5005_v57  ;;  %v4943_v19 = vadd.f32 %v9487_v40, %v4904_v43  ;;  %v10517_v40 = vld [vmem:[#allocation48_spill] sm:$0xff]  ;;  %v4810_v31 = vadd.f32 %v4746_v50, %v4321_v5  ;;  %v4907_v60 = vsel %vm4877_vm5, %v4874_v13, %v10500_v20 }
 0x634   : > { %v5057_v15 = vpack.c.bf16 %v5038_v49, %v5037_v8  ;;  %v1170_v62 = vadd.f32 %v10517_v40, %v10516_v41  ;;  %v4946_v35 = vadd.f32 %v6738_v33, %v4907_v60 }
 0x635   : > { %v3793_v21 = vpop.permute.xlu1 %3792  ;;  %vm4975_vm7 = vcmp.ge.f32.partialorder %v4943_v19, 0.0  ;;  %v5007_v42 = vmul.f32 0.01, %v4943_v19  ;;  %v4843_v0 = vsel %vm4811_vm3, %v10505_v55, %v4810_v31 }
 0x636   : > { %6507 = vmatprep.mubr.bf16.mxu1 %v5057_v15  ;;  %v1632_v63 = vadd.f32 %v10519_v17, %v1170_v62  ;;  %v4876_v48 = vsel %vm4844_vm4, %v4843_v0, %v10505_v55  ;;  %v5010_v14 = vmul.f32 0.01, %v4946_v35  ;;  %vm4978_vm8 = vcmp.ge.f32.partialorder %v4946_v35, 0.0 }
 0x637   : > { %v5039_v45 = vsel %vm4975_vm7, %v4943_v19, %v5007_v42  ;;  %v4909_v30 = vsel %vm4877_vm5, %v4876_v48, %v10505_v55 }
 0x638   : > { %v5058_v12 = vpack.c.bf16 %v5040_v51, %v5039_v45  ;;  %v2136_v1 = vadd.f32 %v10521_v44, %v1632_v63  ;;  %v4948_v10 = vadd.f32 %v6738_v33, %v4909_v30  ;;  %v5042_v52 = vsel %vm4978_vm8, %v4946_v35, %v5010_v14 }
 0x639   : > { %v4251_v2 = vpop.permute.xlu1 %4250 }
 0x63a   : > { %6508 = vmatmul.mubr.bf16.gmra.mrb[152].mxu1 %v5058_v12  ;;  %v2745_v27 = vadd.f32 %v10523_v7, %v2136_v1  ;;  %v4318_v36 = vadd.f32 %v4251_v2, %v3856_v32  ;;  %v5012_v46 = vmul.f32 0.01, %v4948_v10  ;;  %vm4980_vm10 = vcmp.ge.f32.partialorder %v4948_v10, 0.0 }
 0x63c   : > { %v3354_v61 = vadd.f32 %v10524_v16, %v2745_v27 }
 0x63d   : > { %v4255_v9 = vpop.permute.xlu1 %4254 }
 0x63e   : > { %v3858_v53 = vadd.f32 %v3793_v21, %v3354_v61  ;;  %v5044_v21 = vsel %vm4980_vm10, %v4948_v10, %v5012_v46 }
 0x640   : > { %v4320_v18 = vadd.f32 %v4255_v9, %v3858_v53 }
 0x641   : > { %v4740_v22 = vpop.permute.xlu1 %4739 }
 0x642   : > { %v4807_v25 = vadd.f32 %v4740_v22, %v4318_v36 }
 0x644   : > { %v4840_v6 = vsel %vm4811_vm3, %v10511_v38, %v4807_v25 }
 0x645   : > { %v4873_v20 = vsel %vm4844_vm4, %v4840_v6, %v10511_v38  ;;  %v4744_v57 = vpop.permute.xlu1 %4743 }
 0x646   : > { %v4906_v39 = vsel %vm4877_vm5, %v4873_v20, %v10511_v38  ;;  %v4809_v37 = vadd.f32 %v4744_v57, %v4320_v18 }
 0x647   : > { %v4945_v24 = vadd.f32 %v6738_v33, %v4906_v39 }
 0x648   : > { %v4842_v43 = vsel %vm4811_vm3, %v10517_v40, %v4809_v37 }
 0x649   : > { %v4875_v55 = vsel %vm4844_vm4, %v4842_v43, %v10517_v40  ;;  %vm4977_vm9 = vcmp.ge.f32.partialorder %v4945_v24, 0.0  ;;  %v5009_v8 = vmul.f32 0.01, %v4945_v24 }
 0x64a   : > { %v4908_v49 = vsel %vm4877_vm5, %v4875_v55, %v10517_v40 }
 0x64b   : > { %v5041_v19 = vsel %vm4977_vm9, %v4945_v24, %v5009_v8  ;;  %v4947_v38 = vadd.f32 %v6738_v33, %v4908_v49 }
 0x64c   : > { %v5059_v47 = vpack.c.bf16 %v5042_v52, %v5041_v19 }
 0x64d   : > { %vm4979_vm11 = vcmp.ge.f32.partialorder %v4947_v38, 0.0  ;;  %v5011_v29 = vmul.f32 0.01, %v4947_v38 }
 0x64e   : > { %6511 = vmatprep.mubr.bf16.mxu1 %v5059_v47 }
 0x64f   : > { %v5043_v15 = vsel %vm4979_vm11, %v4947_v38, %v5011_v29 }
 0x650   : > { %v5060_v42 = vpack.c.bf16 %v5044_v21, %v5043_v15 }
 0x652   : > { %6512 = vmatmul.mubr.bf16.gmra.mrb[156].mxu1 %v5060_v42 }
 0x695   : > { %v6485_v26 = vpop.f32.mrb[128].mxu1 }
 0x696   : > { %v5175_v11 = vadd.f32 %v6485_v26, %v9964_v28  ;;  %v5166_v34 = vpop.f32.mrb[129].mxu1 }
 0x697   : > { %v5167_v50 = vadd.f32 %v9964_v28, %v5166_v34  ;;  %v6486_v45 = vpop.f32.mrb[130].mxu1 }
 0x698   : > { %v5327_v51 = vmul.f32 0.01, %v5175_v11  ;;  %v5178_v41 = vadd.f32 %v6486_v45, %v9964_v28  ;;  %v5169_v40 = vpop.f32.mrb[131].mxu1  ;;  %vm5295_vm3 = vcmp.ge.f32.partialorder %v5175_v11, 0.0 }
 0x699   : > { %v5325_v62 = vmul.f32 0.01, %v5167_v50  ;;  %v5170_v4 = vadd.f32 %v9964_v28, %v5169_v40  ;;  %vm5293_vm4 = vcmp.ge.f32.partialorder %v5167_v50, 0.0 }
 0x69a   : > { %vm5296_vm5 = vcmp.ge.f32.partialorder %v5178_v41, 0.0  ;;  %v5328_v3 = vmul.f32 0.01, %v5178_v41  ;;  %v5359_v12 = vsel %vm5295_vm3, %v5175_v11, %v5327_v51 }
 0x69b   : > { %vm5294_vm12 = vcmp.ge.f32.partialorder %v5170_v4, 0.0  ;;  %v5326_v5 = vmul.f32 0.01, %v5170_v4  ;;  %v5357_v17 = vsel %vm5293_vm4, %v5167_v50, %v5325_v62 }
 0x69c   : > { %v5360_v2 = vsel %vm5296_vm5, %v5178_v41, %v5328_v3 }
 0x69d   : > { %v5897_v63 = vpack.c.bf16 %v5360_v2, %v5359_v12  ;;  %v5358_v58 = vsel %vm5294_vm12, %v5170_v4, %v5326_v5 }
 0x69e   : > { %v5892_v56 = vpack.c.bf16 %v5358_v58, %v5357_v17 }
 0x69f   : > { %5969 = vst [vmem:[%s9973_s19 + $0x8] sm:$0xff] %v5897_v63  }
 0x6a0   : > { %5893 = vst [vmem:[%s9973_s19] sm:$0xff] %v5892_v56  }
 0x6a5   : > { %v6489_v54 = vpop.f32.mrb[132].mxu1 }
 0x6a6   : > { %v5191_v31 = vadd.f32 %v6489_v54, %v9964_v28  ;;  %v5182_v44 = vpop.f32.mrb[133].mxu1 }
 0x6a7   : > { %v5183_v1 = vadd.f32 %v9964_v28, %v5182_v44  ;;  %v6490_v23 = vpop.f32.mrb[134].mxu1 }
 0x6a8   : > { %v5331_v59 = vmul.f32 0.01, %v5191_v31  ;;  %v5194_v13 = vadd.f32 %v6490_v23, %v9964_v28  ;;  %v5185_v9 = vpop.f32.mrb[135].mxu1  ;;  %vm5299_vm13 = vcmp.ge.f32.partialorder %v5191_v31, 0.0 }
 0x6a9   : > { %v5329_v7 = vmul.f32 0.01, %v5183_v1  ;;  %v5186_v27 = vadd.f32 %v9964_v28, %v5185_v9  ;;  %vm5297_vm14 = vcmp.ge.f32.partialorder %v5183_v1, 0.0 }
 0x6aa   : > { %vm5300_vm15 = vcmp.ge.f32.partialorder %v5194_v13, 0.0  ;;  %v5332_v0 = vmul.f32 0.01, %v5194_v13  ;;  %v5363_v16 = vsel %vm5299_vm13, %v5191_v31, %v5331_v59 }
 0x6ab   : > { %vm5298_vm0 = vcmp.ge.f32.partialorder %v5186_v27, 0.0  ;;  %v5330_v32 = vmul.f32 0.01, %v5186_v27  ;;  %v5361_v60 = vsel %vm5297_vm14, %v5183_v1, %v5329_v7 }
 0x6ac   : > { %v5364_v61 = vsel %vm5300_vm15, %v5194_v13, %v5332_v0 }
 0x6ad   : > { %v5907_v36 = vpack.c.bf16 %v5364_v61, %v5363_v16  ;;  %v5362_v48 = vsel %vm5298_vm0, %v5186_v27, %v5330_v32 }
 0x6ae   : > { %v5902_v22 = vpack.c.bf16 %v5362_v48, %v5361_v60 }
 0x6af   : > { %5971 = vst [vmem:[%s9973_s19 + $0x18] sm:$0xff] %v5907_v36  }
 0x6b0   : > { %5970 = vst [vmem:[%s9973_s19 + $0x10] sm:$0xff] %v5902_v22  }
 0x6b5   : > { %v6493_v53 = vpop.f32.mrb[136].mxu1 }
 0x6b6   : > { %v5207_v25 = vadd.f32 %v6493_v53, %v9964_v28  ;;  %v5198_v33 = vpop.f32.mrb[137].mxu1 }
 0x6b7   : > { %v5199_v35 = vadd.f32 %v9964_v28, %v5198_v33  ;;  %v6494_v30 = vpop.f32.mrb[138].mxu1 }
 0x6b8   : > { %v5335_v18 = vmul.f32 0.01, %v5207_v25  ;;  %v5210_v6 = vadd.f32 %v6494_v30, %v9964_v28  ;;  %v5201_v20 = vpop.f32.mrb[139].mxu1  ;;  %vm5303_vm1 = vcmp.ge.f32.partialorder %v5207_v25, 0.0 }
 0x6b9   : > { %v5333_v57 = vmul.f32 0.01, %v5199_v35  ;;  %v5202_v39 = vadd.f32 %v9964_v28, %v5201_v20  ;;  %vm5301_vm2 = vcmp.ge.f32.partialorder %v5199_v35, 0.0 }
 0x6ba   : > { %vm5304_vm6 = vcmp.ge.f32.partialorder %v5210_v6, 0.0  ;;  %v5336_v37 = vmul.f32 0.01, %v5210_v6  ;;  %v5367_v14 = vsel %vm5303_vm1, %v5207_v25, %v5335_v18 }
 0x6bb   : > { %vm5302_vm7 = vcmp.ge.f32.partialorder %v5202_v39, 0.0  ;;  %v5334_v24 = vmul.f32 0.01, %v5202_v39  ;;  %v5365_v43 = vsel %vm5301_vm2, %v5199_v35, %v5333_v57 }
 0x6bc   : > { %v5368_v10 = vsel %vm5304_vm6, %v5210_v6, %v5336_v37 }
 0x6bd   : > { %v5917_v55 = vpack.c.bf16 %v5368_v10, %v5367_v14  ;;  %v5366_v8 = vsel %vm5302_vm7, %v5202_v39, %v5334_v24 }
 0x6be   : > { %v5912_v49 = vpack.c.bf16 %v5366_v8, %v5365_v43 }
 0x6bf   : > { %5973 = vst [vmem:[%s9973_s19 + $0x28] sm:$0xff] %v5917_v55  }
 0x6c0   : > { %5972 = vst [vmem:[%s9973_s19 + $0x20] sm:$0xff] %v5912_v49  }
 0x6c5   : > { %v6497_v19 = vpop.f32.mrb[140].mxu1 }
 0x6c6   : > { %v5223_v52 = vadd.f32 %v6497_v19, %v9964_v28  ;;  %v5214_v38 = vpop.f32.mrb[141].mxu1 }
 0x6c7   : > { %v5215_v46 = vadd.f32 %v9964_v28, %v5214_v38  ;;  %v6498_v47 = vpop.f32.mrb[142].mxu1 }
 0x6c8   : > { %v5339_v29 = vmul.f32 0.01, %v5223_v52  ;;  %v5226_v15 = vadd.f32 %v6498_v47, %v9964_v28  ;;  %v5217_v21 = vpop.f32.mrb[143].mxu1  ;;  %vm5307_vm8 = vcmp.ge.f32.partialorder %v5223_v52, 0.0 }
 0x6c9   : > { %v5337_v42 = vmul.f32 0.01, %v5215_v46  ;;  %v5218_v26 = vadd.f32 %v9964_v28, %v5217_v21  ;;  %vm5305_vm9 = vcmp.ge.f32.partialorder %v5215_v46, 0.0 }
 0x6ca   : > { %vm5308_vm10 = vcmp.ge.f32.partialorder %v5226_v15, 0.0  ;;  %v5340_v11 = vmul.f32 0.01, %v5226_v15  ;;  %v5371_v50 = vsel %vm5307_vm8, %v5223_v52, %v5339_v29 }
 0x6cb   : > { %vm5306_vm11 = vcmp.ge.f32.partialorder %v5218_v26, 0.0  ;;  %v5338_v34 = vmul.f32 0.01, %v5218_v26  ;;  %v5369_v51 = vsel %vm5305_vm9, %v5215_v46, %v5337_v42 }
 0x6cc   : > { %v5372_v45 = vsel %vm5308_vm10, %v5226_v15, %v5340_v11 }
 0x6cd   : > { %v5927_v41 = vpack.c.bf16 %v5372_v45, %v5371_v50  ;;  %v5370_v40 = vsel %vm5306_vm11, %v5218_v26, %v5338_v34 }
 0x6ce   : > { %v5922_v62 = vpack.c.bf16 %v5370_v40, %v5369_v51 }
 0x6cf   : > { %5975 = vst [vmem:[%s9973_s19 + $0x38] sm:$0xff] %v5927_v41  }
 0x6d0   : > { %5974 = vst [vmem:[%s9973_s19 + $0x30] sm:$0xff] %v5922_v62  }
 0x6dd   : > { %v6501_v4 = vpop.f32.mrb[144].mxu1 }
 0x6de   : > { %v5239_v3 = vadd.f32 %v6501_v4, %v9964_v28  ;;  %v5230_v5 = vpop.f32.mrb[145].mxu1 }
 0x6df   : > { %v5231_v12 = vadd.f32 %v9964_v28, %v5230_v5  ;;  %v6502_v2 = vpop.f32.mrb[146].mxu1 }
 0x6e0   : > { %v5343_v17 = vmul.f32 0.01, %v5239_v3  ;;  %v5242_v63 = vadd.f32 %v6502_v2, %v9964_v28  ;;  %v5233_v58 = vpop.f32.mrb[147].mxu1  ;;  %vm5311_vm3 = vcmp.ge.f32.partialorder %v5239_v3, 0.0 }
 0x6e1   : > { %v5341_v56 = vmul.f32 0.01, %v5231_v12  ;;  %v5234_v54 = vadd.f32 %v9964_v28, %v5233_v58  ;;  %vm5309_vm4 = vcmp.ge.f32.partialorder %v5231_v12, 0.0 }
 0x6e2   : > { %vm5312_vm5 = vcmp.ge.f32.partialorder %v5242_v63, 0.0  ;;  %v5344_v31 = vmul.f32 0.01, %v5242_v63  ;;  %v5375_v1 = vsel %vm5311_vm3, %v5239_v3, %v5343_v17 }
 0x6e3   : > { %vm5310_vm12 = vcmp.ge.f32.partialorder %v5234_v54, 0.0  ;;  %v5342_v44 = vmul.f32 0.01, %v5234_v54  ;;  %v5373_v59 = vsel %vm5309_vm4, %v5231_v12, %v5341_v56 }
 0x6e4   : > { %v5376_v23 = vsel %vm5312_vm5, %v5242_v63, %v5344_v31 }
 0x6e5   : > { %v5937_v13 = vpack.c.bf16 %v5376_v23, %v5375_v1  ;;  %v5374_v9 = vsel %vm5310_vm12, %v5234_v54, %v5342_v44 }
 0x6e6   : > { %v5932_v7 = vpack.c.bf16 %v5374_v9, %v5373_v59 }
 0x6e7   : > { %5977 = vst [vmem:[%s9973_s19 + $0x48] sm:$0xff] %v5937_v13  }
 0x6e8   : > { %5976 = vst [vmem:[%s9973_s19 + $0x40] sm:$0xff] %v5932_v7  }
 0x6f5   : > { %v6505_v27 = vpop.f32.mrb[148].mxu1 }
 0x6f6   : > { %v5255_v0 = vadd.f32 %v6505_v27, %v9964_v28  ;;  %v5246_v32 = vpop.f32.mrb[149].mxu1 }
 0x6f7   : > { %v5247_v16 = vadd.f32 %v9964_v28, %v5246_v32  ;;  %v6506_v61 = vpop.f32.mrb[150].mxu1 }
 0x6f8   : > { %v5347_v60 = vmul.f32 0.01, %v5255_v0  ;;  %v5258_v36 = vadd.f32 %v6506_v61, %v9964_v28  ;;  %v5249_v48 = vpop.f32.mrb[151].mxu1  ;;  %vm5315_vm13 = vcmp.ge.f32.partialorder %v5255_v0, 0.0 }
 0x6f9   : > { %v5345_v22 = vmul.f32 0.01, %v5247_v16  ;;  %v5250_v53 = vadd.f32 %v9964_v28, %v5249_v48  ;;  %vm5313_vm14 = vcmp.ge.f32.partialorder %v5247_v16, 0.0 }
 0x6fa   : > { %vm5316_vm15 = vcmp.ge.f32.partialorder %v5258_v36, 0.0  ;;  %v5348_v25 = vmul.f32 0.01, %v5258_v36  ;;  %v5379_v35 = vsel %vm5315_vm13, %v5255_v0, %v5347_v60 }
 0x6fb   : > { %vm5314_vm0 = vcmp.ge.f32.partialorder %v5250_v53, 0.0  ;;  %v5346_v33 = vmul.f32 0.01, %v5250_v53  ;;  %v5377_v18 = vsel %vm5313_vm14, %v5247_v16, %v5345_v22 }
 0x6fc   : > { %v5380_v30 = vsel %vm5316_vm15, %v5258_v36, %v5348_v25 }
 0x6fd   : > { %v5947_v6 = vpack.c.bf16 %v5380_v30, %v5379_v35  ;;  %v5378_v20 = vsel %vm5314_vm0, %v5250_v53, %v5346_v33 }
 0x6fe   : > { %v5942_v57 = vpack.c.bf16 %v5378_v20, %v5377_v18 }
 0x6ff   : > { %5979 = vst [vmem:[%s9973_s19 + $0x58] sm:$0xff] %v5947_v6  }
 0x700   : > { %5978 = vst [vmem:[%s9973_s19 + $0x50] sm:$0xff] %v5942_v57  }
 0x70d   : > { %v6509_v39 = vpop.f32.mrb[152].mxu1 }
 0x70e   : > { %v5271_v37 = vadd.f32 %v6509_v39, %v9964_v28  ;;  %v5262_v24 = vpop.f32.mrb[153].mxu1 }
 0x70f   : > { %v5263_v14 = vadd.f32 %v9964_v28, %v5262_v24  ;;  %v6510_v10 = vpop.f32.mrb[154].mxu1 }
 0x710   : > { %v5351_v43 = vmul.f32 0.01, %v5271_v37  ;;  %v5274_v55 = vadd.f32 %v6510_v10, %v9964_v28  ;;  %v5265_v8 = vpop.f32.mrb[155].mxu1  ;;  %vm5319_vm1 = vcmp.ge.f32.partialorder %v5271_v37, 0.0 }
 0x711   : > { %v5349_v49 = vmul.f32 0.01, %v5263_v14  ;;  %v5266_v19 = vadd.f32 %v9964_v28, %v5265_v8  ;;  %vm5317_vm2 = vcmp.ge.f32.partialorder %v5263_v14, 0.0 }
 0x712   : > { %vm5320_vm6 = vcmp.ge.f32.partialorder %v5274_v55, 0.0  ;;  %v5352_v52 = vmul.f32 0.01, %v5274_v55  ;;  %v5383_v46 = vsel %vm5319_vm1, %v5271_v37, %v5351_v43 }
 0x713   : > { %vm5318_vm7 = vcmp.ge.f32.partialorder %v5266_v19, 0.0  ;;  %v5350_v38 = vmul.f32 0.01, %v5266_v19  ;;  %v5381_v29 = vsel %vm5317_vm2, %v5263_v14, %v5349_v49 }
 0x714   : > { %v5384_v47 = vsel %vm5320_vm6, %v5274_v55, %v5352_v52 }
 0x715   : > { %v5957_v15 = vpack.c.bf16 %v5384_v47, %v5383_v46  ;;  %v5382_v21 = vsel %vm5318_vm7, %v5266_v19, %v5350_v38 }
 0x716   : > { %v5952_v42 = vpack.c.bf16 %v5382_v21, %v5381_v29 }
 0x717   : > { %5981 = vst [vmem:[%s9973_s19 + $0x68] sm:$0xff] %v5957_v15  }
 0x718   : > { %5980 = vst [vmem:[%s9973_s19 + $0x60] sm:$0xff] %v5952_v42  }
 0x725   : > { %v6513_v26 = vpop.f32.mrb[156].mxu1 }
 0x726   : > { %v5287_v11 = vadd.f32 %v6513_v26, %v9964_v28  ;;  %v5278_v34 = vpop.f32.mrb[157].mxu1 }
 0x727   : > { %v5279_v50 = vadd.f32 %v9964_v28, %v5278_v34  ;;  %v6514_v45 = vpop.f32.mrb[158].mxu1 }
 0x728   : > { %v5355_v51 = vmul.f32 0.01, %v5287_v11  ;;  %v5290_v41 = vadd.f32 %v6514_v45, %v9964_v28  ;;  %v5281_v40 = vpop.f32.mrb[159].mxu1  ;;  %vm5323_vm8 = vcmp.ge.f32.partialorder %v5287_v11, 0.0 }
 0x729   : > { %v5353_v62 = vmul.f32 0.01, %v5279_v50  ;;  %v5282_v4 = vadd.f32 %v9964_v28, %v5281_v40  ;;  %vm5321_vm9 = vcmp.ge.f32.partialorder %v5279_v50, 0.0 }
 0x72a   : > { %vm5324_vm10 = vcmp.ge.f32.partialorder %v5290_v41, 0.0  ;;  %v5356_v3 = vmul.f32 0.01, %v5290_v41  ;;  %v5387_v12 = vsel %vm5323_vm8, %v5287_v11, %v5355_v51 }
 0x72b   : > { %vm5322_vm11 = vcmp.ge.f32.partialorder %v5282_v4, 0.0  ;;  %v5354_v5 = vmul.f32 0.01, %v5282_v4  ;;  %v5385_v17 = vsel %vm5321_vm9, %v5279_v50, %v5353_v62 }
 0x72c   : > { %v5388_v2 = vsel %vm5324_vm10, %v5290_v41, %v5356_v3 }
 0x72d   : > { %v5967_v63 = vpack.c.bf16 %v5388_v2, %v5387_v12  ;;  %v5386_v58 = vsel %vm5322_vm11, %v5282_v4, %v5354_v5 }
 0x72e   : > { %v5962_v28 = vpack.c.bf16 %v5386_v58, %v5385_v17 }
 0x72f   : > { %5983 = vst [vmem:[%s9973_s19 + $0x78] sm:$0xff] %v5967_v63  }
 0x730   : > { %5982 = vst [vmem:[%s9973_s19 + $0x70] sm:$0xff] %v5962_v28  }
 0x731   : > { %6752 = shalt.err (!%p6749_p3)
}
 0x732   : > { %s6753_s23 = scalar_lea.hbm %s10022_s13, 2048  ;;  %s6757_s9 = scalar_lea.hbm %s10078_s7, 4096 }
 0x733   : > { %p6754_p4 = scmp.ne.s32.totalorder %s10022_s13, %s6753_s23  ;;  %p6758_p9 = scmp.lt.u32.totalorder %s10022_s13, %s10078_s7 }
 0x734   : > { %p6759_p10 = scmp.lt.u32.totalorder %s6757_s9, %s6753_s23  ;;  %p6761_p12 = scmp.lt.u32.totalorder %s6753_s23, %s10022_s13 }
 0x735   : > { %p6755_p7 = pnand %p6754_p4, %p6893_p5 }
 0x736   : > { %p6760_p11 = por %p6759_p10, %p6758_p9 }
 0x737   : > { %p6756_p8 = pneg %p6755_p7 }
 0x738   : > { %p6762_p13 = por %p6761_p12, %p6760_p11 }
 0x73a   : > { %p6763_p0 = pnand %p6762_p13, %p6756_p8 }
 0x73c   : > { %6766 = shalt.err (!%p6763_p0)
}
 0x73d   : > { %s6813_s17 = smov 64   ;;  %s6814_s18 = smov 4  }
 0x73e   : > { %6524 = dma.vmem_to_hbm [thread:$0]  (%p6893_p5), %s10024_s16, 2048, %s10022_s13, %s10030_s28, %s6813_s17, %s6813_s17, %s6814_s18  }
 0x73f PF: > { %p6530_p1 = scmp.ge.s32.totalorder %s6801_s27, 2  ;;  %s5578_s20 = sand.u32 1, %s6789_s24  }
 0x740   : > { %s5579_s14 = scalar_lea.sflag [#allocation3], %s5578_s20 }
 0x741   : > { %p6527_p2 = pnand %p6530_p1, %p6897_p6 }
 0x743   : > { %6784 = dma.done.wait (!%p6527_p2), %s5579_s14, 2048  }
 0x744   : > { %6786 = vsyncadd (!%p6527_p2), %s5579_s14, 4294965248  ;;  %p17_p3 = scmp.ge.s32.totalorder %s6880_s30, 4   ;;  %s10525_s24 = smov %s6793_s25 }
 0x745   : > { %s10526_s25 = smov %s6797_s26  ;;  %s10527_s26 = smov %s6891_s10 }
 0x746   : > { %s10528_s27 = smov %s6880_s30  ;;  %19 = sbr.rel (!%p17_p3) target bundleno = 3 (0x3), region = 93 }
 0x74d   :  { %5584 = vsyncpa [#allocation3], 1 }
 0x74e   :  { %5586 = vsyncpa [#allocation3 + $0x1], 1 }

</bundles_post_ra>
